<compile_context>
chip_gen: v5e
topology: v5e:2x2
jax: 0.10.0
libtpu: 0.0.40
codegen_flags: <defaults>
</compile_context>

<pallas_src>
import jax
import jax.numpy as jnp
from jax.experimental import pallas as pl
from jax.experimental.pallas import tpu as pltpu


# ----------------------------------------------------------------------------
# In-kernel building blocks (channels-first (C, H*W) layout, everything in VMEM/vregs)
# ----------------------------------------------------------------------------
def _leaky(x, slope=0.01):
    return jnp.where(x >= 0, x, x * slope)


def _conv3x3(x, w, b, masks, W, HW, relu_in):
    """3x3 'same' conv in channels-first layout, one MXU dot.

    x     : (Cin, HW)      f32 activation (HW = H*W flattened row-major; lane dim)
    w     : (Cout, 9*Cin)  bf16 packed weight, column index = (kh*3+kw)*Cin + ci
    b     : (Cout, 1)      f32 bias
    masks : (9, HW)        f32 validity masks per tap (0 where the wrap-shift would
                            read across an image border, 1 inside the image)
    """
    if relu_in:
        x = jnp.maximum(x, 0.0)                 # relu(0)=0 => zero padding stays zero
    x2 = jnp.concatenate([x, x], axis=1)        # lane-doubled: every tap is a static slice
    taps = []
    for kh in range(3):
        for kw in range(3):
            s = ((kh - 1) * W + (kw - 1)) % HW  # flat shift for (dy, dx) = (kh-1, kw-1)
            v = x if s == 0 else x2[:, s:s + HW]
            t = kh * 3 + kw
            if t != 4:                          # centre tap mask is all-ones
                v = v * masks[t:t + 1, :]
            taps.append(v)
    col = jnp.concatenate(taps, axis=0).astype(jnp.bfloat16)     # (9*Cin, HW)
    return jnp.dot(w, col, preferred_element_type=jnp.float32) + b


def _conv1x1(x, w, b, relu_in):
    """1x1 conv: x (Cin, HW) f32, w (Cout, Cin) bf16, b (Cout, 1) f32."""
    if relu_in:
        x = jnp.maximum(x, 0.0)
    return jnp.dot(w, x.astype(jnp.bfloat16), preferred_element_type=jnp.float32) + b


# ----------------------------------------------------------------------------
# Fused kernels
# ----------------------------------------------------------------------------
def _make_stage1_kernel(num_layers, num_nodes, W, HW):
    """stem + all cells + the two upsampler convs + LeakyReLU, one batch element."""
    n_params = 2 + num_layers * 6 + 4

    def kernel(x_ref, masks_ref, *refs):
        params = refs[:n_params]
        o_ref = refs[n_params]
        masks = masks_ref[...]                  # (9, HW) f32, loaded once

        it = iter(params)

        def nxt():
            return next(it)[...]                # tiny param -> VMEM value

        # stem: Conv3x3(bias=False) + BN (folded into weight/bias)
        stem_w, stem_b = nxt(), nxt()
        s = _conv3x3(x_ref[0], stem_w, stem_b, masks, W, HW, relu_in=False)
        s0, s1 = s, s                           # (C, HW) each

        # cells (activations never leave VMEM)
        for _l in range(num_layers):
            p0w, p0b, p1w, p1b, nw, nb = nxt(), nxt(), nxt(), nxt(), nxt(), nxt()
            s0p = _conv1x1(s0, p0w, p0b, relu_in=True)
            s1p = _conv1x1(s1, p1w, p1b, relu_in=True)
            states = [s0p, s1p]
            for n in range(num_nodes):
                e0 = _conv3x3(states[n], nw[n, 0], nb[n, 0], masks, W, HW, relu_in=True)
                e1 = _conv3x3(states[n + 1], nw[n, 1], nb[n, 1], masks, W, HW, relu_in=True)
                states.append(e0 + e1)
            s0 = s1
            # node-output "concat" = sublane-aligned channel stack (free placement)
            s1 = jnp.concatenate(states[2:], axis=0)          # (num_nodes*C, HW)

        # upsampler convs (LeakyReLU here; PixelShuffle is layout glue outside)
        up_w0, up_b0, up_w1, up_b1 = nxt(), nxt(), nxt(), nxt()
        u = _conv3x3(s1, up_w0, up_b0, masks, W, HW, relu_in=False)
        u = _conv3x3(u, up_w1, up_b1, masks, W, HW, relu_in=False)
        u = _leaky(u)
        o_ref[...] = u.reshape(1, u.shape[0], u.shape[1])

    return kernel


def _make_stage2_kernel(W2, HW2):
    """final_conv: Conv3x3 -> LeakyReLU -> Conv3x3, one batch element."""

    def kernel(u_ref, masks_ref, w0_ref, b0_ref, w1_ref, b1_ref, o_ref):
        masks = masks_ref[...]
        f = _conv3x3(u_ref[0], w0_ref[...], b0_ref[...], masks, W2, HW2, relu_in=False)
        f = _leaky(f)
        f = _conv3x3(f, w1_ref[...], b1_ref[...], masks, W2, HW2, relu_in=False)
        o_ref[...] = f.reshape(1, f.shape[0], f.shape[1])

    return kernel


# ----------------------------------------------------------------------------
# Plain-JAX glue: masks, BN folding, parameter packing, PixelShuffle
# ----------------------------------------------------------------------------
def _shift_masks(H, W):
    """(9, H*W) f32: mask[t][p] = 1 iff pixel p shifted by tap t stays inside the image."""
    p = jnp.arange(H * W, dtype=jnp.int32)
    r, c = p // W, p % W
    rows = []
    for dy in (-1, 0, 1):
        for dx in (-1, 0, 1):
            ok = (r + dy >= 0) & (r + dy < H) & (c + dx >= 0) & (c + dx < W)
            rows.append(ok.astype(jnp.float32))
    return jnp.stack(rows)


def fold_bn(w, gamma, beta, mean, var, eps=1e-5):
    """Fold eval-mode BatchNorm into the preceding (bias-free) conv."""
    s = gamma / jnp.sqrt(var + eps)
    return w * s, beta - mean * s


def conv_init(key, kh, kw, cin, cout):
    fan_in = kh * kw * cin
    std = (2.0 / fan_in) ** 0.5
    return jax.random.normal(key, (kh, kw, cin, cout), jnp.float32) * std


def _pack3x3(w, b, cin_pad=None):
    """(3,3,Cin,Cout) f32 + (Cout,) -> (Cout, 9*Cin_pad) bf16 + (Cout,1) f32."""
    _, _, cin, cout = w.shape
    if cin_pad is not None and cin_pad > cin:
        w = jnp.pad(w, ((0, 0), (0, 0), (0, cin_pad - cin), (0, 0)))
        cin = cin_pad
    wp = jnp.transpose(w, (3, 0, 1, 2)).reshape(cout, 9 * cin)   # col = (kh*3+kw)*Cin + ci
    return wp.astype(jnp.bfloat16), b.reshape(cout, 1).astype(jnp.float32)


def _pack1x1(w, b):
    """(Cin,Cout) f32 + (Cout,) -> (Cout, Cin) bf16 + (Cout,1) f32."""
    cout = w.shape[1]
    return w.T.astype(jnp.bfloat16), b.reshape(cout, 1).astype(jnp.float32)


def init_params(key, input_channels, init_channels, num_layers, num_nodes):
    assert init_channels % 8 == 0, "init_channels must be a multiple of 8"
    keys = iter(jax.random.split(key, 4096))

    def nk():
        return next(keys)

    def bn_stats(cout):
        gamma = 1.0 + 0.01 * jax.random.normal(nk(), (cout,), jnp.float32)
        beta = 0.01 * jax.random.normal(nk(), (cout,), jnp.float32)
        mean = 0.01 * jax.random.normal(nk(), (cout,), jnp.float32)
        var = jnp.abs(1.0 + 0.01 * jax.random.normal(nk(), (cout,), jnp.float32))
        return gamma, beta, mean, var

    C = init_channels
    cin_pad = ((input_channels + 7) // 8) * 8
    params = {}

    # stem: Conv3x3(bias=False) + BN (eval-mode, folded); Cin zero-padded to a multiple of 8
    w = conv_init(nk(), 3, 3, input_channels, C)
    wf, bf = fold_bn(w, *bn_stats(C))
    params["stem_w"], params["stem_b"] = _pack3x3(wf, bf, cin_pad=cin_pad)

    c_pp, c_p = C, C
    cells = []
    for _ in range(num_layers):
        cell = {}
        w0 = conv_init(nk(), 1, 1, c_pp, C).reshape(c_pp, C)
        w0f, b0f = fold_bn(w0, *bn_stats(C))
        cell["pre0_w"], cell["pre0_b"] = _pack1x1(w0f, b0f)
        w1 = conv_init(nk(), 1, 1, c_p, C).reshape(c_p, C)
        w1f, b1f = fold_bn(w1, *bn_stats(C))
        cell["pre1_w"], cell["pre1_b"] = _pack1x1(w1f, b1f)
        nws, nbs = [], []
        for _n in range(num_nodes):
            ws_e, bs_e = [], []
            for _e in range(2):
                we = conv_init(nk(), 3, 3, C, C)
                wef, bef = fold_bn(we, *bn_stats(C))
                wp, bp = _pack3x3(wef, bef)                  # (C, 9C) bf16, (C,1) f32
                ws_e.append(wp)
                bs_e.append(bp)
            nws.append(jnp.stack(ws_e))
            nbs.append(jnp.stack(bs_e))
        cell["node_w"] = jnp.stack(nws)                      # (nodes, 2, C, 9C) bf16
        cell["node_b"] = jnp.stack(nbs)                      # (nodes, 2, C, 1)  f32
        cells.append(cell)
        c_pp, c_p = c_p, C * num_nodes
    params["cells"] = cells

    # upsampler (pixelshuffle_block, upscale=2): Conv3x3(c_p->C); Conv3x3(C->4C); LeakyReLU; PS(2)
    w = conv_init(nk(), 3, 3, c_p, C)
    b = 0.01 * jax.random.normal(nk(), (C,), jnp.float32)
    params["up_w0"], params["up_b0"] = _pack3x3(w, b)
    w = conv_init(nk(), 3, 3, C, C * 4)
    b = 0.01 * jax.random.normal(nk(), (C * 4,), jnp.float32)
    params["up_w1"], params["up_b1"] = _pack3x3(w, b)

    # final_conv: Conv3x3(C->C); LeakyReLU; Conv3x3(C->input_channels)
    w = conv_init(nk(), 3, 3, C, C)
    b = 0.01 * jax.random.normal(nk(), (C,), jnp.float32)
    params["fc_w0"], params["fc_b0"] = _pack3x3(w, b)
    w = conv_init(nk(), 3, 3, C, input_channels)
    b = 0.01 * jax.random.normal(nk(), (input_channels,), jnp.float32)
    params["fc_w1"], params["fc_b1"] = _pack3x3(w, b)
    return params


# ----------------------------------------------------------------------------
# Forward pass
# ----------------------------------------------------------------------------
def search_cnn_forward(params, x_nchw, weights_normal):
    """Matches SearchCNN.forward.  x_nchw: (B, Cin, H, W) -> (B, Cin, 2H, 2W)."""
    del weights_normal  # accepted but (as in the reference forward) never used by the cells

    ch = params["stem_b"].shape[0]                   # init_channels
    num_layers = len(params["cells"])
    num_nodes = params["cells"][0]["node_w"].shape[0]
    c4 = params["up_b1"].shape[0]                    # ch * 4
    cout_img = params["fc_b1"].shape[0]
    cin_pad = params["stem_w"].shape[1] // 9

    B, cin, H, W = x_nchw.shape
    HW = H * W
    assert cin <= cin_pad

    # NCHW is already channels-first; zero-pad channels to a multiple of 8, flatten spatial.
    x = jnp.pad(x_nchw, ((0, 0), (0, cin_pad - cin), (0, 0), (0, 0))).reshape(B, cin_pad, HW)

    masks1 = _shift_masks(H, W)                      # (9, HW) f32

    flat1 = [params["stem_w"], params["stem_b"]]
    for cp in params["cells"]:
        flat1 += [cp["pre0_w"], cp["pre0_b"], cp["pre1_w"], cp["pre1_b"],
                  cp["node_w"], cp["node_b"]]
    flat1 += [params["up_w0"], params["up_b0"], params["up_w1"], params["up_b1"]]

    def full_spec(p):
        nd = p.ndim
        return pl.BlockSpec(p.shape, lambda b, _nd=nd: (0,) * _nd)

    # ---- stage 1: stem + all cells + upsampler convs, fused in one pallas_call ----
    u = pl.pallas_call(
        _make_stage1_kernel(num_layers, num_nodes, W, HW),
        out_shape=jax.ShapeDtypeStruct((B, c4, HW), jnp.float32),
        grid=(B,),
        in_specs=[pl.BlockSpec((1, cin_pad, HW), lambda b: (b, 0, 0)),
                  full_spec(masks1)] + [full_spec(p) for p in flat1],
        out_specs=pl.BlockSpec((1, c4, HW), lambda b: (b, 0, 0)),
        compiler_params=pltpu.CompilerParams(dimension_semantics=("parallel",)),
    )(x, masks1, *flat1)

    # PixelShuffle(2): pure cross-lane layout op on a tiny tensor, done as JAX glue.
    r = 2
    H2, W2, HW2 = H * r, W * r, HW * r * r
    u = u.reshape(B, ch, r, r, H, W)                 # channel = c*r*r + i*r + j
    u = jnp.transpose(u, (0, 1, 4, 2, 5, 3)).reshape(B, ch, HW2)

    # ---- stage 2: final_conv (Conv3x3 -> LeakyReLU -> Conv3x3) fused ----
    masks2 = _shift_masks(H2, W2)
    fc = [params["fc_w0"], params["fc_b0"], params["fc_w1"], params["fc_b1"]]
    sr = pl.pallas_call(
        _make_stage2_kernel(W2, HW2),
        out_shape=jax.ShapeDtypeStruct((B, cout_img, HW2), jnp.float32),
        grid=(B,),
        in_specs=[pl.BlockSpec((1, ch, HW2), lambda b: (b, 0, 0)),
                  full_spec(masks2)] + [full_spec(p) for p in fc],
        out_specs=pl.BlockSpec((1, cout_img, HW2), lambda b: (b, 0, 0)),
        compiler_params=pltpu.CompilerParams(dimension_semantics=("parallel",)),
    )(u, masks2, *fc)

    return sr.reshape(B, cout_img, H2, W2)           # already NCHW


if __name__ == "__main__":
    key = jax.random.PRNGKey(0)
    kx, kw, kp = jax.random.split(key, 3)

    B, Cin, H, W = 2, 3, 16, 16
    init_channels, num_layers, num_nodes = 8, 2, 4

    x = jax.random.normal(kx, (B, Cin, H, W), jnp.float32)
    n_edges = sum(i + 2 for i in range(num_nodes))   # 14 edges (DARTS normal cell)
    weights_normal = jax.nn.softmax(
        jax.random.normal(kw, (n_edges, 8), jnp.float32), axis=-1)

    params = init_params(kp, Cin, init_channels, num_layers, num_nodes)

    sr = jax.jit(search_cnn_forward)(params, x, weights_normal)
    sr = jax.block_until_ready(sr)

    assert sr.shape == (B, Cin, 2 * H, 2 * W), sr.shape
    assert bool(jnp.all(jnp.isfinite(sr)))
    print("KERNEL_OK")
</pallas_src>

<mosaic_0001>
module attributes {stable_mosaic.version = 11 : i64} {
  func.func @kernel(%arg0: i32, %arg1: memref<1x8x256xf32, #tpu.memory_space<vmem>>, %arg2: memref<9x256xf32, #tpu.memory_space<vmem>>, %arg3: memref<8x72xbf16, #tpu.memory_space<vmem>>, %arg4: memref<8x1xf32, #tpu.memory_space<vmem>>, %arg5: memref<8x8xbf16, #tpu.memory_space<vmem>>, %arg6: memref<8x1xf32, #tpu.memory_space<vmem>>, %arg7: memref<8x8xbf16, #tpu.memory_space<vmem>>, %arg8: memref<8x1xf32, #tpu.memory_space<vmem>>, %arg9: memref<4x2x8x72xbf16, #tpu.memory_space<vmem>>, %arg10: memref<4x2x8x1xf32, #tpu.memory_space<vmem>>, %arg11: memref<8x8xbf16, #tpu.memory_space<vmem>>, %arg12: memref<8x1xf32, #tpu.memory_space<vmem>>, %arg13: memref<8x32xbf16, #tpu.memory_space<vmem>>, %arg14: memref<8x1xf32, #tpu.memory_space<vmem>>, %arg15: memref<4x2x8x72xbf16, #tpu.memory_space<vmem>>, %arg16: memref<4x2x8x1xf32, #tpu.memory_space<vmem>>, %arg17: memref<8x288xbf16, #tpu.memory_space<vmem>>, %arg18: memref<8x1xf32, #tpu.memory_space<vmem>>, %arg19: memref<32x72xbf16, #tpu.memory_space<vmem>>, %arg20: memref<32x1xf32, #tpu.memory_space<vmem>>, %arg21: memref<1x32x256xf32, #tpu.memory_space<vmem>>) attributes {dimension_semantics = [#tpu.dimension_semantics<parallel>], iteration_bounds = array<i64: 2>, scalar_prefetch = 0 : i64, scratch_operands = 0 : i64, tpu.core_type = #tpu.core_type<tc>, window_params = [{transform_indices = @transform_0, window_bounds = array<i64: 1, 8, 256>}, {pipeline_mode = #tpu.pipeline_mode<synchronous>, transform_indices = @transform_1, window_bounds = array<i64: 9, 256>}, {pipeline_mode = #tpu.pipeline_mode<synchronous>, transform_indices = @transform_2, window_bounds = array<i64: 8, 72>}, {pipeline_mode = #tpu.pipeline_mode<synchronous>, transform_indices = @transform_3, window_bounds = array<i64: 8, 1>}, {pipeline_mode = #tpu.pipeline_mode<synchronous>, transform_indices = @transform_4, window_bounds = array<i64: 8, 8>}, {pipeline_mode = #tpu.pipeline_mode<synchronous>, transform_indices = @transform_5, window_bounds = array<i64: 8, 1>}, {pipeline_mode = #tpu.pipeline_mode<synchronous>, transform_indices = @transform_6, window_bounds = array<i64: 8, 8>}, {pipeline_mode = #tpu.pipeline_mode<synchronous>, transform_indices = @transform_7, window_bounds = array<i64: 8, 1>}, {pipeline_mode = #tpu.pipeline_mode<synchronous>, transform_indices = @transform_8, window_bounds = array<i64: 4, 2, 8, 72>}, {pipeline_mode = #tpu.pipeline_mode<synchronous>, transform_indices = @transform_9, window_bounds = array<i64: 4, 2, 8, 1>}, {pipeline_mode = #tpu.pipeline_mode<synchronous>, transform_indices = @transform_10, window_bounds = array<i64: 8, 8>}, {pipeline_mode = #tpu.pipeline_mode<synchronous>, transform_indices = @transform_11, window_bounds = array<i64: 8, 1>}, {pipeline_mode = #tpu.pipeline_mode<synchronous>, transform_indices = @transform_12, window_bounds = array<i64: 8, 32>}, {pipeline_mode = #tpu.pipeline_mode<synchronous>, transform_indices = @transform_13, window_bounds = array<i64: 8, 1>}, {pipeline_mode = #tpu.pipeline_mode<synchronous>, transform_indices = @transform_14, window_bounds = array<i64: 4, 2, 8, 72>}, {pipeline_mode = #tpu.pipeline_mode<synchronous>, transform_indices = @transform_15, window_bounds = array<i64: 4, 2, 8, 1>}, {pipeline_mode = #tpu.pipeline_mode<synchronous>, transform_indices = @transform_16, window_bounds = array<i64: 8, 288>}, {pipeline_mode = #tpu.pipeline_mode<synchronous>, transform_indices = @transform_17, window_bounds = array<i64: 8, 1>}, {pipeline_mode = #tpu.pipeline_mode<synchronous>, transform_indices = @transform_18, window_bounds = array<i64: 32, 72>}, {pipeline_mode = #tpu.pipeline_mode<synchronous>, transform_indices = @transform_19, window_bounds = array<i64: 32, 1>}, {transform_indices = @transform_20, window_bounds = array<i64: 1, 32, 256>}]} {
    %c0 = arith.constant 0 : index
    %c0_0 = arith.constant 0 : index
    %0 = vector.load %arg2[%c0, %c0_0] : memref<9x256xf32, #tpu.memory_space<vmem>>, vector<9x256xf32>
    %c0_1 = arith.constant 0 : index
    %c0_2 = arith.constant 0 : index
    %1 = vector.load %arg3[%c0_1, %c0_2] : memref<8x72xbf16, #tpu.memory_space<vmem>>, vector<8x72xbf16>
    %c0_3 = arith.constant 0 : index
    %c0_4 = arith.constant 0 : index
    %2 = vector.load %arg4[%c0_3, %c0_4] : memref<8x1xf32, #tpu.memory_space<vmem>>, vector<8x1xf32>
    %c0_5 = arith.constant 0 : index
    %c0_6 = arith.constant 0 : index
    %c0_7 = arith.constant 0 : index
    %3 = vector.load %arg1[%c0_5, %c0_6, %c0_7] : memref<1x8x256xf32, #tpu.memory_space<vmem>>, vector<1x8x256xf32>
    %4 = vector.shape_cast %3 : vector<1x8x256xf32> to vector<8x256xf32>
    %5 = tpu.concatenate %4, %4 in 1 : vector<8x256xf32>, vector<8x256xf32> -> vector<8x512xf32>
    %6 = vector.extract_strided_slice %5 {offsets = [0, 239], sizes = [8, 256], strides = [1, 1]} : vector<8x512xf32> to vector<8x256xf32>
    %7 = vector.extract_strided_slice %0 {offsets = [0, 0], sizes = [1, 256], strides = [1, 1]} : vector<9x256xf32> to vector<1x256xf32>
    %8 = vector.broadcast %7 : vector<1x256xf32> to vector<8x256xf32>
    %9 = arith.mulf %6, %8 : vector<8x256xf32>
    %10 = vector.extract_strided_slice %5 {offsets = [0, 240], sizes = [8, 256], strides = [1, 1]} : vector<8x512xf32> to vector<8x256xf32>
    %11 = vector.extract_strided_slice %0 {offsets = [1, 0], sizes = [1, 256], strides = [1, 1]} : vector<9x256xf32> to vector<1x256xf32>
    %12 = vector.broadcast %11 : vector<1x256xf32> to vector<8x256xf32>
    %13 = arith.mulf %10, %12 : vector<8x256xf32>
    %14 = vector.extract_strided_slice %5 {offsets = [0, 241], sizes = [8, 256], strides = [1, 1]} : vector<8x512xf32> to vector<8x256xf32>
    %15 = vector.extract_strided_slice %0 {offsets = [2, 0], sizes = [1, 256], strides = [1, 1]} : vector<9x256xf32> to vector<1x256xf32>
    %16 = vector.broadcast %15 : vector<1x256xf32> to vector<8x256xf32>
    %17 = arith.mulf %14, %16 : vector<8x256xf32>
    %18 = vector.extract_strided_slice %5 {offsets = [0, 255], sizes = [8, 256], strides = [1, 1]} : vector<8x512xf32> to vector<8x256xf32>
    %19 = vector.extract_strided_slice %0 {offsets = [3, 0], sizes = [1, 256], strides = [1, 1]} : vector<9x256xf32> to vector<1x256xf32>
    %20 = vector.broadcast %19 : vector<1x256xf32> to vector<8x256xf32>
    %21 = arith.mulf %18, %20 : vector<8x256xf32>
    %22 = vector.extract_strided_slice %5 {offsets = [0, 1], sizes = [8, 256], strides = [1, 1]} : vector<8x512xf32> to vector<8x256xf32>
    %23 = vector.extract_strided_slice %0 {offsets = [5, 0], sizes = [1, 256], strides = [1, 1]} : vector<9x256xf32> to vector<1x256xf32>
    %24 = vector.broadcast %23 : vector<1x256xf32> to vector<8x256xf32>
    %25 = arith.mulf %22, %24 : vector<8x256xf32>
    %26 = vector.extract_strided_slice %5 {offsets = [0, 15], sizes = [8, 256], strides = [1, 1]} : vector<8x512xf32> to vector<8x256xf32>
    %27 = vector.extract_strided_slice %0 {offsets = [6, 0], sizes = [1, 256], strides = [1, 1]} : vector<9x256xf32> to vector<1x256xf32>
    %28 = vector.broadcast %27 : vector<1x256xf32> to vector<8x256xf32>
    %29 = arith.mulf %26, %28 : vector<8x256xf32>
    %30 = vector.extract_strided_slice %5 {offsets = [0, 16], sizes = [8, 256], strides = [1, 1]} : vector<8x512xf32> to vector<8x256xf32>
    %31 = vector.extract_strided_slice %0 {offsets = [7, 0], sizes = [1, 256], strides = [1, 1]} : vector<9x256xf32> to vector<1x256xf32>
    %32 = vector.broadcast %31 : vector<1x256xf32> to vector<8x256xf32>
    %33 = arith.mulf %30, %32 : vector<8x256xf32>
    %34 = vector.extract_strided_slice %5 {offsets = [0, 17], sizes = [8, 256], strides = [1, 1]} : vector<8x512xf32> to vector<8x256xf32>
    %35 = vector.extract_strided_slice %0 {offsets = [8, 0], sizes = [1, 256], strides = [1, 1]} : vector<9x256xf32> to vector<1x256xf32>
    %36 = vector.broadcast %35 : vector<1x256xf32> to vector<8x256xf32>
    %37 = arith.mulf %34, %36 : vector<8x256xf32>
    %38 = tpu.concatenate %9, %13, %17, %21, %4, %25, %29, %33, %37 in 0 : vector<8x256xf32>, vector<8x256xf32>, vector<8x256xf32>, vector<8x256xf32>, vector<8x256xf32>, vector<8x256xf32>, vector<8x256xf32>, vector<8x256xf32>, vector<8x256xf32> -> vector<72x256xf32>
    %39 = arith.truncf %38 : vector<72x256xf32> to vector<72x256xbf16>
    %cst = arith.constant dense<0.000000e+00> : vector<8x256xf32>
    %40 = tpu.matmul %1, %39, %cst {dimension_numbers = #tpu.dot_dimension_numbers<[1], [0], [0], [1], [0, 0, 1, 1], [], []>} : vector<8x72xbf16>, vector<72x256xbf16>, vector<8x256xf32> -> vector<8x256xf32>
    %41 = vector.broadcast %2 : vector<8x1xf32> to vector<8x256xf32>
    %42 = arith.addf %40, %41 : vector<8x256xf32>
    %c0_8 = arith.constant 0 : index
    %c0_9 = arith.constant 0 : index
    %43 = vector.load %arg5[%c0_8, %c0_9] : memref<8x8xbf16, #tpu.memory_space<vmem>>, vector<8x8xbf16>
    %c0_10 = arith.constant 0 : index
    %c0_11 = arith.constant 0 : index
    %44 = vector.load %arg6[%c0_10, %c0_11] : memref<8x1xf32, #tpu.memory_space<vmem>>, vector<8x1xf32>
    %c0_12 = arith.constant 0 : index
    %c0_13 = arith.constant 0 : index
    %45 = vector.load %arg7[%c0_12, %c0_13] : memref<8x8xbf16, #tpu.memory_space<vmem>>, vector<8x8xbf16>
    %c0_14 = arith.constant 0 : index
    %c0_15 = arith.constant 0 : index
    %46 = vector.load %arg8[%c0_14, %c0_15] : memref<8x1xf32, #tpu.memory_space<vmem>>, vector<8x1xf32>
    %c0_16 = arith.constant 0 : index
    %c0_17 = arith.constant 0 : index
    %c0_18 = arith.constant 0 : index
    %c0_19 = arith.constant 0 : index
    %47 = vector.load %arg9[%c0_16, %c0_17, %c0_18, %c0_19] : memref<4x2x8x72xbf16, #tpu.memory_space<vmem>>, vector<4x2x8x72xbf16>
    %c0_20 = arith.constant 0 : index
    %c0_21 = arith.constant 0 : index
    %c0_22 = arith.constant 0 : index
    %c0_23 = arith.constant 0 : index
    %48 = vector.load %arg10[%c0_20, %c0_21, %c0_22, %c0_23] : memref<4x2x8x1xf32, #tpu.memory_space<vmem>>, vector<4x2x8x1xf32>
    %cst_24 = arith.constant 0.000000e+00 : f32
    %49 = vector.broadcast %cst_24 : f32 to vector<8x256xf32>
    %50 = arith.maximumf %42, %49 : vector<8x256xf32>
    %51 = arith.truncf %50 : vector<8x256xf32> to vector<8x256xbf16>
    %cst_25 = arith.constant dense<0.000000e+00> : vector<8x256xf32>
    %52 = tpu.matmul %43, %51, %cst_25 {dimension_numbers = #tpu.dot_dimension_numbers<[1], [0], [0], [1], [0, 0, 1, 1], [], []>} : vector<8x8xbf16>, vector<8x256xbf16>, vector<8x256xf32> -> vector<8x256xf32>
    %53 = vector.broadcast %44 : vector<8x1xf32> to vector<8x256xf32>
    %54 = arith.addf %52, %53 : vector<8x256xf32>
    %cst_26 = arith.constant 0.000000e+00 : f32
    %55 = vector.broadcast %cst_26 : f32 to vector<8x256xf32>
    %56 = arith.maximumf %42, %55 : vector<8x256xf32>
    %57 = arith.truncf %56 : vector<8x256xf32> to vector<8x256xbf16>
    %cst_27 = arith.constant dense<0.000000e+00> : vector<8x256xf32>
    %58 = tpu.matmul %45, %57, %cst_27 {dimension_numbers = #tpu.dot_dimension_numbers<[1], [0], [0], [1], [0, 0, 1, 1], [], []>} : vector<8x8xbf16>, vector<8x256xbf16>, vector<8x256xf32> -> vector<8x256xf32>
    %59 = vector.broadcast %46 : vector<8x1xf32> to vector<8x256xf32>
    %60 = arith.addf %58, %59 : vector<8x256xf32>
    %61 = vector.extract_strided_slice %47 {offsets = [0, 0, 0, 0], sizes = [1, 1, 8, 72], strides = [1, 1, 1, 1]} : vector<4x2x8x72xbf16> to vector<1x1x8x72xbf16>
    %62 = vector.shape_cast %61 : vector<1x1x8x72xbf16> to vector<8x72xbf16>
    %63 = vector.extract_strided_slice %48 {offsets = [0, 0, 0, 0], sizes = [1, 1, 8, 1], strides = [1, 1, 1, 1]} : vector<4x2x8x1xf32> to vector<1x1x8x1xf32>
    %64 = vector.shape_cast %63 : vector<1x1x8x1xf32> to vector<8x1xf32>
    %cst_28 = arith.constant 0.000000e+00 : f32
    %65 = vector.broadcast %cst_28 : f32 to vector<8x256xf32>
    %66 = arith.maximumf %54, %65 : vector<8x256xf32>
    %67 = tpu.concatenate %66, %66 in 1 : vector<8x256xf32>, vector<8x256xf32> -> vector<8x512xf32>
    %68 = vector.extract_strided_slice %67 {offsets = [0, 239], sizes = [8, 256], strides = [1, 1]} : vector<8x512xf32> to vector<8x256xf32>
    %69 = vector.extract_strided_slice %0 {offsets = [0, 0], sizes = [1, 256], strides = [1, 1]} : vector<9x256xf32> to vector<1x256xf32>
    %70 = vector.broadcast %69 : vector<1x256xf32> to vector<8x256xf32>
    %71 = arith.mulf %68, %70 : vector<8x256xf32>
    %72 = vector.extract_strided_slice %67 {offsets = [0, 240], sizes = [8, 256], strides = [1, 1]} : vector<8x512xf32> to vector<8x256xf32>
    %73 = vector.extract_strided_slice %0 {offsets = [1, 0], sizes = [1, 256], strides = [1, 1]} : vector<9x256xf32> to vector<1x256xf32>
    %74 = vector.broadcast %73 : vector<1x256xf32> to vector<8x256xf32>
    %75 = arith.mulf %72, %74 : vector<8x256xf32>
    %76 = vector.extract_strided_slice %67 {offsets = [0, 241], sizes = [8, 256], strides = [1, 1]} : vector<8x512xf32> to vector<8x256xf32>
    %77 = vector.extract_strided_slice %0 {offsets = [2, 0], sizes = [1, 256], strides = [1, 1]} : vector<9x256xf32> to vector<1x256xf32>
    %78 = vector.broadcast %77 : vector<1x256xf32> to vector<8x256xf32>
    %79 = arith.mulf %76, %78 : vector<8x256xf32>
    %80 = vector.extract_strided_slice %67 {offsets = [0, 255], sizes = [8, 256], strides = [1, 1]} : vector<8x512xf32> to vector<8x256xf32>
    %81 = vector.extract_strided_slice %0 {offsets = [3, 0], sizes = [1, 256], strides = [1, 1]} : vector<9x256xf32> to vector<1x256xf32>
    %82 = vector.broadcast %81 : vector<1x256xf32> to vector<8x256xf32>
    %83 = arith.mulf %80, %82 : vector<8x256xf32>
    %84 = vector.extract_strided_slice %67 {offsets = [0, 1], sizes = [8, 256], strides = [1, 1]} : vector<8x512xf32> to vector<8x256xf32>
    %85 = vector.extract_strided_slice %0 {offsets = [5, 0], sizes = [1, 256], strides = [1, 1]} : vector<9x256xf32> to vector<1x256xf32>
    %86 = vector.broadcast %85 : vector<1x256xf32> to vector<8x256xf32>
    %87 = arith.mulf %84, %86 : vector<8x256xf32>
    %88 = vector.extract_strided_slice %67 {offsets = [0, 15], sizes = [8, 256], strides = [1, 1]} : vector<8x512xf32> to vector<8x256xf32>
    %89 = vector.extract_strided_slice %0 {offsets = [6, 0], sizes = [1, 256], strides = [1, 1]} : vector<9x256xf32> to vector<1x256xf32>
    %90 = vector.broadcast %89 : vector<1x256xf32> to vector<8x256xf32>
    %91 = arith.mulf %88, %90 : vector<8x256xf32>
    %92 = vector.extract_strided_slice %67 {offsets = [0, 16], sizes = [8, 256], strides = [1, 1]} : vector<8x512xf32> to vector<8x256xf32>
    %93 = vector.extract_strided_slice %0 {offsets = [7, 0], sizes = [1, 256], strides = [1, 1]} : vector<9x256xf32> to vector<1x256xf32>
    %94 = vector.broadcast %93 : vector<1x256xf32> to vector<8x256xf32>
    %95 = arith.mulf %92, %94 : vector<8x256xf32>
    %96 = vector.extract_strided_slice %67 {offsets = [0, 17], sizes = [8, 256], strides = [1, 1]} : vector<8x512xf32> to vector<8x256xf32>
    %97 = vector.extract_strided_slice %0 {offsets = [8, 0], sizes = [1, 256], strides = [1, 1]} : vector<9x256xf32> to vector<1x256xf32>
    %98 = vector.broadcast %97 : vector<1x256xf32> to vector<8x256xf32>
    %99 = arith.mulf %96, %98 : vector<8x256xf32>
    %100 = tpu.concatenate %71, %75, %79, %83, %66, %87, %91, %95, %99 in 0 : vector<8x256xf32>, vector<8x256xf32>, vector<8x256xf32>, vector<8x256xf32>, vector<8x256xf32>, vector<8x256xf32>, vector<8x256xf32>, vector<8x256xf32>, vector<8x256xf32> -> vector<72x256xf32>
    %101 = arith.truncf %100 : vector<72x256xf32> to vector<72x256xbf16>
    %cst_29 = arith.constant dense<0.000000e+00> : vector<8x256xf32>
    %102 = tpu.matmul %62, %101, %cst_29 {dimension_numbers = #tpu.dot_dimension_numbers<[1], [0], [0], [1], [0, 0, 1, 1], [], []>} : vector<8x72xbf16>, vector<72x256xbf16>, vector<8x256xf32> -> vector<8x256xf32>
    %103 = vector.broadcast %64 : vector<8x1xf32> to vector<8x256xf32>
    %104 = arith.addf %102, %103 : vector<8x256xf32>
    %105 = vector.extract_strided_slice %47 {offsets = [0, 1, 0, 0], sizes = [1, 1, 8, 72], strides = [1, 1, 1, 1]} : vector<4x2x8x72xbf16> to vector<1x1x8x72xbf16>
    %106 = vector.shape_cast %105 : vector<1x1x8x72xbf16> to vector<8x72xbf16>
    %107 = vector.extract_strided_slice %48 {offsets = [0, 1, 0, 0], sizes = [1, 1, 8, 1], strides = [1, 1, 1, 1]} : vector<4x2x8x1xf32> to vector<1x1x8x1xf32>
    %108 = vector.shape_cast %107 : vector<1x1x8x1xf32> to vector<8x1xf32>
    %cst_30 = arith.constant 0.000000e+00 : f32
    %109 = vector.broadcast %cst_30 : f32 to vector<8x256xf32>
    %110 = arith.maximumf %60, %109 : vector<8x256xf32>
    %111 = tpu.concatenate %110, %110 in 1 : vector<8x256xf32>, vector<8x256xf32> -> vector<8x512xf32>
    %112 = vector.extract_strided_slice %111 {offsets = [0, 239], sizes = [8, 256], strides = [1, 1]} : vector<8x512xf32> to vector<8x256xf32>
    %113 = vector.extract_strided_slice %0 {offsets = [0, 0], sizes = [1, 256], strides = [1, 1]} : vector<9x256xf32> to vector<1x256xf32>
    %114 = vector.broadcast %113 : vector<1x256xf32> to vector<8x256xf32>
    %115 = arith.mulf %112, %114 : vector<8x256xf32>
    %116 = vector.extract_strided_slice %111 {offsets = [0, 240], sizes = [8, 256], strides = [1, 1]} : vector<8x512xf32> to vector<8x256xf32>
    %117 = vector.extract_strided_slice %0 {offsets = [1, 0], sizes = [1, 256], strides = [1, 1]} : vector<9x256xf32> to vector<1x256xf32>
    %118 = vector.broadcast %117 : vector<1x256xf32> to vector<8x256xf32>
    %119 = arith.mulf %116, %118 : vector<8x256xf32>
    %120 = vector.extract_strided_slice %111 {offsets = [0, 241], sizes = [8, 256], strides = [1, 1]} : vector<8x512xf32> to vector<8x256xf32>
    %121 = vector.extract_strided_slice %0 {offsets = [2, 0], sizes = [1, 256], strides = [1, 1]} : vector<9x256xf32> to vector<1x256xf32>
    %122 = vector.broadcast %121 : vector<1x256xf32> to vector<8x256xf32>
    %123 = arith.mulf %120, %122 : vector<8x256xf32>
    %124 = vector.extract_strided_slice %111 {offsets = [0, 255], sizes = [8, 256], strides = [1, 1]} : vector<8x512xf32> to vector<8x256xf32>
    %125 = vector.extract_strided_slice %0 {offsets = [3, 0], sizes = [1, 256], strides = [1, 1]} : vector<9x256xf32> to vector<1x256xf32>
    %126 = vector.broadcast %125 : vector<1x256xf32> to vector<8x256xf32>
    %127 = arith.mulf %124, %126 : vector<8x256xf32>
    %128 = vector.extract_strided_slice %111 {offsets = [0, 1], sizes = [8, 256], strides = [1, 1]} : vector<8x512xf32> to vector<8x256xf32>
    %129 = vector.extract_strided_slice %0 {offsets = [5, 0], sizes = [1, 256], strides = [1, 1]} : vector<9x256xf32> to vector<1x256xf32>
    %130 = vector.broadcast %129 : vector<1x256xf32> to vector<8x256xf32>
    %131 = arith.mulf %128, %130 : vector<8x256xf32>
    %132 = vector.extract_strided_slice %111 {offsets = [0, 15], sizes = [8, 256], strides = [1, 1]} : vector<8x512xf32> to vector<8x256xf32>
    %133 = vector.extract_strided_slice %0 {offsets = [6, 0], sizes = [1, 256], strides = [1, 1]} : vector<9x256xf32> to vector<1x256xf32>
    %134 = vector.broadcast %133 : vector<1x256xf32> to vector<8x256xf32>
    %135 = arith.mulf %132, %134 : vector<8x256xf32>
    %136 = vector.extract_strided_slice %111 {offsets = [0, 16], sizes = [8, 256], strides = [1, 1]} : vector<8x512xf32> to vector<8x256xf32>
    %137 = vector.extract_strided_slice %0 {offsets = [7, 0], sizes = [1, 256], strides = [1, 1]} : vector<9x256xf32> to vector<1x256xf32>
    %138 = vector.broadcast %137 : vector<1x256xf32> to vector<8x256xf32>
    %139 = arith.mulf %136, %138 : vector<8x256xf32>
    %140 = vector.extract_strided_slice %111 {offsets = [0, 17], sizes = [8, 256], strides = [1, 1]} : vector<8x512xf32> to vector<8x256xf32>
    %141 = vector.extract_strided_slice %0 {offsets = [8, 0], sizes = [1, 256], strides = [1, 1]} : vector<9x256xf32> to vector<1x256xf32>
    %142 = vector.broadcast %141 : vector<1x256xf32> to vector<8x256xf32>
    %143 = arith.mulf %140, %142 : vector<8x256xf32>
    %144 = tpu.concatenate %115, %119, %123, %127, %110, %131, %135, %139, %143 in 0 : vector<8x256xf32>, vector<8x256xf32>, vector<8x256xf32>, vector<8x256xf32>, vector<8x256xf32>, vector<8x256xf32>, vector<8x256xf32>, vector<8x256xf32>, vector<8x256xf32> -> vector<72x256xf32>
    %145 = arith.truncf %144 : vector<72x256xf32> to vector<72x256xbf16>
    %cst_31 = arith.constant dense<0.000000e+00> : vector<8x256xf32>
    %146 = tpu.matmul %106, %145, %cst_31 {dimension_numbers = #tpu.dot_dimension_numbers<[1], [0], [0], [1], [0, 0, 1, 1], [], []>} : vector<8x72xbf16>, vector<72x256xbf16>, vector<8x256xf32> -> vector<8x256xf32>
    %147 = vector.broadcast %108 : vector<8x1xf32> to vector<8x256xf32>
    %148 = arith.addf %146, %147 : vector<8x256xf32>
    %149 = arith.addf %104, %148 : vector<8x256xf32>
    %150 = vector.extract_strided_slice %47 {offsets = [1, 0, 0, 0], sizes = [1, 1, 8, 72], strides = [1, 1, 1, 1]} : vector<4x2x8x72xbf16> to vector<1x1x8x72xbf16>
    %151 = vector.shape_cast %150 : vector<1x1x8x72xbf16> to vector<8x72xbf16>
    %152 = vector.extract_strided_slice %48 {offsets = [1, 0, 0, 0], sizes = [1, 1, 8, 1], strides = [1, 1, 1, 1]} : vector<4x2x8x1xf32> to vector<1x1x8x1xf32>
    %153 = vector.shape_cast %152 : vector<1x1x8x1xf32> to vector<8x1xf32>
    %cst_32 = arith.constant 0.000000e+00 : f32
    %154 = vector.broadcast %cst_32 : f32 to vector<8x256xf32>
    %155 = arith.maximumf %60, %154 : vector<8x256xf32>
    %156 = tpu.concatenate %155, %155 in 1 : vector<8x256xf32>, vector<8x256xf32> -> vector<8x512xf32>
    %157 = vector.extract_strided_slice %156 {offsets = [0, 239], sizes = [8, 256], strides = [1, 1]} : vector<8x512xf32> to vector<8x256xf32>
    %158 = vector.extract_strided_slice %0 {offsets = [0, 0], sizes = [1, 256], strides = [1, 1]} : vector<9x256xf32> to vector<1x256xf32>
    %159 = vector.broadcast %158 : vector<1x256xf32> to vector<8x256xf32>
    %160 = arith.mulf %157, %159 : vector<8x256xf32>
    %161 = vector.extract_strided_slice %156 {offsets = [0, 240], sizes = [8, 256], strides = [1, 1]} : vector<8x512xf32> to vector<8x256xf32>
    %162 = vector.extract_strided_slice %0 {offsets = [1, 0], sizes = [1, 256], strides = [1, 1]} : vector<9x256xf32> to vector<1x256xf32>
    %163 = vector.broadcast %162 : vector<1x256xf32> to vector<8x256xf32>
    %164 = arith.mulf %161, %163 : vector<8x256xf32>
    %165 = vector.extract_strided_slice %156 {offsets = [0, 241], sizes = [8, 256], strides = [1, 1]} : vector<8x512xf32> to vector<8x256xf32>
    %166 = vector.extract_strided_slice %0 {offsets = [2, 0], sizes = [1, 256], strides = [1, 1]} : vector<9x256xf32> to vector<1x256xf32>
    %167 = vector.broadcast %166 : vector<1x256xf32> to vector<8x256xf32>
    %168 = arith.mulf %165, %167 : vector<8x256xf32>
    %169 = vector.extract_strided_slice %156 {offsets = [0, 255], sizes = [8, 256], strides = [1, 1]} : vector<8x512xf32> to vector<8x256xf32>
    %170 = vector.extract_strided_slice %0 {offsets = [3, 0], sizes = [1, 256], strides = [1, 1]} : vector<9x256xf32> to vector<1x256xf32>
    %171 = vector.broadcast %170 : vector<1x256xf32> to vector<8x256xf32>
    %172 = arith.mulf %169, %171 : vector<8x256xf32>
    %173 = vector.extract_strided_slice %156 {offsets = [0, 1], sizes = [8, 256], strides = [1, 1]} : vector<8x512xf32> to vector<8x256xf32>
    %174 = vector.extract_strided_slice %0 {offsets = [5, 0], sizes = [1, 256], strides = [1, 1]} : vector<9x256xf32> to vector<1x256xf32>
    %175 = vector.broadcast %174 : vector<1x256xf32> to vector<8x256xf32>
    %176 = arith.mulf %173, %175 : vector<8x256xf32>
    %177 = vector.extract_strided_slice %156 {offsets = [0, 15], sizes = [8, 256], strides = [1, 1]} : vector<8x512xf32> to vector<8x256xf32>
    %178 = vector.extract_strided_slice %0 {offsets = [6, 0], sizes = [1, 256], strides = [1, 1]} : vector<9x256xf32> to vector<1x256xf32>
    %179 = vector.broadcast %178 : vector<1x256xf32> to vector<8x256xf32>
    %180 = arith.mulf %177, %179 : vector<8x256xf32>
    %181 = vector.extract_strided_slice %156 {offsets = [0, 16], sizes = [8, 256], strides = [1, 1]} : vector<8x512xf32> to vector<8x256xf32>
    %182 = vector.extract_strided_slice %0 {offsets = [7, 0], sizes = [1, 256], strides = [1, 1]} : vector<9x256xf32> to vector<1x256xf32>
    %183 = vector.broadcast %182 : vector<1x256xf32> to vector<8x256xf32>
    %184 = arith.mulf %181, %183 : vector<8x256xf32>
    %185 = vector.extract_strided_slice %156 {offsets = [0, 17], sizes = [8, 256], strides = [1, 1]} : vector<8x512xf32> to vector<8x256xf32>
    %186 = vector.extract_strided_slice %0 {offsets = [8, 0], sizes = [1, 256], strides = [1, 1]} : vector<9x256xf32> to vector<1x256xf32>
    %187 = vector.broadcast %186 : vector<1x256xf32> to vector<8x256xf32>
    %188 = arith.mulf %185, %187 : vector<8x256xf32>
    %189 = tpu.concatenate %160, %164, %168, %172, %155, %176, %180, %184, %188 in 0 : vector<8x256xf32>, vector<8x256xf32>, vector<8x256xf32>, vector<8x256xf32>, vector<8x256xf32>, vector<8x256xf32>, vector<8x256xf32>, vector<8x256xf32>, vector<8x256xf32> -> vector<72x256xf32>
    %190 = arith.truncf %189 : vector<72x256xf32> to vector<72x256xbf16>
    %cst_33 = arith.constant dense<0.000000e+00> : vector<8x256xf32>
    %191 = tpu.matmul %151, %190, %cst_33 {dimension_numbers = #tpu.dot_dimension_numbers<[1], [0], [0], [1], [0, 0, 1, 1], [], []>} : vector<8x72xbf16>, vector<72x256xbf16>, vector<8x256xf32> -> vector<8x256xf32>
    %192 = vector.broadcast %153 : vector<8x1xf32> to vector<8x256xf32>
    %193 = arith.addf %191, %192 : vector<8x256xf32>
    %194 = vector.extract_strided_slice %47 {offsets = [1, 1, 0, 0], sizes = [1, 1, 8, 72], strides = [1, 1, 1, 1]} : vector<4x2x8x72xbf16> to vector<1x1x8x72xbf16>
    %195 = vector.shape_cast %194 : vector<1x1x8x72xbf16> to vector<8x72xbf16>
    %196 = vector.extract_strided_slice %48 {offsets = [1, 1, 0, 0], sizes = [1, 1, 8, 1], strides = [1, 1, 1, 1]} : vector<4x2x8x1xf32> to vector<1x1x8x1xf32>
    %197 = vector.shape_cast %196 : vector<1x1x8x1xf32> to vector<8x1xf32>
    %cst_34 = arith.constant 0.000000e+00 : f32
    %198 = vector.broadcast %cst_34 : f32 to vector<8x256xf32>
    %199 = arith.maximumf %149, %198 : vector<8x256xf32>
    %200 = tpu.concatenate %199, %199 in 1 : vector<8x256xf32>, vector<8x256xf32> -> vector<8x512xf32>
    %201 = vector.extract_strided_slice %200 {offsets = [0, 239], sizes = [8, 256], strides = [1, 1]} : vector<8x512xf32> to vector<8x256xf32>
    %202 = vector.extract_strided_slice %0 {offsets = [0, 0], sizes = [1, 256], strides = [1, 1]} : vector<9x256xf32> to vector<1x256xf32>
    %203 = vector.broadcast %202 : vector<1x256xf32> to vector<8x256xf32>
    %204 = arith.mulf %201, %203 : vector<8x256xf32>
    %205 = vector.extract_strided_slice %200 {offsets = [0, 240], sizes = [8, 256], strides = [1, 1]} : vector<8x512xf32> to vector<8x256xf32>
    %206 = vector.extract_strided_slice %0 {offsets = [1, 0], sizes = [1, 256], strides = [1, 1]} : vector<9x256xf32> to vector<1x256xf32>
    %207 = vector.broadcast %206 : vector<1x256xf32> to vector<8x256xf32>
    %208 = arith.mulf %205, %207 : vector<8x256xf32>
    %209 = vector.extract_strided_slice %200 {offsets = [0, 241], sizes = [8, 256], strides = [1, 1]} : vector<8x512xf32> to vector<8x256xf32>
    %210 = vector.extract_strided_slice %0 {offsets = [2, 0], sizes = [1, 256], strides = [1, 1]} : vector<9x256xf32> to vector<1x256xf32>
    %211 = vector.broadcast %210 : vector<1x256xf32> to vector<8x256xf32>
    %212 = arith.mulf %209, %211 : vector<8x256xf32>
    %213 = vector.extract_strided_slice %200 {offsets = [0, 255], sizes = [8, 256], strides = [1, 1]} : vector<8x512xf32> to vector<8x256xf32>
    %214 = vector.extract_strided_slice %0 {offsets = [3, 0], sizes = [1, 256], strides = [1, 1]} : vector<9x256xf32> to vector<1x256xf32>
    %215 = vector.broadcast %214 : vector<1x256xf32> to vector<8x256xf32>
    %216 = arith.mulf %213, %215 : vector<8x256xf32>
    %217 = vector.extract_strided_slice %200 {offsets = [0, 1], sizes = [8, 256], strides = [1, 1]} : vector<8x512xf32> to vector<8x256xf32>
    %218 = vector.extract_strided_slice %0 {offsets = [5, 0], sizes = [1, 256], strides = [1, 1]} : vector<9x256xf32> to vector<1x256xf32>
    %219 = vector.broadcast %218 : vector<1x256xf32> to vector<8x256xf32>
    %220 = arith.mulf %217, %219 : vector<8x256xf32>
    %221 = vector.extract_strided_slice %200 {offsets = [0, 15], sizes = [8, 256], strides = [1, 1]} : vector<8x512xf32> to vector<8x256xf32>
    %222 = vector.extract_strided_slice %0 {offsets = [6, 0], sizes = [1, 256], strides = [1, 1]} : vector<9x256xf32> to vector<1x256xf32>
    %223 = vector.broadcast %222 : vector<1x256xf32> to vector<8x256xf32>
    %224 = arith.mulf %221, %223 : vector<8x256xf32>
    %225 = vector.extract_strided_slice %200 {offsets = [0, 16], sizes = [8, 256], strides = [1, 1]} : vector<8x512xf32> to vector<8x256xf32>
    %226 = vector.extract_strided_slice %0 {offsets = [7, 0], sizes = [1, 256], strides = [1, 1]} : vector<9x256xf32> to vector<1x256xf32>
    %227 = vector.broadcast %226 : vector<1x256xf32> to vector<8x256xf32>
    %228 = arith.mulf %225, %227 : vector<8x256xf32>
    %229 = vector.extract_strided_slice %200 {offsets = [0, 17], sizes = [8, 256], strides = [1, 1]} : vector<8x512xf32> to vector<8x256xf32>
    %230 = vector.extract_strided_slice %0 {offsets = [8, 0], sizes = [1, 256], strides = [1, 1]} : vector<9x256xf32> to vector<1x256xf32>
    %231 = vector.broadcast %230 : vector<1x256xf32> to vector<8x256xf32>
    %232 = arith.mulf %229, %231 : vector<8x256xf32>
    %233 = tpu.concatenate %204, %208, %212, %216, %199, %220, %224, %228, %232 in 0 : vector<8x256xf32>, vector<8x256xf32>, vector<8x256xf32>, vector<8x256xf32>, vector<8x256xf32>, vector<8x256xf32>, vector<8x256xf32>, vector<8x256xf32>, vector<8x256xf32> -> vector<72x256xf32>
    %234 = arith.truncf %233 : vector<72x256xf32> to vector<72x256xbf16>
    %cst_35 = arith.constant dense<0.000000e+00> : vector<8x256xf32>
    %235 = tpu.matmul %195, %234, %cst_35 {dimension_numbers = #tpu.dot_dimension_numbers<[1], [0], [0], [1], [0, 0, 1, 1], [], []>} : vector<8x72xbf16>, vector<72x256xbf16>, vector<8x256xf32> -> vector<8x256xf32>
    %236 = vector.broadcast %197 : vector<8x1xf32> to vector<8x256xf32>
    %237 = arith.addf %235, %236 : vector<8x256xf32>
    %238 = arith.addf %193, %237 : vector<8x256xf32>
    %239 = vector.extract_strided_slice %47 {offsets = [2, 0, 0, 0], sizes = [1, 1, 8, 72], strides = [1, 1, 1, 1]} : vector<4x2x8x72xbf16> to vector<1x1x8x72xbf16>
    %240 = vector.shape_cast %239 : vector<1x1x8x72xbf16> to vector<8x72xbf16>
    %241 = vector.extract_strided_slice %48 {offsets = [2, 0, 0, 0], sizes = [1, 1, 8, 1], strides = [1, 1, 1, 1]} : vector<4x2x8x1xf32> to vector<1x1x8x1xf32>
    %242 = vector.shape_cast %241 : vector<1x1x8x1xf32> to vector<8x1xf32>
    %cst_36 = arith.constant 0.000000e+00 : f32
    %243 = vector.broadcast %cst_36 : f32 to vector<8x256xf32>
    %244 = arith.maximumf %149, %243 : vector<8x256xf32>
    %245 = tpu.concatenate %244, %244 in 1 : vector<8x256xf32>, vector<8x256xf32> -> vector<8x512xf32>
    %246 = vector.extract_strided_slice %245 {offsets = [0, 239], sizes = [8, 256], strides = [1, 1]} : vector<8x512xf32> to vector<8x256xf32>
    %247 = vector.extract_strided_slice %0 {offsets = [0, 0], sizes = [1, 256], strides = [1, 1]} : vector<9x256xf32> to vector<1x256xf32>
    %248 = vector.broadcast %247 : vector<1x256xf32> to vector<8x256xf32>
    %249 = arith.mulf %246, %248 : vector<8x256xf32>
    %250 = vector.extract_strided_slice %245 {offsets = [0, 240], sizes = [8, 256], strides = [1, 1]} : vector<8x512xf32> to vector<8x256xf32>
    %251 = vector.extract_strided_slice %0 {offsets = [1, 0], sizes = [1, 256], strides = [1, 1]} : vector<9x256xf32> to vector<1x256xf32>
    %252 = vector.broadcast %251 : vector<1x256xf32> to vector<8x256xf32>
    %253 = arith.mulf %250, %252 : vector<8x256xf32>
    %254 = vector.extract_strided_slice %245 {offsets = [0, 241], sizes = [8, 256], strides = [1, 1]} : vector<8x512xf32> to vector<8x256xf32>
    %255 = vector.extract_strided_slice %0 {offsets = [2, 0], sizes = [1, 256], strides = [1, 1]} : vector<9x256xf32> to vector<1x256xf32>
    %256 = vector.broadcast %255 : vector<1x256xf32> to vector<8x256xf32>
    %257 = arith.mulf %254, %256 : vector<8x256xf32>
    %258 = vector.extract_strided_slice %245 {offsets = [0, 255], sizes = [8, 256], strides = [1, 1]} : vector<8x512xf32> to vector<8x256xf32>
    %259 = vector.extract_strided_slice %0 {offsets = [3, 0], sizes = [1, 256], strides = [1, 1]} : vector<9x256xf32> to vector<1x256xf32>
    %260 = vector.broadcast %259 : vector<1x256xf32> to vector<8x256xf32>
    %261 = arith.mulf %258, %260 : vector<8x256xf32>
    %262 = vector.extract_strided_slice %245 {offsets = [0, 1], sizes = [8, 256], strides = [1, 1]} : vector<8x512xf32> to vector<8x256xf32>
    %263 = vector.extract_strided_slice %0 {offsets = [5, 0], sizes = [1, 256], strides = [1, 1]} : vector<9x256xf32> to vector<1x256xf32>
    %264 = vector.broadcast %263 : vector<1x256xf32> to vector<8x256xf32>
    %265 = arith.mulf %262, %264 : vector<8x256xf32>
    %266 = vector.extract_strided_slice %245 {offsets = [0, 15], sizes = [8, 256], strides = [1, 1]} : vector<8x512xf32> to vector<8x256xf32>
    %267 = vector.extract_strided_slice %0 {offsets = [6, 0], sizes = [1, 256], strides = [1, 1]} : vector<9x256xf32> to vector<1x256xf32>
    %268 = vector.broadcast %267 : vector<1x256xf32> to vector<8x256xf32>
    %269 = arith.mulf %266, %268 : vector<8x256xf32>
    %270 = vector.extract_strided_slice %245 {offsets = [0, 16], sizes = [8, 256], strides = [1, 1]} : vector<8x512xf32> to vector<8x256xf32>
    %271 = vector.extract_strided_slice %0 {offsets = [7, 0], sizes = [1, 256], strides = [1, 1]} : vector<9x256xf32> to vector<1x256xf32>
    %272 = vector.broadcast %271 : vector<1x256xf32> to vector<8x256xf32>
    %273 = arith.mulf %270, %272 : vector<8x256xf32>
    %274 = vector.extract_strided_slice %245 {offsets = [0, 17], sizes = [8, 256], strides = [1, 1]} : vector<8x512xf32> to vector<8x256xf32>
    %275 = vector.extract_strided_slice %0 {offsets = [8, 0], sizes = [1, 256], strides = [1, 1]} : vector<9x256xf32> to vector<1x256xf32>
    %276 = vector.broadcast %275 : vector<1x256xf32> to vector<8x256xf32>
    %277 = arith.mulf %274, %276 : vector<8x256xf32>
    %278 = tpu.concatenate %249, %253, %257, %261, %244, %265, %269, %273, %277 in 0 : vector<8x256xf32>, vector<8x256xf32>, vector<8x256xf32>, vector<8x256xf32>, vector<8x256xf32>, vector<8x256xf32>, vector<8x256xf32>, vector<8x256xf32>, vector<8x256xf32> -> vector<72x256xf32>
    %279 = arith.truncf %278 : vector<72x256xf32> to vector<72x256xbf16>
    %cst_37 = arith.constant dense<0.000000e+00> : vector<8x256xf32>
    %280 = tpu.matmul %240, %279, %cst_37 {dimension_numbers = #tpu.dot_dimension_numbers<[1], [0], [0], [1], [0, 0, 1, 1], [], []>} : vector<8x72xbf16>, vector<72x256xbf16>, vector<8x256xf32> -> vector<8x256xf32>
    %281 = vector.broadcast %242 : vector<8x1xf32> to vector<8x256xf32>
    %282 = arith.addf %280, %281 : vector<8x256xf32>
    %283 = vector.extract_strided_slice %47 {offsets = [2, 1, 0, 0], sizes = [1, 1, 8, 72], strides = [1, 1, 1, 1]} : vector<4x2x8x72xbf16> to vector<1x1x8x72xbf16>
    %284 = vector.shape_cast %283 : vector<1x1x8x72xbf16> to vector<8x72xbf16>
    %285 = vector.extract_strided_slice %48 {offsets = [2, 1, 0, 0], sizes = [1, 1, 8, 1], strides = [1, 1, 1, 1]} : vector<4x2x8x1xf32> to vector<1x1x8x1xf32>
    %286 = vector.shape_cast %285 : vector<1x1x8x1xf32> to vector<8x1xf32>
    %cst_38 = arith.constant 0.000000e+00 : f32
    %287 = vector.broadcast %cst_38 : f32 to vector<8x256xf32>
    %288 = arith.maximumf %238, %287 : vector<8x256xf32>
    %289 = tpu.concatenate %288, %288 in 1 : vector<8x256xf32>, vector<8x256xf32> -> vector<8x512xf32>
    %290 = vector.extract_strided_slice %289 {offsets = [0, 239], sizes = [8, 256], strides = [1, 1]} : vector<8x512xf32> to vector<8x256xf32>
    %291 = vector.extract_strided_slice %0 {offsets = [0, 0], sizes = [1, 256], strides = [1, 1]} : vector<9x256xf32> to vector<1x256xf32>
    %292 = vector.broadcast %291 : vector<1x256xf32> to vector<8x256xf32>
    %293 = arith.mulf %290, %292 : vector<8x256xf32>
    %294 = vector.extract_strided_slice %289 {offsets = [0, 240], sizes = [8, 256], strides = [1, 1]} : vector<8x512xf32> to vector<8x256xf32>
    %295 = vector.extract_strided_slice %0 {offsets = [1, 0], sizes = [1, 256], strides = [1, 1]} : vector<9x256xf32> to vector<1x256xf32>
    %296 = vector.broadcast %295 : vector<1x256xf32> to vector<8x256xf32>
    %297 = arith.mulf %294, %296 : vector<8x256xf32>
    %298 = vector.extract_strided_slice %289 {offsets = [0, 241], sizes = [8, 256], strides = [1, 1]} : vector<8x512xf32> to vector<8x256xf32>
    %299 = vector.extract_strided_slice %0 {offsets = [2, 0], sizes = [1, 256], strides = [1, 1]} : vector<9x256xf32> to vector<1x256xf32>
    %300 = vector.broadcast %299 : vector<1x256xf32> to vector<8x256xf32>
    %301 = arith.mulf %298, %300 : vector<8x256xf32>
    %302 = vector.extract_strided_slice %289 {offsets = [0, 255], sizes = [8, 256], strides = [1, 1]} : vector<8x512xf32> to vector<8x256xf32>
    %303 = vector.extract_strided_slice %0 {offsets = [3, 0], sizes = [1, 256], strides = [1, 1]} : vector<9x256xf32> to vector<1x256xf32>
    %304 = vector.broadcast %303 : vector<1x256xf32> to vector<8x256xf32>
    %305 = arith.mulf %302, %304 : vector<8x256xf32>
    %306 = vector.extract_strided_slice %289 {offsets = [0, 1], sizes = [8, 256], strides = [1, 1]} : vector<8x512xf32> to vector<8x256xf32>
    %307 = vector.extract_strided_slice %0 {offsets = [5, 0], sizes = [1, 256], strides = [1, 1]} : vector<9x256xf32> to vector<1x256xf32>
    %308 = vector.broadcast %307 : vector<1x256xf32> to vector<8x256xf32>
    %309 = arith.mulf %306, %308 : vector<8x256xf32>
    %310 = vector.extract_strided_slice %289 {offsets = [0, 15], sizes = [8, 256], strides = [1, 1]} : vector<8x512xf32> to vector<8x256xf32>
    %311 = vector.extract_strided_slice %0 {offsets = [6, 0], sizes = [1, 256], strides = [1, 1]} : vector<9x256xf32> to vector<1x256xf32>
    %312 = vector.broadcast %311 : vector<1x256xf32> to vector<8x256xf32>
    %313 = arith.mulf %310, %312 : vector<8x256xf32>
    %314 = vector.extract_strided_slice %289 {offsets = [0, 16], sizes = [8, 256], strides = [1, 1]} : vector<8x512xf32> to vector<8x256xf32>
    %315 = vector.extract_strided_slice %0 {offsets = [7, 0], sizes = [1, 256], strides = [1, 1]} : vector<9x256xf32> to vector<1x256xf32>
    %316 = vector.broadcast %315 : vector<1x256xf32> to vector<8x256xf32>
    %317 = arith.mulf %314, %316 : vector<8x256xf32>
    %318 = vector.extract_strided_slice %289 {offsets = [0, 17], sizes = [8, 256], strides = [1, 1]} : vector<8x512xf32> to vector<8x256xf32>
    %319 = vector.extract_strided_slice %0 {offsets = [8, 0], sizes = [1, 256], strides = [1, 1]} : vector<9x256xf32> to vector<1x256xf32>
    %320 = vector.broadcast %319 : vector<1x256xf32> to vector<8x256xf32>
    %321 = arith.mulf %318, %320 : vector<8x256xf32>
    %322 = tpu.concatenate %293, %297, %301, %305, %288, %309, %313, %317, %321 in 0 : vector<8x256xf32>, vector<8x256xf32>, vector<8x256xf32>, vector<8x256xf32>, vector<8x256xf32>, vector<8x256xf32>, vector<8x256xf32>, vector<8x256xf32>, vector<8x256xf32> -> vector<72x256xf32>
    %323 = arith.truncf %322 : vector<72x256xf32> to vector<72x256xbf16>
    %cst_39 = arith.constant dense<0.000000e+00> : vector<8x256xf32>
    %324 = tpu.matmul %284, %323, %cst_39 {dimension_numbers = #tpu.dot_dimension_numbers<[1], [0], [0], [1], [0, 0, 1, 1], [], []>} : vector<8x72xbf16>, vector<72x256xbf16>, vector<8x256xf32> -> vector<8x256xf32>
    %325 = vector.broadcast %286 : vector<8x1xf32> to vector<8x256xf32>
    %326 = arith.addf %324, %325 : vector<8x256xf32>
    %327 = arith.addf %282, %326 : vector<8x256xf32>
    %328 = vector.extract_strided_slice %47 {offsets = [3, 0, 0, 0], sizes = [1, 1, 8, 72], strides = [1, 1, 1, 1]} : vector<4x2x8x72xbf16> to vector<1x1x8x72xbf16>
    %329 = vector.shape_cast %328 : vector<1x1x8x72xbf16> to vector<8x72xbf16>
    %330 = vector.extract_strided_slice %48 {offsets = [3, 0, 0, 0], sizes = [1, 1, 8, 1], strides = [1, 1, 1, 1]} : vector<4x2x8x1xf32> to vector<1x1x8x1xf32>
    %331 = vector.shape_cast %330 : vector<1x1x8x1xf32> to vector<8x1xf32>
    %cst_40 = arith.constant 0.000000e+00 : f32
    %332 = vector.broadcast %cst_40 : f32 to vector<8x256xf32>
    %333 = arith.maximumf %238, %332 : vector<8x256xf32>
    %334 = tpu.concatenate %333, %333 in 1 : vector<8x256xf32>, vector<8x256xf32> -> vector<8x512xf32>
    %335 = vector.extract_strided_slice %334 {offsets = [0, 239], sizes = [8, 256], strides = [1, 1]} : vector<8x512xf32> to vector<8x256xf32>
    %336 = vector.extract_strided_slice %0 {offsets = [0, 0], sizes = [1, 256], strides = [1, 1]} : vector<9x256xf32> to vector<1x256xf32>
    %337 = vector.broadcast %336 : vector<1x256xf32> to vector<8x256xf32>
    %338 = arith.mulf %335, %337 : vector<8x256xf32>
    %339 = vector.extract_strided_slice %334 {offsets = [0, 240], sizes = [8, 256], strides = [1, 1]} : vector<8x512xf32> to vector<8x256xf32>
    %340 = vector.extract_strided_slice %0 {offsets = [1, 0], sizes = [1, 256], strides = [1, 1]} : vector<9x256xf32> to vector<1x256xf32>
    %341 = vector.broadcast %340 : vector<1x256xf32> to vector<8x256xf32>
    %342 = arith.mulf %339, %341 : vector<8x256xf32>
    %343 = vector.extract_strided_slice %334 {offsets = [0, 241], sizes = [8, 256], strides = [1, 1]} : vector<8x512xf32> to vector<8x256xf32>
    %344 = vector.extract_strided_slice %0 {offsets = [2, 0], sizes = [1, 256], strides = [1, 1]} : vector<9x256xf32> to vector<1x256xf32>
    %345 = vector.broadcast %344 : vector<1x256xf32> to vector<8x256xf32>
    %346 = arith.mulf %343, %345 : vector<8x256xf32>
    %347 = vector.extract_strided_slice %334 {offsets = [0, 255], sizes = [8, 256], strides = [1, 1]} : vector<8x512xf32> to vector<8x256xf32>
    %348 = vector.extract_strided_slice %0 {offsets = [3, 0], sizes = [1, 256], strides = [1, 1]} : vector<9x256xf32> to vector<1x256xf32>
    %349 = vector.broadcast %348 : vector<1x256xf32> to vector<8x256xf32>
    %350 = arith.mulf %347, %349 : vector<8x256xf32>
    %351 = vector.extract_strided_slice %334 {offsets = [0, 1], sizes = [8, 256], strides = [1, 1]} : vector<8x512xf32> to vector<8x256xf32>
    %352 = vector.extract_strided_slice %0 {offsets = [5, 0], sizes = [1, 256], strides = [1, 1]} : vector<9x256xf32> to vector<1x256xf32>
    %353 = vector.broadcast %352 : vector<1x256xf32> to vector<8x256xf32>
    %354 = arith.mulf %351, %353 : vector<8x256xf32>
    %355 = vector.extract_strided_slice %334 {offsets = [0, 15], sizes = [8, 256], strides = [1, 1]} : vector<8x512xf32> to vector<8x256xf32>
    %356 = vector.extract_strided_slice %0 {offsets = [6, 0], sizes = [1, 256], strides = [1, 1]} : vector<9x256xf32> to vector<1x256xf32>
    %357 = vector.broadcast %356 : vector<1x256xf32> to vector<8x256xf32>
    %358 = arith.mulf %355, %357 : vector<8x256xf32>
    %359 = vector.extract_strided_slice %334 {offsets = [0, 16], sizes = [8, 256], strides = [1, 1]} : vector<8x512xf32> to vector<8x256xf32>
    %360 = vector.extract_strided_slice %0 {offsets = [7, 0], sizes = [1, 256], strides = [1, 1]} : vector<9x256xf32> to vector<1x256xf32>
    %361 = vector.broadcast %360 : vector<1x256xf32> to vector<8x256xf32>
    %362 = arith.mulf %359, %361 : vector<8x256xf32>
    %363 = vector.extract_strided_slice %334 {offsets = [0, 17], sizes = [8, 256], strides = [1, 1]} : vector<8x512xf32> to vector<8x256xf32>
    %364 = vector.extract_strided_slice %0 {offsets = [8, 0], sizes = [1, 256], strides = [1, 1]} : vector<9x256xf32> to vector<1x256xf32>
    %365 = vector.broadcast %364 : vector<1x256xf32> to vector<8x256xf32>
    %366 = arith.mulf %363, %365 : vector<8x256xf32>
    %367 = tpu.concatenate %338, %342, %346, %350, %333, %354, %358, %362, %366 in 0 : vector<8x256xf32>, vector<8x256xf32>, vector<8x256xf32>, vector<8x256xf32>, vector<8x256xf32>, vector<8x256xf32>, vector<8x256xf32>, vector<8x256xf32>, vector<8x256xf32> -> vector<72x256xf32>
    %368 = arith.truncf %367 : vector<72x256xf32> to vector<72x256xbf16>
    %cst_41 = arith.constant dense<0.000000e+00> : vector<8x256xf32>
    %369 = tpu.matmul %329, %368, %cst_41 {dimension_numbers = #tpu.dot_dimension_numbers<[1], [0], [0], [1], [0, 0, 1, 1], [], []>} : vector<8x72xbf16>, vector<72x256xbf16>, vector<8x256xf32> -> vector<8x256xf32>
    %370 = vector.broadcast %331 : vector<8x1xf32> to vector<8x256xf32>
    %371 = arith.addf %369, %370 : vector<8x256xf32>
    %372 = vector.extract_strided_slice %47 {offsets = [3, 1, 0, 0], sizes = [1, 1, 8, 72], strides = [1, 1, 1, 1]} : vector<4x2x8x72xbf16> to vector<1x1x8x72xbf16>
    %373 = vector.shape_cast %372 : vector<1x1x8x72xbf16> to vector<8x72xbf16>
    %374 = vector.extract_strided_slice %48 {offsets = [3, 1, 0, 0], sizes = [1, 1, 8, 1], strides = [1, 1, 1, 1]} : vector<4x2x8x1xf32> to vector<1x1x8x1xf32>
    %375 = vector.shape_cast %374 : vector<1x1x8x1xf32> to vector<8x1xf32>
    %cst_42 = arith.constant 0.000000e+00 : f32
    %376 = vector.broadcast %cst_42 : f32 to vector<8x256xf32>
    %377 = arith.maximumf %327, %376 : vector<8x256xf32>
    %378 = tpu.concatenate %377, %377 in 1 : vector<8x256xf32>, vector<8x256xf32> -> vector<8x512xf32>
    %379 = vector.extract_strided_slice %378 {offsets = [0, 239], sizes = [8, 256], strides = [1, 1]} : vector<8x512xf32> to vector<8x256xf32>
    %380 = vector.extract_strided_slice %0 {offsets = [0, 0], sizes = [1, 256], strides = [1, 1]} : vector<9x256xf32> to vector<1x256xf32>
    %381 = vector.broadcast %380 : vector<1x256xf32> to vector<8x256xf32>
    %382 = arith.mulf %379, %381 : vector<8x256xf32>
    %383 = vector.extract_strided_slice %378 {offsets = [0, 240], sizes = [8, 256], strides = [1, 1]} : vector<8x512xf32> to vector<8x256xf32>
    %384 = vector.extract_strided_slice %0 {offsets = [1, 0], sizes = [1, 256], strides = [1, 1]} : vector<9x256xf32> to vector<1x256xf32>
    %385 = vector.broadcast %384 : vector<1x256xf32> to vector<8x256xf32>
    %386 = arith.mulf %383, %385 : vector<8x256xf32>
    %387 = vector.extract_strided_slice %378 {offsets = [0, 241], sizes = [8, 256], strides = [1, 1]} : vector<8x512xf32> to vector<8x256xf32>
    %388 = vector.extract_strided_slice %0 {offsets = [2, 0], sizes = [1, 256], strides = [1, 1]} : vector<9x256xf32> to vector<1x256xf32>
    %389 = vector.broadcast %388 : vector<1x256xf32> to vector<8x256xf32>
    %390 = arith.mulf %387, %389 : vector<8x256xf32>
    %391 = vector.extract_strided_slice %378 {offsets = [0, 255], sizes = [8, 256], strides = [1, 1]} : vector<8x512xf32> to vector<8x256xf32>
    %392 = vector.extract_strided_slice %0 {offsets = [3, 0], sizes = [1, 256], strides = [1, 1]} : vector<9x256xf32> to vector<1x256xf32>
    %393 = vector.broadcast %392 : vector<1x256xf32> to vector<8x256xf32>
    %394 = arith.mulf %391, %393 : vector<8x256xf32>
    %395 = vector.extract_strided_slice %378 {offsets = [0, 1], sizes = [8, 256], strides = [1, 1]} : vector<8x512xf32> to vector<8x256xf32>
    %396 = vector.extract_strided_slice %0 {offsets = [5, 0], sizes = [1, 256], strides = [1, 1]} : vector<9x256xf32> to vector<1x256xf32>
    %397 = vector.broadcast %396 : vector<1x256xf32> to vector<8x256xf32>
    %398 = arith.mulf %395, %397 : vector<8x256xf32>
    %399 = vector.extract_strided_slice %378 {offsets = [0, 15], sizes = [8, 256], strides = [1, 1]} : vector<8x512xf32> to vector<8x256xf32>
    %400 = vector.extract_strided_slice %0 {offsets = [6, 0], sizes = [1, 256], strides = [1, 1]} : vector<9x256xf32> to vector<1x256xf32>
    %401 = vector.broadcast %400 : vector<1x256xf32> to vector<8x256xf32>
    %402 = arith.mulf %399, %401 : vector<8x256xf32>
    %403 = vector.extract_strided_slice %378 {offsets = [0, 16], sizes = [8, 256], strides = [1, 1]} : vector<8x512xf32> to vector<8x256xf32>
    %404 = vector.extract_strided_slice %0 {offsets = [7, 0], sizes = [1, 256], strides = [1, 1]} : vector<9x256xf32> to vector<1x256xf32>
    %405 = vector.broadcast %404 : vector<1x256xf32> to vector<8x256xf32>
    %406 = arith.mulf %403, %405 : vector<8x256xf32>
    %407 = vector.extract_strided_slice %378 {offsets = [0, 17], sizes = [8, 256], strides = [1, 1]} : vector<8x512xf32> to vector<8x256xf32>
    %408 = vector.extract_strided_slice %0 {offsets = [8, 0], sizes = [1, 256], strides = [1, 1]} : vector<9x256xf32> to vector<1x256xf32>
    %409 = vector.broadcast %408 : vector<1x256xf32> to vector<8x256xf32>
    %410 = arith.mulf %407, %409 : vector<8x256xf32>
    %411 = tpu.concatenate %382, %386, %390, %394, %377, %398, %402, %406, %410 in 0 : vector<8x256xf32>, vector<8x256xf32>, vector<8x256xf32>, vector<8x256xf32>, vector<8x256xf32>, vector<8x256xf32>, vector<8x256xf32>, vector<8x256xf32>, vector<8x256xf32> -> vector<72x256xf32>
    %412 = arith.truncf %411 : vector<72x256xf32> to vector<72x256xbf16>
    %cst_43 = arith.constant dense<0.000000e+00> : vector<8x256xf32>
    %413 = tpu.matmul %373, %412, %cst_43 {dimension_numbers = #tpu.dot_dimension_numbers<[1], [0], [0], [1], [0, 0, 1, 1], [], []>} : vector<8x72xbf16>, vector<72x256xbf16>, vector<8x256xf32> -> vector<8x256xf32>
    %414 = vector.broadcast %375 : vector<8x1xf32> to vector<8x256xf32>
    %415 = arith.addf %413, %414 : vector<8x256xf32>
    %416 = arith.addf %371, %415 : vector<8x256xf32>
    %417 = tpu.concatenate %149, %238, %327, %416 in 0 : vector<8x256xf32>, vector<8x256xf32>, vector<8x256xf32>, vector<8x256xf32> -> vector<32x256xf32>
    %c0_44 = arith.constant 0 : index
    %c0_45 = arith.constant 0 : index
    %418 = vector.load %arg11[%c0_44, %c0_45] : memref<8x8xbf16, #tpu.memory_space<vmem>>, vector<8x8xbf16>
    %c0_46 = arith.constant 0 : index
    %c0_47 = arith.constant 0 : index
    %419 = vector.load %arg12[%c0_46, %c0_47] : memref<8x1xf32, #tpu.memory_space<vmem>>, vector<8x1xf32>
    %c0_48 = arith.constant 0 : index
    %c0_49 = arith.constant 0 : index
    %420 = vector.load %arg13[%c0_48, %c0_49] : memref<8x32xbf16, #tpu.memory_space<vmem>>, vector<8x32xbf16>
    %c0_50 = arith.constant 0 : index
    %c0_51 = arith.constant 0 : index
    %421 = vector.load %arg14[%c0_50, %c0_51] : memref<8x1xf32, #tpu.memory_space<vmem>>, vector<8x1xf32>
    %c0_52 = arith.constant 0 : index
    %c0_53 = arith.constant 0 : index
    %c0_54 = arith.constant 0 : index
    %c0_55 = arith.constant 0 : index
    %422 = vector.load %arg15[%c0_52, %c0_53, %c0_54, %c0_55] : memref<4x2x8x72xbf16, #tpu.memory_space<vmem>>, vector<4x2x8x72xbf16>
    %c0_56 = arith.constant 0 : index
    %c0_57 = arith.constant 0 : index
    %c0_58 = arith.constant 0 : index
    %c0_59 = arith.constant 0 : index
    %423 = vector.load %arg16[%c0_56, %c0_57, %c0_58, %c0_59] : memref<4x2x8x1xf32, #tpu.memory_space<vmem>>, vector<4x2x8x1xf32>
    %cst_60 = arith.constant 0.000000e+00 : f32
    %424 = vector.broadcast %cst_60 : f32 to vector<8x256xf32>
    %425 = arith.maximumf %42, %424 : vector<8x256xf32>
    %426 = arith.truncf %425 : vector<8x256xf32> to vector<8x256xbf16>
    %cst_61 = arith.constant dense<0.000000e+00> : vector<8x256xf32>
    %427 = tpu.matmul %418, %426, %cst_61 {dimension_numbers = #tpu.dot_dimension_numbers<[1], [0], [0], [1], [0, 0, 1, 1], [], []>} : vector<8x8xbf16>, vector<8x256xbf16>, vector<8x256xf32> -> vector<8x256xf32>
    %428 = vector.broadcast %419 : vector<8x1xf32> to vector<8x256xf32>
    %429 = arith.addf %427, %428 : vector<8x256xf32>
    %cst_62 = arith.constant 0.000000e+00 : f32
    %430 = vector.broadcast %cst_62 : f32 to vector<32x256xf32>
    %431 = arith.maximumf %417, %430 : vector<32x256xf32>
    %432 = arith.truncf %431 : vector<32x256xf32> to vector<32x256xbf16>
    %cst_63 = arith.constant dense<0.000000e+00> : vector<8x256xf32>
    %433 = tpu.matmul %420, %432, %cst_63 {dimension_numbers = #tpu.dot_dimension_numbers<[1], [0], [0], [1], [0, 0, 1, 1], [], []>} : vector<8x32xbf16>, vector<32x256xbf16>, vector<8x256xf32> -> vector<8x256xf32>
    %434 = vector.broadcast %421 : vector<8x1xf32> to vector<8x256xf32>
    %435 = arith.addf %433, %434 : vector<8x256xf32>
    %436 = vector.extract_strided_slice %422 {offsets = [0, 0, 0, 0], sizes = [1, 1, 8, 72], strides = [1, 1, 1, 1]} : vector<4x2x8x72xbf16> to vector<1x1x8x72xbf16>
    %437 = vector.shape_cast %436 : vector<1x1x8x72xbf16> to vector<8x72xbf16>
    %438 = vector.extract_strided_slice %423 {offsets = [0, 0, 0, 0], sizes = [1, 1, 8, 1], strides = [1, 1, 1, 1]} : vector<4x2x8x1xf32> to vector<1x1x8x1xf32>
    %439 = vector.shape_cast %438 : vector<1x1x8x1xf32> to vector<8x1xf32>
    %cst_64 = arith.constant 0.000000e+00 : f32
    %440 = vector.broadcast %cst_64 : f32 to vector<8x256xf32>
    %441 = arith.maximumf %429, %440 : vector<8x256xf32>
    %442 = tpu.concatenate %441, %441 in 1 : vector<8x256xf32>, vector<8x256xf32> -> vector<8x512xf32>
    %443 = vector.extract_strided_slice %442 {offsets = [0, 239], sizes = [8, 256], strides = [1, 1]} : vector<8x512xf32> to vector<8x256xf32>
    %444 = vector.extract_strided_slice %0 {offsets = [0, 0], sizes = [1, 256], strides = [1, 1]} : vector<9x256xf32> to vector<1x256xf32>
    %445 = vector.broadcast %444 : vector<1x256xf32> to vector<8x256xf32>
    %446 = arith.mulf %443, %445 : vector<8x256xf32>
    %447 = vector.extract_strided_slice %442 {offsets = [0, 240], sizes = [8, 256], strides = [1, 1]} : vector<8x512xf32> to vector<8x256xf32>
    %448 = vector.extract_strided_slice %0 {offsets = [1, 0], sizes = [1, 256], strides = [1, 1]} : vector<9x256xf32> to vector<1x256xf32>
    %449 = vector.broadcast %448 : vector<1x256xf32> to vector<8x256xf32>
    %450 = arith.mulf %447, %449 : vector<8x256xf32>
    %451 = vector.extract_strided_slice %442 {offsets = [0, 241], sizes = [8, 256], strides = [1, 1]} : vector<8x512xf32> to vector<8x256xf32>
    %452 = vector.extract_strided_slice %0 {offsets = [2, 0], sizes = [1, 256], strides = [1, 1]} : vector<9x256xf32> to vector<1x256xf32>
    %453 = vector.broadcast %452 : vector<1x256xf32> to vector<8x256xf32>
    %454 = arith.mulf %451, %453 : vector<8x256xf32>
    %455 = vector.extract_strided_slice %442 {offsets = [0, 255], sizes = [8, 256], strides = [1, 1]} : vector<8x512xf32> to vector<8x256xf32>
    %456 = vector.extract_strided_slice %0 {offsets = [3, 0], sizes = [1, 256], strides = [1, 1]} : vector<9x256xf32> to vector<1x256xf32>
    %457 = vector.broadcast %456 : vector<1x256xf32> to vector<8x256xf32>
    %458 = arith.mulf %455, %457 : vector<8x256xf32>
    %459 = vector.extract_strided_slice %442 {offsets = [0, 1], sizes = [8, 256], strides = [1, 1]} : vector<8x512xf32> to vector<8x256xf32>
    %460 = vector.extract_strided_slice %0 {offsets = [5, 0], sizes = [1, 256], strides = [1, 1]} : vector<9x256xf32> to vector<1x256xf32>
    %461 = vector.broadcast %460 : vector<1x256xf32> to vector<8x256xf32>
    %462 = arith.mulf %459, %461 : vector<8x256xf32>
    %463 = vector.extract_strided_slice %442 {offsets = [0, 15], sizes = [8, 256], strides = [1, 1]} : vector<8x512xf32> to vector<8x256xf32>
    %464 = vector.extract_strided_slice %0 {offsets = [6, 0], sizes = [1, 256], strides = [1, 1]} : vector<9x256xf32> to vector<1x256xf32>
    %465 = vector.broadcast %464 : vector<1x256xf32> to vector<8x256xf32>
    %466 = arith.mulf %463, %465 : vector<8x256xf32>
    %467 = vector.extract_strided_slice %442 {offsets = [0, 16], sizes = [8, 256], strides = [1, 1]} : vector<8x512xf32> to vector<8x256xf32>
    %468 = vector.extract_strided_slice %0 {offsets = [7, 0], sizes = [1, 256], strides = [1, 1]} : vector<9x256xf32> to vector<1x256xf32>
    %469 = vector.broadcast %468 : vector<1x256xf32> to vector<8x256xf32>
    %470 = arith.mulf %467, %469 : vector<8x256xf32>
    %471 = vector.extract_strided_slice %442 {offsets = [0, 17], sizes = [8, 256], strides = [1, 1]} : vector<8x512xf32> to vector<8x256xf32>
    %472 = vector.extract_strided_slice %0 {offsets = [8, 0], sizes = [1, 256], strides = [1, 1]} : vector<9x256xf32> to vector<1x256xf32>
    %473 = vector.broadcast %472 : vector<1x256xf32> to vector<8x256xf32>
    %474 = arith.mulf %471, %473 : vector<8x256xf32>
    %475 = tpu.concatenate %446, %450, %454, %458, %441, %462, %466, %470, %474 in 0 : vector<8x256xf32>, vector<8x256xf32>, vector<8x256xf32>, vector<8x256xf32>, vector<8x256xf32>, vector<8x256xf32>, vector<8x256xf32>, vector<8x256xf32>, vector<8x256xf32> -> vector<72x256xf32>
    %476 = arith.truncf %475 : vector<72x256xf32> to vector<72x256xbf16>
    %cst_65 = arith.constant dense<0.000000e+00> : vector<8x256xf32>
    %477 = tpu.matmul %437, %476, %cst_65 {dimension_numbers = #tpu.dot_dimension_numbers<[1], [0], [0], [1], [0, 0, 1, 1], [], []>} : vector<8x72xbf16>, vector<72x256xbf16>, vector<8x256xf32> -> vector<8x256xf32>
    %478 = vector.broadcast %439 : vector<8x1xf32> to vector<8x256xf32>
    %479 = arith.addf %477, %478 : vector<8x256xf32>
    %480 = vector.extract_strided_slice %422 {offsets = [0, 1, 0, 0], sizes = [1, 1, 8, 72], strides = [1, 1, 1, 1]} : vector<4x2x8x72xbf16> to vector<1x1x8x72xbf16>
    %481 = vector.shape_cast %480 : vector<1x1x8x72xbf16> to vector<8x72xbf16>
    %482 = vector.extract_strided_slice %423 {offsets = [0, 1, 0, 0], sizes = [1, 1, 8, 1], strides = [1, 1, 1, 1]} : vector<4x2x8x1xf32> to vector<1x1x8x1xf32>
    %483 = vector.shape_cast %482 : vector<1x1x8x1xf32> to vector<8x1xf32>
    %cst_66 = arith.constant 0.000000e+00 : f32
    %484 = vector.broadcast %cst_66 : f32 to vector<8x256xf32>
    %485 = arith.maximumf %435, %484 : vector<8x256xf32>
    %486 = tpu.concatenate %485, %485 in 1 : vector<8x256xf32>, vector<8x256xf32> -> vector<8x512xf32>
    %487 = vector.extract_strided_slice %486 {offsets = [0, 239], sizes = [8, 256], strides = [1, 1]} : vector<8x512xf32> to vector<8x256xf32>
    %488 = vector.extract_strided_slice %0 {offsets = [0, 0], sizes = [1, 256], strides = [1, 1]} : vector<9x256xf32> to vector<1x256xf32>
    %489 = vector.broadcast %488 : vector<1x256xf32> to vector<8x256xf32>
    %490 = arith.mulf %487, %489 : vector<8x256xf32>
    %491 = vector.extract_strided_slice %486 {offsets = [0, 240], sizes = [8, 256], strides = [1, 1]} : vector<8x512xf32> to vector<8x256xf32>
    %492 = vector.extract_strided_slice %0 {offsets = [1, 0], sizes = [1, 256], strides = [1, 1]} : vector<9x256xf32> to vector<1x256xf32>
    %493 = vector.broadcast %492 : vector<1x256xf32> to vector<8x256xf32>
    %494 = arith.mulf %491, %493 : vector<8x256xf32>
    %495 = vector.extract_strided_slice %486 {offsets = [0, 241], sizes = [8, 256], strides = [1, 1]} : vector<8x512xf32> to vector<8x256xf32>
    %496 = vector.extract_strided_slice %0 {offsets = [2, 0], sizes = [1, 256], strides = [1, 1]} : vector<9x256xf32> to vector<1x256xf32>
    %497 = vector.broadcast %496 : vector<1x256xf32> to vector<8x256xf32>
    %498 = arith.mulf %495, %497 : vector<8x256xf32>
    %499 = vector.extract_strided_slice %486 {offsets = [0, 255], sizes = [8, 256], strides = [1, 1]} : vector<8x512xf32> to vector<8x256xf32>
    %500 = vector.extract_strided_slice %0 {offsets = [3, 0], sizes = [1, 256], strides = [1, 1]} : vector<9x256xf32> to vector<1x256xf32>
    %501 = vector.broadcast %500 : vector<1x256xf32> to vector<8x256xf32>
    %502 = arith.mulf %499, %501 : vector<8x256xf32>
    %503 = vector.extract_strided_slice %486 {offsets = [0, 1], sizes = [8, 256], strides = [1, 1]} : vector<8x512xf32> to vector<8x256xf32>
    %504 = vector.extract_strided_slice %0 {offsets = [5, 0], sizes = [1, 256], strides = [1, 1]} : vector<9x256xf32> to vector<1x256xf32>
    %505 = vector.broadcast %504 : vector<1x256xf32> to vector<8x256xf32>
    %506 = arith.mulf %503, %505 : vector<8x256xf32>
    %507 = vector.extract_strided_slice %486 {offsets = [0, 15], sizes = [8, 256], strides = [1, 1]} : vector<8x512xf32> to vector<8x256xf32>
    %508 = vector.extract_strided_slice %0 {offsets = [6, 0], sizes = [1, 256], strides = [1, 1]} : vector<9x256xf32> to vector<1x256xf32>
    %509 = vector.broadcast %508 : vector<1x256xf32> to vector<8x256xf32>
    %510 = arith.mulf %507, %509 : vector<8x256xf32>
    %511 = vector.extract_strided_slice %486 {offsets = [0, 16], sizes = [8, 256], strides = [1, 1]} : vector<8x512xf32> to vector<8x256xf32>
    %512 = vector.extract_strided_slice %0 {offsets = [7, 0], sizes = [1, 256], strides = [1, 1]} : vector<9x256xf32> to vector<1x256xf32>
    %513 = vector.broadcast %512 : vector<1x256xf32> to vector<8x256xf32>
    %514 = arith.mulf %511, %513 : vector<8x256xf32>
    %515 = vector.extract_strided_slice %486 {offsets = [0, 17], sizes = [8, 256], strides = [1, 1]} : vector<8x512xf32> to vector<8x256xf32>
    %516 = vector.extract_strided_slice %0 {offsets = [8, 0], sizes = [1, 256], strides = [1, 1]} : vector<9x256xf32> to vector<1x256xf32>
    %517 = vector.broadcast %516 : vector<1x256xf32> to vector<8x256xf32>
    %518 = arith.mulf %515, %517 : vector<8x256xf32>
    %519 = tpu.concatenate %490, %494, %498, %502, %485, %506, %510, %514, %518 in 0 : vector<8x256xf32>, vector<8x256xf32>, vector<8x256xf32>, vector<8x256xf32>, vector<8x256xf32>, vector<8x256xf32>, vector<8x256xf32>, vector<8x256xf32>, vector<8x256xf32> -> vector<72x256xf32>
    %520 = arith.truncf %519 : vector<72x256xf32> to vector<72x256xbf16>
    %cst_67 = arith.constant dense<0.000000e+00> : vector<8x256xf32>
    %521 = tpu.matmul %481, %520, %cst_67 {dimension_numbers = #tpu.dot_dimension_numbers<[1], [0], [0], [1], [0, 0, 1, 1], [], []>} : vector<8x72xbf16>, vector<72x256xbf16>, vector<8x256xf32> -> vector<8x256xf32>
    %522 = vector.broadcast %483 : vector<8x1xf32> to vector<8x256xf32>
    %523 = arith.addf %521, %522 : vector<8x256xf32>
    %524 = arith.addf %479, %523 : vector<8x256xf32>
    %525 = vector.extract_strided_slice %422 {offsets = [1, 0, 0, 0], sizes = [1, 1, 8, 72], strides = [1, 1, 1, 1]} : vector<4x2x8x72xbf16> to vector<1x1x8x72xbf16>
    %526 = vector.shape_cast %525 : vector<1x1x8x72xbf16> to vector<8x72xbf16>
    %527 = vector.extract_strided_slice %423 {offsets = [1, 0, 0, 0], sizes = [1, 1, 8, 1], strides = [1, 1, 1, 1]} : vector<4x2x8x1xf32> to vector<1x1x8x1xf32>
    %528 = vector.shape_cast %527 : vector<1x1x8x1xf32> to vector<8x1xf32>
    %cst_68 = arith.constant 0.000000e+00 : f32
    %529 = vector.broadcast %cst_68 : f32 to vector<8x256xf32>
    %530 = arith.maximumf %435, %529 : vector<8x256xf32>
    %531 = tpu.concatenate %530, %530 in 1 : vector<8x256xf32>, vector<8x256xf32> -> vector<8x512xf32>
    %532 = vector.extract_strided_slice %531 {offsets = [0, 239], sizes = [8, 256], strides = [1, 1]} : vector<8x512xf32> to vector<8x256xf32>
    %533 = vector.extract_strided_slice %0 {offsets = [0, 0], sizes = [1, 256], strides = [1, 1]} : vector<9x256xf32> to vector<1x256xf32>
    %534 = vector.broadcast %533 : vector<1x256xf32> to vector<8x256xf32>
    %535 = arith.mulf %532, %534 : vector<8x256xf32>
    %536 = vector.extract_strided_slice %531 {offsets = [0, 240], sizes = [8, 256], strides = [1, 1]} : vector<8x512xf32> to vector<8x256xf32>
    %537 = vector.extract_strided_slice %0 {offsets = [1, 0], sizes = [1, 256], strides = [1, 1]} : vector<9x256xf32> to vector<1x256xf32>
    %538 = vector.broadcast %537 : vector<1x256xf32> to vector<8x256xf32>
    %539 = arith.mulf %536, %538 : vector<8x256xf32>
    %540 = vector.extract_strided_slice %531 {offsets = [0, 241], sizes = [8, 256], strides = [1, 1]} : vector<8x512xf32> to vector<8x256xf32>
    %541 = vector.extract_strided_slice %0 {offsets = [2, 0], sizes = [1, 256], strides = [1, 1]} : vector<9x256xf32> to vector<1x256xf32>
    %542 = vector.broadcast %541 : vector<1x256xf32> to vector<8x256xf32>
    %543 = arith.mulf %540, %542 : vector<8x256xf32>
    %544 = vector.extract_strided_slice %531 {offsets = [0, 255], sizes = [8, 256], strides = [1, 1]} : vector<8x512xf32> to vector<8x256xf32>
    %545 = vector.extract_strided_slice %0 {offsets = [3, 0], sizes = [1, 256], strides = [1, 1]} : vector<9x256xf32> to vector<1x256xf32>
    %546 = vector.broadcast %545 : vector<1x256xf32> to vector<8x256xf32>
    %547 = arith.mulf %544, %546 : vector<8x256xf32>
    %548 = vector.extract_strided_slice %531 {offsets = [0, 1], sizes = [8, 256], strides = [1, 1]} : vector<8x512xf32> to vector<8x256xf32>
    %549 = vector.extract_strided_slice %0 {offsets = [5, 0], sizes = [1, 256], strides = [1, 1]} : vector<9x256xf32> to vector<1x256xf32>
    %550 = vector.broadcast %549 : vector<1x256xf32> to vector<8x256xf32>
    %551 = arith.mulf %548, %550 : vector<8x256xf32>
    %552 = vector.extract_strided_slice %531 {offsets = [0, 15], sizes = [8, 256], strides = [1, 1]} : vector<8x512xf32> to vector<8x256xf32>
    %553 = vector.extract_strided_slice %0 {offsets = [6, 0], sizes = [1, 256], strides = [1, 1]} : vector<9x256xf32> to vector<1x256xf32>
    %554 = vector.broadcast %553 : vector<1x256xf32> to vector<8x256xf32>
    %555 = arith.mulf %552, %554 : vector<8x256xf32>
    %556 = vector.extract_strided_slice %531 {offsets = [0, 16], sizes = [8, 256], strides = [1, 1]} : vector<8x512xf32> to vector<8x256xf32>
    %557 = vector.extract_strided_slice %0 {offsets = [7, 0], sizes = [1, 256], strides = [1, 1]} : vector<9x256xf32> to vector<1x256xf32>
    %558 = vector.broadcast %557 : vector<1x256xf32> to vector<8x256xf32>
    %559 = arith.mulf %556, %558 : vector<8x256xf32>
    %560 = vector.extract_strided_slice %531 {offsets = [0, 17], sizes = [8, 256], strides = [1, 1]} : vector<8x512xf32> to vector<8x256xf32>
    %561 = vector.extract_strided_slice %0 {offsets = [8, 0], sizes = [1, 256], strides = [1, 1]} : vector<9x256xf32> to vector<1x256xf32>
    %562 = vector.broadcast %561 : vector<1x256xf32> to vector<8x256xf32>
    %563 = arith.mulf %560, %562 : vector<8x256xf32>
    %564 = tpu.concatenate %535, %539, %543, %547, %530, %551, %555, %559, %563 in 0 : vector<8x256xf32>, vector<8x256xf32>, vector<8x256xf32>, vector<8x256xf32>, vector<8x256xf32>, vector<8x256xf32>, vector<8x256xf32>, vector<8x256xf32>, vector<8x256xf32> -> vector<72x256xf32>
    %565 = arith.truncf %564 : vector<72x256xf32> to vector<72x256xbf16>
    %cst_69 = arith.constant dense<0.000000e+00> : vector<8x256xf32>
    %566 = tpu.matmul %526, %565, %cst_69 {dimension_numbers = #tpu.dot_dimension_numbers<[1], [0], [0], [1], [0, 0, 1, 1], [], []>} : vector<8x72xbf16>, vector<72x256xbf16>, vector<8x256xf32> -> vector<8x256xf32>
    %567 = vector.broadcast %528 : vector<8x1xf32> to vector<8x256xf32>
    %568 = arith.addf %566, %567 : vector<8x256xf32>
    %569 = vector.extract_strided_slice %422 {offsets = [1, 1, 0, 0], sizes = [1, 1, 8, 72], strides = [1, 1, 1, 1]} : vector<4x2x8x72xbf16> to vector<1x1x8x72xbf16>
    %570 = vector.shape_cast %569 : vector<1x1x8x72xbf16> to vector<8x72xbf16>
    %571 = vector.extract_strided_slice %423 {offsets = [1, 1, 0, 0], sizes = [1, 1, 8, 1], strides = [1, 1, 1, 1]} : vector<4x2x8x1xf32> to vector<1x1x8x1xf32>
    %572 = vector.shape_cast %571 : vector<1x1x8x1xf32> to vector<8x1xf32>
    %cst_70 = arith.constant 0.000000e+00 : f32
    %573 = vector.broadcast %cst_70 : f32 to vector<8x256xf32>
    %574 = arith.maximumf %524, %573 : vector<8x256xf32>
    %575 = tpu.concatenate %574, %574 in 1 : vector<8x256xf32>, vector<8x256xf32> -> vector<8x512xf32>
    %576 = vector.extract_strided_slice %575 {offsets = [0, 239], sizes = [8, 256], strides = [1, 1]} : vector<8x512xf32> to vector<8x256xf32>
    %577 = vector.extract_strided_slice %0 {offsets = [0, 0], sizes = [1, 256], strides = [1, 1]} : vector<9x256xf32> to vector<1x256xf32>
    %578 = vector.broadcast %577 : vector<1x256xf32> to vector<8x256xf32>
    %579 = arith.mulf %576, %578 : vector<8x256xf32>
    %580 = vector.extract_strided_slice %575 {offsets = [0, 240], sizes = [8, 256], strides = [1, 1]} : vector<8x512xf32> to vector<8x256xf32>
    %581 = vector.extract_strided_slice %0 {offsets = [1, 0], sizes = [1, 256], strides = [1, 1]} : vector<9x256xf32> to vector<1x256xf32>
    %582 = vector.broadcast %581 : vector<1x256xf32> to vector<8x256xf32>
    %583 = arith.mulf %580, %582 : vector<8x256xf32>
    %584 = vector.extract_strided_slice %575 {offsets = [0, 241], sizes = [8, 256], strides = [1, 1]} : vector<8x512xf32> to vector<8x256xf32>
    %585 = vector.extract_strided_slice %0 {offsets = [2, 0], sizes = [1, 256], strides = [1, 1]} : vector<9x256xf32> to vector<1x256xf32>
    %586 = vector.broadcast %585 : vector<1x256xf32> to vector<8x256xf32>
    %587 = arith.mulf %584, %586 : vector<8x256xf32>
    %588 = vector.extract_strided_slice %575 {offsets = [0, 255], sizes = [8, 256], strides = [1, 1]} : vector<8x512xf32> to vector<8x256xf32>
    %589 = vector.extract_strided_slice %0 {offsets = [3, 0], sizes = [1, 256], strides = [1, 1]} : vector<9x256xf32> to vector<1x256xf32>
    %590 = vector.broadcast %589 : vector<1x256xf32> to vector<8x256xf32>
    %591 = arith.mulf %588, %590 : vector<8x256xf32>
    %592 = vector.extract_strided_slice %575 {offsets = [0, 1], sizes = [8, 256], strides = [1, 1]} : vector<8x512xf32> to vector<8x256xf32>
    %593 = vector.extract_strided_slice %0 {offsets = [5, 0], sizes = [1, 256], strides = [1, 1]} : vector<9x256xf32> to vector<1x256xf32>
    %594 = vector.broadcast %593 : vector<1x256xf32> to vector<8x256xf32>
    %595 = arith.mulf %592, %594 : vector<8x256xf32>
    %596 = vector.extract_strided_slice %575 {offsets = [0, 15], sizes = [8, 256], strides = [1, 1]} : vector<8x512xf32> to vector<8x256xf32>
    %597 = vector.extract_strided_slice %0 {offsets = [6, 0], sizes = [1, 256], strides = [1, 1]} : vector<9x256xf32> to vector<1x256xf32>
    %598 = vector.broadcast %597 : vector<1x256xf32> to vector<8x256xf32>
    %599 = arith.mulf %596, %598 : vector<8x256xf32>
    %600 = vector.extract_strided_slice %575 {offsets = [0, 16], sizes = [8, 256], strides = [1, 1]} : vector<8x512xf32> to vector<8x256xf32>
    %601 = vector.extract_strided_slice %0 {offsets = [7, 0], sizes = [1, 256], strides = [1, 1]} : vector<9x256xf32> to vector<1x256xf32>
    %602 = vector.broadcast %601 : vector<1x256xf32> to vector<8x256xf32>
    %603 = arith.mulf %600, %602 : vector<8x256xf32>
    %604 = vector.extract_strided_slice %575 {offsets = [0, 17], sizes = [8, 256], strides = [1, 1]} : vector<8x512xf32> to vector<8x256xf32>
    %605 = vector.extract_strided_slice %0 {offsets = [8, 0], sizes = [1, 256], strides = [1, 1]} : vector<9x256xf32> to vector<1x256xf32>
    %606 = vector.broadcast %605 : vector<1x256xf32> to vector<8x256xf32>
    %607 = arith.mulf %604, %606 : vector<8x256xf32>
    %608 = tpu.concatenate %579, %583, %587, %591, %574, %595, %599, %603, %607 in 0 : vector<8x256xf32>, vector<8x256xf32>, vector<8x256xf32>, vector<8x256xf32>, vector<8x256xf32>, vector<8x256xf32>, vector<8x256xf32>, vector<8x256xf32>, vector<8x256xf32> -> vector<72x256xf32>
    %609 = arith.truncf %608 : vector<72x256xf32> to vector<72x256xbf16>
    %cst_71 = arith.constant dense<0.000000e+00> : vector<8x256xf32>
    %610 = tpu.matmul %570, %609, %cst_71 {dimension_numbers = #tpu.dot_dimension_numbers<[1], [0], [0], [1], [0, 0, 1, 1], [], []>} : vector<8x72xbf16>, vector<72x256xbf16>, vector<8x256xf32> -> vector<8x256xf32>
    %611 = vector.broadcast %572 : vector<8x1xf32> to vector<8x256xf32>
    %612 = arith.addf %610, %611 : vector<8x256xf32>
    %613 = arith.addf %568, %612 : vector<8x256xf32>
    %614 = vector.extract_strided_slice %422 {offsets = [2, 0, 0, 0], sizes = [1, 1, 8, 72], strides = [1, 1, 1, 1]} : vector<4x2x8x72xbf16> to vector<1x1x8x72xbf16>
    %615 = vector.shape_cast %614 : vector<1x1x8x72xbf16> to vector<8x72xbf16>
    %616 = vector.extract_strided_slice %423 {offsets = [2, 0, 0, 0], sizes = [1, 1, 8, 1], strides = [1, 1, 1, 1]} : vector<4x2x8x1xf32> to vector<1x1x8x1xf32>
    %617 = vector.shape_cast %616 : vector<1x1x8x1xf32> to vector<8x1xf32>
    %cst_72 = arith.constant 0.000000e+00 : f32
    %618 = vector.broadcast %cst_72 : f32 to vector<8x256xf32>
    %619 = arith.maximumf %524, %618 : vector<8x256xf32>
    %620 = tpu.concatenate %619, %619 in 1 : vector<8x256xf32>, vector<8x256xf32> -> vector<8x512xf32>
    %621 = vector.extract_strided_slice %620 {offsets = [0, 239], sizes = [8, 256], strides = [1, 1]} : vector<8x512xf32> to vector<8x256xf32>
    %622 = vector.extract_strided_slice %0 {offsets = [0, 0], sizes = [1, 256], strides = [1, 1]} : vector<9x256xf32> to vector<1x256xf32>
    %623 = vector.broadcast %622 : vector<1x256xf32> to vector<8x256xf32>
    %624 = arith.mulf %621, %623 : vector<8x256xf32>
    %625 = vector.extract_strided_slice %620 {offsets = [0, 240], sizes = [8, 256], strides = [1, 1]} : vector<8x512xf32> to vector<8x256xf32>
    %626 = vector.extract_strided_slice %0 {offsets = [1, 0], sizes = [1, 256], strides = [1, 1]} : vector<9x256xf32> to vector<1x256xf32>
    %627 = vector.broadcast %626 : vector<1x256xf32> to vector<8x256xf32>
    %628 = arith.mulf %625, %627 : vector<8x256xf32>
    %629 = vector.extract_strided_slice %620 {offsets = [0, 241], sizes = [8, 256], strides = [1, 1]} : vector<8x512xf32> to vector<8x256xf32>
    %630 = vector.extract_strided_slice %0 {offsets = [2, 0], sizes = [1, 256], strides = [1, 1]} : vector<9x256xf32> to vector<1x256xf32>
    %631 = vector.broadcast %630 : vector<1x256xf32> to vector<8x256xf32>
    %632 = arith.mulf %629, %631 : vector<8x256xf32>
    %633 = vector.extract_strided_slice %620 {offsets = [0, 255], sizes = [8, 256], strides = [1, 1]} : vector<8x512xf32> to vector<8x256xf32>
    %634 = vector.extract_strided_slice %0 {offsets = [3, 0], sizes = [1, 256], strides = [1, 1]} : vector<9x256xf32> to vector<1x256xf32>
    %635 = vector.broadcast %634 : vector<1x256xf32> to vector<8x256xf32>
    %636 = arith.mulf %633, %635 : vector<8x256xf32>
    %637 = vector.extract_strided_slice %620 {offsets = [0, 1], sizes = [8, 256], strides = [1, 1]} : vector<8x512xf32> to vector<8x256xf32>
    %638 = vector.extract_strided_slice %0 {offsets = [5, 0], sizes = [1, 256], strides = [1, 1]} : vector<9x256xf32> to vector<1x256xf32>
    %639 = vector.broadcast %638 : vector<1x256xf32> to vector<8x256xf32>
    %640 = arith.mulf %637, %639 : vector<8x256xf32>
    %641 = vector.extract_strided_slice %620 {offsets = [0, 15], sizes = [8, 256], strides = [1, 1]} : vector<8x512xf32> to vector<8x256xf32>
    %642 = vector.extract_strided_slice %0 {offsets = [6, 0], sizes = [1, 256], strides = [1, 1]} : vector<9x256xf32> to vector<1x256xf32>
    %643 = vector.broadcast %642 : vector<1x256xf32> to vector<8x256xf32>
    %644 = arith.mulf %641, %643 : vector<8x256xf32>
    %645 = vector.extract_strided_slice %620 {offsets = [0, 16], sizes = [8, 256], strides = [1, 1]} : vector<8x512xf32> to vector<8x256xf32>
    %646 = vector.extract_strided_slice %0 {offsets = [7, 0], sizes = [1, 256], strides = [1, 1]} : vector<9x256xf32> to vector<1x256xf32>
    %647 = vector.broadcast %646 : vector<1x256xf32> to vector<8x256xf32>
    %648 = arith.mulf %645, %647 : vector<8x256xf32>
    %649 = vector.extract_strided_slice %620 {offsets = [0, 17], sizes = [8, 256], strides = [1, 1]} : vector<8x512xf32> to vector<8x256xf32>
    %650 = vector.extract_strided_slice %0 {offsets = [8, 0], sizes = [1, 256], strides = [1, 1]} : vector<9x256xf32> to vector<1x256xf32>
    %651 = vector.broadcast %650 : vector<1x256xf32> to vector<8x256xf32>
    %652 = arith.mulf %649, %651 : vector<8x256xf32>
    %653 = tpu.concatenate %624, %628, %632, %636, %619, %640, %644, %648, %652 in 0 : vector<8x256xf32>, vector<8x256xf32>, vector<8x256xf32>, vector<8x256xf32>, vector<8x256xf32>, vector<8x256xf32>, vector<8x256xf32>, vector<8x256xf32>, vector<8x256xf32> -> vector<72x256xf32>
    %654 = arith.truncf %653 : vector<72x256xf32> to vector<72x256xbf16>
    %cst_73 = arith.constant dense<0.000000e+00> : vector<8x256xf32>
    %655 = tpu.matmul %615, %654, %cst_73 {dimension_numbers = #tpu.dot_dimension_numbers<[1], [0], [0], [1], [0, 0, 1, 1], [], []>} : vector<8x72xbf16>, vector<72x256xbf16>, vector<8x256xf32> -> vector<8x256xf32>
    %656 = vector.broadcast %617 : vector<8x1xf32> to vector<8x256xf32>
    %657 = arith.addf %655, %656 : vector<8x256xf32>
    %658 = vector.extract_strided_slice %422 {offsets = [2, 1, 0, 0], sizes = [1, 1, 8, 72], strides = [1, 1, 1, 1]} : vector<4x2x8x72xbf16> to vector<1x1x8x72xbf16>
    %659 = vector.shape_cast %658 : vector<1x1x8x72xbf16> to vector<8x72xbf16>
    %660 = vector.extract_strided_slice %423 {offsets = [2, 1, 0, 0], sizes = [1, 1, 8, 1], strides = [1, 1, 1, 1]} : vector<4x2x8x1xf32> to vector<1x1x8x1xf32>
    %661 = vector.shape_cast %660 : vector<1x1x8x1xf32> to vector<8x1xf32>
    %cst_74 = arith.constant 0.000000e+00 : f32
    %662 = vector.broadcast %cst_74 : f32 to vector<8x256xf32>
    %663 = arith.maximumf %613, %662 : vector<8x256xf32>
    %664 = tpu.concatenate %663, %663 in 1 : vector<8x256xf32>, vector<8x256xf32> -> vector<8x512xf32>
    %665 = vector.extract_strided_slice %664 {offsets = [0, 239], sizes = [8, 256], strides = [1, 1]} : vector<8x512xf32> to vector<8x256xf32>
    %666 = vector.extract_strided_slice %0 {offsets = [0, 0], sizes = [1, 256], strides = [1, 1]} : vector<9x256xf32> to vector<1x256xf32>
    %667 = vector.broadcast %666 : vector<1x256xf32> to vector<8x256xf32>
    %668 = arith.mulf %665, %667 : vector<8x256xf32>
    %669 = vector.extract_strided_slice %664 {offsets = [0, 240], sizes = [8, 256], strides = [1, 1]} : vector<8x512xf32> to vector<8x256xf32>
    %670 = vector.extract_strided_slice %0 {offsets = [1, 0], sizes = [1, 256], strides = [1, 1]} : vector<9x256xf32> to vector<1x256xf32>
    %671 = vector.broadcast %670 : vector<1x256xf32> to vector<8x256xf32>
    %672 = arith.mulf %669, %671 : vector<8x256xf32>
    %673 = vector.extract_strided_slice %664 {offsets = [0, 241], sizes = [8, 256], strides = [1, 1]} : vector<8x512xf32> to vector<8x256xf32>
    %674 = vector.extract_strided_slice %0 {offsets = [2, 0], sizes = [1, 256], strides = [1, 1]} : vector<9x256xf32> to vector<1x256xf32>
    %675 = vector.broadcast %674 : vector<1x256xf32> to vector<8x256xf32>
    %676 = arith.mulf %673, %675 : vector<8x256xf32>
    %677 = vector.extract_strided_slice %664 {offsets = [0, 255], sizes = [8, 256], strides = [1, 1]} : vector<8x512xf32> to vector<8x256xf32>
    %678 = vector.extract_strided_slice %0 {offsets = [3, 0], sizes = [1, 256], strides = [1, 1]} : vector<9x256xf32> to vector<1x256xf32>
    %679 = vector.broadcast %678 : vector<1x256xf32> to vector<8x256xf32>
    %680 = arith.mulf %677, %679 : vector<8x256xf32>
    %681 = vector.extract_strided_slice %664 {offsets = [0, 1], sizes = [8, 256], strides = [1, 1]} : vector<8x512xf32> to vector<8x256xf32>
    %682 = vector.extract_strided_slice %0 {offsets = [5, 0], sizes = [1, 256], strides = [1, 1]} : vector<9x256xf32> to vector<1x256xf32>
    %683 = vector.broadcast %682 : vector<1x256xf32> to vector<8x256xf32>
    %684 = arith.mulf %681, %683 : vector<8x256xf32>
    %685 = vector.extract_strided_slice %664 {offsets = [0, 15], sizes = [8, 256], strides = [1, 1]} : vector<8x512xf32> to vector<8x256xf32>
    %686 = vector.extract_strided_slice %0 {offsets = [6, 0], sizes = [1, 256], strides = [1, 1]} : vector<9x256xf32> to vector<1x256xf32>
    %687 = vector.broadcast %686 : vector<1x256xf32> to vector<8x256xf32>
    %688 = arith.mulf %685, %687 : vector<8x256xf32>
    %689 = vector.extract_strided_slice %664 {offsets = [0, 16], sizes = [8, 256], strides = [1, 1]} : vector<8x512xf32> to vector<8x256xf32>
    %690 = vector.extract_strided_slice %0 {offsets = [7, 0], sizes = [1, 256], strides = [1, 1]} : vector<9x256xf32> to vector<1x256xf32>
    %691 = vector.broadcast %690 : vector<1x256xf32> to vector<8x256xf32>
    %692 = arith.mulf %689, %691 : vector<8x256xf32>
    %693 = vector.extract_strided_slice %664 {offsets = [0, 17], sizes = [8, 256], strides = [1, 1]} : vector<8x512xf32> to vector<8x256xf32>
    %694 = vector.extract_strided_slice %0 {offsets = [8, 0], sizes = [1, 256], strides = [1, 1]} : vector<9x256xf32> to vector<1x256xf32>
    %695 = vector.broadcast %694 : vector<1x256xf32> to vector<8x256xf32>
    %696 = arith.mulf %693, %695 : vector<8x256xf32>
    %697 = tpu.concatenate %668, %672, %676, %680, %663, %684, %688, %692, %696 in 0 : vector<8x256xf32>, vector<8x256xf32>, vector<8x256xf32>, vector<8x256xf32>, vector<8x256xf32>, vector<8x256xf32>, vector<8x256xf32>, vector<8x256xf32>, vector<8x256xf32> -> vector<72x256xf32>
    %698 = arith.truncf %697 : vector<72x256xf32> to vector<72x256xbf16>
    %cst_75 = arith.constant dense<0.000000e+00> : vector<8x256xf32>
    %699 = tpu.matmul %659, %698, %cst_75 {dimension_numbers = #tpu.dot_dimension_numbers<[1], [0], [0], [1], [0, 0, 1, 1], [], []>} : vector<8x72xbf16>, vector<72x256xbf16>, vector<8x256xf32> -> vector<8x256xf32>
    %700 = vector.broadcast %661 : vector<8x1xf32> to vector<8x256xf32>
    %701 = arith.addf %699, %700 : vector<8x256xf32>
    %702 = arith.addf %657, %701 : vector<8x256xf32>
    %703 = vector.extract_strided_slice %422 {offsets = [3, 0, 0, 0], sizes = [1, 1, 8, 72], strides = [1, 1, 1, 1]} : vector<4x2x8x72xbf16> to vector<1x1x8x72xbf16>
    %704 = vector.shape_cast %703 : vector<1x1x8x72xbf16> to vector<8x72xbf16>
    %705 = vector.extract_strided_slice %423 {offsets = [3, 0, 0, 0], sizes = [1, 1, 8, 1], strides = [1, 1, 1, 1]} : vector<4x2x8x1xf32> to vector<1x1x8x1xf32>
    %706 = vector.shape_cast %705 : vector<1x1x8x1xf32> to vector<8x1xf32>
    %cst_76 = arith.constant 0.000000e+00 : f32
    %707 = vector.broadcast %cst_76 : f32 to vector<8x256xf32>
    %708 = arith.maximumf %613, %707 : vector<8x256xf32>
    %709 = tpu.concatenate %708, %708 in 1 : vector<8x256xf32>, vector<8x256xf32> -> vector<8x512xf32>
    %710 = vector.extract_strided_slice %709 {offsets = [0, 239], sizes = [8, 256], strides = [1, 1]} : vector<8x512xf32> to vector<8x256xf32>
    %711 = vector.extract_strided_slice %0 {offsets = [0, 0], sizes = [1, 256], strides = [1, 1]} : vector<9x256xf32> to vector<1x256xf32>
    %712 = vector.broadcast %711 : vector<1x256xf32> to vector<8x256xf32>
    %713 = arith.mulf %710, %712 : vector<8x256xf32>
    %714 = vector.extract_strided_slice %709 {offsets = [0, 240], sizes = [8, 256], strides = [1, 1]} : vector<8x512xf32> to vector<8x256xf32>
    %715 = vector.extract_strided_slice %0 {offsets = [1, 0], sizes = [1, 256], strides = [1, 1]} : vector<9x256xf32> to vector<1x256xf32>
    %716 = vector.broadcast %715 : vector<1x256xf32> to vector<8x256xf32>
    %717 = arith.mulf %714, %716 : vector<8x256xf32>
    %718 = vector.extract_strided_slice %709 {offsets = [0, 241], sizes = [8, 256], strides = [1, 1]} : vector<8x512xf32> to vector<8x256xf32>
    %719 = vector.extract_strided_slice %0 {offsets = [2, 0], sizes = [1, 256], strides = [1, 1]} : vector<9x256xf32> to vector<1x256xf32>
    %720 = vector.broadcast %719 : vector<1x256xf32> to vector<8x256xf32>
    %721 = arith.mulf %718, %720 : vector<8x256xf32>
    %722 = vector.extract_strided_slice %709 {offsets = [0, 255], sizes = [8, 256], strides = [1, 1]} : vector<8x512xf32> to vector<8x256xf32>
    %723 = vector.extract_strided_slice %0 {offsets = [3, 0], sizes = [1, 256], strides = [1, 1]} : vector<9x256xf32> to vector<1x256xf32>
    %724 = vector.broadcast %723 : vector<1x256xf32> to vector<8x256xf32>
    %725 = arith.mulf %722, %724 : vector<8x256xf32>
    %726 = vector.extract_strided_slice %709 {offsets = [0, 1], sizes = [8, 256], strides = [1, 1]} : vector<8x512xf32> to vector<8x256xf32>
    %727 = vector.extract_strided_slice %0 {offsets = [5, 0], sizes = [1, 256], strides = [1, 1]} : vector<9x256xf32> to vector<1x256xf32>
    %728 = vector.broadcast %727 : vector<1x256xf32> to vector<8x256xf32>
    %729 = arith.mulf %726, %728 : vector<8x256xf32>
    %730 = vector.extract_strided_slice %709 {offsets = [0, 15], sizes = [8, 256], strides = [1, 1]} : vector<8x512xf32> to vector<8x256xf32>
    %731 = vector.extract_strided_slice %0 {offsets = [6, 0], sizes = [1, 256], strides = [1, 1]} : vector<9x256xf32> to vector<1x256xf32>
    %732 = vector.broadcast %731 : vector<1x256xf32> to vector<8x256xf32>
    %733 = arith.mulf %730, %732 : vector<8x256xf32>
    %734 = vector.extract_strided_slice %709 {offsets = [0, 16], sizes = [8, 256], strides = [1, 1]} : vector<8x512xf32> to vector<8x256xf32>
    %735 = vector.extract_strided_slice %0 {offsets = [7, 0], sizes = [1, 256], strides = [1, 1]} : vector<9x256xf32> to vector<1x256xf32>
    %736 = vector.broadcast %735 : vector<1x256xf32> to vector<8x256xf32>
    %737 = arith.mulf %734, %736 : vector<8x256xf32>
    %738 = vector.extract_strided_slice %709 {offsets = [0, 17], sizes = [8, 256], strides = [1, 1]} : vector<8x512xf32> to vector<8x256xf32>
    %739 = vector.extract_strided_slice %0 {offsets = [8, 0], sizes = [1, 256], strides = [1, 1]} : vector<9x256xf32> to vector<1x256xf32>
    %740 = vector.broadcast %739 : vector<1x256xf32> to vector<8x256xf32>
    %741 = arith.mulf %738, %740 : vector<8x256xf32>
    %742 = tpu.concatenate %713, %717, %721, %725, %708, %729, %733, %737, %741 in 0 : vector<8x256xf32>, vector<8x256xf32>, vector<8x256xf32>, vector<8x256xf32>, vector<8x256xf32>, vector<8x256xf32>, vector<8x256xf32>, vector<8x256xf32>, vector<8x256xf32> -> vector<72x256xf32>
    %743 = arith.truncf %742 : vector<72x256xf32> to vector<72x256xbf16>
    %cst_77 = arith.constant dense<0.000000e+00> : vector<8x256xf32>
    %744 = tpu.matmul %704, %743, %cst_77 {dimension_numbers = #tpu.dot_dimension_numbers<[1], [0], [0], [1], [0, 0, 1, 1], [], []>} : vector<8x72xbf16>, vector<72x256xbf16>, vector<8x256xf32> -> vector<8x256xf32>
    %745 = vector.broadcast %706 : vector<8x1xf32> to vector<8x256xf32>
    %746 = arith.addf %744, %745 : vector<8x256xf32>
    %747 = vector.extract_strided_slice %422 {offsets = [3, 1, 0, 0], sizes = [1, 1, 8, 72], strides = [1, 1, 1, 1]} : vector<4x2x8x72xbf16> to vector<1x1x8x72xbf16>
    %748 = vector.shape_cast %747 : vector<1x1x8x72xbf16> to vector<8x72xbf16>
    %749 = vector.extract_strided_slice %423 {offsets = [3, 1, 0, 0], sizes = [1, 1, 8, 1], strides = [1, 1, 1, 1]} : vector<4x2x8x1xf32> to vector<1x1x8x1xf32>
    %750 = vector.shape_cast %749 : vector<1x1x8x1xf32> to vector<8x1xf32>
    %cst_78 = arith.constant 0.000000e+00 : f32
    %751 = vector.broadcast %cst_78 : f32 to vector<8x256xf32>
    %752 = arith.maximumf %702, %751 : vector<8x256xf32>
    %753 = tpu.concatenate %752, %752 in 1 : vector<8x256xf32>, vector<8x256xf32> -> vector<8x512xf32>
    %754 = vector.extract_strided_slice %753 {offsets = [0, 239], sizes = [8, 256], strides = [1, 1]} : vector<8x512xf32> to vector<8x256xf32>
    %755 = vector.extract_strided_slice %0 {offsets = [0, 0], sizes = [1, 256], strides = [1, 1]} : vector<9x256xf32> to vector<1x256xf32>
    %756 = vector.broadcast %755 : vector<1x256xf32> to vector<8x256xf32>
    %757 = arith.mulf %754, %756 : vector<8x256xf32>
    %758 = vector.extract_strided_slice %753 {offsets = [0, 240], sizes = [8, 256], strides = [1, 1]} : vector<8x512xf32> to vector<8x256xf32>
    %759 = vector.extract_strided_slice %0 {offsets = [1, 0], sizes = [1, 256], strides = [1, 1]} : vector<9x256xf32> to vector<1x256xf32>
    %760 = vector.broadcast %759 : vector<1x256xf32> to vector<8x256xf32>
    %761 = arith.mulf %758, %760 : vector<8x256xf32>
    %762 = vector.extract_strided_slice %753 {offsets = [0, 241], sizes = [8, 256], strides = [1, 1]} : vector<8x512xf32> to vector<8x256xf32>
    %763 = vector.extract_strided_slice %0 {offsets = [2, 0], sizes = [1, 256], strides = [1, 1]} : vector<9x256xf32> to vector<1x256xf32>
    %764 = vector.broadcast %763 : vector<1x256xf32> to vector<8x256xf32>
    %765 = arith.mulf %762, %764 : vector<8x256xf32>
    %766 = vector.extract_strided_slice %753 {offsets = [0, 255], sizes = [8, 256], strides = [1, 1]} : vector<8x512xf32> to vector<8x256xf32>
    %767 = vector.extract_strided_slice %0 {offsets = [3, 0], sizes = [1, 256], strides = [1, 1]} : vector<9x256xf32> to vector<1x256xf32>
    %768 = vector.broadcast %767 : vector<1x256xf32> to vector<8x256xf32>
    %769 = arith.mulf %766, %768 : vector<8x256xf32>
    %770 = vector.extract_strided_slice %753 {offsets = [0, 1], sizes = [8, 256], strides = [1, 1]} : vector<8x512xf32> to vector<8x256xf32>
    %771 = vector.extract_strided_slice %0 {offsets = [5, 0], sizes = [1, 256], strides = [1, 1]} : vector<9x256xf32> to vector<1x256xf32>
    %772 = vector.broadcast %771 : vector<1x256xf32> to vector<8x256xf32>
    %773 = arith.mulf %770, %772 : vector<8x256xf32>
    %774 = vector.extract_strided_slice %753 {offsets = [0, 15], sizes = [8, 256], strides = [1, 1]} : vector<8x512xf32> to vector<8x256xf32>
    %775 = vector.extract_strided_slice %0 {offsets = [6, 0], sizes = [1, 256], strides = [1, 1]} : vector<9x256xf32> to vector<1x256xf32>
    %776 = vector.broadcast %775 : vector<1x256xf32> to vector<8x256xf32>
    %777 = arith.mulf %774, %776 : vector<8x256xf32>
    %778 = vector.extract_strided_slice %753 {offsets = [0, 16], sizes = [8, 256], strides = [1, 1]} : vector<8x512xf32> to vector<8x256xf32>
    %779 = vector.extract_strided_slice %0 {offsets = [7, 0], sizes = [1, 256], strides = [1, 1]} : vector<9x256xf32> to vector<1x256xf32>
    %780 = vector.broadcast %779 : vector<1x256xf32> to vector<8x256xf32>
    %781 = arith.mulf %778, %780 : vector<8x256xf32>
    %782 = vector.extract_strided_slice %753 {offsets = [0, 17], sizes = [8, 256], strides = [1, 1]} : vector<8x512xf32> to vector<8x256xf32>
    %783 = vector.extract_strided_slice %0 {offsets = [8, 0], sizes = [1, 256], strides = [1, 1]} : vector<9x256xf32> to vector<1x256xf32>
    %784 = vector.broadcast %783 : vector<1x256xf32> to vector<8x256xf32>
    %785 = arith.mulf %782, %784 : vector<8x256xf32>
    %786 = tpu.concatenate %757, %761, %765, %769, %752, %773, %777, %781, %785 in 0 : vector<8x256xf32>, vector<8x256xf32>, vector<8x256xf32>, vector<8x256xf32>, vector<8x256xf32>, vector<8x256xf32>, vector<8x256xf32>, vector<8x256xf32>, vector<8x256xf32> -> vector<72x256xf32>
    %787 = arith.truncf %786 : vector<72x256xf32> to vector<72x256xbf16>
    %cst_79 = arith.constant dense<0.000000e+00> : vector<8x256xf32>
    %788 = tpu.matmul %748, %787, %cst_79 {dimension_numbers = #tpu.dot_dimension_numbers<[1], [0], [0], [1], [0, 0, 1, 1], [], []>} : vector<8x72xbf16>, vector<72x256xbf16>, vector<8x256xf32> -> vector<8x256xf32>
    %789 = vector.broadcast %750 : vector<8x1xf32> to vector<8x256xf32>
    %790 = arith.addf %788, %789 : vector<8x256xf32>
    %791 = arith.addf %746, %790 : vector<8x256xf32>
    %792 = tpu.concatenate %524, %613, %702, %791 in 0 : vector<8x256xf32>, vector<8x256xf32>, vector<8x256xf32>, vector<8x256xf32> -> vector<32x256xf32>
    %c0_80 = arith.constant 0 : index
    %c0_81 = arith.constant 0 : index
    %793 = vector.load %arg17[%c0_80, %c0_81] : memref<8x288xbf16, #tpu.memory_space<vmem>>, vector<8x288xbf16>
    %c0_82 = arith.constant 0 : index
    %c0_83 = arith.constant 0 : index
    %794 = vector.load %arg18[%c0_82, %c0_83] : memref<8x1xf32, #tpu.memory_space<vmem>>, vector<8x1xf32>
    %c0_84 = arith.constant 0 : index
    %c0_85 = arith.constant 0 : index
    %795 = vector.load %arg19[%c0_84, %c0_85] : memref<32x72xbf16, #tpu.memory_space<vmem>>, vector<32x72xbf16>
    %c0_86 = arith.constant 0 : index
    %c0_87 = arith.constant 0 : index
    %796 = vector.load %arg20[%c0_86, %c0_87] : memref<32x1xf32, #tpu.memory_space<vmem>>, vector<32x1xf32>
    %797 = tpu.concatenate %792, %792 in 1 : vector<32x256xf32>, vector<32x256xf32> -> vector<32x512xf32>
    %798 = vector.extract_strided_slice %797 {offsets = [0, 239], sizes = [32, 256], strides = [1, 1]} : vector<32x512xf32> to vector<32x256xf32>
    %799 = vector.extract_strided_slice %0 {offsets = [0, 0], sizes = [1, 256], strides = [1, 1]} : vector<9x256xf32> to vector<1x256xf32>
    %800 = vector.broadcast %799 : vector<1x256xf32> to vector<32x256xf32>
    %801 = arith.mulf %798, %800 : vector<32x256xf32>
    %802 = vector.extract_strided_slice %797 {offsets = [0, 240], sizes = [32, 256], strides = [1, 1]} : vector<32x512xf32> to vector<32x256xf32>
    %803 = vector.extract_strided_slice %0 {offsets = [1, 0], sizes = [1, 256], strides = [1, 1]} : vector<9x256xf32> to vector<1x256xf32>
    %804 = vector.broadcast %803 : vector<1x256xf32> to vector<32x256xf32>
    %805 = arith.mulf %802, %804 : vector<32x256xf32>
    %806 = vector.extract_strided_slice %797 {offsets = [0, 241], sizes = [32, 256], strides = [1, 1]} : vector<32x512xf32> to vector<32x256xf32>
    %807 = vector.extract_strided_slice %0 {offsets = [2, 0], sizes = [1, 256], strides = [1, 1]} : vector<9x256xf32> to vector<1x256xf32>
    %808 = vector.broadcast %807 : vector<1x256xf32> to vector<32x256xf32>
    %809 = arith.mulf %806, %808 : vector<32x256xf32>
    %810 = vector.extract_strided_slice %797 {offsets = [0, 255], sizes = [32, 256], strides = [1, 1]} : vector<32x512xf32> to vector<32x256xf32>
    %811 = vector.extract_strided_slice %0 {offsets = [3, 0], sizes = [1, 256], strides = [1, 1]} : vector<9x256xf32> to vector<1x256xf32>
    %812 = vector.broadcast %811 : vector<1x256xf32> to vector<32x256xf32>
    %813 = arith.mulf %810, %812 : vector<32x256xf32>
    %814 = vector.extract_strided_slice %797 {offsets = [0, 1], sizes = [32, 256], strides = [1, 1]} : vector<32x512xf32> to vector<32x256xf32>
    %815 = vector.extract_strided_slice %0 {offsets = [5, 0], sizes = [1, 256], strides = [1, 1]} : vector<9x256xf32> to vector<1x256xf32>
    %816 = vector.broadcast %815 : vector<1x256xf32> to vector<32x256xf32>
    %817 = arith.mulf %814, %816 : vector<32x256xf32>
    %818 = vector.extract_strided_slice %797 {offsets = [0, 15], sizes = [32, 256], strides = [1, 1]} : vector<32x512xf32> to vector<32x256xf32>
    %819 = vector.extract_strided_slice %0 {offsets = [6, 0], sizes = [1, 256], strides = [1, 1]} : vector<9x256xf32> to vector<1x256xf32>
    %820 = vector.broadcast %819 : vector<1x256xf32> to vector<32x256xf32>
    %821 = arith.mulf %818, %820 : vector<32x256xf32>
    %822 = vector.extract_strided_slice %797 {offsets = [0, 16], sizes = [32, 256], strides = [1, 1]} : vector<32x512xf32> to vector<32x256xf32>
    %823 = vector.extract_strided_slice %0 {offsets = [7, 0], sizes = [1, 256], strides = [1, 1]} : vector<9x256xf32> to vector<1x256xf32>
    %824 = vector.broadcast %823 : vector<1x256xf32> to vector<32x256xf32>
    %825 = arith.mulf %822, %824 : vector<32x256xf32>
    %826 = vector.extract_strided_slice %797 {offsets = [0, 17], sizes = [32, 256], strides = [1, 1]} : vector<32x512xf32> to vector<32x256xf32>
    %827 = vector.extract_strided_slice %0 {offsets = [8, 0], sizes = [1, 256], strides = [1, 1]} : vector<9x256xf32> to vector<1x256xf32>
    %828 = vector.broadcast %827 : vector<1x256xf32> to vector<32x256xf32>
    %829 = arith.mulf %826, %828 : vector<32x256xf32>
    %830 = tpu.concatenate %801, %805, %809, %813, %792, %817, %821, %825, %829 in 0 : vector<32x256xf32>, vector<32x256xf32>, vector<32x256xf32>, vector<32x256xf32>, vector<32x256xf32>, vector<32x256xf32>, vector<32x256xf32>, vector<32x256xf32>, vector<32x256xf32> -> vector<288x256xf32>
    %831 = arith.truncf %830 : vector<288x256xf32> to vector<288x256xbf16>
    %cst_88 = arith.constant dense<0.000000e+00> : vector<8x256xf32>
    %832 = tpu.matmul %793, %831, %cst_88 {dimension_numbers = #tpu.dot_dimension_numbers<[1], [0], [0], [1], [0, 0, 1, 1], [], []>} : vector<8x288xbf16>, vector<288x256xbf16>, vector<8x256xf32> -> vector<8x256xf32>
    %833 = vector.broadcast %794 : vector<8x1xf32> to vector<8x256xf32>
    %834 = arith.addf %832, %833 : vector<8x256xf32>
    %835 = tpu.concatenate %834, %834 in 1 : vector<8x256xf32>, vector<8x256xf32> -> vector<8x512xf32>
    %836 = vector.extract_strided_slice %835 {offsets = [0, 239], sizes = [8, 256], strides = [1, 1]} : vector<8x512xf32> to vector<8x256xf32>
    %837 = vector.extract_strided_slice %0 {offsets = [0, 0], sizes = [1, 256], strides = [1, 1]} : vector<9x256xf32> to vector<1x256xf32>
    %838 = vector.broadcast %837 : vector<1x256xf32> to vector<8x256xf32>
    %839 = arith.mulf %836, %838 : vector<8x256xf32>
    %840 = vector.extract_strided_slice %835 {offsets = [0, 240], sizes = [8, 256], strides = [1, 1]} : vector<8x512xf32> to vector<8x256xf32>
    %841 = vector.extract_strided_slice %0 {offsets = [1, 0], sizes = [1, 256], strides = [1, 1]} : vector<9x256xf32> to vector<1x256xf32>
    %842 = vector.broadcast %841 : vector<1x256xf32> to vector<8x256xf32>
    %843 = arith.mulf %840, %842 : vector<8x256xf32>
    %844 = vector.extract_strided_slice %835 {offsets = [0, 241], sizes = [8, 256], strides = [1, 1]} : vector<8x512xf32> to vector<8x256xf32>
    %845 = vector.extract_strided_slice %0 {offsets = [2, 0], sizes = [1, 256], strides = [1, 1]} : vector<9x256xf32> to vector<1x256xf32>
    %846 = vector.broadcast %845 : vector<1x256xf32> to vector<8x256xf32>
    %847 = arith.mulf %844, %846 : vector<8x256xf32>
    %848 = vector.extract_strided_slice %835 {offsets = [0, 255], sizes = [8, 256], strides = [1, 1]} : vector<8x512xf32> to vector<8x256xf32>
    %849 = vector.extract_strided_slice %0 {offsets = [3, 0], sizes = [1, 256], strides = [1, 1]} : vector<9x256xf32> to vector<1x256xf32>
    %850 = vector.broadcast %849 : vector<1x256xf32> to vector<8x256xf32>
    %851 = arith.mulf %848, %850 : vector<8x256xf32>
    %852 = vector.extract_strided_slice %835 {offsets = [0, 1], sizes = [8, 256], strides = [1, 1]} : vector<8x512xf32> to vector<8x256xf32>
    %853 = vector.extract_strided_slice %0 {offsets = [5, 0], sizes = [1, 256], strides = [1, 1]} : vector<9x256xf32> to vector<1x256xf32>
    %854 = vector.broadcast %853 : vector<1x256xf32> to vector<8x256xf32>
    %855 = arith.mulf %852, %854 : vector<8x256xf32>
    %856 = vector.extract_strided_slice %835 {offsets = [0, 15], sizes = [8, 256], strides = [1, 1]} : vector<8x512xf32> to vector<8x256xf32>
    %857 = vector.extract_strided_slice %0 {offsets = [6, 0], sizes = [1, 256], strides = [1, 1]} : vector<9x256xf32> to vector<1x256xf32>
    %858 = vector.broadcast %857 : vector<1x256xf32> to vector<8x256xf32>
    %859 = arith.mulf %856, %858 : vector<8x256xf32>
    %860 = vector.extract_strided_slice %835 {offsets = [0, 16], sizes = [8, 256], strides = [1, 1]} : vector<8x512xf32> to vector<8x256xf32>
    %861 = vector.extract_strided_slice %0 {offsets = [7, 0], sizes = [1, 256], strides = [1, 1]} : vector<9x256xf32> to vector<1x256xf32>
    %862 = vector.broadcast %861 : vector<1x256xf32> to vector<8x256xf32>
    %863 = arith.mulf %860, %862 : vector<8x256xf32>
    %864 = vector.extract_strided_slice %835 {offsets = [0, 17], sizes = [8, 256], strides = [1, 1]} : vector<8x512xf32> to vector<8x256xf32>
    %865 = vector.extract_strided_slice %0 {offsets = [8, 0], sizes = [1, 256], strides = [1, 1]} : vector<9x256xf32> to vector<1x256xf32>
    %866 = vector.broadcast %865 : vector<1x256xf32> to vector<8x256xf32>
    %867 = arith.mulf %864, %866 : vector<8x256xf32>
    %868 = tpu.concatenate %839, %843, %847, %851, %834, %855, %859, %863, %867 in 0 : vector<8x256xf32>, vector<8x256xf32>, vector<8x256xf32>, vector<8x256xf32>, vector<8x256xf32>, vector<8x256xf32>, vector<8x256xf32>, vector<8x256xf32>, vector<8x256xf32> -> vector<72x256xf32>
    %869 = arith.truncf %868 : vector<72x256xf32> to vector<72x256xbf16>
    %cst_89 = arith.constant dense<0.000000e+00> : vector<32x256xf32>
    %870 = tpu.matmul %795, %869, %cst_89 {dimension_numbers = #tpu.dot_dimension_numbers<[1], [0], [0], [1], [0, 0, 1, 1], [], []>} : vector<32x72xbf16>, vector<72x256xbf16>, vector<32x256xf32> -> vector<32x256xf32>
    %871 = vector.broadcast %796 : vector<32x1xf32> to vector<32x256xf32>
    %872 = arith.addf %870, %871 : vector<32x256xf32>
    %cst_90 = arith.constant 0.000000e+00 : f32
    %873 = vector.broadcast %cst_90 : f32 to vector<32x256xf32>
    %874 = arith.cmpf oge, %872, %873 : vector<32x256xf32>
    %cst_91 = arith.constant 0.00999999977 : f32
    %875 = vector.broadcast %cst_91 : f32 to vector<32x256xf32>
    %876 = arith.mulf %872, %875 : vector<32x256xf32>
    %877 = arith.select %874, %872, %876 : vector<32x256xi1>, vector<32x256xf32>
    %878 = vector.shape_cast %877 : vector<32x256xf32> to vector<1x32x256xf32>
    %c0_92 = arith.constant 0 : index
    %c0_93 = arith.constant 0 : index
    %c0_94 = arith.constant 0 : index
    %879 = vector.load %arg21[%c0_92, %c0_93, %c0_94] : memref<1x32x256xf32, #tpu.memory_space<vmem>>, vector<1x32x256xf32>
    tpu.vector_store %arg21[%c0_92, %c0_93, %c0_94], %878 {strides = array<i32>} : memref<1x32x256xf32, #tpu.memory_space<vmem>>, vector<1x32x256xf32>,
    return
  }
  func.func @transform_0(%arg0: i32) -> (i32, i32, i32) {
    %c0_i32 = arith.constant 0 : i32
    %c0_i32_0 = arith.constant 0 : i32
    %c0_i32_1 = arith.constant 0 : i32
    return %arg0, %c0_i32, %c0_i32_0 : i32, i32, i32
  }
  func.func @transform_1(%arg0: i32) -> (i32, i32) {
    %c0_i32 = arith.constant 0 : i32
    %c0_i32_0 = arith.constant 0 : i32
    %c0_i32_1 = arith.constant 0 : i32
    return %c0_i32, %c0_i32_0 : i32, i32
  }
  func.func @transform_2(%arg0: i32) -> (i32, i32) {
    %c0_i32 = arith.constant 0 : i32
    %c0_i32_0 = arith.constant 0 : i32
    %c0_i32_1 = arith.constant 0 : i32
    return %c0_i32, %c0_i32_0 : i32, i32
  }
  func.func @transform_3(%arg0: i32) -> (i32, i32) {
    %c0_i32 = arith.constant 0 : i32
    %c0_i32_0 = arith.constant 0 : i32
    %c0_i32_1 = arith.constant 0 : i32
    return %c0_i32, %c0_i32_0 : i32, i32
  }
  func.func @transform_4(%arg0: i32) -> (i32, i32) {
    %c0_i32 = arith.constant 0 : i32
    %c0_i32_0 = arith.constant 0 : i32
    %c0_i32_1 = arith.constant 0 : i32
    return %c0_i32, %c0_i32_0 : i32, i32
  }
  func.func @transform_5(%arg0: i32) -> (i32, i32) {
    %c0_i32 = arith.constant 0 : i32
    %c0_i32_0 = arith.constant 0 : i32
    %c0_i32_1 = arith.constant 0 : i32
    return %c0_i32, %c0_i32_0 : i32, i32
  }
  func.func @transform_6(%arg0: i32) -> (i32, i32) {
    %c0_i32 = arith.constant 0 : i32
    %c0_i32_0 = arith.constant 0 : i32
    %c0_i32_1 = arith.constant 0 : i32
    return %c0_i32, %c0_i32_0 : i32, i32
  }
  func.func @transform_7(%arg0: i32) -> (i32, i32) {
    %c0_i32 = arith.constant 0 : i32
    %c0_i32_0 = arith.constant 0 : i32
    %c0_i32_1 = arith.constant 0 : i32
    return %c0_i32, %c0_i32_0 : i32, i32
  }
  func.func @transform_8(%arg0: i32) -> (i32, i32, i32, i32) {
    %c0_i32 = arith.constant 0 : i32
    %c0_i32_0 = arith.constant 0 : i32
    %c0_i32_1 = arith.constant 0 : i32
    %c0_i32_2 = arith.constant 0 : i32
    %c0_i32_3 = arith.constant 0 : i32
    return %c0_i32, %c0_i32_0, %c0_i32_1, %c0_i32_2 : i32, i32, i32, i32
  }
  func.func @transform_9(%arg0: i32) -> (i32, i32, i32, i32) {
    %c0_i32 = arith.constant 0 : i32
    %c0_i32_0 = arith.constant 0 : i32
    %c0_i32_1 = arith.constant 0 : i32
    %c0_i32_2 = arith.constant 0 : i32
    %c0_i32_3 = arith.constant 0 : i32
    return %c0_i32, %c0_i32_0, %c0_i32_1, %c0_i32_2 : i32, i32, i32, i32
  }
  func.func @transform_10(%arg0: i32) -> (i32, i32) {
    %c0_i32 = arith.constant 0 : i32
    %c0_i32_0 = arith.constant 0 : i32
    %c0_i32_1 = arith.constant 0 : i32
    return %c0_i32, %c0_i32_0 : i32, i32
  }
  func.func @transform_11(%arg0: i32) -> (i32, i32) {
    %c0_i32 = arith.constant 0 : i32
    %c0_i32_0 = arith.constant 0 : i32
    %c0_i32_1 = arith.constant 0 : i32
    return %c0_i32, %c0_i32_0 : i32, i32
  }
  func.func @transform_12(%arg0: i32) -> (i32, i32) {
    %c0_i32 = arith.constant 0 : i32
    %c0_i32_0 = arith.constant 0 : i32
    %c0_i32_1 = arith.constant 0 : i32
    return %c0_i32, %c0_i32_0 : i32, i32
  }
  func.func @transform_13(%arg0: i32) -> (i32, i32) {
    %c0_i32 = arith.constant 0 : i32
    %c0_i32_0 = arith.constant 0 : i32
    %c0_i32_1 = arith.constant 0 : i32
    return %c0_i32, %c0_i32_0 : i32, i32
  }
  func.func @transform_14(%arg0: i32) -> (i32, i32, i32, i32) {
    %c0_i32 = arith.constant 0 : i32
    %c0_i32_0 = arith.constant 0 : i32
    %c0_i32_1 = arith.constant 0 : i32
    %c0_i32_2 = arith.constant 0 : i32
    %c0_i32_3 = arith.constant 0 : i32
    return %c0_i32, %c0_i32_0, %c0_i32_1, %c0_i32_2 : i32, i32, i32, i32
  }
  func.func @transform_15(%arg0: i32) -> (i32, i32, i32, i32) {
    %c0_i32 = arith.constant 0 : i32
    %c0_i32_0 = arith.constant 0 : i32
    %c0_i32_1 = arith.constant 0 : i32
    %c0_i32_2 = arith.constant 0 : i32
    %c0_i32_3 = arith.constant 0 : i32
    return %c0_i32, %c0_i32_0, %c0_i32_1, %c0_i32_2 : i32, i32, i32, i32
  }
  func.func @transform_16(%arg0: i32) -> (i32, i32) {
    %c0_i32 = arith.constant 0 : i32
    %c0_i32_0 = arith.constant 0 : i32
    %c0_i32_1 = arith.constant 0 : i32
    return %c0_i32, %c0_i32_0 : i32, i32
  }
  func.func @transform_17(%arg0: i32) -> (i32, i32) {
    %c0_i32 = arith.constant 0 : i32
    %c0_i32_0 = arith.constant 0 : i32
    %c0_i32_1 = arith.constant 0 : i32
    return %c0_i32, %c0_i32_0 : i32, i32
  }
  func.func @transform_18(%arg0: i32) -> (i32, i32) {
    %c0_i32 = arith.constant 0 : i32
    %c0_i32_0 = arith.constant 0 : i32
    %c0_i32_1 = arith.constant 0 : i32
    return %c0_i32, %c0_i32_0 : i32, i32
  }
  func.func @transform_19(%arg0: i32) -> (i32, i32) {
    %c0_i32 = arith.constant 0 : i32
    %c0_i32_0 = arith.constant 0 : i32
    %c0_i32_1 = arith.constant 0 : i32
    return %c0_i32, %c0_i32_0 : i32, i32
  }
  func.func @transform_20(%arg0: i32) -> (i32, i32, i32) {
    %c0_i32 = arith.constant 0 : i32
    %c0_i32_0 = arith.constant 0 : i32
    %c0_i32_1 = arith.constant 0 : i32
    return %arg0, %c0_i32, %c0_i32_0 : i32, i32, i32
  }
}

module attributes {stable_mosaic.version = 11 : i64} {
  func.func @kernel(%arg0: i32, %arg1: memref<1x8x1024xf32, #tpu.memory_space<vmem>>, %arg2: memref<9x1024xf32, #tpu.memory_space<vmem>>, %arg3: memref<8x72xbf16, #tpu.memory_space<vmem>>, %arg4: memref<8x1xf32, #tpu.memory_space<vmem>>, %arg5: memref<3x72xbf16, #tpu.memory_space<vmem>>, %arg6: memref<3x1xf32, #tpu.memory_space<vmem>>, %arg7: memref<1x3x1024xf32, #tpu.memory_space<vmem>>) attributes {dimension_semantics = [#tpu.dimension_semantics<parallel>], iteration_bounds = array<i64: 2>, scalar_prefetch = 0 : i64, scratch_operands = 0 : i64, tpu.core_type = #tpu.core_type<tc>, window_params = [{transform_indices = @transform_0, window_bounds = array<i64: 1, 8, 1024>}, {pipeline_mode = #tpu.pipeline_mode<synchronous>, transform_indices = @transform_1, window_bounds = array<i64: 9, 1024>}, {pipeline_mode = #tpu.pipeline_mode<synchronous>, transform_indices = @transform_2, window_bounds = array<i64: 8, 72>}, {pipeline_mode = #tpu.pipeline_mode<synchronous>, transform_indices = @transform_3, window_bounds = array<i64: 8, 1>}, {pipeline_mode = #tpu.pipeline_mode<synchronous>, transform_indices = @transform_4, window_bounds = array<i64: 3, 72>}, {pipeline_mode = #tpu.pipeline_mode<synchronous>, transform_indices = @transform_5, window_bounds = array<i64: 3, 1>}, {transform_indices = @transform_6, window_bounds = array<i64: 1, 3, 1024>}]} {
    %c0 = arith.constant 0 : index
    %c0_0 = arith.constant 0 : index
    %0 = vector.load %arg2[%c0, %c0_0] : memref<9x1024xf32, #tpu.memory_space<vmem>>, vector<9x1024xf32>
    %c0_1 = arith.constant 0 : index
    %c0_2 = arith.constant 0 : index
    %c0_3 = arith.constant 0 : index
    %1 = vector.load %arg1[%c0_1, %c0_2, %c0_3] : memref<1x8x1024xf32, #tpu.memory_space<vmem>>, vector<1x8x1024xf32>
    %2 = vector.shape_cast %1 : vector<1x8x1024xf32> to vector<8x1024xf32>
    %c0_4 = arith.constant 0 : index
    %c0_5 = arith.constant 0 : index
    %3 = vector.load %arg3[%c0_4, %c0_5] : memref<8x72xbf16, #tpu.memory_space<vmem>>, vector<8x72xbf16>
    %c0_6 = arith.constant 0 : index
    %c0_7 = arith.constant 0 : index
    %4 = vector.load %arg4[%c0_6, %c0_7] : memref<8x1xf32, #tpu.memory_space<vmem>>, vector<8x1xf32>
    %5 = tpu.concatenate %2, %2 in 1 : vector<8x1024xf32>, vector<8x1024xf32> -> vector<8x2048xf32>
    %6 = vector.extract_strided_slice %5 {offsets = [0, 991], sizes = [8, 1024], strides = [1, 1]} : vector<8x2048xf32> to vector<8x1024xf32>
    %7 = vector.extract_strided_slice %0 {offsets = [0, 0], sizes = [1, 1024], strides = [1, 1]} : vector<9x1024xf32> to vector<1x1024xf32>
    %8 = vector.broadcast %7 : vector<1x1024xf32> to vector<8x1024xf32>
    %9 = arith.mulf %6, %8 : vector<8x1024xf32>
    %10 = vector.extract_strided_slice %5 {offsets = [0, 992], sizes = [8, 1024], strides = [1, 1]} : vector<8x2048xf32> to vector<8x1024xf32>
    %11 = vector.extract_strided_slice %0 {offsets = [1, 0], sizes = [1, 1024], strides = [1, 1]} : vector<9x1024xf32> to vector<1x1024xf32>
    %12 = vector.broadcast %11 : vector<1x1024xf32> to vector<8x1024xf32>
    %13 = arith.mulf %10, %12 : vector<8x1024xf32>
    %14 = vector.extract_strided_slice %5 {offsets = [0, 993], sizes = [8, 1024], strides = [1, 1]} : vector<8x2048xf32> to vector<8x1024xf32>
    %15 = vector.extract_strided_slice %0 {offsets = [2, 0], sizes = [1, 1024], strides = [1, 1]} : vector<9x1024xf32> to vector<1x1024xf32>
    %16 = vector.broadcast %15 : vector<1x1024xf32> to vector<8x1024xf32>
    %17 = arith.mulf %14, %16 : vector<8x1024xf32>
    %18 = vector.extract_strided_slice %5 {offsets = [0, 1023], sizes = [8, 1024], strides = [1, 1]} : vector<8x2048xf32> to vector<8x1024xf32>
    %19 = vector.extract_strided_slice %0 {offsets = [3, 0], sizes = [1, 1024], strides = [1, 1]} : vector<9x1024xf32> to vector<1x1024xf32>
    %20 = vector.broadcast %19 : vector<1x1024xf32> to vector<8x1024xf32>
    %21 = arith.mulf %18, %20 : vector<8x1024xf32>
    %22 = vector.extract_strided_slice %5 {offsets = [0, 1], sizes = [8, 1024], strides = [1, 1]} : vector<8x2048xf32> to vector<8x1024xf32>
    %23 = vector.extract_strided_slice %0 {offsets = [5, 0], sizes = [1, 1024], strides = [1, 1]} : vector<9x1024xf32> to vector<1x1024xf32>
    %24 = vector.broadcast %23 : vector<1x1024xf32> to vector<8x1024xf32>
    %25 = arith.mulf %22, %24 : vector<8x1024xf32>
    %26 = vector.extract_strided_slice %5 {offsets = [0, 31], sizes = [8, 1024], strides = [1, 1]} : vector<8x2048xf32> to vector<8x1024xf32>
    %27 = vector.extract_strided_slice %0 {offsets = [6, 0], sizes = [1, 1024], strides = [1, 1]} : vector<9x1024xf32> to vector<1x1024xf32>
    %28 = vector.broadcast %27 : vector<1x1024xf32> to vector<8x1024xf32>
    %29 = arith.mulf %26, %28 : vector<8x1024xf32>
    %30 = vector.extract_strided_slice %5 {offsets = [0, 32], sizes = [8, 1024], strides = [1, 1]} : vector<8x2048xf32> to vector<8x1024xf32>
    %31 = vector.extract_strided_slice %0 {offsets = [7, 0], sizes = [1, 1024], strides = [1, 1]} : vector<9x1024xf32> to vector<1x1024xf32>
    %32 = vector.broadcast %31 : vector<1x1024xf32> to vector<8x1024xf32>
    %33 = arith.mulf %30, %32 : vector<8x1024xf32>
    %34 = vector.extract_strided_slice %5 {offsets = [0, 33], sizes = [8, 1024], strides = [1, 1]} : vector<8x2048xf32> to vector<8x1024xf32>
    %35 = vector.extract_strided_slice %0 {offsets = [8, 0], sizes = [1, 1024], strides = [1, 1]} : vector<9x1024xf32> to vector<1x1024xf32>
    %36 = vector.broadcast %35 : vector<1x1024xf32> to vector<8x1024xf32>
    %37 = arith.mulf %34, %36 : vector<8x1024xf32>
    %38 = tpu.concatenate %9, %13, %17, %21, %2, %25, %29, %33, %37 in 0 : vector<8x1024xf32>, vector<8x1024xf32>, vector<8x1024xf32>, vector<8x1024xf32>, vector<8x1024xf32>, vector<8x1024xf32>, vector<8x1024xf32>, vector<8x1024xf32>, vector<8x1024xf32> -> vector<72x1024xf32>
    %39 = arith.truncf %38 : vector<72x1024xf32> to vector<72x1024xbf16>
    %cst = arith.constant dense<0.000000e+00> : vector<8x1024xf32>
    %40 = tpu.matmul %3, %39, %cst {dimension_numbers = #tpu.dot_dimension_numbers<[1], [0], [0], [1], [0, 0, 1, 1], [], []>} : vector<8x72xbf16>, vector<72x1024xbf16>, vector<8x1024xf32> -> vector<8x1024xf32>
    %41 = vector.broadcast %4 : vector<8x1xf32> to vector<8x1024xf32>
    %42 = arith.addf %40, %41 : vector<8x1024xf32>
    %cst_8 = arith.constant 0.000000e+00 : f32
    %43 = vector.broadcast %cst_8 : f32 to vector<8x1024xf32>
    %44 = arith.cmpf oge, %42, %43 : vector<8x1024xf32>
    %cst_9 = arith.constant 0.00999999977 : f32
    %45 = vector.broadcast %cst_9 : f32 to vector<8x1024xf32>
    %46 = arith.mulf %42, %45 : vector<8x1024xf32>
    %47 = arith.select %44, %42, %46 : vector<8x1024xi1>, vector<8x1024xf32>
    %c0_10 = arith.constant 0 : index
    %c0_11 = arith.constant 0 : index
    %48 = vector.load %arg5[%c0_10, %c0_11] : memref<3x72xbf16, #tpu.memory_space<vmem>>, vector<3x72xbf16>
    %c0_12 = arith.constant 0 : index
    %c0_13 = arith.constant 0 : index
    %49 = vector.load %arg6[%c0_12, %c0_13] : memref<3x1xf32, #tpu.memory_space<vmem>>, vector<3x1xf32>
    %50 = tpu.concatenate %47, %47 in 1 : vector<8x1024xf32>, vector<8x1024xf32> -> vector<8x2048xf32>
    %51 = vector.extract_strided_slice %50 {offsets = [0, 991], sizes = [8, 1024], strides = [1, 1]} : vector<8x2048xf32> to vector<8x1024xf32>
    %52 = vector.extract_strided_slice %0 {offsets = [0, 0], sizes = [1, 1024], strides = [1, 1]} : vector<9x1024xf32> to vector<1x1024xf32>
    %53 = vector.broadcast %52 : vector<1x1024xf32> to vector<8x1024xf32>
    %54 = arith.mulf %51, %53 : vector<8x1024xf32>
    %55 = vector.extract_strided_slice %50 {offsets = [0, 992], sizes = [8, 1024], strides = [1, 1]} : vector<8x2048xf32> to vector<8x1024xf32>
    %56 = vector.extract_strided_slice %0 {offsets = [1, 0], sizes = [1, 1024], strides = [1, 1]} : vector<9x1024xf32> to vector<1x1024xf32>
    %57 = vector.broadcast %56 : vector<1x1024xf32> to vector<8x1024xf32>
    %58 = arith.mulf %55, %57 : vector<8x1024xf32>
    %59 = vector.extract_strided_slice %50 {offsets = [0, 993], sizes = [8, 1024], strides = [1, 1]} : vector<8x2048xf32> to vector<8x1024xf32>
    %60 = vector.extract_strided_slice %0 {offsets = [2, 0], sizes = [1, 1024], strides = [1, 1]} : vector<9x1024xf32> to vector<1x1024xf32>
    %61 = vector.broadcast %60 : vector<1x1024xf32> to vector<8x1024xf32>
    %62 = arith.mulf %59, %61 : vector<8x1024xf32>
    %63 = vector.extract_strided_slice %50 {offsets = [0, 1023], sizes = [8, 1024], strides = [1, 1]} : vector<8x2048xf32> to vector<8x1024xf32>
    %64 = vector.extract_strided_slice %0 {offsets = [3, 0], sizes = [1, 1024], strides = [1, 1]} : vector<9x1024xf32> to vector<1x1024xf32>
    %65 = vector.broadcast %64 : vector<1x1024xf32> to vector<8x1024xf32>
    %66 = arith.mulf %63, %65 : vector<8x1024xf32>
    %67 = vector.extract_strided_slice %50 {offsets = [0, 1], sizes = [8, 1024], strides = [1, 1]} : vector<8x2048xf32> to vector<8x1024xf32>
    %68 = vector.extract_strided_slice %0 {offsets = [5, 0], sizes = [1, 1024], strides = [1, 1]} : vector<9x1024xf32> to vector<1x1024xf32>
    %69 = vector.broadcast %68 : vector<1x1024xf32> to vector<8x1024xf32>
    %70 = arith.mulf %67, %69 : vector<8x1024xf32>
    %71 = vector.extract_strided_slice %50 {offsets = [0, 31], sizes = [8, 1024], strides = [1, 1]} : vector<8x2048xf32> to vector<8x1024xf32>
    %72 = vector.extract_strided_slice %0 {offsets = [6, 0], sizes = [1, 1024], strides = [1, 1]} : vector<9x1024xf32> to vector<1x1024xf32>
    %73 = vector.broadcast %72 : vector<1x1024xf32> to vector<8x1024xf32>
    %74 = arith.mulf %71, %73 : vector<8x1024xf32>
    %75 = vector.extract_strided_slice %50 {offsets = [0, 32], sizes = [8, 1024], strides = [1, 1]} : vector<8x2048xf32> to vector<8x1024xf32>
    %76 = vector.extract_strided_slice %0 {offsets = [7, 0], sizes = [1, 1024], strides = [1, 1]} : vector<9x1024xf32> to vector<1x1024xf32>
    %77 = vector.broadcast %76 : vector<1x1024xf32> to vector<8x1024xf32>
    %78 = arith.mulf %75, %77 : vector<8x1024xf32>
    %79 = vector.extract_strided_slice %50 {offsets = [0, 33], sizes = [8, 1024], strides = [1, 1]} : vector<8x2048xf32> to vector<8x1024xf32>
    %80 = vector.extract_strided_slice %0 {offsets = [8, 0], sizes = [1, 1024], strides = [1, 1]} : vector<9x1024xf32> to vector<1x1024xf32>
    %81 = vector.broadcast %80 : vector<1x1024xf32> to vector<8x1024xf32>
    %82 = arith.mulf %79, %81 : vector<8x1024xf32>
    %83 = tpu.concatenate %54, %58, %62, %66, %47, %70, %74, %78, %82 in 0 : vector<8x1024xf32>, vector<8x1024xf32>, vector<8x1024xf32>, vector<8x1024xf32>, vector<8x1024xf32>, vector<8x1024xf32>, vector<8x1024xf32>, vector<8x1024xf32>, vector<8x1024xf32> -> vector<72x1024xf32>
    %84 = arith.truncf %83 : vector<72x1024xf32> to vector<72x1024xbf16>
    %cst_14 = arith.constant dense<0.000000e+00> : vector<3x1024xf32>
    %85 = tpu.matmul %48, %84, %cst_14 {dimension_numbers = #tpu.dot_dimension_numbers<[1], [0], [0], [1], [0, 0, 1, 1], [], []>} : vector<3x72xbf16>, vector<72x1024xbf16>, vector<3x1024xf32> -> vector<3x1024xf32>
    %86 = vector.broadcast %49 : vector<3x1xf32> to vector<3x1024xf32>
    %87 = arith.addf %85, %86 : vector<3x1024xf32>
    %88 = vector.shape_cast %87 : vector<3x1024xf32> to vector<1x3x1024xf32>
    %c0_15 = arith.constant 0 : index
    %c0_16 = arith.constant 0 : index
    %c0_17 = arith.constant 0 : index
    %89 = vector.load %arg7[%c0_15, %c0_16, %c0_17] : memref<1x3x1024xf32, #tpu.memory_space<vmem>>, vector<1x3x1024xf32>
    tpu.vector_store %arg7[%c0_15, %c0_16, %c0_17], %88 {strides = array<i32>} : memref<1x3x1024xf32, #tpu.memory_space<vmem>>, vector<1x3x1024xf32>,
    return
  }
  func.func @transform_0(%arg0: i32) -> (i32, i32, i32) {
    %c0_i32 = arith.constant 0 : i32
    %c0_i32_0 = arith.constant 0 : i32
    %c0_i32_1 = arith.constant 0 : i32
    return %arg0, %c0_i32, %c0_i32_0 : i32, i32, i32
  }
  func.func @transform_1(%arg0: i32) -> (i32, i32) {
    %c0_i32 = arith.constant 0 : i32
    %c0_i32_0 = arith.constant 0 : i32
    %c0_i32_1 = arith.constant 0 : i32
    return %c0_i32, %c0_i32_0 : i32, i32
  }
  func.func @transform_2(%arg0: i32) -> (i32, i32) {
    %c0_i32 = arith.constant 0 : i32
    %c0_i32_0 = arith.constant 0 : i32
    %c0_i32_1 = arith.constant 0 : i32
    return %c0_i32, %c0_i32_0 : i32, i32
  }
  func.func @transform_3(%arg0: i32) -> (i32, i32) {
    %c0_i32 = arith.constant 0 : i32
    %c0_i32_0 = arith.constant 0 : i32
    %c0_i32_1 = arith.constant 0 : i32
    return %c0_i32, %c0_i32_0 : i32, i32
  }
  func.func @transform_4(%arg0: i32) -> (i32, i32) {
    %c0_i32 = arith.constant 0 : i32
    %c0_i32_0 = arith.constant 0 : i32
    %c0_i32_1 = arith.constant 0 : i32
    return %c0_i32, %c0_i32_0 : i32, i32
  }
  func.func @transform_5(%arg0: i32) -> (i32, i32) {
    %c0_i32 = arith.constant 0 : i32
    %c0_i32_0 = arith.constant 0 : i32
    %c0_i32_1 = arith.constant 0 : i32
    return %c0_i32, %c0_i32_0 : i32, i32
  }
  func.func @transform_6(%arg0: i32) -> (i32, i32, i32) {
    %c0_i32 = arith.constant 0 : i32
    %c0_i32_0 = arith.constant 0 : i32
    %c0_i32_1 = arith.constant 0 : i32
    return %arg0, %c0_i32, %c0_i32_0 : i32, i32, i32
  }
}

</mosaic_0001>

<bundles_post_ra>
// kernel: search_cnn_forward.3
= control target key start
LH: loop header
LB: loop body
LE: loop exit
PB: predicated region body
PF: predicated region fallthrough
CT: control target
= control target key end

     0   :  { %s2840_s21 = smov 0   ;;  %s4690_s0 = inlined_call_operand.vmem [shape: f32[2,8,1024], index: 0, kind: input, shape index: {}]   ;;  %s4691_s1 = inlined_call_operand.vmem [shape: f32[9,1024], index: 1, kind: input, shape index: {}]   ;;  %s4692_s2 = inlined_call_operand.vmem [shape: bf16[8,72], index: 2, kind: input, shape index: {}]   ;;  %s4693_s3 = inlined_call_operand.vmem [shape: f32[8,1], index: 3, kind: input, shape index: {}]   ;;  %s4694_s4 = inlined_call_operand.vmem [shape: bf16[3,72], index: 4, kind: input, shape index: {}]   ;;  %s4695_s5 = inlined_call_operand.vmem [shape: f32[3,1], index: 5, kind: input, shape index: {}]   ;;  %s4696_s6 = inlined_call_operand.vmem [shape: f32[2,3,1024], index: 6, kind: output, shape index: {}]  }
   0x1 LB: > { %s2400_s22 = sadd.s32 4294967295, %s2789_s21   ;;  %p2404_p0 = scmp.ge.s32.totalorder %s2789_s21, 1  ;;  %s2789_s21 = sphi %s2840_s21, %s16_s21  }
   0x2   : > { %p212_p1 = scmp.lt.s32.totalorder %s2789_s21, 3 }
   0x4   : > { %p213_p2 = pnand %p2404_p0, %p212_p1 }
   0x6   : > { %216 = sbr.rel (%p213_p2) target bundleno = 1255 (0x4e7), region = 44 }
   0xb   : > { %v2851_v0 = vld [vmem:[%s4691_s1 + $0x20] sm:$0xff]  ;;  %v2856_v1 = vld [vmem:[%s4691_s1 + $0x10] sm:$0xff]  ;;  %s2791_s29 = smov 95   ;;  %v2871_v6 = vld [vmem:[%s4691_s1 + $0x28] sm:$0xff]  ;;  %s2792_s16 = smov 96   ;;  %vm369_vm0 = vcmask 785408  }
   0xc   : > { %v2861_v2 = vld [vmem:[%s4691_s1] sm:$0xff]  ;;  %v283_v3 = vperm.slane %v2851_v0, 0  ;;  %v281_v4 = vperm.slane %v2856_v1, 0  ;;  %v2876_v7 = vld [vmem:[%s4691_s1 + $0x18] sm:$0xff]  ;;  %v2882_v8 = vld [vmem:[%s4691_s1 + $0x8] sm:$0xff]  ;;  %v284_v9 = vperm.slane %v2871_v6, 0 }
   0xd   : > { %v279_v5 = vperm.slane %v2861_v2, 0  ;;  %v282_v10 = vperm.slane %v2876_v7, 0  ;;  %v280_v11 = vperm.slane %v2882_v8, 0  ;;  %v2893_v12 = vld [vmem:[%s4691_s1 + $0x38] sm:$0xff]  ;;  %v2898_v13 = vld [vmem:[%s4691_s1 + $0x30] sm:$0xff]  ;;  %v337_v15 = vperm.slane %v2861_v2, 1 }
   0xe   : > { %303 = vrot.lane.b32.xlu2 %v283_v3, %s2791_s29  ;;  %299 = vrot.lane.b32.xlu1 %v281_v4, %s2791_s29  ;;  %v286_v14 = vperm.slane %v2893_v12, 0  ;;  %v285_v16 = vperm.slane %v2898_v13, 0  ;;  %v339_v17 = vperm.slane %v2856_v1, 1  ;;  %v340_v18 = vperm.slane %v2876_v7, 1  ;;  %s2793_s17 = smov 97   ;;  %s2794_s18 = smov 127  }
   0xf   : > { %295 = vrot.lane.b32.xlu0 %v279_v5, %s2791_s29  ;;  %v338_v19 = vperm.slane %v2882_v8, 1  ;;  %v342_v20 = vperm.slane %v2871_v6, 1  ;;  %v343_v21 = vperm.slane %v2898_v13, 1  ;;  %v341_v22 = vperm.slane %v2851_v0, 1  ;;  %s2795_s19 = smov 1   ;;  %s2796_s20 = smov 31  }
  0x10   : > { %v395_v23 = vperm.slane %v2861_v2, 2  ;;  %v396_v24 = vperm.slane %v2882_v8, 2  ;;  %v344_v25 = vperm.slane %v2893_v12, 1  ;;  %v398_v26 = vperm.slane %v2876_v7, 2  ;;  %s2797_s23 = smov 32   ;;  %s2798_s26 = smov 33  }
  0x11   : > { %v399_v27 = vperm.slane %v2851_v0, 2  ;;  %v397_v28 = vperm.slane %v2856_v1, 2  ;;  %v401_v29 = vperm.slane %v2898_v13, 2  ;;  %v402_v30 = vperm.slane %v2893_v12, 2  ;;  %p242_p3 = scmp.lt.s32.totalorder %s2400_s22, 1  ;;  %s2799_s27 = smov 126  }
  0x12   : > { %v400_v31 = vperm.slane %v2871_v6, 2  ;;  %v454_v32 = vperm.slane %v2882_v8, 3  ;;  %v455_v33 = vperm.slane %v2856_v1, 3  ;;  %v453_v34 = vperm.slane %v2861_v2, 3  ;;  %s2800_s28 = smov 94   ;;  %s2801_s30 = smov 64  }
  0x13   : > { %v457_v35 = vperm.slane %v2851_v0, 3  ;;  %v458_v36 = vperm.slane %v2871_v6, 3  ;;  %v456_v37 = vperm.slane %v2876_v7, 3  ;;  %v460_v38 = vperm.slane %v2893_v12, 3  ;;  %s4960_s22 = smov (!%p242_p3, %s2400_s22), 1  ;;  %s2802_s7 = smov 63  }
  0x14   : > { %v511_v39 = vperm.slane %v2861_v2, 5  ;;  %v459_v40 = vperm.slane %v2898_v13, 3  ;;  %v513_v41 = vperm.slane %v2856_v1, 5  ;;  %v514_v42 = vperm.slane %v2876_v7, 5  ;;  %s2427_s14 = sshll.u32 %s4960_s22, 6  ;;  %s2804_s8 = smov 62  }
  0x15   : > { %v512_v43 = vperm.slane %v2882_v8, 5  ;;  %v516_v45 = vperm.slane %v2871_v6, 5  ;;  %v517_v46 = vperm.slane %v2898_v13, 5  ;;  %v515_v47 = vperm.slane %v2851_v0, 5  ;;  %s2428_s13 = sshll.u32 %s4960_s22, 5 }
  0x16   : > { %305 = vrot.lane.b32.xlu2 %v284_v9, %s2791_s29  ;;  %301 = vrot.lane.b32.xlu1 %v282_v10, %s2791_s29  ;;  %v569_v49 = vperm.slane %v2861_v2, 6  ;;  %v570_v50 = vperm.slane %v2882_v8, 6  ;;  %v518_v51 = vperm.slane %v2893_v12, 5  ;;  %v572_v53 = vperm.slane %v2876_v7, 6 }
  0x17   : > { %297 = vrot.lane.b32.xlu0 %v280_v11, %s2791_s29  ;;  %v573_v54 = vperm.slane %v2851_v0, 6  ;;  %v571_v55 = vperm.slane %v2856_v1, 6  ;;  %v575_v59 = vperm.slane %v2898_v13, 6  ;;  %v576_v60 = vperm.slane %v2893_v12, 6 }
  0x18   : > { %v574_v61 = vperm.slane %v2871_v6, 6  ;;  %v628_v4 = vperm.slane %v2882_v8, 7  ;;  %v629_v5 = vperm.slane %v2856_v1, 7  ;;  %v627_v9 = vperm.slane %v2861_v2, 7 }
  0x19   : > { %v630_v8 = vperm.slane %v2876_v7, 7  ;;  %vm427_vm1 = vcmask 793600   ;;  %vm485_vm2 = vcmask 1039360   ;;  %vm543_vm3 = vcmask 7168  }
  0x1a   : > { %vm601_vm4 = vcmask 252928   ;;  %vm659_vm5 = vcmask 261120   ;;  %vm717_vm6 = vcmask 269312   ;;  %vm311_vm7 = vcmask 777216  }
  0x1b   : > { %vm1033_vm8 = vcmask 515072   ;;  %vm988_vm9 = vcmask 523264   ;;  %vm1078_vm10 = vcmask 506880   ;;  %vm943_vm11 = vcmask 769024  }
  0x1c   : > { %vm814_vm12 = vcmask 1031168   ;;  %vm1358_vm13 = vcmask 1043456   ;;  %vm1354_vm14 = vcmask 588800  }
  0x1e   : > { %309 = vrot.lane.b32.xlu1 %v286_v14, %s2791_s29  ;;  %353 = vrot.lane.b32.xlu2 %v337_v15, %s2792_s16  ;;  %v631_v15 = vperm.slane %v2851_v0, 7  ;;  %v633_v0 = vperm.slane %v2898_v13, 7  ;;  %v2777_v13 = vld [vmem:[%s4691_s1 + $0x48] ss:$0 sm:$0xff] }
  0x1f   : > { %307 = vrot.lane.b32.xlu0 %v285_v16, %s2791_s29  ;;  %v632_v16 = vperm.slane %v2871_v6, 7 }
  0x26   : > { %357 = vrot.lane.b32.xlu1 %v339_v17, %s2792_s16  ;;  %359 = vrot.lane.b32.xlu2 %v340_v18, %s2792_s16  ;;  %v634_v18 = vperm.slane %v2893_v12, 7  ;;  %v2775_v12 = vld [vmem:[%s4691_s1 + $0x50] ss:$0 sm:$0xff] }
  0x27   : > { %355 = vrot.lane.b32.xlu0 %v338_v19, %s2792_s16  ;;  %v2774_v19 = vld [vmem:[%s4691_s1 + $0x40] ss:$0 sm:$0xff] }
  0x2e   : > { %363 = vrot.lane.b32.xlu1 %v342_v20, %s2792_s16  ;;  %365 = vrot.lane.b32.xlu2 %v343_v21, %s2792_s16  ;;  %v2776_v21 = vld [vmem:[%s4691_s1 + $0x58] ss:$0 sm:$0xff] }
  0x2f   : > { %361 = vrot.lane.b32.xlu0 %v341_v22, %s2792_s16 }
  0x36   : > { %411 = vrot.lane.b32.xlu1 %v395_v23, %s2793_s17  ;;  %413 = vrot.lane.b32.xlu2 %v396_v24, %s2793_s17 }
  0x37   : > { %367 = vrot.lane.b32.xlu0 %v344_v25, %s2792_s16  ;;  %v2778_v25 = vld [vmem:[%s4691_s1 + $0x68] ss:$0 sm:$0xff] }
  0x3e   : > { %417 = vrot.lane.b32.xlu1 %v398_v26, %s2793_s17  ;;  %419 = vrot.lane.b32.xlu2 %v399_v27, %s2793_s17  ;;  %v2779_v26 = vld [vmem:[%s4691_s1 + $0x70] ss:$0 sm:$0xff]  ;;  %v2780_v27 = vld [vmem:[%s4691_s1 + $0x60] ss:$0 sm:$0xff] }
  0x3f   : > { %415 = vrot.lane.b32.xlu0 %v397_v28, %s2793_s17 }
  0x46   : > { %423 = vrot.lane.b32.xlu1 %v401_v29, %s2793_s17  ;;  %425 = vrot.lane.b32.xlu2 %v402_v30, %s2793_s17 }
  0x47   : > { %421 = vrot.lane.b32.xlu0 %v400_v31, %s2793_s17  ;;  %s251_s17 = scalar_lea.vmem %s4696_s6, %s2428_s13 }
  0x4e   : > { %471 = vrot.lane.b32.xlu1 %v454_v32, %s2794_s18  ;;  %473 = vrot.lane.b32.xlu2 %v455_v33, %s2794_s18 }
  0x4f   : > { %469 = vrot.lane.b32.xlu0 %v453_v34, %s2794_s18 }
  0x56   : > { %477 = vrot.lane.b32.xlu1 %v457_v35, %s2794_s18  ;;  %479 = vrot.lane.b32.xlu2 %v458_v36, %s2794_s18 }
  0x57   : > { %475 = vrot.lane.b32.xlu0 %v456_v37, %s2794_s18 }
  0x5e   : > { %483 = vrot.lane.b32.xlu1 %v460_v38, %s2794_s18  ;;  %527 = vrot.lane.b32.xlu2 %v511_v39, %s2795_s19 }
  0x5f   : > { %481 = vrot.lane.b32.xlu0 %v459_v40, %s2794_s18 }
  0x66   : > { %531 = vrot.lane.b32.xlu1 %v513_v41, %s2795_s19  ;;  %533 = vrot.lane.b32.xlu2 %v514_v42, %s2795_s19  ;;  %v2781_v42 = vld [vmem:[%s4691_s1 + $0x78] ss:$0 sm:$0xff] }
  0x67   : > { %529 = vrot.lane.b32.xlu0 %v512_v43, %s2795_s19 }
  0x68   : > { %v2948_v44 = vpop.permute.xlu2 %303 }
  0x6e   : > { %537 = vrot.lane.b32.xlu1 %v516_v45, %s2795_s19  ;;  %539 = vrot.lane.b32.xlu2 %v517_v46, %s2795_s19 }
  0x6f   : > { %535 = vrot.lane.b32.xlu0 %v515_v47, %s2795_s19 }
  0x70   : > { %v2953_v48 = vpop.permute.xlu2 %305 }
  0x76   : > { %585 = vrot.lane.b32.xlu1 %v569_v49, %s2796_s20  ;;  %587 = vrot.lane.b32.xlu2 %v570_v50, %s2796_s20 }
  0x77   : > { %541 = vrot.lane.b32.xlu0 %v518_v51, %s2795_s19 }
  0x78   : > { %v2958_v52 = vpop.permute.xlu2 %353 }
  0x79   : > { %4787 = vst [vmem:[#allocation2_spill] sm:$0xff] %v2958_v52 }
  0x7e   : > { %591 = vrot.lane.b32.xlu1 %v572_v53, %s2796_s20  ;;  %593 = vrot.lane.b32.xlu2 %v573_v54, %s2796_s20 }
  0x7f   : > { %589 = vrot.lane.b32.xlu0 %v571_v55, %s2796_s20 }
  0x80   : > { %v2963_v56 = vpop.permute.xlu1 %299  ;;  %v2965_v57 = vpop.permute.xlu2 %359 }
  0x81   : > { %v2967_v58 = vpop.permute.xlu0 %295 }
  0x82   : > { %4788 = vst [vmem:[#allocation3_spill] sm:$0xff] %v2967_v58 }
  0x86   : > { %597 = vrot.lane.b32.xlu1 %v575_v59, %s2796_s20  ;;  %599 = vrot.lane.b32.xlu2 %v576_v60, %s2796_s20 }
  0x87   : > { %595 = vrot.lane.b32.xlu0 %v574_v61, %s2796_s20 }
  0x88   : > { %v2972_v62 = vpop.permute.xlu1 %301  ;;  %v2974_v63 = vpop.permute.xlu2 %365 }
  0x89   : > { %v2976_v3 = vpop.permute.xlu0 %297 }
  0x8e   : > { %645 = vrot.lane.b32.xlu1 %v628_v4, %s2797_s23  ;;  %647 = vrot.lane.b32.xlu2 %v629_v5, %s2797_s23 }
  0x8f   : > { %643 = vrot.lane.b32.xlu0 %v627_v9, %s2797_s23 }
  0x90   : > { %v2981_v10 = vpop.permute.xlu1 %309  ;;  %v2983_v11 = vpop.permute.xlu2 %413 }
  0x91   : > { %v2985_v14 = vpop.permute.xlu0 %307 }
  0x96   : > { %651 = vrot.lane.b32.xlu1 %v631_v15, %s2797_s23  ;;  %653 = vrot.lane.b32.xlu2 %v632_v16, %s2797_s23 }
  0x97   : > { %649 = vrot.lane.b32.xlu0 %v630_v8, %s2797_s23 }
  0x98   : > { %v358_v1 = vpop.permute.xlu1 %357  ;;  %v2990_v2 = vpop.permute.xlu2 %419 }
  0x99   : > { %v356_v17 = vpop.permute.xlu0 %355  ;;  %v3036_v28 = vsel %vm369_vm0, %v358_v1, %v2965_v57 }
  0x9a   : > { %v3040_v29 = vsel %vm369_vm0, %v2958_v52, %v356_v17  ;;  %v3043_v30 = vsel %vm369_vm0, %v356_v17, %v358_v1 }
  0x9b   : > { %4792 = vst [vmem:[#allocation7_spill] sm:$0xff] %v3040_v29 }
  0x9e   : > { %657 = vrot.lane.b32.xlu1 %v634_v18, %s2797_s23  ;;  %701 = vrot.lane.b32.xlu2 %v2774_v19, %s2798_s26 }
  0x9f   : > { %655 = vrot.lane.b32.xlu0 %v633_v0, %s2797_s23  ;;  %s3048_s23 = scalar_lea.vmem %s4690_s0, %s2427_s14 }
  0xa0   : > { %v364_v6 = vpop.permute.xlu1 %363  ;;  %v2998_v7 = vpop.permute.xlu2 %425  ;;  %v3053_v31 = vld [vmem:[%s3048_s23 + $0x10] sm:$0xff]  ;;  %v3056_v32 = vld [vmem:[%s3048_s23] sm:$0xff]  ;;  %v3059_v33 = vld [vmem:[%s3048_s23 + $0x8] sm:$0xff] }
  0xa1   : > { %4789 = vst [vmem:[#allocation4_spill] sm:$0xff] %v2998_v7  ;;  %v362_v20 = vpop.permute.xlu0 %361  ;;  %v389_v34 = vmul.f32 %v3036_v28, %v3053_v31  ;;  %v387_v35 = vmul.f32 %v3040_v29, %v3056_v32  ;;  %v388_v36 = vmul.f32 %v3043_v30, %v3059_v33  ;;  %v3071_v39 = vld [vmem:[%s3048_s23 + $0x38] sm:$0xff]  ;;  %v3093_v50 = vld [vmem:[%s3048_s23 + $0x30] sm:$0xff]  ;;  %v3097_v51 = vsel %vm369_vm0, %v364_v6, %v2974_v63  ;;  %v3101_v53 = vld [vmem:[%s3048_s23 + $0x20] sm:$0xff] }
  0xa2   : > { %v386_v41 = vmul.f32 %v2958_v52, %v3071_v39  ;;  %v3085_v47 = vsel %vm369_vm0, %v2965_v57, %v362_v20  ;;  %v3088_v49 = vsel %vm369_vm0, %v362_v20, %v364_v6  ;;  %4796 = vst [vmem:[#allocation11_spill] sm:$0xff] %v3097_v51  ;;  %v3104_v54 = vld [vmem:[%s3048_s23 + $0x18] sm:$0xff]  ;;  %v3111_v60 = vld [vmem:[%s3048_s23 + $0x28] sm:$0xff]  ;;  %v2803_v29 = vmov 0  }
  0xa3   : > { %v2456_v43 = vpack.i.bf16 %v389_v34, %v388_v36  ;;  %4794 = vst [vmem:[#allocation9_spill] sm:$0xff] %v3085_v47  ;;  %v390_v61 = vmul.f32 %v3085_v47, %v3104_v54  ;;  %v392_v5 = vmul.f32 %v3097_v51, %v3111_v60  ;;  %2611 = vset.pattern.permute.xlu1 %v2803_v29 }
  0xa4   : > { %v2451_v45 = vpack.i.bf16 %v387_v35, %v386_v41  ;;  %4795 = vst [vmem:[#allocation10_spill] sm:$0xff] %v3088_v49  ;;  %2772 = vset.pattern.permute.xlu2 %v2803_v29  ;;  %2773 = vset.pattern.permute.xlu0 %v2803_v29 }
  0xa6   : > { %705 = vrot.lane.b32.xlu1 %v2775_v12, %s2798_s26  ;;  %707 = vrot.lane.b32.xlu2 %v2776_v21, %s2798_s26 }
  0xa7   : > { %703 = vrot.lane.b32.xlu0 %v2777_v13, %s2798_s26 }
  0xa8   : > { %v3018_v22 = vpop.permute.xlu1 %411  ;;  %v3020_v23 = vpop.permute.xlu2 %473 }
  0xa9   : > { %4790 = vst [vmem:[#allocation5_spill] sm:$0xff] %v3018_v22  ;;  %v3022_v24 = vpop.permute.xlu0 %367  ;;  %v3135_v18 = vsel %vm427_vm1, %v3018_v22, %v2983_v11  ;;  %v444_v21 = vmul.f32 %v3018_v22, %v3071_v39 }
  0xaa   : > { %4791 = vst [vmem:[#allocation6_spill] sm:$0xff] %v3022_v24  ;;  %v3081_v46 = vsel %vm369_vm0, %v2974_v63, %v3022_v24  ;;  %v391_v63 = vmul.f32 %v3088_v49, %v3101_v53  ;;  %v394_v9 = vmul.f32 %v3022_v24, %v3071_v39 }
  0xab   : > { %4793 = vst [vmem:[#allocation8_spill] sm:$0xff] %v3081_v46  ;;  %v393_v59 = vmul.f32 %v3081_v46, %v3093_v50 }
  0xac   : > { %v2461_v17 = vpack.i.bf16 %v391_v63, %v390_v61  ;;  %4799 = vst [vmem:[#allocation14_spill] sm:$0xff] %v3135_v18  ;;  %v452_v63 = vmul.f32 %v2998_v7, %v3071_v39 }
  0xad   : > { %v2466_v15 = vpack.i.bf16 %v393_v59, %v392_v5 }
  0xae   : > { %711 = vrot.lane.b32.xlu1 %v2778_v25, %s2798_s26  ;;  %713 = vrot.lane.b32.xlu2 %v2779_v26, %s2798_s26 }
  0xaf   : > { %709 = vrot.lane.b32.xlu0 %v2780_v27, %s2798_s26 }
  0xb0   : > { %v418_v37 = vpop.permute.xlu1 %417  ;;  %v3068_v38 = vpop.permute.xlu2 %479 }
  0xb1   : > { %v416_v40 = vpop.permute.xlu0 %415  ;;  %v3141_v19 = vsel %vm427_vm1, %v418_v37, %v2990_v2 }
  0xb2   : > { %v3123_v16 = vsel %vm427_vm1, %v2983_v11, %v416_v40  ;;  %v3126_v8 = vsel %vm427_vm1, %v416_v40, %v418_v37  ;;  %4800 = vst [vmem:[#allocation15_spill] sm:$0xff] %v3141_v19  ;;  %v448_v25 = vmul.f32 %v3141_v19, %v3104_v54 }
  0xb3   : > { %v446_v0 = vmul.f32 %v3123_v16, %v3059_v33  ;;  %v447_v6 = vmul.f32 %v3126_v8, %v3053_v31 }
  0xb5   : > { %v2476_v27 = vpack.i.bf16 %v447_v6, %v446_v0 }
  0xb6   : > { %2457 = vrot.lane.b32.xlu2 %v2456_v43, %s2794_s18  ;;  %2452 = vrot.lane.b32.xlu1 %v2451_v45, %s2794_s18 }
  0xb7   : > { %715 = vrot.lane.b32.xlu0 %v2781_v42, %s2798_s26 }
  0xb8   : > { %v424_v55 = vpop.permute.xlu1 %423  ;;  %v3106_v57 = vpop.permute.xlu2 %527 }
  0xb9   : > { %4797 = vst [vmem:[#allocation12_spill] sm:$0xff] %v3106_v57  ;;  %v422_v4 = vpop.permute.xlu0 %421  ;;  %v3166_v36 = vsel %vm427_vm1, %v424_v55, %v2998_v7 }
  0xba   : > { %v3130_v1 = vsel %vm427_vm1, %v2990_v2, %v422_v4  ;;  %v445_v2 = vmul.f32 %v3135_v18, %v3056_v32  ;;  %4803 = vst [vmem:[#allocation18_spill] sm:$0xff] %v3166_v36  ;;  %v3169_v37 = vsel %vm427_vm1, %v422_v4, %v424_v55  ;;  %v451_v45 = vmul.f32 %v3166_v36, %v3093_v50 }
  0xbb   : > { %4798 = vst [vmem:[#allocation13_spill] sm:$0xff] %v3130_v1  ;;  %v449_v11 = vmul.f32 %v3130_v1, %v3101_v53  ;;  %v450_v55 = vmul.f32 %v3169_v37, %v3111_v60 }
  0xbc   : > { %v2471_v35 = vpack.i.bf16 %v445_v2, %v444_v21  ;;  %4804 = vst [vmem:[#allocation19_spill] sm:$0xff] %v3169_v37 }
  0xbd   : > { %v2481_v26 = vpack.i.bf16 %v449_v11, %v448_v25 }
  0xbe   : > { %768 = vrot.lane.b32.xlu2 %v394_v9, %s2794_s18  ;;  %2467 = vrot.lane.b32.xlu1 %v2466_v15, %s2794_s18  ;;  %v2486_v9 = vpack.i.bf16 %v451_v45, %v450_v55 }
  0xbf   : > { %2462 = vrot.lane.b32.xlu0 %v2461_v17, %s2794_s18 }
  0xc0   : > { %v472_v20 = vpop.permute.xlu1 %471  ;;  %v3150_v12 = vpop.permute.xlu2 %533 }
  0xc1   : > { %v3154_v13 = vpop.permute.xlu0 %469  ;;  %v3202_v17 = vsel %vm485_vm2, %v472_v20, %v3020_v23 }
  0xc2   : > { %4801 = vst [vmem:[#allocation16_spill] sm:$0xff] %v3154_v13  ;;  %v3162_v34 = vsel %vm485_vm2, %v3154_v13, %v472_v20  ;;  %v502_v40 = vmul.f32 %v3154_v13, %v3071_v39  ;;  %v504_v20 = vmul.f32 %v3202_v17, %v3059_v33 }
  0xc3   : > { %4802 = vst [vmem:[#allocation17_spill] sm:$0xff] %v3162_v34  ;;  %v503_v43 = vmul.f32 %v3162_v34, %v3056_v32 }
  0xc5   : > { %v2491_v61 = vpack.i.bf16 %v503_v43, %v502_v40 }
  0xc6   : > { %2482 = vrot.lane.b32.xlu2 %v2481_v26, %s2799_s27  ;;  %2477 = vrot.lane.b32.xlu1 %v2476_v27, %s2799_s27 }
  0xc7   : > { %2472 = vrot.lane.b32.xlu0 %v2471_v35, %s2799_s27 }
  0xc8   : > { %v478_v41 = vpop.permute.xlu1 %477  ;;  %v3176_v42 = vpop.permute.xlu2 %539 }
  0xc9   : > { %v476_v59 = vpop.permute.xlu0 %475  ;;  %v3188_v4 = vsel %vm485_vm2, %v478_v41, %v3068_v38 }
  0xca   : > { %4805 = vst [vmem:[#allocation20_spill] sm:$0xff] %v3188_v4  ;;  %v3191_v5 = vsel %vm485_vm2, %v476_v59, %v478_v41  ;;  %v3195_v15 = vsel %vm485_vm2, %v3020_v23, %v476_v59  ;;  %v507_v0 = vmul.f32 %v3188_v4, %v3101_v53  ;;  %v2511_v59 = vpack.i.bf16 %v3059_v33, %v3056_v32 }
  0xcb   : > { %4806 = vst [vmem:[#allocation21_spill] sm:$0xff] %v3191_v5  ;;  %v506_v6 = vmul.f32 %v3191_v5, %v3104_v54  ;;  %v505_v2 = vmul.f32 %v3195_v15, %v3053_v31 }
  0xcd   : > { %v2501_v40 = vpack.i.bf16 %v507_v0, %v506_v6  ;;  %v2496_v43 = vpack.i.bf16 %v505_v2, %v504_v20  ;;  %v2526_v20 = vpack.i.bf16 %v3071_v39, %v3093_v50 }
  0xce   : > { %2492 = vrot.lane.b32.xlu2 %v2491_v61, %s2792_s16  ;;  %812 = vrot.lane.b32.xlu1 %v452_v63, %s2799_s27  ;;  %v2516_v61 = vpack.i.bf16 %v3104_v54, %v3053_v31 }
  0xcf   : > { %2487 = vrot.lane.b32.xlu0 %v2486_v9, %s2799_s27 }
  0xd0   : > { %v3208_v11 = vpop.permute.xlu1 %483  ;;  %v3210_v21 = vpop.permute.xlu2 %587 }
  0xd1   : > { %4807 = vst [vmem:[#allocation22_spill] sm:$0xff] %v3208_v11  ;;  %v482_v25 = vpop.permute.xlu0 %481  ;;  %v510_v63 = vmul.f32 %v3208_v11, %v3071_v39 }
  0xd2   : > { %v3216_v26 = vsel %vm485_vm2, %v3068_v38, %v482_v25  ;;  %v3220_v23 = vsel %vm485_vm2, %v482_v25, %v3208_v11 }
  0xd3   : > { %4808 = vst [vmem:[#allocation23_spill] sm:$0xff] %v3216_v26  ;;  %v508_v27 = vmul.f32 %v3216_v26, %v3111_v60  ;;  %v509_v35 = vmul.f32 %v3220_v23, %v3093_v50 }
  0xd4   : > { %4809 = vst [vmem:[#allocation24_spill] sm:$0xff] %v3220_v23 }
  0xd5   : > { %v2506_v41 = vpack.i.bf16 %v509_v35, %v508_v27  ;;  %v560_v27 = vmul.f32 %v3106_v57, %v3056_v32  ;;  %v2521_v35 = vpack.i.bf16 %v3111_v60, %v3101_v53 }
  0xd6   : > { %2502 = vrot.lane.b32.xlu1 %v2501_v40, %s2792_s16 }
  0xd7   : > { %2507 = vrot.lane.b32.xlu2 %v2506_v41, %s2792_s16  ;;  %2497 = vrot.lane.b32.xlu0 %v2496_v43, %s2792_s16 }
  0xd8   : > { %v532_v38 = vpop.permute.xlu1 %531  ;;  %v3231_v45 = vpop.permute.xlu2 %593 }
  0xd9   : > { %v530_v55 = vpop.permute.xlu0 %529 }
  0xda   : > { %v3241_v9 = vsel %vm543_vm3, %v3106_v57, %v530_v55 }
  0xdb   : > { %4810 = vst [vmem:[#allocation25_spill] sm:$0xff] %v3241_v9  ;;  %v561_v2 = vmul.f32 %v3241_v9, %v3059_v33 }
  0xdd   : > { %v2531_v43 = vpack.i.bf16 %v561_v2, %v560_v27 }
  0xde   : > { %2512 = vrot.lane.b32.xlu1 %v2511_v59, %s2791_s29  ;;  %v3265_v59 = vsel %vm543_vm3, %v532_v38, %v3150_v12 }
  0xdf   : > { %2517 = vrot.lane.b32.xlu2 %v2516_v61, %s2791_s29  ;;  %857 = vrot.lane.b32.xlu0 %v510_v63, %s2792_s16  ;;  %4813 = vst [vmem:[#allocation28_spill] sm:$0xff] %v3265_v59  ;;  %v3268_v61 = vsel %vm543_vm3, %v530_v55, %v532_v38  ;;  %v563_v55 = vmul.f32 %v3265_v59, %v3104_v54 }
  0xe0   : > { %v538_v0 = vpop.permute.xlu1 %537  ;;  %v3246_v6 = vpop.permute.xlu2 %599  ;;  %4814 = vst [vmem:[#allocation29_spill] sm:$0xff] %v3268_v61 }
  0xe1   : > { %v536_v25 = vpop.permute.xlu0 %535  ;;  %v3275_v63 = vsel %vm543_vm3, %v538_v0, %v3176_v42  ;;  %v626_v23 = vmul.f32 %v3246_v6, %v3056_v32 }
  0xe2   : > { %v3258_v40 = vsel %vm543_vm3, %v3150_v12, %v536_v25  ;;  %v3261_v41 = vsel %vm543_vm3, %v536_v25, %v538_v0  ;;  %4815 = vst [vmem:[#allocation30_spill] sm:$0xff] %v3275_v63 }
  0xe3   : > { %4811 = vst [vmem:[#allocation26_spill] sm:$0xff] %v3258_v40  ;;  %v564_v2 = vmul.f32 %v3258_v40, %v3101_v53  ;;  %v565_v12 = vmul.f32 %v3261_v41, %v3111_v60 }
  0xe4   : > { %4812 = vst [vmem:[#allocation27_spill] sm:$0xff] %v3261_v41 }
  0xe5   : > { %v2541_v11 = vpack.i.bf16 %v565_v12, %v564_v2 }
  0xe6   : > { %2527 = vrot.lane.b32.xlu1 %v2526_v20, %s2791_s29  ;;  %v562_v20 = vmul.f32 %v3268_v61, %v3053_v31 }
  0xe7   : > { %2532 = vrot.lane.b32.xlu2 %v2531_v43, %s2800_s28  ;;  %2522 = vrot.lane.b32.xlu0 %v2521_v35, %s2791_s29  ;;  %v566_v35 = vmul.f32 %v3275_v63, %v3093_v50 }
  0xe8   : > { %v3281_v25 = vpop.permute.xlu1 %585  ;;  %v3283_v38 = vpop.permute.xlu2 %647  ;;  %v2536_v26 = vpack.i.bf16 %v563_v55, %v562_v20 }
  0xe9   : > { %4816 = vst [vmem:[#allocation31_spill] sm:$0xff] %v3281_v25  ;;  %v3289_v27 = vpop.permute.xlu0 %541  ;;  %v3303_v7 = vsel %vm601_vm4, %v3281_v25, %v3210_v21 }
  0xea   : > { %v3294_v0 = vsel %vm543_vm3, %v3176_v42, %v3289_v27  ;;  %4818 = vst [vmem:[#allocation33_spill] sm:$0xff] %v3303_v7  ;;  %v618_v42 = vmul.f32 %v3281_v25, %v3056_v32  ;;  %v619_v2 = vmul.f32 %v3303_v7, %v3059_v33 }
  0xeb   : > { %4817 = vst [vmem:[#allocation32_spill] sm:$0xff] %v3294_v0  ;;  %v567_v43 = vmul.f32 %v3294_v0, %v3071_v39 }
  0xec   : > { %v2551_v55 = vpack.i.bf16 %v619_v2, %v618_v42 }
  0xed   : > { %v2546_v37 = vpack.i.bf16 %v567_v43, %v566_v35  ;;  %v568_v43 = vmul.f32 %v3289_v27, %v3056_v32 }
  0xee   : > { %2542 = vrot.lane.b32.xlu1 %v2541_v11, %s2800_s28 }
  0xef   : > { %2547 = vrot.lane.b32.xlu2 %v2546_v37, %s2800_s28  ;;  %2537 = vrot.lane.b32.xlu0 %v2536_v26, %s2800_s28 }
  0xf0   : > { %v592_v63 = vpop.permute.xlu1 %591  ;;  %v3310_v36 = vpop.permute.xlu2 %653 }
  0xf1   : > { %v590_v12 = vpop.permute.xlu0 %589 }
  0xf2   : > { %v3316_v35 = vsel %vm601_vm4, %v3210_v21, %v590_v12  ;;  %v3319_v11 = vsel %vm601_vm4, %v590_v12, %v592_v63  ;;  %v3332_v21 = vsel %vm601_vm4, %v592_v63, %v3231_v45 }
  0xf3   : > { %4819 = vst [vmem:[#allocation34_spill] sm:$0xff] %v3316_v35  ;;  %v620_v37 = vmul.f32 %v3316_v35, %v3053_v31  ;;  %v621_v26 = vmul.f32 %v3319_v11, %v3104_v54  ;;  %v622_v63 = vmul.f32 %v3332_v21, %v3101_v53 }
  0xf4   : > { %4820 = vst [vmem:[#allocation35_spill] sm:$0xff] %v3319_v11 }
  0xf5   : > { %v2556_v20 = vpack.i.bf16 %v621_v26, %v620_v37  ;;  %4821 = vst [vmem:[#allocation36_spill] sm:$0xff] %v3332_v21 }
  0xf6   : > { %2552 = vrot.lane.b32.xlu1 %v2551_v55, %s2801_s30 }
  0xf7   : > { %2557 = vrot.lane.b32.xlu2 %v2556_v20, %s2801_s30  ;;  %941 = vrot.lane.b32.xlu0 %v568_v43, %s2800_s28 }
  0xf8   : > { %v598_v12 = vpop.permute.xlu1 %597  ;;  %v3334_v0 = vpop.permute.xlu2 %701 }
  0xf9   : > { %4822 = vst [vmem:[#allocation37_spill] sm:$0xff] %v3334_v0  ;;  %v3338_v42 = vsel %vm601_vm4, %v598_v12, %v3246_v6  ;;  %v596_v2 = vpop.permute.xlu0 %595 }
  0xfa   : > { %4823 = vst [vmem:[#allocation38_spill] sm:$0xff] %v3338_v42  ;;  %v625_v37 = vmul.f32 %v3338_v42, %v3071_v39  ;;  %v3344_v26 = vsel %vm601_vm4, %v3231_v45, %v596_v2  ;;  %v3347_v55 = vsel %vm601_vm4, %v596_v2, %v598_v12 }
  0xfb   : > { %4824 = vst [vmem:[#allocation39_spill] sm:$0xff] %v3344_v26  ;;  %v623_v20 = vmul.f32 %v3344_v26, %v3111_v60  ;;  %v624_v43 = vmul.f32 %v3347_v55, %v3093_v50 }
  0xfc   : > { %4825 = vst [vmem:[#allocation40_spill] sm:$0xff] %v3347_v55 }
  0xfd   : > { %v2561_v42 = vpack.i.bf16 %v623_v20, %v622_v63  ;;  %v2566_v51 = vpack.i.bf16 %v625_v37, %v624_v43 }
  0xff   : > { %986 = vrot.lane.b32.xlu2 %v626_v23, %s2801_s30  ;;  %2562 = vrot.lane.b32.xlu0 %v2561_v42, %s2801_s30 }
 0x100   : > { %2567 = vrot.lane.b32.xlu1 %v2566_v51, %s2801_s30  ;;  %v646_v45 = vpop.permute.xlu1 %645  ;;  %v708_v12 = vpop.permute.xlu2 %707 }
 0x101   : > { %v3360_v2 = vpop.permute.xlu0 %643  ;;  %v3373_v51 = vsel %vm659_vm5, %v646_v45, %v3283_v38 }
 0x102   : > { %4826 = vst [vmem:[#allocation41_spill] sm:$0xff] %v3360_v2  ;;  %v3364_v18 = vsel %vm659_vm5, %v3360_v2, %v646_v45  ;;  %v676_v55 = vmul.f32 %v3360_v2, %v3056_v32  ;;  %v678_v45 = vmul.f32 %v3373_v51, %v3053_v31 }
 0x103   : > { %4827 = vst [vmem:[#allocation42_spill] sm:$0xff] %v3364_v18  ;;  %v677_v37 = vmul.f32 %v3364_v18, %v3059_v33 }
 0x104   : > { %4828 = vst [vmem:[#allocation43_spill] sm:$0xff] %v3373_v51 }
 0x105   : > { %v2571_v23 = vpack.i.bf16 %v677_v37, %v676_v55 }
 0x107   : > { %2572 = vrot.lane.b32.xlu0 %v2571_v23, %s2802_s7 }
 0x108   : > { %v652_v42 = vpop.permute.xlu1 %651  ;;  %v714_v63 = vpop.permute.xlu2 %713 }
 0x109   : > { %v3377_v20 = vsel %vm659_vm5, %v652_v42, %v3310_v36  ;;  %v650_v43 = vpop.permute.xlu0 %649 }
 0x10a   : > { %4829 = vst [vmem:[#allocation44_spill] sm:$0xff] %v3377_v20  ;;  %v681_v46 = vmul.f32 %v3377_v20, %v3111_v60  ;;  %v3383_v55 = vsel %vm659_vm5, %v3283_v38, %v650_v43  ;;  %v3386_v37 = vsel %vm659_vm5, %v650_v43, %v652_v42 }
 0x10b   : > { %4830 = vst [vmem:[#allocation45_spill] sm:$0xff] %v3383_v55  ;;  %v679_v23 = vmul.f32 %v3383_v55, %v3104_v54  ;;  %v680_v34 = vmul.f32 %v3386_v37, %v3101_v53 }
 0x10c   : > { %4831 = vst [vmem:[#allocation46_spill] sm:$0xff] %v3386_v37 }
 0x10d   : > { %v2581_v22 = vpack.i.bf16 %v681_v46, %v680_v34  ;;  %v2576_v13 = vpack.i.bf16 %v679_v23, %v678_v45 }
 0x10f   : > { %2582 = vrot.lane.b32.xlu2 %v2581_v22, %s2802_s7  ;;  %2577 = vrot.lane.b32.xlu1 %v2576_v13, %s2802_s7 }
 0x110   : > { %v3396_v38 = vpop.permute.xlu1 %657  ;;  %v3398_v42 = vpop.permute.xlu2 %2457 }
 0x111   : > { %v656_v43 = vpop.permute.xlu0 %655  ;;  %v684_v34 = vmul.f32 %v3396_v38, %v3056_v32  ;;  %v2459_v20 = vunpack.i.l.bf16 %v3398_v42 }
 0x112   : > { %v3402_v24 = vsel %vm659_vm5, %v3310_v36, %v656_v43  ;;  %v3406_v46 = vsel %vm659_vm5, %v656_v43, %v3396_v38 }
 0x113   : > { %4832 = vst [vmem:[#allocation47_spill] sm:$0xff] %v3402_v24  ;;  %v682_v29 = vmul.f32 %v3402_v24, %v3093_v50  ;;  %v683_v22 = vmul.f32 %v3406_v46, %v3071_v39 }
 0x114   : > { %4833 = vst [vmem:[#allocation48_spill] sm:$0xff] %v3406_v46 }
 0x115   : > { %v2586_v13 = vpack.i.bf16 %v683_v22, %v682_v29 }
 0x117   : > { %2587 = vrot.lane.b32.xlu0 %v2586_v13, %s2802_s7  ;;  %1031 = vrot.lane.b32.xlu1 %v684_v34, %s2802_s7  ;;  %v734_v13 = vmul.f32 %v3334_v0, %v3056_v32 }
 0x118   : > { %v706_v36 = vpop.permute.xlu1 %705  ;;  %v3416_v45 = vpop.permute.xlu2 %768 }
 0x119   : > { %v3419_v23 = vsel %vm717_vm6, %v706_v36, %v708_v12  ;;  %v704_v43 = vpop.permute.xlu0 %703 }
 0x11a   : > { %4834 = vst [vmem:[#allocation49_spill] sm:$0xff] %v3419_v23  ;;  %v737_v24 = vmul.f32 %v3419_v23, %v3104_v54  ;;  %v3425_v29 = vsel %vm717_vm6, %v3334_v0, %v704_v43  ;;  %v3428_v22 = vsel %vm717_vm6, %v704_v43, %v706_v36 }
 0x11b   : > { %4835 = vst [vmem:[#allocation50_spill] sm:$0xff] %v3425_v29  ;;  %v735_v34 = vmul.f32 %v3425_v29, %v3059_v33  ;;  %v736_v46 = vmul.f32 %v3428_v22, %v3053_v31 }
 0x11c   : > { %4836 = vst [vmem:[#allocation51_spill] sm:$0xff] %v3428_v22 }
 0x11d   : > { %v2591_v57 = vpack.i.bf16 %v735_v34, %v734_v13  ;;  %v2596_v52 = vpack.i.bf16 %v737_v24, %v736_v46 }
 0x11f   : > { %2592 = vrot.lane.b32.xlu2 %v2591_v57, %s2804_s8  ;;  %2597 = vrot.lane.b32.xlu0 %v2596_v52, %s2804_s8 }
 0x120   : > { %v712_v41 = vpop.permute.xlu1 %711  ;;  %v3438_v59 = vpop.permute.xlu2 %2482 }
 0x121   : > { %v710_v36 = vpop.permute.xlu0 %709  ;;  %v3452_v52 = vsel %vm717_vm6, %v712_v41, %v714_v63 }
 0x122   : > { %v3441_v43 = vsel %vm717_vm6, %v708_v12, %v710_v36  ;;  %v3444_v2 = vsel %vm717_vm6, %v710_v36, %v712_v41  ;;  %4839 = vst [vmem:[#allocation54_spill] sm:$0xff] %v3452_v52 }
 0x123   : > { %4837 = vst [vmem:[#allocation52_spill] sm:$0xff] %v3441_v43  ;;  %v738_v40 = vmul.f32 %v3441_v43, %v3101_v53  ;;  %v739_v24 = vmul.f32 %v3444_v2, %v3111_v60 }
 0x124   : > { %4838 = vst [vmem:[#allocation53_spill] sm:$0xff] %v3444_v2 }
 0x125   : > { %v2601_v46 = vpack.i.bf16 %v739_v24, %v738_v40  ;;  %v740_v40 = vmul.f32 %v3452_v52, %v3093_v50  ;;  %v2460_v52 = vunpack.i.h.bf16 %v3398_v42 }
 0x127   : > { %2602 = vrot.lane.b32.xlu1 %v2601_v46, %s2804_s8  ;;  %v278_v46 = vld [vmem:[%s4693_s3] sm:$0xff] }
 0x128   : > { %v2453_v57 = vpop.permute.xlu1 %2452  ;;  %v3456_v12 = vpop.permute.xlu2 %2492 }
 0x129   : > { %v3454_v13 = vpop.permute.xlu0 %715  ;;  %v2455_v24 = vunpack.i.h.bf16 %v2453_v57  ;;  %v2454_v55 = vunpack.i.l.bf16 %v2453_v57 }
 0x12a   : > { %v3460_v34 = vsel %vm717_vm6, %v714_v63, %v3454_v13  ;;  %v742_v36 = vmul.f32 %v3454_v13, %v3056_v32  ;;  %v3475_v63 = vsel %vm311_vm7, %v2967_v58, %v2976_v3 }
 0x12b   : > { %4840 = vst [vmem:[#allocation55_spill] sm:$0xff] %v3460_v34  ;;  %v741_v41 = vmul.f32 %v3460_v34, %v3071_v39  ;;  %v3484_v34 = vsel %vm311_vm7, %v2976_v3, %v2963_v56  ;;  %v329_v26 = vmul.f32 %v3475_v63, %v3056_v32  ;;  %v770_v42 = vsel %vm485_vm2, %v2454_v55, %v2455_v24 }
 0x12c   : > { %1076 = vrot.lane.b32.xlu0 %v742_v36, %s2804_s8  ;;  %4841 = vst [vmem:[#allocation56_spill] sm:$0xff] %v3475_v63  ;;  %v771_v36 = vsel %vm485_vm2, %v2455_v24, %v2459_v20  ;;  %v330_v57 = vmul.f32 %v3484_v34, %v3059_v33  ;;  %v3500_v32 = vsel %vm311_vm7, %v2972_v62, %v2948_v44 }
 0x12d   : > { %v2606_v25 = vpack.i.bf16 %v741_v41, %v740_v40  ;;  %4842 = vst [vmem:[#allocation57_spill] sm:$0xff] %v3484_v34  ;;  %v1097_v43 = vpack.c.bf16 %v771_v36, %v329_v26  ;;  %v772_v40 = vsel %vm485_vm2, %v2459_v20, %v2460_v52 }
 0x12e   : > { %4843 = vst [vmem:[#allocation58_spill] sm:$0xff] %v3500_v32  ;;  %v1098_v26 = vpack.c.bf16 %v772_v40, %v330_v57 }
 0x12f   : > { %2607 = vrot.lane.b32.xlu2 %v2606_v25, %s2804_s8  ;;  %1143 = vperm.xlu1 %2611, %v278_v46   ;;  %v328_v25 = vmul.f32 %v2967_v58, %v3071_v39  ;;  %v3508_v39 = vsel %vm311_vm7, %v2948_v44, %v2953_v48 }
 0x130   : > { %v2468_v23 = vpop.permute.xlu1 %2467  ;;  %4844 = vst [vmem:[#allocation59_spill] sm:$0xff] %v3508_v39  ;;  %v333_v44 = vmul.f32 %v3508_v39, %v3101_v53 }
 0x131   : > { %v2463_v37 = vpop.permute.xlu0 %2462  ;;  %v3494_v3 = vpop.permute.xlu2 %2507  ;;  %v1096_v20 = vpack.c.bf16 %v770_v42, %v328_v25  ;;  %v2469_v55 = vunpack.i.l.bf16 %v2468_v23 }
 0x132   : > { %v2465_v41 = vunpack.i.h.bf16 %v2463_v37  ;;  %v2464_v46 = vunpack.i.l.bf16 %v2463_v37  ;;  %v3513_v37 = vsel %vm311_vm7, %v2963_v56, %v2972_v62  ;;  %v2470_v56 = vunpack.i.h.bf16 %v2468_v23 }
 0x133   : > { %4845 = vst [vmem:[#allocation60_spill] sm:$0xff] %v3513_v37  ;;  %v331_v57 = vmul.f32 %v3513_v37, %v3053_v31  ;;  %v3531_v62 = vsel %vm311_vm7, %v2985_v14, %v2981_v10  ;;  %v3542_v31 = vsel %vm311_vm7, %v2953_v48, %v2985_v14 }
 0x134   : > { %1193 = vrot.lane.b32.xlu0 %v1097_v43, %s2798_s26  ;;  %v774_v33 = vsel %vm485_vm2, %v2464_v46, %v2465_v41  ;;  %v332_v43 = vmul.f32 %v3500_v32, %v3104_v54  ;;  %v775_v42 = vsel %vm485_vm2, %v2465_v41, %v2469_v55  ;;  %v773_v25 = vsel %vm485_vm2, %v2460_v52, %v2464_v46 }
 0x135   : > { %4846 = vst [vmem:[#allocation61_spill] sm:$0xff] %v3531_v62  ;;  %v1099_v41 = vpack.c.bf16 %v773_v25, %v331_v57  ;;  %v777_v53 = vsel %vm485_vm2, %v2470_v56, %v3416_v45  ;;  %v335_v23 = vmul.f32 %v3531_v62, %v3093_v50 }
 0x136   : > { %v1100_v40 = vpack.c.bf16 %v774_v33, %v332_v43  ;;  %4847 = vst [vmem:[#allocation62_spill] sm:$0xff] %v3542_v31  ;;  %v776_v33 = vsel %vm485_vm2, %v2469_v55, %v2470_v56  ;;  %v334_v43 = vmul.f32 %v3542_v31, %v3111_v60 }
 0x137   : > { %1195 = vrot.lane.b32.xlu1 %v1098_v26, %s2798_s26  ;;  %1191 = vrot.lane.b32.xlu2 %v1096_v20, %s2798_s26  ;;  %v1101_v26 = vpack.c.bf16 %v775_v42, %v333_v44  ;;  %v1103_v20 = vpack.c.bf16 %v777_v53, %v335_v23 }
 0x138   : > { %v3517_v24 = vpop.permute.xlu1 %2477 }
 0x139   : > { %v3519_v36 = vpop.permute.xlu0 %2472  ;;  %v3533_v54 = vpop.permute.xlu2 %2517 }
 0x13c   : > { %1199 = vrot.lane.b32.xlu0 %v1100_v40, %s2798_s26  ;;  %v1102_v40 = vpack.c.bf16 %v776_v33, %v334_v43 }
 0x13f   : > { %1201 = vrot.lane.b32.xlu1 %v1101_v26, %s2798_s26  ;;  %1197 = vrot.lane.b32.xlu2 %v1099_v41, %s2798_s26 }
 0x140   : > { %v3546_v52 = vpop.permute.xlu1 %812 }
 0x141   : > { %v3548_v46 = vpop.permute.xlu0 %2487  ;;  %v3554_v42 = vpop.permute.xlu2 %2532 }
 0x142   : > { %v4759_v61 = vunpack.i.h.bf16 %v3554_v42 }
 0x144   : > { %1205 = vrot.lane.b32.xlu0 %v1103_v20, %s2798_s26 }
 0x147   : > { %1203 = vrot.lane.b32.xlu2 %v1102_v40, %s2798_s26 }
 0x148   : > { %v3557_v48 = vpop.permute.xlu1 %2502 }
 0x149   : > { %v3559_v14 = vpop.permute.xlu0 %2497  ;;  %v3563_v25 = vpop.permute.xlu2 %2547 }
 0x150   : > { %v3561_v50 = vpop.permute.xlu1 %2512 }
 0x151   : > { %v3565_v44 = vpop.permute.xlu0 %857  ;;  %v3571_v57 = vpop.permute.xlu2 %2557  ;;  %v2514_v0 = vunpack.i.l.bf16 %v3561_v50 }
 0x158   : > { %v3567_v55 = vpop.permute.xlu1 %2527 }
 0x159   : > { %v3569_v60 = vpop.permute.xlu0 %2522  ;;  %v987_v41 = vpop.permute.xlu2 %986 }
 0x160   : > { %v3573_v56 = vpop.permute.xlu1 %2542 }
 0x161   : > { %v3575_v26 = vpop.permute.xlu0 %2537 }
 0x168   : > { %v3577_v53 = vpop.permute.xlu1 %2552 }
 0x169   : > { %v3579_v23 = vpop.permute.xlu0 %941  ;;  %v3581_v20 = vpop.permute.xlu2 %2582  ;;  %v4760_v5 = vunpack.i.h.bf16 %v3577_v53 }
 0x16a   : > { %v2585_v33 = vunpack.i.h.bf16 %v3581_v20  ;;  %v4746_v43 = vunpack.i.l.bf16 %v3581_v20 }
 0x16c   : > { %v3597_v37 = vsel %vm1033_vm8, %v4746_v43, %v2585_v33 }
 0x171   : > { %v3585_v40 = vpop.permute.xlu0 %2562 }
 0x172   : > { %v2565_v58 = vunpack.i.h.bf16 %v3585_v40  ;;  %v4743_v62 = vunpack.i.l.bf16 %v3585_v40  ;;  %v2568_v31 = vpop.permute.xlu1 %2567 }
 0x173   : > { %v2570_v39 = vunpack.i.h.bf16 %v2568_v31  ;;  %v2569_v63 = vunpack.i.l.bf16 %v2568_v31 }
 0x174   : > { %v3592_v32 = vsel %vm988_vm9, %v4743_v62, %v2565_v58  ;;  %v2554_v62 = vunpack.i.l.bf16 %v3577_v53 }
 0x175   : > { %v3600_v34 = vsel %vm988_vm9, %v2570_v39, %v987_v41  ;;  %v3605_v47 = vsel %vm988_vm9, %v2565_v58, %v2569_v63 }
 0x179   : > { %v2593_v31 = vpop.permute.xlu2 %2592  ;;  %v3607_v2 = vpop.permute.xlu0 %2572 }
 0x17a   : > { %v2595_v19 = vunpack.i.h.bf16 %v2593_v31  ;;  %v2594_v49 = vunpack.i.l.bf16 %v2593_v31  ;;  %v2574_v43 = vunpack.i.l.bf16 %v3607_v2  ;;  %v4756_v58 = vunpack.i.h.bf16 %v3607_v2 }
 0x17b   : > { %v2534_v31 = vunpack.i.l.bf16 %v3554_v42 }
 0x17c   : > { %v1132_v1 = vpack.c.bf16 %v2594_v49, %v2594_v49  ;;  %v1123_v11 = vpack.c.bf16 %v2574_v43, %v2554_v62  ;;  %v1079_v41 = vsel %vm1078_vm10, %v2594_v49, %v2595_v19  ;;  %v1034_v21 = vsel %vm1033_vm8, %v2574_v43, %v4756_v58 }
 0x17d   : > { %v1133_v9 = vpack.c.bf16 %v1079_v41, %v1079_v41  ;;  %v4848_v41 = vunpack.i.h.bf16 %v3561_v50  ;;  %v944_v4 = vsel %vm943_vm11, %v2534_v31, %v4759_v61  ;;  %v1114_v51 = vpack.c.bf16 %v2534_v31, %v2514_v0 }
 0x17e   : > { %1263 = vrot.lane.b32.xlu1 %v1132_v1, %s2798_s26  ;;  %1245 = vrot.lane.b32.xlu0 %v1123_v11, %s2798_s26  ;;  %v989_v11 = vsel %vm988_vm9, %v2554_v62, %v4760_v5 }
 0x17f   : > { %1265 = vrot.lane.b32.xlu2 %v1133_v9, %s2798_s26  ;;  %v900_v1 = vsel %vm311_vm7, %v2514_v0, %v4848_v41  ;;  %v1124_v9 = vpack.c.bf16 %v1034_v21, %v989_v11  ;;  %v3645_v21 = vsel %vm988_vm9, %v2569_v63, %v2570_v39 }
 0x180   : > { %v1115_v18 = vpack.c.bf16 %v944_v4, %v900_v1 }
 0x181   : > { %v3621_v49 = vpop.permute.xlu1 %2577 }
 0x182   : > { %v2580_v22 = vunpack.i.h.bf16 %v3621_v49 }
 0x186   : > { %1247 = vrot.lane.b32.xlu1 %v1124_v9, %s2798_s26  ;;  %1229 = vrot.lane.b32.xlu0 %v1115_v18, %s2798_s26  ;;  %v2475_v9 = vunpack.i.h.bf16 %v3519_v36  ;;  %v2494_v18 = vunpack.i.l.bf16 %v3456_v12 }
 0x187   : > { %1227 = vrot.lane.b32.xlu2 %v1114_v51, %s2798_s26 }
 0x189   : > { %v2588_v43 = vpop.permute.xlu0 %2587  ;;  %v1032_v29 = vpop.permute.xlu1 %1031 }
 0x18a   : > { %v2590_v58 = vunpack.i.h.bf16 %v2588_v43  ;;  %v2589_v41 = vunpack.i.l.bf16 %v2588_v43  ;;  %v2474_v43 = vunpack.i.l.bf16 %v3519_v36 }
 0x18c   : > { %v3639_v7 = vsel %vm1033_vm8, %v2590_v58, %v1032_v29  ;;  %v3642_v62 = vsel %vm1033_vm8, %v2585_v33, %v2589_v41  ;;  %v3648_v4 = vsel %vm1033_vm8, %v2589_v41, %v2590_v58  ;;  %v3656_v33 = vpop.permute.xlu2 %2607  ;;  %v2499_v41 = vunpack.i.l.bf16 %v3559_v14 }
 0x191   : > { %v2598_v29 = vpop.permute.xlu0 %2597 }
 0x192   : > { %v2600_v31 = vunpack.i.h.bf16 %v2598_v29  ;;  %v2599_v1 = vunpack.i.l.bf16 %v2598_v29  ;;  %v2495_v29 = vunpack.i.h.bf16 %v3456_v12 }
 0x194   : > { %v1080_v63 = vsel %vm1078_vm10, %v2595_v19, %v2599_v1  ;;  %v1081_v39 = vsel %vm1078_vm10, %v2599_v1, %v2600_v31  ;;  %v4763_v19 = vunpack.i.l.bf16 %v3517_v24  ;;  %v860_v36 = vsel %vm369_vm0, %v2495_v29, %v2499_v41  ;;  %v3680_v51 = vpop.permute.xlu2 %1191 }
 0x195   : > { %v1134_v58 = vpack.c.bf16 %v1080_v63, %v1080_v63  ;;  %v1135_v11 = vpack.c.bf16 %v1081_v39, %v1081_v39  ;;  %v815_v39 = vsel %vm814_vm12, %v2474_v43, %v2475_v9  ;;  %v2579_v43 = vunpack.i.l.bf16 %v3621_v49 }
 0x197   : > { %1267 = vrot.lane.b32.xlu1 %v1134_v58, %s2798_s26  ;;  %1269 = vrot.lane.b32.xlu2 %v1135_v11, %s2798_s26  ;;  %v859_v58 = vsel %vm369_vm0, %v2494_v18, %v2495_v29  ;;  %v816_v11 = vsel %vm814_vm12, %v2475_v9, %v4763_v19  ;;  %v2560_v18 = vunpack.i.h.bf16 %v3571_v57  ;;  %v2559_v9 = vunpack.i.l.bf16 %v3571_v57 }
 0x198   : > { %v1105_v0 = vpack.c.bf16 %v859_v58, %v815_v39  ;;  %v1106_v61 = vpack.c.bf16 %v860_v36, %v816_v11  ;;  %v1036_v29 = vsel %vm1033_vm8, %v2579_v43, %v2580_v22  ;;  %v4849_v39 = vunpack.i.l.bf16 %v3581_v20 }
 0x199   : > { %v3668_v1 = vpop.permute.xlu1 %2602  ;;  %v4850_v36 = vunpack.i.h.bf16 %v3607_v2  ;;  %v4851_v58 = vunpack.i.l.bf16 %v3585_v40  ;;  %v2540_v20 = vunpack.i.h.bf16 %v3575_v26  ;;  %v2520_v40 = vunpack.i.h.bf16 %v3533_v54 }
 0x19a   : > { %v2604_v63 = vunpack.i.l.bf16 %v3668_v1  ;;  %v1037_v49 = vsel %vm1033_vm8, %v2580_v22, %v4849_v39  ;;  %v2539_v22 = vunpack.i.l.bf16 %v3575_v26 }
 0x19b   : > { %v992_v57 = vsel %vm988_vm9, %v2560_v18, %v4851_v58 }
 0x19c   : > { %v1082_v12 = vsel %vm1078_vm10, %v2600_v31, %v2604_v63 }
 0x19d   : > { %v1136_v5 = vpack.c.bf16 %v1082_v12, %v1082_v12  ;;  %v4852_v12 = vunpack.i.h.bf16 %v3577_v53  ;;  %v2519_v53 = vunpack.i.l.bf16 %v3533_v54 }
 0x19e   : > { %v3684_v35 = vpop.permute.xlu0 %1076 }
 0x19f   : > { %1209 = vrot.lane.b32.xlu1 %v1105_v0, %s2798_s26  ;;  %1211 = vrot.lane.b32.xlu2 %v1106_v61, %s2798_s26  ;;  %v1035_v0 = vsel %vm1033_vm8, %v4850_v36, %v2579_v43  ;;  %v991_v61 = vsel %vm988_vm9, %v2559_v9, %v2560_v18  ;;  %v990_v19 = vsel %vm988_vm9, %v4852_v12, %v2559_v9  ;;  %v2605_v43 = vunpack.i.h.bf16 %v3668_v1  ;;  %v1198_v36 = vpop.permute.xlu2 %1197 }
 0x1a0   : > { %1271 = vrot.lane.b32.xlu0 %v1136_v5, %s2798_s26  ;;  %v1126_v11 = vpack.c.bf16 %v1036_v29, %v991_v61  ;;  %v1127_v5 = vpack.c.bf16 %v1037_v49, %v992_v57  ;;  %v1125_v2 = vpack.c.bf16 %v1035_v0, %v990_v19  ;;  %v4853_v9 = vunpack.i.h.bf16 %v3554_v42 }
 0x1a1   : > { %v3691_v31 = vpop.permute.xlu1 %1143  ;;  %v946_v19 = vsel %vm943_vm11, %v2539_v22, %v2540_v20  ;;  %v1083_v54 = vsel %vm1078_vm10, %v2604_v63, %v2605_v43  ;;  %v4854_v0 = vunpack.i.h.bf16 %v3561_v50  ;;  %v902_v42 = vsel %vm311_vm7, %v2519_v53, %v2520_v40 }
 0x1a2   : > { %v945_v26 = vsel %vm943_vm11, %v4853_v9, %v2539_v22  ;;  %v1117_v57 = vpack.c.bf16 %v946_v19, %v902_v42  ;;  %v1137_v12 = vpack.c.bf16 %v1083_v54, %v1083_v54  ;;  %v2544_v22 = vunpack.i.l.bf16 %v3573_v56 }
 0x1a3   : > { %v901_v61 = vsel %vm311_vm7, %v4854_v0, %v2519_v53  ;;  %v2480_v50 = vunpack.i.h.bf16 %v3517_v24  ;;  %v4855_v54 = vunpack.i.l.bf16 %v3517_v24  ;;  %v2485_v24 = vunpack.i.h.bf16 %v3438_v59 }
 0x1a4   : > { %v1116_v58 = vpack.c.bf16 %v945_v26, %v901_v61  ;;  %v947_v19 = vsel %vm943_vm11, %v2540_v20, %v2544_v22  ;;  %v2505_v61 = vunpack.i.h.bf16 %v3557_v48  ;;  %v4856_v20 = vpack.c.bf16 %v3597_v37, %v3592_v32 }
 0x1a5   : > { %v817_v0 = vsel %vm814_vm12, %v4855_v54, %v2480_v50  ;;  %v2530_v1 = vunpack.i.h.bf16 %v3567_v55 }
 0x1a6   : > { %v3709_v39 = vpop.permute.xlu0 %1193 }
 0x1a7   : > { %1251 = vrot.lane.b32.xlu1 %v1126_v11, %s2798_s26  ;;  %1253 = vrot.lane.b32.xlu2 %v1127_v5, %s2798_s26  ;;  %v2500_v11 = vunpack.i.h.bf16 %v3559_v14  ;;  %v3745_v53 = vpop.permute.xlu2 %1203 }
 0x1a8   : > { %1249 = vrot.lane.b32.xlu0 %v1125_v2, %s2798_s26  ;;  %v2524_v2 = vunpack.i.l.bf16 %v3569_v60 }
 0x1a9   : > { %v1196_v18 = vpop.permute.xlu1 %1195  ;;  %v861_v9 = vsel %vm369_vm0, %v2499_v41, %v2500_v11  ;;  %v2504_v41 = vunpack.i.l.bf16 %v3557_v48 }
 0x1aa   : > { %v3723_v29 = vsel %vm717_vm6, %v3709_v39, %v1196_v18  ;;  %v3726_v49 = vsel %vm717_vm6, %v1196_v18, %v1198_v36  ;;  %v1107_v42 = vpack.c.bf16 %v861_v9, %v817_v0  ;;  %v903_v14 = vsel %vm311_vm7, %v2520_v40, %v2524_v2 }
 0x1ab   : > { %v863_v48 = vsel %vm369_vm0, %v2504_v41, %v2505_v61  ;;  %v862_v40 = vsel %vm369_vm0, %v2500_v11, %v2504_v41 }
 0x1ae   : > { %v1200_v5 = vpop.permute.xlu0 %1199 }
 0x1af   : > { %1231 = vrot.lane.b32.xlu1 %v1116_v58, %s2798_s26  ;;  %1233 = vrot.lane.b32.xlu2 %v1117_v57, %s2798_s26  ;;  %v3740_v63 = vsel %vm717_vm6, %v1198_v36, %v1200_v5  ;;  %v2525_v58 = vunpack.i.h.bf16 %v3569_v60  ;;  %v2545_v57 = vunpack.i.h.bf16 %v3573_v56 }
 0x1b0   : > { %1273 = vrot.lane.b32.xlu0 %v1137_v12, %s2798_s26  ;;  %v2484_v12 = vunpack.i.l.bf16 %v3438_v59  ;;  %v2609_v59 = vunpack.i.l.bf16 %v3656_v33 }
 0x1b1   : > { %v1202_v18 = vpop.permute.xlu1 %1201  ;;  %v904_v60 = vsel %vm311_vm7, %v2524_v2, %v2525_v58  ;;  %v948_v56 = vsel %vm943_vm11, %v2544_v22, %v2545_v57 }
 0x1b2   : > { %v3751_v26 = vsel %vm717_vm6, %v1200_v5, %v1202_v18  ;;  %v3755_v36 = vsel %vm717_vm6, %v1202_v18, %v3745_v53  ;;  %v1118_v5 = vpack.c.bf16 %v947_v19, %v903_v14  ;;  %v819_v18 = vsel %vm814_vm12, %v2484_v12, %v2485_v24 }
 0x1b3   : > { %v1109_v32 = vpack.c.bf16 %v863_v48, %v819_v18  ;;  %v1119_v37 = vpack.c.bf16 %v948_v56, %v904_v60  ;;  %v818_v9 = vsel %vm814_vm12, %v2480_v50, %v2484_v12  ;;  %v2610_v19 = vunpack.i.h.bf16 %v3656_v33 }
 0x1b4   : > { %v1108_v54 = vpack.c.bf16 %v862_v40, %v818_v9  ;;  %v1084_v50 = vsel %vm1078_vm10, %v2605_v43, %v2609_v59  ;;  %v2509_v33 = vunpack.i.l.bf16 %v3494_v3  ;;  %v2489_v14 = vunpack.i.l.bf16 %v3548_v46 }
 0x1b5   : > { %v1086_v11 = vsel %vm1078_vm10, %v2610_v19, %v3684_v35  ;;  %v1085_v22 = vsel %vm1078_vm10, %v2609_v59, %v2610_v19  ;;  %v2529_v43 = vunpack.i.l.bf16 %v3567_v55  ;;  %v4858_v12 = vpack.c.bf16 %v3648_v4, %v3645_v21 }
 0x1b6   : > { %v1140_v2 = vpack.c.bf16 %v1086_v11, %v1086_v11  ;;  %v1139_v0 = vpack.c.bf16 %v1085_v22, %v1085_v22  ;;  %v864_v35 = vsel %vm369_vm0, %v2505_v61, %v2509_v33  ;;  %v820_v41 = vsel %vm814_vm12, %v2485_v24, %v2489_v14  ;;  %v3840_v59 = vpop.permute.xlu0 %1205 }
 0x1b7   : > { %1255 = vrot.lane.b32.xlu1 %v4856_v20, %s2798_s26  ;;  %1213 = vrot.lane.b32.xlu2 %v1107_v42, %s2798_s26  ;;  %v1138_v42 = vpack.c.bf16 %v1084_v50, %v1084_v50  ;;  %v4857_v20 = vpack.c.bf16 %v3642_v62, %v3605_v47  ;;  %v2550_v48 = vunpack.i.h.bf16 %v3563_v25  ;;  %v2549_v61 = vunpack.i.l.bf16 %v3563_v25 }
 0x1b8   : > { %1235 = vrot.lane.b32.xlu0 %v1118_v5, %s2798_s26  ;;  %v1110_v5 = vpack.c.bf16 %v864_v35, %v820_v41  ;;  %v905_v24 = vsel %vm311_vm7, %v2525_v58, %v2529_v43  ;;  %v906_v60 = vsel %vm311_vm7, %v2529_v43, %v2530_v1  ;;  %v2490_v40 = vunpack.i.h.bf16 %v3548_v46 }
 0x1b9   : > { %v949_v55 = vsel %vm943_vm11, %v2545_v57, %v2549_v61  ;;  %v950_v47 = vsel %vm943_vm11, %v2549_v61, %v2550_v48  ;;  %v2510_v25 = vunpack.i.h.bf16 %v3494_v3  ;;  %v4859_v21 = vpack.c.bf16 %v3639_v7, %v3600_v34  ;;  %v2782_v7 = vld [vmem:[%s3048_s23 + $0x38] sm:$0xff] }
 0x1ba   : > { %v1120_v62 = vpack.c.bf16 %v949_v55, %v905_v24  ;;  %v1121_v56 = vpack.c.bf16 %v950_v47, %v906_v60  ;;  %v821_v58 = vsel %vm814_vm12, %v2489_v14, %v2490_v40  ;;  %v951_v46 = vsel %vm943_vm11, %v2550_v48, %v3579_v23  ;;  %v3860_v47 = vld [vmem:[%s4692_s2] sm:$0xf] }
 0x1bb   : > { %v866_v4 = vsel %vm369_vm0, %v2510_v25, %v3565_v44  ;;  %v822_v57 = vsel %vm814_vm12, %v2490_v40, %v3546_v52  ;;  %v865_v18 = vsel %vm369_vm0, %v2509_v33, %v2510_v25  ;;  %v336_v34 = vmul.f32 %v2782_v7, %v2981_v10 }
 0x1bc   : > { %v1112_v3 = vpack.c.bf16 %v866_v4, %v822_v57  ;;  %v1113_v19 = vpack.c.bf16 %v3565_v44, %v3546_v52  ;;  %v1282_v60 = vsel %vm717_vm6, %v3680_v51, %v3709_v39 }
 0x1bd   : > { %v1104_v9 = vpack.c.bf16 %v3416_v45, %v336_v34 }
 0x1bf   : > { %1217 = vrot.lane.b32.xlu1 %v1109_v32, %s2798_s26  ;;  %1237 = vrot.lane.b32.xlu2 %v1119_v37, %s2798_s26  ;;  %v1111_v32 = vpack.c.bf16 %v865_v18, %v821_v58  ;;  %v1122_v37 = vpack.c.bf16 %v951_v46, %v2530_v1 }
 0x1c0   : > { %1215 = vrot.lane.b32.xlu0 %v1108_v54, %s2798_s26 }
 0x1c7   : > { %1277 = vrot.lane.b32.xlu1 %v1139_v0, %s2798_s26  ;;  %1279 = vrot.lane.b32.xlu2 %v1140_v2, %s2798_s26 }
 0x1c8   : > { %1275 = vrot.lane.b32.xlu0 %v1138_v42, %s2798_s26 }
 0x1cf   : > { %1257 = vrot.lane.b32.xlu1 %v4857_v20, %s2798_s26  ;;  %1259 = vrot.lane.b32.xlu2 %v4858_v12, %s2798_s26 }
 0x1d0   : > { %1219 = vrot.lane.b32.xlu0 %v1110_v5, %s2798_s26 }
 0x1d7   : > { %1239 = vrot.lane.b32.xlu1 %v1120_v62, %s2798_s26  ;;  %1241 = vrot.lane.b32.xlu2 %v1121_v56, %s2798_s26 }
 0x1d8   : > { %1261 = vrot.lane.b32.xlu0 %v4859_v21, %s2798_s26 }
 0x1d9   : > { %v1266_v23 = vpop.permute.xlu2 %1265 }
 0x1df   : > { %1221 = vrot.lane.b32.xlu1 %v1111_v32, %s2798_s26  ;;  %1223 = vrot.lane.b32.xlu2 %v1112_v3, %s2798_s26 }
 0x1e0   : > { %1243 = vrot.lane.b32.xlu0 %v1122_v37, %s2798_s26 }
 0x1e1   : > { %v1228_v54 = vpop.permute.xlu2 %1227 }
 0x1e7   : > { %1207 = vrot.lane.b32.xlu1 %v1104_v9, %s2798_s26 }
 0x1e8   : > { %1225 = vrot.lane.b32.xlu0 %v1113_v19, %s2798_s26 }
 0x1f0   : > { %v1264_v11 = vpop.permute.xlu1 %1263  ;;  %v1246_v22 = vpop.permute.xlu0 %1245 }
 0x1f1   : > { %v1314_v50 = vsel %vm717_vm6, %v1264_v11, %v1266_v23  ;;  %v1270_v45 = vpop.permute.xlu2 %1269 }
 0x1f2   : > { %v1360_v2 = vsel %vm1358_vm13, %v1314_v50, 0 }
 0x1f3   : > { %1386 = vmatpush.bf16.msra.mxu0 %v1360_v2 }
 0x1f8   : > { %v1248_v0 = vpop.permute.xlu1 %1247  ;;  %v1230_v52 = vpop.permute.xlu0 %1229 }
 0x1f9   : > { %v1306_v42 = vsel %vm717_vm6, %v1246_v22, %v1248_v0  ;;  %v1298_v44 = vsel %vm717_vm6, %v1228_v54, %v1230_v52  ;;  %v1212_v33 = vpop.permute.xlu2 %1211 }
 0x1fa   : > { %1387 = vmatpush.bf16.msra.mxu0 %v1306_v42 }
 0x1fe   : > { %1388 = vmatpush.bf16.msra.mxu0 %v1298_v44 }
 0x201   : > { %v1254_v1 = vpop.permute.xlu2 %1253 }
 0x209   : > { %v1268_v14 = vpop.permute.xlu1 %1267  ;;  %v1234_v55 = vpop.permute.xlu2 %1233 }
 0x20a   : > { %v1315_v35 = vsel %vm717_vm6, %v1266_v23, %v1268_v14  ;;  %v1316_v41 = vsel %vm717_vm6, %v1268_v14, %v1270_v45 }
 0x20b   : > { %v1363_v43 = vsel %vm1358_vm13, %v1315_v35, 0  ;;  %v1366_v5 = vsel %vm1358_vm13, %v1316_v41, 0 }
 0x20c   : > { %1399 = vmatpush.bf16.msra.mxu1 %v1363_v43  ;;  %1412 = vmatpush.bf16.msra.mxu2 %v1366_v5 }
 0x211   : > { %v1210_v20 = vpop.permute.xlu1 %1209  ;;  %v1214_v51 = vpop.permute.xlu2 %1213 }
 0x212   : > { %v1272_v12 = vpop.permute.xlu0 %1271  ;;  %v1290_v48 = vsel %vm717_vm6, %v1210_v20, %v1212_v33  ;;  %v1291_v32 = vsel %vm717_vm6, %v1212_v33, %v1214_v51 }
 0x213   : > { %1389 = vmatpush.bf16.msra.mxu0 %v1290_v48  ;;  %v1317_v61 = vsel %vm717_vm6, %v1270_v45, %v1272_v12 }
 0x214   : > { %v1369_v24 = vsel %vm1358_vm13, %v1317_v61, 0 }
 0x215   : > { %1425 = vmatpush.bf16.msra.mxu3 %v1369_v24 }
 0x217   : > { %1390 = vmatpush.bf16.msra.mxu0 %v1282_v60 }
 0x219   : > { %v1252_v62 = vpop.permute.xlu1 %1251  ;;  %v1238_v3 = vpop.permute.xlu2 %1237 }
 0x21a   : > { %v1250_v56 = vpop.permute.xlu0 %1249  ;;  %2409 = vmatmul.msk.bf16.vlgmr.msra.gmra.mxu0 %vm1354_vm14, %v3860_v47  ;;  %v1309_v40 = vsel %vm717_vm6, %v1252_v62, %v1254_v1 }
 0x21b   : > { %v1307_v25 = vsel %vm717_vm6, %v1248_v0, %v1250_v56  ;;  %v1308_v21 = vsel %vm717_vm6, %v1250_v56, %v1252_v62  ;;  %1426 = vmatpush.bf16.msra.mxu3 %v1309_v40  ;;  %v1288_v40 = vsel %vm717_vm6, %v3745_v53, %v3840_v59 }
 0x21c   : > { %1400 = vmatpush.bf16.msra.mxu1 %v1307_v25  ;;  %1413 = vmatpush.bf16.msra.mxu2 %v1308_v21 }
 0x221   : > { %v1232_v39 = vpop.permute.xlu1 %1231  ;;  %v1280_v11 = vpop.permute.xlu2 %1279 }
 0x222   : > { %v1274_v4 = vpop.permute.xlu0 %1273  ;;  %v1299_v58 = vsel %vm717_vm6, %v1230_v52, %v1232_v39  ;;  %v1300_v46 = vsel %vm717_vm6, %v1232_v39, %v1234_v55 }
 0x223   : > { %1401 = vmatpush.bf16.msra.mxu1 %v1299_v58  ;;  %1414 = vmatpush.bf16.msra.mxu2 %v1300_v46  ;;  %v1318_v57 = vsel %vm717_vm6, %v1272_v12, %v1274_v4 }
 0x224   : > { %v1372_v18 = vsel %vm1358_vm13, %v1318_v57, 0 }
 0x225   : > { %1438 = vmatpush.bf16.msrb.mxu0 %v1372_v18 }
 0x227   : > { %1402 = vmatpush.bf16.msra.mxu1 %v1291_v32 }
 0x229   : > { %v1256_v37 = vpop.permute.xlu1 %1255  ;;  %v1260_v44 = vpop.permute.xlu2 %1259 }
 0x22a   : > { %v1236_v7 = vpop.permute.xlu0 %1235  ;;  %v1310_v34 = vsel %vm717_vm6, %v1254_v1, %v1256_v37 }
 0x22b   : > { %1403 = vmatpush.bf16.msra.mxu1 %v3723_v29  ;;  %v1301_v9 = vsel %vm717_vm6, %v1234_v55, %v1236_v7  ;;  %1439 = vmatpush.bf16.msrb.mxu0 %v1310_v34  ;;  %v1302_v23 = vsel %vm717_vm6, %v1236_v7, %v1238_v3 }
 0x22c   : > { %1427 = vmatpush.bf16.msra.mxu3 %v1301_v9 }
 0x22e   : > { %2410 = vmatmul.msk.bf16.vlgmr.msra.gmra.mxu1 %vm1354_vm14, %v3860_v47 }
 0x22f   : > { %1440 = vmatpush.bf16.msrb.mxu0 %v1302_v23 }
 0x231   : > { %v1218_v19 = vpop.permute.xlu1 %1217  ;;  %v1242_v43 = vpop.permute.xlu2 %1241 }
 0x232   : > { %v1216_v54 = vpop.permute.xlu0 %1215 }
 0x233   : > { %v1292_v22 = vsel %vm717_vm6, %v1214_v51, %v1216_v54  ;;  %v1293_v50 = vsel %vm717_vm6, %v1216_v54, %v1218_v19 }
 0x234   : > { %1415 = vmatpush.bf16.msra.mxu2 %v1292_v22  ;;  %1428 = vmatpush.bf16.msra.mxu3 %v1293_v50 }
 0x238   : > { %1416 = vmatpush.bf16.msra.mxu2 %v3726_v49  ;;  %1429 = vmatpush.bf16.msra.mxu3 %v3740_v63 }
 0x239   : > { %v1278_v29 = vpop.permute.xlu1 %1277  ;;  %v1224_v24 = vpop.permute.xlu2 %1223 }
 0x23a   : > { %v1276_v2 = vpop.permute.xlu0 %1275  ;;  %v1321_v45 = vsel %vm717_vm6, %v1278_v29, %v1280_v11 }
 0x23b   : > { %2411 = vmatmul.msk.bf16.vlgmr.msra.gmra.mxu2 %vm1354_vm14, %v3860_v47  ;;  %2412 = vmatmul.msk.bf16.vlgmr.msra.gmra.mxu3 %vm1354_vm14, %v3860_v47  ;;  %v1319_v0 = vsel %vm717_vm6, %v1274_v4, %v1276_v2  ;;  %v1320_v42 = vsel %vm717_vm6, %v1276_v2, %v1278_v29  ;;  %v1381_v52 = vsel %vm1358_vm13, %v1321_v45, 0 }
 0x23c   : > { %v1375_v49 = vsel %vm1358_vm13, %v1319_v0, 0  ;;  %v1378_v63 = vsel %vm1358_vm13, %v1320_v42, 0  ;;  %1477 = vmatpush.bf16.msrb.mxu3 %v1381_v52 }
 0x23d   : > { %1451 = vmatpush.bf16.msrb.mxu1 %v1375_v49  ;;  %1464 = vmatpush.bf16.msrb.mxu2 %v1378_v63 }
 0x241   : > { %v1258_v33 = vpop.permute.xlu1 %1257 }
 0x242   : > { %v1220_v14 = vpop.permute.xlu0 %1219  ;;  %v1311_v35 = vsel %vm717_vm6, %v1256_v37, %v1258_v33  ;;  %v1312_v41 = vsel %vm717_vm6, %v1258_v33, %v1260_v44  ;;  %v4861_v33 = vld [vmem:[#allocation51_spill] sm:$0xff] }
 0x243   : > { %v1294_v1 = vsel %vm717_vm6, %v1218_v19, %v1220_v14  ;;  %1452 = vmatpush.bf16.msrb.mxu1 %v1311_v35  ;;  %1465 = vmatpush.bf16.msrb.mxu2 %v1312_v41 }
 0x244   : > { %1441 = vmatpush.bf16.msrb.mxu0 %v1294_v1  ;;  %v4862_v1 = vld [vmem:[#allocation33_spill] sm:$0xff] }
 0x248   : > { %1442 = vmatpush.bf16.msrb.mxu0 %v3751_v26 }
 0x249   : > { %v1240_v5 = vpop.permute.xlu1 %1239 }
 0x24a   : > { %v1262_v20 = vpop.permute.xlu0 %1261  ;;  %v1303_v12 = vsel %vm717_vm6, %v1238_v3, %v1240_v5  ;;  %v1304_v48 = vsel %vm717_vm6, %v1240_v5, %v1242_v43  ;;  %v4863_v5 = vld [vmem:[#allocation50_spill] sm:$0xff] }
 0x24b   : > { %2413 = vmatmul.msk.bf16.vlgmr.msrb.gmra.mxu0 %vm1354_vm14, %v3860_v47  ;;  %1453 = vmatpush.bf16.msrb.mxu1 %v1303_v12  ;;  %v1313_v61 = vsel %vm717_vm6, %v1260_v44, %v1262_v20 }
 0x24c   : > { %1466 = vmatpush.bf16.msrb.mxu2 %v1304_v48  ;;  %1478 = vmatpush.bf16.msrb.mxu3 %v1313_v61  ;;  %v4864_v48 = vld [vmem:[#allocation43_spill] sm:$0xff] }
 0x251   : > { %v1222_v55 = vpop.permute.xlu1 %1221 }
 0x252   : > { %v1244_v60 = vpop.permute.xlu0 %1243  ;;  %v1295_v62 = vsel %vm717_vm6, %v1220_v14, %v1222_v55  ;;  %v1296_v26 = vsel %vm717_vm6, %v1222_v55, %v1224_v24  ;;  %v4865_v55 = vld [vmem:[#allocation42_spill] sm:$0xff] }
 0x253   : > { %1454 = vmatpush.bf16.msrb.mxu1 %v1295_v62  ;;  %1467 = vmatpush.bf16.msrb.mxu2 %v1296_v26  ;;  %v1305_v56 = vsel %vm717_vm6, %v1242_v43, %v1244_v60  ;;  %v4866_v62 = vld [vmem:[#allocation20_spill] sm:$0xff] }
 0x254   : > { %1479 = vmatpush.bf16.msrb.mxu3 %v1305_v56 }
 0x257   : > { %1455 = vmatpush.bf16.msrb.mxu1 %v3755_v36  ;;  %1468 = vmatpush.bf16.msrb.mxu2 %v1288_v40  ;;  %v4867_v40 = vld [vmem:[#allocation21_spill] sm:$0xff] }
 0x259   : > { %v1208_v51 = vpop.permute.xlu1 %1207 }
 0x25a   : > { %v1226_v25 = vpop.permute.xlu0 %1225  ;;  %2414 = vmatmul.msk.bf16.vlgmr.msrb.gmra.mxu1 %vm1354_vm14, %v3860_v47  ;;  %2415 = vmatmul.msk.bf16.vlgmr.msrb.gmra.mxu2 %vm1354_vm14, %v3860_v47  ;;  %v1289_v39 = vsel %vm717_vm6, %v3840_v59, %v1208_v51 }
 0x25b   : > { %v1297_v21 = vsel %vm717_vm6, %v1224_v24, %v1226_v25 }
 0x25c   : > { %1480 = vmatpush.bf16.msrb.mxu3 %v1297_v21 }
 0x260   : > { %1481 = vmatpush.bf16.msrb.mxu3 %v1289_v39 }
 0x263   : > { %2416 = vmatmul.msk.bf16.vlgmr.msrb.gmra.mxu3 %vm1354_vm14, %v3860_v47 }
 0x297   : > { %v1392_v53 = vpop.f32.mrf.mxu0 }
 0x298   : > { %v1393_v36 = vadd.f32 %v1392_v53, %v3691_v31  ;;  %v4868_v53 = vld [vmem:[#allocation29_spill] sm:$0xff] }
 0x29a   : > { %vm1487_vm15 = vcmp.ge.f32.partialorder %v1393_v36, 0.0  ;;  %v1495_v4 = vmul.f32 0.01, %v1393_v36 }
 0x29c   : > { %v3918_v58 = vsel %vm1487_vm15, %v1393_v36, %v1495_v4 }
 0x29d   : > { %v1584_v46 = vmul.f32 %v3918_v58, %v3454_v13  ;;  %v1575_v57 = vmul.f32 %v3918_v58, %v3396_v38  ;;  %v1557_v47 = vmul.f32 %v3918_v58, %v3289_v27  ;;  %v1566_v7 = vmul.f32 %v3918_v58, %v3246_v6 }
 0x29f   : > { %1914 = vrot.lane.b32.xlu0 %v1584_v46, %s2804_s8  ;;  %1870 = vrot.lane.b32.xlu1 %v1575_v57, %s2802_s7  ;;  %v1394_v59 = vpop.f32.mrf.mxu0  ;;  %v4869_v46 = vld [vmem:[#allocation25_spill] sm:$0xff] }
 0x2a0   : > { %v4870_v59 = vld [vmem:[#allocation36_spill] sm:$0xff] }
 0x2a7   : > { %1782 = vrot.lane.b32.xlu1 %v1557_v47, %s2800_s28 }
 0x2ab   : > { %v1405_v18 = vpop.f32.mrf.mxu1 }
 0x2ac   : > { %v1406_v32 = vadd.f32 %v1405_v18, %v3691_v31 }
 0x2ae   : > { %vm1488_vm1 = vcmp.ge.f32.partialorder %v1406_v32, 0.0  ;;  %v1496_v3 = vmul.f32 0.01, %v1406_v32 }
 0x2b0   : > { %v3930_v37 = vsel %vm1488_vm1, %v1406_v32, %v1496_v3  ;;  %v4871_v3 = vld [vmem:[#allocation35_spill] sm:$0xff] }
 0x2b1   : > { %v2612_v38 = vpack.i.bf16 %v3930_v37, %v3918_v58  ;;  %v1542_v50 = vmul.f32 %v3930_v37, %v3202_v17  ;;  %v1533_v2 = vmul.f32 %v3930_v37, %v3123_v16  ;;  %v1524_v16 = vmul.f32 %v3930_v37, %v3043_v30 }
 0x2b2   : > { %v1559_v43 = vmul.f32 %v3930_v37, %v4862_v1  ;;  %v1568_v60 = vmul.f32 %v3930_v37, %v4865_v55  ;;  %v1550_v57 = vmul.f32 %v3930_v37, %v4869_v46  ;;  %v4881_v1 = vld [vmem:[#allocation39_spill] sm:$0xff] }
 0x2b3   : > { %2613 = vrot.lane.b32.xlu2 %v2612_v38, %s2791_s29  ;;  %v1407_v13 = vpop.f32.mrf.mxu1 }
 0x2bb   : > { %1826 = vrot.lane.b32.xlu2 %v1566_v7, %s2801_s30 }
 0x2be   : > { %v1418_v27 = vpop.f32.mrf.mxu2  ;;  %v1431_v34 = vpop.f32.mrf.mxu3 }
 0x2bf   : > { %v1419_v9 = vadd.f32 %v1418_v27, %v3691_v31  ;;  %v1432_v23 = vadd.f32 %v1431_v34, %v3691_v31 }
 0x2c1   : > { %vm1489_vm3 = vcmp.ge.f32.partialorder %v1419_v9, 0.0  ;;  %v1497_v19 = vmul.f32 0.01, %v1419_v9  ;;  %vm1490_vm4 = vcmp.ge.f32.partialorder %v1432_v23, 0.0  ;;  %v1498_v54 = vmul.f32 0.01, %v1432_v23 }
 0x2c3   : > { %v3940_v11 = vsel %vm1489_vm3, %v1419_v9, %v1497_v19  ;;  %v3942_v22 = vsel %vm1490_vm4, %v1432_v23, %v1498_v54  ;;  %v4872_v9 = vld [vmem:[#allocation13_spill] sm:$0xff]  ;;  %v4873_v19 = vld [vmem:[#allocation10_spill] sm:$0xff] }
 0x2c4   : > { %v2617_v6 = vpack.i.bf16 %v3942_v22, %v3940_v11  ;;  %v1543_v29 = vmul.f32 %v3940_v11, %v3195_v15  ;;  %v1534_v45 = vmul.f32 %v3940_v11, %v3126_v8  ;;  %v1525_v15 = vmul.f32 %v3940_v11, %v3036_v28  ;;  %v4860_v8 = vld [vmem:[#allocation34_spill] sm:$0xff] }
 0x2c5   : > { %v1560_v44 = vmul.f32 %v3940_v11, %v4860_v8  ;;  %v1578_v14 = vmul.f32 %v3940_v11, %v4861_v33  ;;  %v1577_v28 = vmul.f32 %v3930_v37, %v4863_v5  ;;  %v1569_v61 = vmul.f32 %v3940_v11, %v4864_v48  ;;  %v4878_v8 = vld [vmem:[#allocation52_spill] sm:$0xff]  ;;  %v4879_v33 = vld [vmem:[#allocation46_spill] sm:$0xff]  ;;  %v4883_v48 = vld [vmem:[#allocation31_spill] sm:$0xff] }
 0x2c6   : > { %v1420_v0 = vpop.f32.mrf.mxu2  ;;  %2618 = vrot.lane.b32.xlu0 %v2617_v6, %s2791_s29  ;;  %v1433_v42 = vpop.f32.mrf.mxu3  ;;  %v2632_v52 = vpack.i.bf16 %v1543_v29, %v1542_v50  ;;  %v2627_v49 = vpack.i.bf16 %v1534_v45, %v1533_v2  ;;  %v2622_v41 = vpack.i.bf16 %v1525_v15, %v1524_v16  ;;  %v1544_v25 = vmul.f32 %v3942_v22, %v4867_v40  ;;  %v4874_v50 = vld [vmem:[#allocation15_spill] sm:$0xff]  ;;  %v4875_v29 = vld [vmem:[#allocation53_spill] sm:$0xff] }
 0x2c7   : > { %v2642_v20 = vpack.i.bf16 %v1560_v44, %v1559_v43  ;;  %v2637_v12 = vpack.i.bf16 %v1578_v14, %v1577_v28  ;;  %v2647_v56 = vpack.i.bf16 %v1569_v61, %v1568_v60  ;;  %v1551_v36 = vmul.f32 %v3940_v11, %v4868_v53  ;;  %v4876_v45 = vld [vmem:[#allocation9_spill] sm:$0xff] }
 0x2c8   : > { %2633 = vrot.lane.b32.xlu1 %v2632_v52, %s2792_s16  ;;  %2628 = vrot.lane.b32.xlu2 %v2627_v49, %s2799_s27  ;;  %v1444_v17 = vpop.f32.mrf.mxu0  ;;  %v1561_v38 = vmul.f32 %v3942_v22, %v4871_v3  ;;  %v1535_v6 = vmul.f32 %v3942_v22, %v4874_v50  ;;  %v1526_v0 = vmul.f32 %v3942_v22, %v4876_v45  ;;  %v4877_v52 = vld [vmem:[#allocation37_spill] sm:$0xff] }
 0x2c9   : > { %v1445_v63 = vadd.f32 %v1444_v17, %v3691_v31  ;;  %v2652_v32 = vpack.i.bf16 %v1551_v36, %v1550_v57  ;;  %v1576_v49 = vmul.f32 %v3918_v58, %v4877_v52  ;;  %v4882_v28 = vld [vmem:[#allocation45_spill] sm:$0xff]  ;;  %v1558_v61 = vmul.f32 %v3918_v58, %v4883_v48  ;;  %v4887_v36 = vld [vmem:[#allocation28_spill] sm:$0xff] }
 0x2ca   : > { %v4896_v52 = vld [vmem:[#allocation8_spill] sm:$0xff] }
 0x2cb   : > { %v1499_v35 = vmul.f32 0.01, %v1445_v63  ;;  %vm1491_vm5 = vcmp.ge.f32.partialorder %v1445_v63, 0.0 }
 0x2cd   : > { %v3971_v30 = vsel %vm1491_vm5, %v1445_v63, %v1499_v35  ;;  %v4880_v35 = vld [vmem:[#allocation49_spill] sm:$0xff] }
 0x2ce   : > { %2623 = vrot.lane.b32.xlu0 %v2622_v41, %s2794_s18  ;;  %v1545_v26 = vmul.f32 %v3971_v30, %v4866_v62  ;;  %v1562_v47 = vmul.f32 %v3971_v30, %v4870_v59  ;;  %v1536_v23 = vmul.f32 %v3971_v30, %v4872_v9  ;;  %v1527_v54 = vmul.f32 %v3971_v30, %v4873_v19 }
 0x2cf   : > { %v1580_v44 = vmul.f32 %v3971_v30, %v4878_v8  ;;  %v1571_v14 = vmul.f32 %v3971_v30, %v4879_v33  ;;  %v1579_v41 = vmul.f32 %v3942_v22, %v4880_v35 }
 0x2d0   : > { %2643 = vrot.lane.b32.xlu1 %v2642_v20, %s2801_s30  ;;  %2638 = vrot.lane.b32.xlu2 %v2637_v12, %s2804_s8  ;;  %v1446_v24 = vpop.f32.mrf.mxu0  ;;  %v2672_v21 = vpack.i.bf16 %v1545_v26, %v1544_v25  ;;  %v2682_v27 = vpack.i.bf16 %v1562_v47, %v1561_v38  ;;  %v2667_v42 = vpack.i.bf16 %v1536_v23, %v1535_v6  ;;  %v4889_v38 = vld [vmem:[#allocation2_spill] sm:$0xff]  ;;  %v4892_v23 = vld [vmem:[#allocation7_spill] sm:$0xff]  ;;  %v4893_v6 = vld [vmem:[#allocation16_spill] sm:$0xff] }
 0x2d1   : > { %v2662_v17 = vpack.i.bf16 %v1527_v54, %v1526_v0  ;;  %v1570_v20 = vmul.f32 %v3942_v22, %v4882_v28  ;;  %v2677_v12 = vpack.i.bf16 %v1580_v44, %v1579_v41  ;;  %v1523_v19 = vmul.f32 %v3918_v58, %v4892_v23  ;;  %v4895_v0 = vld [vmem:[#allocation17_spill] sm:$0xff]  ;;  %v4900_v41 = vld [vmem:[#allocation18_spill] sm:$0xff]  ;;  %v4902_v28 = vld [vmem:[#allocation19_spill] sm:$0xff] }
 0x2d3   : > { %v2687_v55 = vpack.i.bf16 %v1571_v14, %v1570_v20  ;;  %v4899_v14 = vld [vmem:[#allocation24_spill] sm:$0xff] }
 0x2d6   : > { %2648 = vrot.lane.b32.xlu0 %v2647_v56, %s2802_s7  ;;  %v4884_v56 = vld [vmem:[#allocation44_spill] sm:$0xff] }
 0x2d7   : > { %v1457_v51 = vpop.f32.mrf.mxu1 }
 0x2d8   : > { %v1458_v39 = vadd.f32 %v1457_v51, %v3691_v31  ;;  %2673 = vrot.lane.b32.xlu2 %v2672_v21, %s2792_s16  ;;  %v4885_v21 = vld [vmem:[#allocation26_spill] sm:$0xff] }
 0x2d9   : > { %v1553_v51 = vmul.f32 %v3971_v30, %v4885_v21 }
 0x2da   : > { %vm1492_vm15 = vcmp.ge.f32.partialorder %v1458_v39, 0.0  ;;  %v1500_v4 = vmul.f32 0.01, %v1458_v39 }
 0x2dc   : > { %v3992_v18 = vsel %vm1492_vm15, %v1458_v39, %v1500_v4  ;;  %v1552_v4 = vmul.f32 %v3942_v22, %v4887_v36 }
 0x2dd   : > { %v1470_v13 = vpop.f32.mrf.mxu2  ;;  %v2657_v7 = vpack.i.bf16 %v3992_v18, %v3971_v30  ;;  %v1581_v2 = vmul.f32 %v3992_v18, %v4875_v29  ;;  %v1563_v43 = vmul.f32 %v3992_v18, %v4881_v1  ;;  %v1572_v40 = vmul.f32 %v3992_v18, %v4884_v56 }
 0x2de   : > { %2653 = vrot.lane.b32.xlu0 %v2652_v32, %s2800_s28  ;;  %v1471_v24 = vadd.f32 %v1470_v13, %v3691_v31  ;;  %v2697_v59 = vpack.i.bf16 %v1553_v51, %v1552_v4  ;;  %v4888_v32 = vld [vmem:[#allocation27_spill] sm:$0xff]  ;;  %v1537_v20 = vmul.f32 %v3992_v18, %v4902_v28  ;;  %v4907_v51 = vld [vmem:[#allocation54_spill] sm:$0xff] }
 0x2df   : > { %v1459_v34 = vpop.f32.mrf.mxu1  ;;  %2658 = vrot.lane.b32.xlu1 %v2657_v7, %s2791_s29  ;;  %v2692_v16 = vpack.i.bf16 %v1581_v2, %v1576_v49  ;;  %v2702_v60 = vpack.i.bf16 %v1563_v43, %v1558_v61  ;;  %v1554_v3 = vmul.f32 %v3992_v18, %v4888_v32  ;;  %v4890_v7 = vld [vmem:[#allocation12_spill] sm:$0xff]  ;;  %v4894_v2 = vld [vmem:[#allocation5_spill] sm:$0xff]  ;;  %v4901_v43 = vld [vmem:[#allocation23_spill] sm:$0xff] }
 0x2e0   : > { %2683 = vrot.lane.b32.xlu2 %v2682_v27, %s2801_s30  ;;  %v1501_v25 = vmul.f32 0.01, %v1471_v24  ;;  %vm1493_vm3 = vcmp.ge.f32.partialorder %v1471_v24, 0.0  ;;  %v1549_v27 = vmul.f32 %v3918_v58, %v4890_v7  ;;  %v4891_v34 = vld [vmem:[#allocation6_spill] sm:$0xff]  ;;  %v4903_v61 = vld [vmem:[#allocation4_spill] sm:$0xff] }
 0x2e1   : > { %v4912_v7 = vld [vmem:[#allocation40_spill] sm:$0xff] }
 0x2e2   : > { %v4043_v57 = vsel %vm1493_vm3, %v1471_v24, %v1501_v25  ;;  %v2712_v54 = vpack.i.bf16 %v1554_v3, %v1549_v27 }
 0x2e3   : > { %v1529_v49 = vmul.f32 %v4043_v57, %v4896_v52  ;;  %v1547_v35 = vmul.f32 %v4043_v57, %v4899_v14  ;;  %v1538_v1 = vmul.f32 %v4043_v57, %v4900_v41  ;;  %v1564_v27 = vmul.f32 %v4043_v57, %v4912_v7 }
 0x2e5   : > { %v1472_v15 = vpop.f32.mrf.mxu2  ;;  %v2737_v48 = vpack.i.bf16 %v1538_v1, %v1537_v20 }
 0x2e6   : > { %2668 = vrot.lane.b32.xlu0 %v2667_v42, %s2799_s27  ;;  %v1483_v63 = vpop.f32.mrf.mxu3  ;;  %v1541_v42 = vmul.f32 %v3918_v58, %v4895_v0 }
 0x2e7   : > { %2663 = vrot.lane.b32.xlu1 %v2662_v17, %s2794_s18  ;;  %v1484_v5 = vadd.f32 %v1483_v63, %v3691_v31  ;;  %v4886_v31 = vld [vmem:[#allocation41_spill] sm:$0xff]  ;;  %v4897_v17 = vld [vmem:[#allocation14_spill] sm:$0xff] }
 0x2e8   : > { %2693 = vrot.lane.b32.xlu2 %v2692_v16, %s2804_s8  ;;  %v1567_v39 = vmul.f32 %v3918_v58, %v4886_v31  ;;  %v1532_v15 = vmul.f32 %v3918_v58, %v4897_v17  ;;  %v4898_v16 = vld [vmem:[#allocation11_spill] sm:$0xff]  ;;  %v1582_v31 = vmul.f32 %v4043_v57, %v4907_v51 }
 0x2e9   : > { %v1502_v26 = vmul.f32 0.01, %v1484_v5  ;;  %vm1494_vm1 = vcmp.ge.f32.partialorder %v1484_v5, 0.0  ;;  %v1528_v8 = vmul.f32 %v3992_v18, %v4898_v16 }
 0x2ea   : > { %v2707_v46 = vpack.i.bf16 %v1572_v40, %v1567_v39  ;;  %v4906_v40 = vld [vmem:[#allocation55_spill] sm:$0xff]  ;;  %v4908_v39 = vld [vmem:[#allocation22_spill] sm:$0xff] }
 0x2eb   : > { %v4039_v53 = vsel %vm1494_vm1, %v1484_v5, %v1502_v26  ;;  %v2727_v33 = vpack.i.bf16 %v1529_v49, %v1528_v8  ;;  %v1546_v5 = vmul.f32 %v3992_v18, %v4901_v43  ;;  %v4905_v26 = vld [vmem:[#allocation47_spill] sm:$0xff] }
 0x2ec   : > { %v2717_v47 = vpack.i.bf16 %v4039_v53, %v4043_v57  ;;  %v1522_v13 = vmul.f32 %v4039_v53, %v4889_v38  ;;  %v1530_v9 = vmul.f32 %v4039_v53, %v4891_v34  ;;  %v1540_v29 = vmul.f32 %v4039_v53, %v4893_v6  ;;  %v4911_v38 = vld [vmem:[#allocation30_spill] sm:$0xff] }
 0x2ed   : > { %v1531_v45 = vmul.f32 %v4039_v53, %v4894_v2  ;;  %v1539_v24 = vmul.f32 %v4039_v53, %v4903_v61  ;;  %v1573_v56 = vmul.f32 %v4043_v57, %v4905_v26  ;;  %v1583_v25 = vmul.f32 %v4039_v53, %v4906_v40 }
 0x2ee   : > { %2678 = vrot.lane.b32.xlu0 %v2677_v12, %s2804_s8  ;;  %v1485_v62 = vpop.f32.mrf.mxu3  ;;  %v2722_v50 = vpack.i.bf16 %v1523_v19, %v1522_v13  ;;  %v2742_v63 = vpack.i.bf16 %v1541_v42, %v1540_v29  ;;  %v2747_v12 = vpack.i.bf16 %v1547_v35, %v1546_v5  ;;  %v1548_v36 = vmul.f32 %v4039_v53, %v4908_v39  ;;  %v4913_v5 = vld [vmem:[#allocation57_spill] sm:$0xff] }
 0x2ef   : > { %2688 = vrot.lane.b32.xlu1 %v2687_v55, %s2802_s7  ;;  %v2732_v44 = vpack.i.bf16 %v1532_v15, %v1531_v45  ;;  %v2752_v4 = vpack.i.bf16 %v1583_v25, %v1582_v31  ;;  %v1555_v13 = vmul.f32 %v4043_v57, %v4911_v38  ;;  %v4169_v28 = vmul.f32 %v3930_v37, %v4913_v5 }
 0x2f0   : > { %2703 = vrot.lane.b32.xlu2 %v2702_v60, %s2801_s30  ;;  %v4904_v60 = vld [vmem:[#allocation48_spill] sm:$0xff] }
 0x2f1   : > { %v1574_v62 = vmul.f32 %v4039_v53, %v4904_v60 }
 0x2f3   : > { %v2762_v21 = vpack.i.bf16 %v1574_v62, %v1573_v56 }
 0x2f6   : > { %2708 = vrot.lane.b32.xlu0 %v2707_v46, %s2802_s7  ;;  %v4909_v46 = vld [vmem:[#allocation32_spill] sm:$0xff] }
 0x2f7   : > { %2698 = vrot.lane.b32.xlu1 %v2697_v59, %s2800_s28  ;;  %v1556_v59 = vmul.f32 %v4039_v53, %v4909_v46 }
 0x2f8   : > { %2718 = vrot.lane.b32.xlu2 %v2717_v47, %s2791_s29  ;;  %v4910_v47 = vld [vmem:[#allocation38_spill] sm:$0xff] }
 0x2f9   : > { %v1565_v32 = vmul.f32 %v4039_v53, %v4910_v47  ;;  %v2767_v34 = vpack.i.bf16 %v1556_v59, %v1555_v13 }
 0x2fe   : > { %1610 = vrot.lane.b32.xlu0 %v1530_v9, %s2794_s18  ;;  %v2757_v9 = vpack.i.bf16 %v1565_v32, %v1564_v27 }
 0x2ff   : > { %2713 = vrot.lane.b32.xlu1 %v2712_v54, %s2800_s28 }
 0x300   : > { %2723 = vrot.lane.b32.xlu2 %v2722_v50, %s2794_s18 }
 0x306   : > { %2743 = vrot.lane.b32.xlu0 %v2742_v63, %s2792_s16 }
 0x307   : > { %2733 = vrot.lane.b32.xlu1 %v2732_v44, %s2799_s27 }
 0x308   : > { %2728 = vrot.lane.b32.xlu2 %v2727_v33, %s2794_s18 }
 0x30d   : > { %v4090_v55 = vpop.permute.xlu2 %2613 }
 0x30e   : > { %2748 = vrot.lane.b32.xlu0 %v2747_v12, %s2792_s16  ;;  %v4776_v45 = vunpack.i.h.bf16 %v4090_v55 }
 0x30f   : > { %2738 = vrot.lane.b32.xlu1 %v2737_v48, %s2799_s27 }
 0x310   : > { %1654 = vrot.lane.b32.xlu2 %v1539_v24, %s2799_s27 }
 0x311   : > { %v4120_v19 = vpop.permute.xlu1 %1870  ;;  %v4124_v50 = vpop.permute.xlu0 %1914 }
 0x315   : > { %v4110_v3 = vpop.permute.xlu2 %1826 }
 0x316   : > { %2763 = vrot.lane.b32.xlu0 %v2762_v21, %s2802_s7 }
 0x317   : > { %1698 = vrot.lane.b32.xlu1 %v1548_v36, %s2792_s16 }
 0x318   : > { %2753 = vrot.lane.b32.xlu2 %v2752_v4, %s2804_s8 }
 0x319   : > { %v4126_v6 = vpop.permute.xlu1 %1782 }
 0x31e   : > { %2768 = vrot.lane.b32.xlu0 %v2767_v34, %s2800_s28 }
 0x31f   : > { %2758 = vrot.lane.b32.xlu1 %v2757_v9, %s2801_s30  ;;  %v4914_v9 = vld [vmem:[#allocation60_spill] sm:$0xff] }
 0x322   : > { %v4118_v23 = vpop.permute.xlu2 %2628 }
 0x323   : > { %v2631_v0 = vunpack.i.h.bf16 %v4118_v23  ;;  %v4775_v42 = vunpack.i.l.bf16 %v4118_v23 }
 0x325   : > { %v4153_v44 = vsel %vm814_vm12, %v4775_v42, %v2631_v0 }
 0x32a   : > { %v4122_v54 = vpop.permute.xlu2 %2638 }
 0x32b   : > { %v2640_v42 = vunpack.i.l.bf16 %v4122_v54 }
 0x332   : > { %v4128_v29 = vpop.permute.xlu2 %2673 }
 0x333   : > { %v4770_v15 = vunpack.i.l.bf16 %v4128_v29 }
 0x338   : > { %v4130_v2 = vpop.permute.xlu0 %2618 }
 0x339   : > { %v4773_v52 = vunpack.i.l.bf16 %v4130_v2  ;;  %v4774_v51 = vunpack.i.h.bf16 %v4130_v2 }
 0x33a   : > { %v4136_v49 = vpop.permute.xlu1 %2633  ;;  %v4138_v17 = vpop.permute.xlu2 %2683 }
 0x33b   : > { %v4146_v63 = vsel %vm311_vm7, %v4776_v45, %v4773_v52  ;;  %v2636_v16 = vunpack.i.h.bf16 %v4136_v49  ;;  %v4772_v8 = vunpack.i.l.bf16 %v4136_v49  ;;  %v4768_v26 = vunpack.i.h.bf16 %v4138_v17 }
 0x33c   : > { %v4314_v45 = vmul.f32 %v4039_v53, %v2981_v10 }
 0x33d   : > { %v4158_v33 = vsel %vm369_vm0, %v4772_v8, %v2636_v16  ;;  %v4163_v14 = vsel %vm369_vm0, %v2636_v16, %v4770_v15  ;;  %v4235_v16 = vmul.f32 %v3940_v11, %v4914_v9  ;;  %v4924_v8 = vunpack.i.h.bf16 %v4090_v55 }
 0x340   : > { %v2624_v41 = vpop.permute.xlu0 %2623 }
 0x341   : > { %v2626_v1 = vunpack.i.h.bf16 %v2624_v41  ;;  %v2625_v43 = vunpack.i.l.bf16 %v2624_v41  ;;  %v4915_v41 = vld [vmem:[#allocation58_spill] sm:$0xff] }
 0x342   : > { %v4171_v20 = vpop.permute.xlu2 %2693  ;;  %v4186_v37 = vpop.permute.xlu1 %2643  ;;  %v4239_v5 = vmul.f32 %v3942_v22, %v4915_v41  ;;  %v4919_v22 = vld [vmem:[#allocation62_spill] sm:$0xff] }
 0x343   : > { %v4174_v12 = vsel %vm485_vm2, %v2625_v43, %v2626_v1  ;;  %v4179_v61 = vunpack.i.l.bf16 %v4171_v20 }
 0x345   : > { %v1969_v24 = vpack.c.bf16 %v4179_v61, %v4179_v61 }
 0x347   : > { %2100 = vrot.lane.b32.xlu2 %v1969_v24, %s2798_s26 }
 0x348   : > { %v4184_v60 = vpop.permute.xlu0 %2648 }
 0x34a   : > { %v4188_v62 = vpop.permute.xlu2 %2703 }
 0x34b   : > { %v4767_v56 = vunpack.i.h.bf16 %v4188_v62 }
 0x34d   : > { %v4197_v40 = vsel %vm988_vm9, %v4768_v26, %v4767_v56  ;;  %v4917_v56 = vld [vmem:[#allocation59_spill] sm:$0xff]  ;;  %v4275_v26 = vmul.f32 %v3992_v18, %v4919_v22  ;;  %v2650_v18 = vunpack.i.l.bf16 %v4184_v60 }
 0x34e   : > { %v4271_v11 = vmul.f32 %v3971_v30, %v4917_v56 }
 0x34f   : > { %4920 = vst [vmem:[#allocation51_spill] sm:$0xff] %v4275_v26  ;;  %v2651_v26 = vunpack.i.h.bf16 %v4184_v60 }
 0x350   : > { %v4199_v25 = vpop.permute.xlu0 %2653  ;;  %4918 = vst [vmem:[#allocation34_spill] sm:$0xff] %v4271_v11 }
 0x351   : > { %v4201_v21 = vpop.permute.xlu1 %2658 }
 0x352   : > { %v4766_v31 = vunpack.i.h.bf16 %v4201_v21  ;;  %v4765_v39 = vunpack.i.l.bf16 %v4201_v21  ;;  %v4206_v36 = vpop.permute.xlu2 %2718 }
 0x353   : > { %v4764_v4 = vunpack.i.l.bf16 %v4206_v36 }
 0x354   : > { %v4214_v46 = vsel %vm311_vm7, %v4774_v51, %v4765_v39  ;;  %v4779_v51 = vunpack.i.h.bf16 %v4122_v54 }
 0x355   : > { %v4221_v59 = vsel %vm311_vm7, %v4766_v31, %v4764_v4 }
 0x358   : > { %v4223_v47 = vpop.permute.xlu0 %2668 }
 0x359   : > { %v4771_v32 = vunpack.i.l.bf16 %v4223_v47  ;;  %v2664_v38 = vpop.permute.xlu1 %2663 }
 0x35a   : > { %v2666_v13 = vunpack.i.h.bf16 %v2664_v38  ;;  %v2665_v7 = vunpack.i.l.bf16 %v2664_v38  ;;  %v4226_v27 = vpop.permute.xlu2 %2723 }
 0x35b   : > { %v4231_v34 = vsel %vm814_vm12, %v2631_v0, %v4771_v32  ;;  %v4769_v24 = vunpack.i.h.bf16 %v4226_v27  ;;  %v4916_v0 = vld [vmem:[#allocation56_spill] sm:$0xff]  ;;  %v2645_v32 = vunpack.i.l.bf16 %v4186_v37 }
 0x35c   : > { %v4245_v4 = vsel %vm485_vm2, %v2626_v1, %v2665_v7  ;;  %v4248_v35 = vsel %vm485_vm2, %v2665_v7, %v2666_v13  ;;  %v4252_v39 = vmul.f32 %v3918_v58, %v4916_v0 }
 0x35d   : > { %v4261_v9 = vsel %vm485_vm2, %v4769_v24, %v2625_v43  ;;  %v2705_v43 = vunpack.i.l.bf16 %v4188_v62 }
 0x35f   : > { %v1828_v48 = vsel %vm988_vm9, %v2705_v43, %v2645_v32 }
 0x360   : > { %v4265_v7 = vpop.permute.xlu0 %2678 }
 0x361   : > { %v4267_v41 = vpop.permute.xlu1 %2688 }
 0x362   : > { %v2729_v58 = vpop.permute.xlu2 %2728  ;;  %v4778_v22 = vunpack.i.h.bf16 %v4267_v41 }
 0x363   : > { %v2731_v0 = vunpack.i.h.bf16 %v2729_v58  ;;  %v2730_v31 = vunpack.i.l.bf16 %v2729_v58 }
 0x365   : > { %v4279_v24 = vsel %vm485_vm2, %v2666_v13, %v2730_v31  ;;  %v4282_v15 = vsel %vm485_vm2, %v2730_v31, %v2731_v0 }
 0x366   : > { %4921 = vst [vmem:[#allocation33_spill] sm:$0xff] %v4279_v24 }
 0x367   : > { %4922 = vst [vmem:[#allocation50_spill] sm:$0xff] %v4282_v15  ;;  %v2656_v15 = vunpack.i.h.bf16 %v4199_v25 }
 0x368   : > { %v4289_v56 = vpop.permute.xlu0 %2708 }
 0x369   : > { %v4777_v13 = vunpack.i.h.bf16 %v4289_v56  ;;  %v2710_v1 = vunpack.i.l.bf16 %v4289_v56  ;;  %v4295_v31 = vpop.permute.xlu1 %2698 }
 0x36b   : > { %v4303_v58 = vsel %vm1033_vm8, %v4778_v22, %v4777_v13  ;;  %v1872_v30 = vsel %vm1033_vm8, %v2710_v1, %v2650_v18  ;;  %v1960_v38 = vpack.c.bf16 %v2710_v1, %v2705_v43  ;;  %v2615_v13 = vunpack.i.l.bf16 %v4090_v55  ;;  %v4923_v22 = vld [vmem:[#allocation61_spill] sm:$0xff] }
 0x36c   : > { %v1961_v52 = vpack.c.bf16 %v1872_v30, %v1828_v48  ;;  %v4319_v1 = vmul.f32 %v4043_v57, %v4923_v22  ;;  %v1917_v48 = vsel %vm1078_vm10, %v2640_v42, %v4779_v51  ;;  %v2655_v30 = vunpack.i.l.bf16 %v4199_v25 }
 0x36d   : > { %2082 = vrot.lane.b32.xlu1 %v1960_v38, %s2798_s26  ;;  %v1741_v51 = vsel %vm311_vm7, %v2615_v13, %v4924_v8  ;;  %v1971_v11 = vpack.c.bf16 %v1917_v48, %v1917_v48  ;;  %v2646_v57 = vunpack.i.h.bf16 %v4186_v37  ;;  %v1916_v55 = vsel %vm1078_vm10, %v4179_v61, %v2640_v42 }
 0x36e   : > { %2084 = vrot.lane.b32.xlu2 %v1961_v52, %s2798_s26  ;;  %v1873_v8 = vsel %vm1033_vm8, %v2650_v18, %v2651_v26  ;;  %v4785_v42 = vunpack.i.l.bf16 %v4295_v31  ;;  %v4941_v37 = vpack.c.bf16 %v4248_v35, %v4239_v5 }
 0x370   : > { %v4321_v43 = vpop.permute.xlu0 %1610 }
 0x371   : > { %v4328_v38 = vsel %vm485_vm2, %v2731_v0, %v4321_v43  ;;  %v4332_v52 = vpop.permute.xlu1 %2713 }
 0x372   : > { %v2715_v22 = vunpack.i.l.bf16 %v4332_v52 }
 0x374   : > { %v1784_v0 = vsel %vm943_vm11, %v2715_v22, %v2655_v30  ;;  %v1951_v24 = vpack.c.bf16 %v2715_v22, %v2615_v13 }
 0x375   : > { %v1952_v10 = vpack.c.bf16 %v1784_v0, %v1741_v51  ;;  %v1785_v51 = vsel %vm943_vm11, %v2655_v30, %v2656_v15  ;;  %v4925_v30 = vunpack.i.l.bf16 %v4118_v23  ;;  %v4926_v0 = vunpack.i.h.bf16 %v4130_v2 }
 0x376   : > { %2104 = vrot.lane.b32.xlu2 %v1971_v11, %s2798_s26  ;;  %2064 = vrot.lane.b32.xlu0 %v1951_v24, %s2798_s26  ;;  %v1829_v24 = vsel %vm988_vm9, %v2645_v32, %v2646_v57  ;;  %v1970_v11 = vpack.c.bf16 %v1916_v55, %v1916_v55  ;;  %v1786_v32 = vsel %vm943_vm11, %v2656_v15, %v4785_v42  ;;  %v4927_v55 = vunpack.i.l.bf16 %v4130_v2 }
 0x377   : > { %2066 = vrot.lane.b32.xlu1 %v1952_v10, %s2798_s26  ;;  %v1962_v48 = vpack.c.bf16 %v1873_v8, %v1829_v24  ;;  %v1953_v10 = vpack.c.bf16 %v1785_v51, %v4146_v63  ;;  %v4928_v51 = vunpack.i.l.bf16 %v4136_v49  ;;  %v4929_v2 = vpack.c.bf16 %v4163_v14, %v4231_v34 }
 0x378   : > { %v4356_v25 = vpop.permute.xlu0 %2743  ;;  %v1743_v8 = vsel %vm311_vm7, %v4927_v55, %v4926_v0  ;;  %v2690_v0 = vunpack.i.l.bf16 %v4267_v41  ;;  %v4931_v14 = vpack.c.bf16 %v4261_v9, %v4252_v39  ;;  %v2676_v34 = vunpack.i.h.bf16 %v4128_v29 }
 0x379   : > { %v4353_v13 = vpop.permute.xlu1 %2733  ;;  %v4786_v18 = vunpack.i.h.bf16 %v4356_v25  ;;  %v1954_v24 = vpack.c.bf16 %v1786_v32, %v1743_v8  ;;  %v2685_v8 = vunpack.i.l.bf16 %v4138_v17  ;;  %v4938_v42 = vunpack.i.h.bf16 %v4188_v62 }
 0x37a   : > { %v2736_v61 = vunpack.i.h.bf16 %v4353_v13  ;;  %v4943_v5 = vunpack.i.h.bf16 %v4356_v25 }
 0x37b   : > { %v1701_v15 = vsel %vm369_vm0, %v4786_v18, %v4928_v51  ;;  %v4416_v51 = vpop.permute.xlu2 %1654 }
 0x37c   : > { %v1657_v63 = vsel %vm814_vm12, %v2736_v61, %v4925_v30  ;;  %v4784_v30 = vunpack.i.h.bf16 %v4223_v47 }
 0x37d   : > { %v1943_v23 = vpack.c.bf16 %v1701_v15, %v1657_v63  ;;  %v4932_v15 = vunpack.i.l.bf16 %v4223_v47 }
 0x37e   : > { %2086 = vrot.lane.b32.xlu2 %v1962_v48, %s2798_s26  ;;  %2102 = vrot.lane.b32.xlu0 %v1970_v11, %s2798_s26  ;;  %v2681_v48 = vunpack.i.h.bf16 %v4265_v7 }
 0x37f   : > { %2068 = vrot.lane.b32.xlu1 %v1953_v10, %s2798_s26  ;;  %v2680_v10 = vunpack.i.l.bf16 %v4265_v7  ;;  %v4930_v7 = vpack.c.bf16 %v4174_v12, %v4169_v28  ;;  %v1660_v28 = vsel %vm814_vm12, %v4932_v15, %v4784_v30  ;;  %v4933_v12 = vunpack.i.h.bf16 %v4122_v54 }
 0x380   : > { %v4388_v11 = vpop.permute.xlu0 %2748  ;;  %v4936_v54 = vunpack.i.h.bf16 %v4138_v17  ;;  %v2716_v30 = vunpack.i.h.bf16 %v4332_v52 }
 0x381   : > { %v4376_v22 = vpop.permute.xlu1 %2738  ;;  %v1919_v32 = vsel %vm1078_vm10, %v2680_v10, %v2681_v48 }
 0x382   : > { %v1973_v63 = vpack.c.bf16 %v1919_v32, %v1919_v32 }
 0x386   : > { %2070 = vrot.lane.b32.xlu2 %v1954_v24, %s2798_s26  ;;  %2048 = vrot.lane.b32.xlu0 %v1943_v23, %s2798_s26  ;;  %v1918_v24 = vsel %vm1078_vm10, %v4933_v12, %v2680_v10  ;;  %v4934_v23 = vunpack.i.h.bf16 %v4267_v41  ;;  %v1831_v10 = vsel %vm988_vm9, %v2685_v8, %v4936_v54  ;;  %v4937_v41 = vunpack.i.h.bf16 %v4289_v56 }
 0x387   : > { %2052 = vrot.lane.b32.xlu1 %v4929_v2, %s2798_s26  ;;  %v1972_v15 = vpack.c.bf16 %v1918_v24, %v1918_v24  ;;  %v1874_v56 = vsel %vm1033_vm8, %v2651_v26, %v2690_v0  ;;  %v1830_v24 = vsel %vm988_vm9, %v2646_v57, %v2685_v8  ;;  %v2696_v26 = vunpack.i.h.bf16 %v4171_v20 }
 0x388   : > { %v4403_v55 = vpop.permute.xlu0 %2763  ;;  %v1875_v2 = vsel %vm1033_vm8, %v2690_v0, %v4934_v23  ;;  %v1963_v54 = vpack.c.bf16 %v1874_v56, %v1830_v24  ;;  %v2745_v20 = vunpack.i.l.bf16 %v4356_v25  ;;  %v4946_v25 = vunpack.i.l.bf16 %v4295_v31 }
 0x389   : > { %v4398_v49 = vpop.permute.xlu1 %1698  ;;  %v2765_v39 = vunpack.i.l.bf16 %v4403_v55  ;;  %v1964_v12 = vpack.c.bf16 %v1875_v2, %v1831_v10  ;;  %v4939_v2 = vunpack.i.h.bf16 %v4201_v21 }
 0x38b   : > { %v4445_v23 = vsel %vm1033_vm8, %v4937_v41, %v2765_v39 }
 0x38e   : > { %2032 = vrot.lane.b32.xlu2 %v4930_v7, %s2798_s26  ;;  %2030 = vrot.lane.b32.xlu0 %v4931_v14, %s2798_s26 }
 0x38f   : > { %2108 = vrot.lane.b32.xlu1 %v1973_v63, %s2798_s26  ;;  %v4935_v63 = vunpack.i.l.bf16 %v4128_v29 }
 0x391   : > { %v4427_v9 = vpop.permute.xlu1 %2758  ;;  %v1704_v7 = vsel %vm369_vm0, %v4935_v63, %v2676_v34  ;;  %v4940_v63 = vunpack.i.l.bf16 %v4201_v21  ;;  %v1920_v21 = vsel %vm1078_vm10, %v2681_v48, %v2696_v26  ;;  %v1700_v48 = vsel %vm369_vm0, %v2745_v20, %v4943_v5 }
 0x392   : > { %v2760_v32 = vunpack.i.l.bf16 %v4427_v9  ;;  %v1946_v14 = vpack.c.bf16 %v1704_v7, %v1660_v28  ;;  %v2701_v28 = vunpack.i.h.bf16 %v4295_v31  ;;  %v1974_v8 = vpack.c.bf16 %v1920_v21, %v1920_v21 }
 0x393   : > { %v1745_v7 = vsel %vm311_vm7, %v4940_v63, %v4939_v2  ;;  %v2761_v41 = vunpack.i.h.bf16 %v4427_v9 }
 0x394   : > { %v4450_v18 = vsel %vm988_vm9, %v4938_v42, %v2760_v32  ;;  %v1788_v62 = vsel %vm943_vm11, %v2701_v28, %v2716_v30  ;;  %v2754_v42 = vpop.permute.xlu2 %2753 }
 0x395   : > { %v1966_v17 = vpack.c.bf16 %v4445_v23, %v4450_v18  ;;  %v1956_v10 = vpack.c.bf16 %v1788_v62, %v1745_v7  ;;  %v2755_v60 = vunpack.i.l.bf16 %v2754_v42  ;;  %v1834_v9 = vsel %vm988_vm9, %v2760_v32, %v2761_v41 }
 0x396   : > { %2054 = vrot.lane.b32.xlu2 %v1946_v14, %s2798_s26  ;;  %2106 = vrot.lane.b32.xlu0 %v1972_v15, %s2798_s26  ;;  %v2735_v14 = vunpack.i.l.bf16 %v4353_v13  ;;  %v4942_v15 = vpack.c.bf16 %v4158_v33, %v4153_v44  ;;  %v4944_v44 = vpack.c.bf16 %v4245_v4, %v4235_v16  ;;  %v2766_v33 = vunpack.i.h.bf16 %v4403_v55 }
 0x397   : > { %2090 = vrot.lane.b32.xlu1 %v1964_v12, %s2798_s26  ;;  %v1921_v57 = vsel %vm1078_vm10, %v2696_v26, %v2755_v60  ;;  %v4945_v13 = vpack.c.bf16 %v4303_v58, %v4197_v40  ;;  %v2725_v4 = vunpack.i.l.bf16 %v4226_v27  ;;  %v2756_v16 = vunpack.i.h.bf16 %v2754_v42 }
 0x398   : > { %v1975_v0 = vpack.c.bf16 %v1921_v57, %v1921_v57  ;;  %v1656_v35 = vsel %vm814_vm12, %v2735_v14, %v2736_v61  ;;  %v1787_v61 = vsel %vm943_vm11, %v4946_v25, %v2701_v28  ;;  %v1878_v56 = vsel %vm1033_vm8, %v2765_v39, %v2766_v33  ;;  %v2769_v28 = vpop.permute.xlu0 %2768 }
 0x399   : > { %v1942_v12 = vpack.c.bf16 %v1700_v48, %v1656_v35  ;;  %v1955_v62 = vpack.c.bf16 %v1787_v61, %v4214_v46  ;;  %v1967_v24 = vpack.c.bf16 %v1878_v56, %v1834_v9  ;;  %v1950_v55 = vpack.c.bf16 %v4398_v49, %v4416_v51  ;;  %v4948_v46 = vld [vmem:[#allocation3_spill] sm:$0xff]  ;;  %v4952_v48 = vld [vmem:[#allocation50_spill] sm:$0xff] }
 0x39a   : > { %v4947_v40 = vunpack.i.h.bf16 %v4226_v27  ;;  %v1922_v31 = vsel %vm1078_vm10, %v2755_v60, %v2756_v16  ;;  %v1513_v39 = vmul.f32 %v4039_v53, %v4948_v46  ;;  %v1923_v32 = vsel %vm1078_vm10, %v2756_v16, %v4124_v50 }
 0x39b   : > { %v1976_v2 = vpack.c.bf16 %v1922_v31, %v1922_v31  ;;  %v1977_v63 = vpack.c.bf16 %v1923_v32, %v1923_v32  ;;  %v2771_v7 = vunpack.i.h.bf16 %v2769_v28  ;;  %v2721_v27 = vunpack.i.h.bf16 %v4206_v36 }
 0x39c   : > { %v1612_v58 = vsel %vm485_vm2, %v2725_v4, %v4947_v40  ;;  %v1835_v50 = vsel %vm988_vm9, %v2761_v41, %v4110_v3  ;;  %v4949_v60 = vunpack.i.l.bf16 %v4206_v36  ;;  %v2751_v14 = vunpack.i.h.bf16 %v4388_v11  ;;  %v4956_v41 = vld [vmem:[#allocation34_spill] sm:$0xff] }
 0x39d   : > { %v1933_v42 = vpack.c.bf16 %v1612_v58, %v1513_v39  ;;  %v2750_v3 = vunpack.i.l.bf16 %v4388_v11  ;;  %v4950_v23 = vpack.c.bf16 %v4321_v43, %v4314_v45  ;;  %v4958_v43 = vunpack.i.h.bf16 %v4223_v47 }
 0x39e   : > { %2074 = vrot.lane.b32.xlu2 %v1956_v10, %s2798_s26  ;;  %2088 = vrot.lane.b32.xlu0 %v1963_v54, %s2798_s26  ;;  %v2770_v54 = vunpack.i.l.bf16 %v2769_v28  ;;  %v1747_v26 = vsel %vm311_vm7, %v4949_v60, %v2721_v27 }
 0x39f   : > { %2036 = vrot.lane.b32.xlu1 %v4941_v37, %s2798_s26  ;;  %v1879_v37 = vsel %vm1033_vm8, %v2766_v33, %v4120_v19  ;;  %v1706_v20 = vsel %vm369_vm0, %v2750_v3, %v2751_v14 }
 0x3a0   : > { %v1790_v53 = vsel %vm943_vm11, %v2770_v54, %v2771_v7  ;;  %v1968_v21 = vpack.c.bf16 %v1879_v37, %v1835_v50 }
 0x3a1   : > { %v2101_v10 = vpop.permute.xlu2 %2100  ;;  %v1958_v57 = vpack.c.bf16 %v1790_v53, %v1747_v26 }
 0x3a6   : > { %2112 = vrot.lane.b32.xlu2 %v1975_v0, %s2798_s26  ;;  %2050 = vrot.lane.b32.xlu0 %v4942_v15, %s2798_s26  ;;  %v2741_v0 = vunpack.i.h.bf16 %v4376_v22  ;;  %v1791_v15 = vsel %vm943_vm11, %v2771_v7, %v4126_v6  ;;  %v1707_v6 = vsel %vm369_vm0, %v2751_v14, %v4398_v49  ;;  %v4953_v49 = vld [vmem:[#allocation51_spill] sm:$0xff] }
 0x3a7   : > { %2110 = vrot.lane.b32.xlu1 %v1974_v8, %s2798_s26  ;;  %v2740_v8 = vunpack.i.l.bf16 %v4376_v22  ;;  %v1789_v22 = vsel %vm943_vm11, %v2716_v30, %v2770_v54  ;;  %v1959_v5 = vpack.c.bf16 %v1791_v15, %v2721_v27 }
 0x3a8   : > { %v1957_v11 = vpack.c.bf16 %v1789_v22, %v4221_v59  ;;  %v1663_v52 = vsel %vm814_vm12, %v2741_v0, %v4416_v51  ;;  %v4951_v59 = vpack.c.bf16 %v4328_v38, %v4319_v1  ;;  %v4955_v51 = vld [vmem:[#allocation33_spill] sm:$0xff]  ;;  %v1705_v1 = vsel %vm369_vm0, %v2676_v34, %v2750_v3 }
 0x3a9   : > { %v1662_v36 = vsel %vm814_vm12, %v2740_v8, %v2741_v0  ;;  %v1949_v30 = vpack.c.bf16 %v1707_v6, %v1663_v52  ;;  %v1661_v33 = vsel %vm814_vm12, %v4958_v43, %v2740_v8 }
 0x3aa   : > { %v1948_v35 = vpack.c.bf16 %v1706_v20, %v1662_v36  ;;  %v1947_v38 = vpack.c.bf16 %v1705_v1, %v1661_v33 }
 0x3ae   : > { %2046 = vrot.lane.b32.xlu2 %v1942_v12, %s2798_s26  ;;  %2034 = vrot.lane.b32.xlu0 %v4944_v44, %s2798_s26  ;;  %v4954_v12 = vpack.c.bf16 %v4952_v48, %v4953_v49  ;;  %v4957_v44 = vpack.c.bf16 %v4955_v51, %v4956_v41 }
 0x3af   : > { %2092 = vrot.lane.b32.xlu1 %v4945_v13, %s2798_s26 }
 0x3b6   : > { %2096 = vrot.lane.b32.xlu2 %v1967_v24, %s2798_s26  ;;  %2072 = vrot.lane.b32.xlu0 %v1955_v62, %s2798_s26 }
 0x3b7   : > { %2062 = vrot.lane.b32.xlu1 %v1950_v55, %s2798_s26 }
 0x3be   : > { %2028 = vrot.lane.b32.xlu2 %v1933_v42, %s2798_s26  ;;  %2114 = vrot.lane.b32.xlu0 %v1976_v2, %s2798_s26 }
 0x3bf   : > { %2116 = vrot.lane.b32.xlu1 %v1977_v63, %s2798_s26 }
 0x3c6   : > { %2078 = vrot.lane.b32.xlu2 %v1958_v57, %s2798_s26  ;;  %2098 = vrot.lane.b32.xlu0 %v1968_v21, %s2798_s26 }
 0x3c7   : > { %2094 = vrot.lane.b32.xlu1 %v1966_v17, %s2798_s26 }
 0x3c8   : > { %v2085_v19 = vpop.permute.xlu2 %2084 }
 0x3ce   : > { %2058 = vrot.lane.b32.xlu2 %v1948_v35, %s2798_s26  ;;  %2080 = vrot.lane.b32.xlu0 %v1959_v5, %s2798_s26 }
 0x3cf   : > { %2076 = vrot.lane.b32.xlu1 %v1957_v11, %s2798_s26 }
 0x3d0   : > { %v2105_v18 = vpop.permute.xlu2 %2104 }
 0x3d6   : > { %2044 = vrot.lane.b32.xlu2 %v4950_v23, %s2798_s26  ;;  %2060 = vrot.lane.b32.xlu0 %v1949_v30, %s2798_s26  ;;  %v4629_v23 = vld [vmem:[%s4694_s4] sm:$0x3] }
 0x3d7   : > { %2042 = vrot.lane.b32.xlu1 %v4951_v59, %s2798_s26 }
 0x3d8   : > { %v2087_v17 = vpop.permute.xlu2 %2086 }
 0x3d9   : > { %v2143_v55 = vsel %vm717_vm6, %v2085_v19, %v2087_v17 }
 0x3de   : > { %2040 = vrot.lane.b32.xlu0 %v4954_v12, %s2798_s26 }
 0x3df   : > { %2038 = vrot.lane.b32.xlu1 %v4957_v44, %s2798_s26  ;;  %v2083_v13 = vpop.permute.xlu1 %2082 }
 0x3e0   : > { %v4580_v45 = vpop.permute.xlu2 %2070  ;;  %v2142_v34 = vsel %vm717_vm6, %v2083_v13, %v2085_v19 }
 0x3e6   : > { %2056 = vrot.lane.b32.xlu0 %v1947_v38, %s2798_s26 }
 0x3e8   : > { %v4589_v25 = vpop.permute.xlu2 %2032  ;;  %v2065_v61 = vpop.permute.xlu0 %2064 }
 0x3e9   : > { %v2067_v9 = vpop.permute.xlu1 %2066 }
 0x3ea   : > { %v2134_v46 = vsel %vm717_vm6, %v2065_v61, %v2067_v9 }
 0x3f0   : > { %v4591_v56 = vpop.permute.xlu2 %2054  ;;  %v2103_v62 = vpop.permute.xlu0 %2102 }
 0x3f1   : > { %v2150_v24 = vsel %vm717_vm6, %v2101_v10, %v2103_v62  ;;  %v2151_v47 = vsel %vm717_vm6, %v2103_v62, %v2105_v18  ;;  %v2069_v4 = vpop.permute.xlu1 %2068 }
 0x3f2   : > { %v2194_v16 = vsel %vm1358_vm13, %v2150_v24, 0  ;;  %v2197_v29 = vsel %vm1358_vm13, %v2151_v47, 0  ;;  %v2135_v39 = vsel %vm717_vm6, %v2067_v9, %v2069_v4  ;;  %v2136_v0 = vsel %vm717_vm6, %v2069_v4, %v4580_v45 }
 0x3f3   : > { %2220 = vmatpush.bf16.msra.mxu0 %v2194_v16  ;;  %2233 = vmatpush.bf16.msra.mxu1 %v2197_v29  ;;  %v1512_v16 = vld [vmem:[%s4695_s5] sm:$0x7] }
 0x3f4   : > { %1980 = vperm.xlu2 %2772, %v1512_v16  }
 0x3f7   : > { %2221 = vmatpush.bf16.msra.mxu0 %v2142_v34  ;;  %2234 = vmatpush.bf16.msra.mxu1 %v2143_v55 }
 0x3f8   : > { %v4599_v40 = vpop.permute.xlu2 %2074  ;;  %v2049_v58 = vpop.permute.xlu0 %2048 }
 0x3f9   : > { %v2053_v31 = vpop.permute.xlu1 %2052 }
 0x3fa   : > { %v2129_v12 = vsel %vm717_vm6, %v2053_v31, %v4591_v56 }
 0x3fb   : > { %2222 = vmatpush.bf16.msra.mxu0 %v2134_v46  ;;  %2235 = vmatpush.bf16.msra.mxu1 %v2135_v39 }
 0x400   : > { %v2113_v32 = vpop.permute.xlu2 %2112  ;;  %v2031_v28 = vpop.permute.xlu0 %2030 }
 0x401   : > { %v2109_v42 = vpop.permute.xlu1 %2108  ;;  %v2119_v5 = vsel %vm717_vm6, %v2031_v28, %v4589_v25 }
 0x408   : > { %v2047_v2 = vpop.permute.xlu2 %2046  ;;  %v2107_v63 = vpop.permute.xlu0 %2106 }
 0x409   : > { %v2152_v7 = vsel %vm717_vm6, %v2105_v18, %v2107_v63  ;;  %v2153_v54 = vsel %vm717_vm6, %v2107_v63, %v2109_v42  ;;  %v2126_v27 = vsel %vm717_vm6, %v2047_v2, %v2049_v58  ;;  %v2091_v10 = vpop.permute.xlu1 %2090 }
 0x40a   : > { %v2200_v53 = vsel %vm1358_vm13, %v2152_v7, 0  ;;  %v2203_v50 = vsel %vm1358_vm13, %v2153_v54, 0  ;;  %2223 = vmatpush.bf16.msra.mxu0 %v2126_v27 }
 0x40b   : > { %2246 = vmatpush.bf16.msra.mxu2 %v2200_v53  ;;  %2259 = vmatpush.bf16.msra.mxu3 %v2203_v50 }
 0x410   : > { %v2097_v60 = vpop.permute.xlu2 %2096  ;;  %v2089_v26 = vpop.permute.xlu0 %2088 }
 0x411   : > { %v4608_v37 = vpop.permute.xlu1 %2036  ;;  %v2144_v57 = vsel %vm717_vm6, %v2087_v17, %v2089_v26  ;;  %v2145_v21 = vsel %vm717_vm6, %v2089_v26, %v2091_v10 }
 0x412   : > { %2247 = vmatpush.bf16.msra.mxu2 %v2144_v57  ;;  %2260 = vmatpush.bf16.msra.mxu3 %v2145_v21 }
 0x416   : > { %2248 = vmatpush.bf16.msra.mxu2 %v2136_v0 }
 0x418   : > { %v2029_v8 = vpop.permute.xlu2 %2028  ;;  %v2051_v14 = vpop.permute.xlu0 %2050 }
 0x419   : > { %v2118_v3 = vsel %vm717_vm6, %v2029_v8, %v2031_v28  ;;  %v2111_v19 = vpop.permute.xlu1 %2110  ;;  %v2127_v36 = vsel %vm717_vm6, %v2049_v58, %v2051_v14  ;;  %v2128_v15 = vsel %vm717_vm6, %v2051_v14, %v2053_v31 }
 0x41a   : > { %2224 = vmatpush.bf16.msra.mxu0 %v2118_v3  ;;  %v2154_v22 = vsel %vm717_vm6, %v2109_v42, %v2111_v19  ;;  %2236 = vmatpush.bf16.msra.mxu1 %v2127_v36  ;;  %v2155_v20 = vsel %vm717_vm6, %v2111_v19, %v2113_v32 }
 0x41b   : > { %v2206_v35 = vsel %vm1358_vm13, %v2154_v22, 0  ;;  %2249 = vmatpush.bf16.msra.mxu2 %v2128_v15  ;;  %v2209_v11 = vsel %vm1358_vm13, %v2155_v20, 0 }
 0x41d   : > { %2417 = vmatmul.msk.bf16.vlgmr.msra.gmra.mxu0 %vm1354_vm14, %v4629_v23 }
 0x41e   : > { %2272 = vmatpush.bf16.msrb.mxu0 %v2206_v35  ;;  %2237 = vmatpush.bf16.msra.mxu1 %v2119_v5 }
 0x420   : > { %v2035_v18 = vpop.permute.xlu0 %2034  ;;  %v2079_v1 = vpop.permute.xlu2 %2078 }
 0x421   : > { %v2093_v6 = vpop.permute.xlu1 %2092  ;;  %v2120_v52 = vsel %vm717_vm6, %v4589_v25, %v2035_v18  ;;  %2418 = vmatmul.msk.bf16.vlgmr.msra.gmra.mxu1 %vm1354_vm14, %v4629_v23  ;;  %v2121_v43 = vsel %vm717_vm6, %v2035_v18, %v4608_v37 }
 0x422   : > { %2285 = vmatpush.bf16.msrb.mxu1 %v2209_v11  ;;  %2250 = vmatpush.bf16.msra.mxu2 %v2120_v52  ;;  %v2146_v30 = vsel %vm717_vm6, %v2091_v10, %v2093_v6 }
 0x423   : > { %2273 = vmatpush.bf16.msrb.mxu0 %v2146_v30 }
 0x425   : > { %2419 = vmatmul.msk.bf16.vlgmr.msra.gmra.mxu2 %vm1354_vm14, %v4629_v23 }
 0x428   : > { %v2073_v59 = vpop.permute.xlu0 %2072  ;;  %v2059_v29 = vpop.permute.xlu2 %2058 }
 0x429   : > { %v2063_v17 = vpop.permute.xlu1 %2062  ;;  %v2137_v48 = vsel %vm717_vm6, %v4580_v45, %v2073_v59  ;;  %v2138_v49 = vsel %vm717_vm6, %v2073_v59, %v4599_v40 }
 0x42a   : > { %2261 = vmatpush.bf16.msra.mxu3 %v2137_v48  ;;  %2274 = vmatpush.bf16.msrb.mxu0 %v2138_v49 }
 0x42e   : > { %2262 = vmatpush.bf16.msra.mxu3 %v2129_v12 }
 0x430   : > { %v2115_v51 = vpop.permute.xlu0 %2114 }
 0x431   : > { %v2156_v41 = vsel %vm717_vm6, %v2113_v32, %v2115_v51  ;;  %v2117_v44 = vpop.permute.xlu1 %2116  ;;  %v2045_v32 = vpop.permute.xlu2 %2044 }
 0x432   : > { %v2212_v33 = vsel %vm1358_vm13, %v2156_v41, 0  ;;  %v2157_v45 = vsel %vm717_vm6, %v2115_v51, %v2117_v44  ;;  %2263 = vmatpush.bf16.msra.mxu3 %v2121_v43 }
 0x433   : > { %v2215_v13 = vsel %vm1358_vm13, %v2157_v45, 0  ;;  %2298 = vmatpush.bf16.msrb.mxu2 %v2212_v33 }
 0x435   : > { %2420 = vmatmul.msk.bf16.vlgmr.msra.gmra.mxu3 %vm1354_vm14, %v4629_v23 }
 0x436   : > { %2311 = vmatpush.bf16.msrb.mxu3 %v2215_v13 }
 0x438   : > { %v2099_v38 = vpop.permute.xlu0 %2098 }
 0x439   : > { %v2095_v25 = vpop.permute.xlu1 %2094  ;;  %v2149_v61 = vsel %vm717_vm6, %v2097_v60, %v2099_v38 }
 0x43a   : > { %2312 = vmatpush.bf16.msrb.mxu3 %v2149_v61  ;;  %v2147_v9 = vsel %vm717_vm6, %v2093_v6, %v2095_v25  ;;  %v2148_v62 = vsel %vm717_vm6, %v2095_v25, %v2097_v60 }
 0x43b   : > { %2286 = vmatpush.bf16.msrb.mxu1 %v2147_v9  ;;  %2299 = vmatpush.bf16.msrb.mxu2 %v2148_v62 }
 0x440   : > { %v2081_v24 = vpop.permute.xlu0 %2080 }
 0x441   : > { %v2077_v47 = vpop.permute.xlu1 %2076  ;;  %v2141_v4 = vsel %vm717_vm6, %v2079_v1, %v2081_v24 }
 0x442   : > { %2313 = vmatpush.bf16.msrb.mxu3 %v2141_v4  ;;  %v2139_v34 = vsel %vm717_vm6, %v4599_v40, %v2077_v47  ;;  %v2140_v55 = vsel %vm717_vm6, %v2077_v47, %v2079_v1 }
 0x443   : > { %2287 = vmatpush.bf16.msrb.mxu1 %v2139_v34  ;;  %2300 = vmatpush.bf16.msrb.mxu2 %v2140_v55 }
 0x448   : > { %v2061_v58 = vpop.permute.xlu0 %2060 }
 0x449   : > { %v2132_v31 = vsel %vm717_vm6, %v2059_v29, %v2061_v58  ;;  %v2133_v46 = vsel %vm717_vm6, %v2061_v58, %v2063_v17  ;;  %v2043_v39 = vpop.permute.xlu1 %2042 }
 0x44a   : > { %2301 = vmatpush.bf16.msrb.mxu2 %v2132_v31  ;;  %2314 = vmatpush.bf16.msrb.mxu3 %v2133_v46  ;;  %v2125_v28 = vsel %vm717_vm6, %v2043_v39, %v2045_v32 }
 0x44e   : > { %2315 = vmatpush.bf16.msrb.mxu3 %v2125_v28  ;;  %v1981_v57 = vpop.permute.xlu2 %1980 }
 0x450   : > { %v2041_v42 = vpop.permute.xlu0 %2040 }
 0x451   : > { %v2124_v40 = vsel %vm717_vm6, %v2041_v42, %v2043_v39  ;;  %2424 = vmatmul.msk.bf16.vlgmr.msrb.gmra.mxu3 %vm1354_vm14, %v4629_v23  ;;  %v2039_v54 = vpop.permute.xlu1 %2038 }
 0x452   : > { %2302 = vmatpush.bf16.msrb.mxu2 %v2124_v40  ;;  %v2122_v27 = vsel %vm717_vm6, %v4608_v37, %v2039_v54  ;;  %v2123_v10 = vsel %vm717_vm6, %v2039_v54, %v2041_v42 }
 0x455   : > { %2423 = vmatmul.msk.bf16.vlgmr.msrb.gmra.mxu2 %vm1354_vm14, %v4629_v23 }
 0x458   : > { %v2057_v2 = vpop.permute.xlu0 %2056 }
 0x459   : > { %v2130_v63 = vsel %vm717_vm6, %v4591_v56, %v2057_v2  ;;  %v2131_v7 = vsel %vm717_vm6, %v2057_v2, %v2059_v29 }
 0x45a   : > { %2275 = vmatpush.bf16.msrb.mxu0 %v2130_v63  ;;  %2288 = vmatpush.bf16.msrb.mxu1 %v2131_v7 }
 0x45e   : > { %2276 = vmatpush.bf16.msrb.mxu0 %v2122_v27  ;;  %2289 = vmatpush.bf16.msrb.mxu1 %v2123_v10 }
 0x461   : > { %2421 = vmatmul.msk.bf16.vlgmr.msrb.gmra.mxu0 %vm1354_vm14, %v4629_v23  ;;  %2422 = vmatmul.msk.bf16.vlgmr.msrb.gmra.mxu1 %vm1354_vm14, %v4629_v23 }
 0x49a   : > { %v2226_v53 = vpop.f32.mrf.mxu0 }
 0x49b   : > { %v2227_v37 = vadd.f32 %v2226_v53, %v1981_v57 }
 0x49e   : > { %v2239_v56 = vpop.f32.mrf.mxu1 }
 0x49f   : > { %v2240_v21 = vadd.f32 %v2239_v56, %v1981_v57 }
 0x4a1   : > { %v2329_v8 = vrot.slane %v2240_v21, 4 }
 0x4a2   : > { %v2228_v26 = vpop.f32.mrf.mxu0 }
 0x4a3   : > { %v2333_v3 = vsel %vm1358_vm13, %v2227_v37, %v2329_v8 }
 0x4a4   : > { %2341 = vst [vmem:[%s251_s17] sm:$0x77] %v2333_v3 }
 0x4a6   : > { %v2241_v60 = vpop.f32.mrf.mxu1 }
 0x4a8   : > { %v2252_v50 = vpop.f32.mrf.mxu2 }
 0x4a9   : > { %v2253_v19 = vadd.f32 %v2252_v50, %v1981_v57 }
 0x4b0   : > { %v2254_v0 = vpop.f32.mrf.mxu2 }
 0x4b8   : > { %v2265_v14 = vpop.f32.mrf.mxu3 }
 0x4b9   : > { %v2266_v36 = vadd.f32 %v2265_v14, %v1981_v57 }
 0x4bb   : > { %v2330_v15 = vrot.slane %v2266_v36, 4 }
 0x4bd   : > { %v2334_v22 = vsel %vm1358_vm13, %v2253_v19, %v2330_v15 }
 0x4be   : > { %2342 = vst [vmem:[%s251_s17 + $0x8] sm:$0x77] %v2334_v22 }
 0x4c0   : > { %v2267_v20 = vpop.f32.mrf.mxu3 }
 0x4d4   : > { %v2317_v35 = vpop.f32.mrf.mxu3 }
 0x4d5   : > { %v2318_v5 = vadd.f32 %v2317_v35, %v1981_v57 }
 0x4d7   : > { %v2332_v11 = vrot.slane %v2318_v5, 4 }
 0x4d8   : > { %v2304_v18 = vpop.f32.mrf.mxu2 }
 0x4d9   : > { %v2305_v6 = vadd.f32 %v2304_v18, %v1981_v57 }
 0x4db   : > { %v2336_v52 = vsel %vm1358_vm13, %v2305_v6, %v2332_v11 }
 0x4dc   : > { %2344 = vst [vmem:[%s251_s17 + $0x18] sm:$0x77] %v2336_v52  ;;  %v2319_v30 = vpop.f32.mrf.mxu3 }
 0x4de   : > { %v2278_v23 = vpop.f32.mrf.mxu0  ;;  %v2291_v59 = vpop.f32.mrf.mxu1 }
 0x4df   : > { %v2292_v17 = vadd.f32 %v2291_v59, %v1981_v57  ;;  %v2279_v49 = vadd.f32 %v2278_v23, %v1981_v57 }
 0x4e0   : > { %v2306_v48 = vpop.f32.mrf.mxu2 }
 0x4e1   : > { %v2331_v12 = vrot.slane %v2292_v17, 4 }
 0x4e3   : > { %v2335_v51 = vsel %vm1358_vm13, %v2279_v49, %v2331_v12 }
 0x4e4   : > { %2343 = vst [vmem:[%s251_s17 + $0x10] sm:$0x77] %v2335_v51 }
 0x4e6   : > { %v2280_v41 = vpop.f32.mrf.mxu0  ;;  %v2293_v44 = vpop.f32.mrf.mxu1 }
 0x4e7 PF: > { %s16_s21 = sadd.s32 1, %s2789_s21  }
 0x4e8   : > { %p13_p4 = scmp.ge.s32.totalorder %s16_s21, 4  }
 0x4ea   :  { %15 = sbr.rel (!%p13_p4) target bundleno = 1 (0x1), region = 74 }

// kernel: search_cnn_forward.2
= control target key start
LH: loop header
LB: loop body
LE: loop exit
PB: predicated region body
PF: predicated region fallthrough
CT: control target
= control target key end

     0   :  { %s9496_s0 = inlined_call_operand.vmem [shape: f32[2,8,256], index: 0, kind: input, shape index: {}]   ;;  %s9497_s1 = inlined_call_operand.vmem [shape: f32[9,256], index: 1, kind: input, shape index: {}]   ;;  %s9498_s2 = inlined_call_operand.vmem [shape: bf16[8,72], index: 2, kind: input, shape index: {}]   ;;  %s9499_s3 = inlined_call_operand.vmem [shape: f32[8,1], index: 3, kind: input, shape index: {}]   ;;  %s9500_s4 = inlined_call_operand.vmem [shape: bf16[8,8], index: 4, kind: input, shape index: {}]   ;;  %s9501_s5 = inlined_call_operand.vmem [shape: f32[8,1], index: 5, kind: input, shape index: {}]   ;;  %s9502_s6 = inlined_call_operand.vmem [shape: bf16[8,8], index: 6, kind: input, shape index: {}]   ;;  %s9503_s7 = inlined_call_operand.vmem [shape: f32[8,1], index: 7, kind: input, shape index: {}]   ;;  %s9504_s8 = inlined_call_operand.vmem [shape: bf16[4,2,8,72], index: 8, kind: input, shape index: {}]   ;;  %s9505_s9 = inlined_call_operand.vmem [shape: f32[4,2,8,1], index: 9, kind: input, shape index: {}]   ;;  %s9506_s10 = inlined_call_operand.vmem [shape: bf16[8,8], index: 10, kind: input, shape index: {}]   ;;  %s9507_s11 = inlined_call_operand.vmem [shape: f32[8,1], index: 11, kind: input, shape index: {}]   ;;  %s9508_s12 = inlined_call_operand.vmem [shape: bf16[8,32], index: 12, kind: input, shape index: {}]   ;;  %s9509_s13 = inlined_call_operand.vmem [shape: f32[8,1], index: 13, kind: input, shape index: {}]   ;;  %s9510_s14 = inlined_call_operand.vmem [shape: bf16[4,2,8,72], index: 14, kind: input, shape index: {}]   ;;  %s9511_s15 = inlined_call_operand.vmem [shape: f32[4,2,8,1], index: 15, kind: input, shape index: {}]   ;;  %s9512_s16 = inlined_call_operand.vmem [shape: bf16[8,288], index: 16, kind: input, shape index: {}]   ;;  %s9513_s17 = inlined_call_operand.vmem [shape: f32[8,1], index: 17, kind: input, shape index: {}]   ;;  %s9514_s18 = inlined_call_operand.vmem [shape: bf16[32,72], index: 18, kind: input, shape index: {}]   ;;  %s9515_s19 = inlined_call_operand.vmem [shape: f32[32,1], index: 19, kind: input, shape index: {}]   ;;  %s9516_s20 = inlined_call_operand.vmem [shape: f32[2,32,256], index: 20, kind: output, shape index: {}]  }
   0x1   :  { %9679 = sst [smem:[#allocation68_spill]] %s9496_s0 }
   0x2   :  { %9680 = sst [smem:[#allocation69_spill]] %s9497_s1  ;;  %s6240_s1 = smov 0  }
   0x3   :  { %9681 = sst [smem:[#allocation70_spill]] %s9498_s2 }
   0x4   :  { %9682 = sst [smem:[#allocation71_spill]] %s9499_s3 }
   0x5   :  { %9683 = sst [smem:[#allocation72_spill]] %s9500_s4 }
   0x6 LB: > { %s5235_s22 = sadd.s32 4294967295, %s6119_s1   ;;  %p5239_p0 = scmp.ge.s32.totalorder %s6119_s1, 1  ;;  %s6119_s1 = sphi %s6240_s1, %s30_s1  }
   0x7   : > { %p562_p1 = scmp.lt.s32.totalorder %s6119_s1, 3 }
   0x9   : > { %p563_p2 = pnand %p5239_p0, %p562_p1 }
   0xb   : > { %566 = sbr.rel (%p563_p2) target bundleno = 5740 (0x166c), region = 100 }
  0x10   : > { %s9684_s2 = sld [smem:[#allocation69_spill]]  ;;  %s9518_s26 = smov 17   ;;  %vm727_vm0 = vcmask 121856   ;;  %vm743_vm1 = vcmask 130048   ;;  %vm711_vm2 = vcmask 7168   ;;  %vm679_vm3 = vcmask 924672  }
  0x11   : > { %s6122_s27 = smov 16   ;;  %s6123_s28 = smov 15   ;;  %vm695_vm4 = vcmask 1039360   ;;  %vm759_vm5 = vcmask 138240   ;;  %vm663_vm6 = vcmask 916480   ;;  %vm874_vm7 = vcmask 769024  }
  0x12   : > { %s6124_s21 = smov 1   ;;  %s6125_s23 = smov 113   ;;  %vm844_vm8 = vcmask 785408   ;;  %vm859_vm9 = vcmask 777216   ;;  %vm829_vm10 = vcmask 900096   ;;  %vm647_vm11 = vcmask 908288  }
  0x13   : > { %s9520_s24 = smov 127   ;;  %s9529_s25 = smov 112   ;;  %vm790_vm12 = vcmask 1031168   ;;  %vm968_vm13 = vcmask 1043456   ;;  %vm964_vm14 = vcmask 588800   ;;  %vm1030_vm15 = vcmask 64512  }
  0x14   : > { %p620_p3 = scmp.lt.s32.totalorder %s5235_s22, 1  ;;  %s9535_s3 = smov 111  }
  0x15   : > { %s9686_s29 = sld [smem:[#allocation68_spill]]  ;;  %s9537_s0 = smov 94  }
  0x16   : > { %v6111_v0 = vld [vmem:[%s9684_s2 + $0x10] ss:$0 sm:$0xff]  ;;  %v6254_v1 = vld [vmem:[%s9684_s2] sm:$0xff]  ;;  %v632_v4 = vld [vmem:[%s9684_s2 + $0x8] sm:$0xff]  ;;  %s9992_s22 = smov (!%p620_p3, %s5235_s22), 1  ;;  %s9716_s4 = smov 17  }
  0x17   : > { %v735_v2 = vperm.slane %v6254_v1, 7  ;;  %v719_v3 = vperm.slane %v6254_v1, 6  ;;  %755 = vrot.lane.b32.xlu0 %v6111_v0, %s9518_s26  ;;  %v6112_v5 = vld [vmem:[%s9684_s2 + $0x18] ss:$0 sm:$0xff]  ;;  %v736_v6 = vperm.slane %v632_v4, 7  ;;  %v720_v7 = vperm.slane %v632_v4, 6 }
  0x18   : > { %v703_v8 = vperm.slane %v6254_v1, 5  ;;  %v704_v9 = vperm.slane %v632_v4, 5  ;;  %v671_v10 = vperm.slane %v6254_v1, 2  ;;  %v672_v11 = vperm.slane %v632_v4, 2 }
  0x19   : > { %739 = vrot.lane.b32.xlu2 %v735_v2, %s6122_s27  ;;  %723 = vrot.lane.b32.xlu1 %v719_v3, %s6123_s28  ;;  %v687_v12 = vperm.slane %v6254_v1, 3  ;;  %v688_v13 = vperm.slane %v632_v4, 3  ;;  %v655_v14 = vperm.slane %v6254_v1, 1  ;;  %v656_v15 = vperm.slane %v632_v4, 1 }
  0x1a   : > { %v640_v16 = vperm.slane %v632_v4, 0  ;;  %v639_v63 = vperm.slane %v6254_v1, 0 }
  0x1f   : > { %757 = vrot.lane.b32.xlu0 %v6112_v5, %s9518_s26 }
  0x21   : > { %741 = vrot.lane.b32.xlu2 %v736_v6, %s6122_s27  ;;  %725 = vrot.lane.b32.xlu1 %v720_v7, %s6123_s28  ;;  %s5302_s27 = sshll.u32 %s9992_s22, 4  ;;  %s9531_s28 = smov 126  }
  0x22   : > { %s624_s30 = scalar_lea.vmem %s9686_s29, %s5302_s27  ;;  %s9533_s27 = smov 110  }
  0x23   : > { %v6287_v18 = vld [vmem:[%s624_s30 + $0x8] sm:$0xff]  ;;  %v6289_v19 = vld [vmem:[%s624_s30] sm:$0xff]  ;;  %s9710_s30 = sld [smem:[#allocation71_spill]]  ;;  %s9725_s29 = smov 126  }
  0x24   : > { %v5328_v21 = vpack.i.bf16 %v6287_v18, %v6289_v19 }
  0x27   : > { %707 = vrot.lane.b32.xlu0 %v703_v8, %s6124_s21 }
  0x29   : > { %709 = vrot.lane.b32.xlu1 %v704_v9, %s6124_s21  ;;  %675 = vrot.lane.b32.xlu2 %v671_v10, %s6125_s23  ;;  %s9539_s21 = smov 96  }
  0x2f   : > { %677 = vrot.lane.b32.xlu0 %v672_v11, %s6125_s23  ;;  %s9546_s23 = smov 95  }
  0x31   : > { %691 = vrot.lane.b32.xlu1 %v687_v12, %s9520_s24  ;;  %693 = vrot.lane.b32.xlu2 %v688_v13, %s9520_s24 }
  0x37   : > { %659 = vrot.lane.b32.xlu0 %v655_v14, %s9529_s25 }
  0x39   : > { %661 = vrot.lane.b32.xlu1 %v656_v15, %s9529_s25  ;;  %5329 = vrot.lane.b32.xlu2 %v5328_v21, %s9535_s3 }
  0x3f   : > { %645 = vrot.lane.b32.xlu0 %v640_v16, %s9535_s3 }
  0x73   : > { %v6281_v17 = vpop.permute.xlu2 %739 }
  0x74   : > { %9685 = vst [vmem:[#allocation2_spill] sm:$0xff] %v6281_v17  ;;  %v748_v37 = vmul.f32 %v6281_v17, %v6289_v19 }
  0x7b   : > { %v6291_v20 = vpop.permute.xlu2 %741 }
  0x7c   : > { %9687 = vst [vmem:[#allocation3_spill] sm:$0xff] %v6291_v20  ;;  %v6323_v33 = vsel %vm743_vm1, %v6281_v17, %v6291_v20  ;;  %v750_v5 = vmul.f32 %v6291_v20, %v6289_v19 }
  0x7d   : > { %9695 = vst [vmem:[#allocation11_spill] sm:$0xff] %v6323_v33  ;;  %v749_v35 = vmul.f32 %v6323_v33, %v6287_v18 }
  0x7f   : > { %v5343_v40 = vpack.i.bf16 %v749_v35, %v748_v37 }
  0x83   : > { %v6296_v22 = vpop.permute.xlu2 %675 }
  0x84   : > { %9688 = vst [vmem:[#allocation4_spill] sm:$0xff] %v6296_v22  ;;  %v684_v48 = vmul.f32 %v6296_v22, %v6287_v18 }
  0x89   : > { %v6298_v23 = vpop.permute.xlu0 %755 }
  0x8a   : > { %9689 = vst [vmem:[#allocation5_spill] sm:$0xff] %v6298_v23  ;;  %v764_v57 = vmul.f32 %v6298_v23, %v6289_v19 }
  0x8b   : > { %v6300_v24 = vpop.permute.xlu1 %723  ;;  %v6302_v25 = vpop.permute.xlu2 %693 }
  0x8c   : > { %9690 = vst [vmem:[#allocation6_spill] sm:$0xff] %v6300_v24  ;;  %v702_v26 = vmul.f32 %v6302_v25, %v6287_v18  ;;  %v732_v31 = vmul.f32 %v6300_v24, %v6289_v19 }
  0x8d   : > { %9691 = vst [vmem:[#allocation7_spill] sm:$0xff] %v6302_v25 }
  0x8e   : > { %803 = vrot.lane.b32.xlu1 %v702_v26, %s9529_s25 }
  0x91   : > { %v6307_v27 = vpop.permute.xlu0 %757 }
  0x92   : > { %9692 = vst [vmem:[#allocation8_spill] sm:$0xff] %v6307_v27  ;;  %v766_v29 = vmul.f32 %v6307_v27, %v6289_v19  ;;  %v6369_v52 = vsel %vm759_vm5, %v6298_v23, %v6307_v27 }
  0x93   : > { %v6309_v28 = vpop.permute.xlu1 %725  ;;  %9703 = vst [vmem:[#allocation19_spill] sm:$0xff] %v6369_v52  ;;  %v765_v56 = vmul.f32 %v6369_v52, %v6287_v18  ;;  %v6409_v6 = vpop.permute.xlu2 %5329 }
  0x94   : > { %9693 = vst [vmem:[#allocation9_spill] sm:$0xff] %v6309_v28  ;;  %v6315_v30 = vsel %vm727_vm0, %v6300_v24, %v6309_v28  ;;  %v734_v61 = vmul.f32 %v6309_v28, %v6289_v19  ;;  %vm2535_vm0 = vcmask 261120  }
  0x95   : > { %9694 = vst [vmem:[#allocation10_spill] sm:$0xff] %v6315_v30  ;;  %v733_v32 = vmul.f32 %v6315_v30, %v6287_v18  ;;  %v5333_v59 = vpack.i.bf16 %v765_v56, %v764_v57 }
  0x96   : > { %872 = vrot.lane.b32.xlu1 %v766_v29, %s9537_s0 }
  0x97   : > { %v5338_v34 = vpack.i.bf16 %v733_v32, %v732_v31 }
  0x99   : > { %5339 = vrot.lane.b32.xlu0 %v5338_v34, %s9539_s21  ;;  %v6329_v36 = vpop.permute.xlu0 %707 }
  0x9a   : > { %9696 = vst [vmem:[#allocation12_spill] sm:$0xff] %v6329_v36  ;;  %v716_v39 = vmul.f32 %v6329_v36, %v6289_v19 }
  0x9b   : > { %v6333_v38 = vpop.permute.xlu1 %709 }
  0x9c   : > { %9697 = vst [vmem:[#allocation13_spill] sm:$0xff] %v6333_v38  ;;  %v6339_v41 = vsel %vm711_vm2, %v6329_v36, %v6333_v38  ;;  %v718_v2 = vmul.f32 %v6333_v38, %v6289_v19 }
  0x9d   : > { %9698 = vst [vmem:[#allocation14_spill] sm:$0xff] %v6339_v41  ;;  %v717_v42 = vmul.f32 %v6339_v41, %v6287_v18 }
  0x9e   : > { %5344 = vrot.lane.b32.xlu1 %v5343_v40, %s9546_s23 }
  0x9f   : > { %v5348_v43 = vpack.i.bf16 %v717_v42, %v716_v39 }
  0xa1   : > { %5349 = vrot.lane.b32.xlu0 %v5348_v43, %s9533_s27  ;;  %v6345_v44 = vpop.permute.xlu0 %677  ;;  %v5331_v43 = vunpack.i.l.bf16 %v6409_v6 }
  0xa2   : > { %9699 = vst [vmem:[#allocation15_spill] sm:$0xff] %v6345_v44  ;;  %v686_v46 = vmul.f32 %v6345_v44, %v6287_v18  ;;  %v6353_v47 = vsel %vm679_vm3, %v6296_v22, %v6345_v44 }
  0xa3   : > { %v6347_v45 = vpop.permute.xlu1 %691  ;;  %9701 = vst [vmem:[#allocation17_spill] sm:$0xff] %v6353_v47  ;;  %v685_v51 = vmul.f32 %v6353_v47, %v6289_v19 }
  0xa4   : > { %9700 = vst [vmem:[#allocation16_spill] sm:$0xff] %v6347_v45  ;;  %v6360_v49 = vsel %vm695_vm4, %v6347_v45, %v6302_v25  ;;  %v700_v50 = vmul.f32 %v6347_v45, %v6287_v18  ;;  %788 = vrot.lane.b32.xlu2 %v686_v46, %s9531_s28 }
  0xa5   : > { %9702 = vst [vmem:[#allocation18_spill] sm:$0xff] %v6360_v49  ;;  %v701_v53 = vmul.f32 %v6360_v49, %v6289_v19  ;;  %v5353_v54 = vpack.i.bf16 %v685_v51, %v684_v48  ;;  %v5332_v51 = vunpack.i.h.bf16 %v6409_v6 }
  0xa7   : > { %v5358_v55 = vpack.i.bf16 %v701_v53, %v700_v50  ;;  %5354 = vrot.lane.b32.xlu1 %v5353_v54, %s9531_s28  ;;  %v816_v56 = vsel %vm647_vm11, %v5331_v43, %v5332_v51 }
  0xa9   : > { %5359 = vrot.lane.b32.xlu0 %v5358_v55, %s9529_s25  ;;  %v6388_v62 = vpop.permute.xlu0 %659 }
  0xaa   : > { %9705 = vst [vmem:[#allocation21_spill] sm:$0xff] %v6388_v62  ;;  %v668_v3 = vmul.f32 %v6388_v62, %v6287_v18 }
  0xab   : > { %v6380_v58 = vpop.permute.xlu1 %661 }
  0xac   : > { %9704 = vst [vmem:[#allocation20_spill] sm:$0xff] %v6380_v58  ;;  %5334 = vrot.lane.b32.xlu2 %v5333_v59, %s9537_s0  ;;  %v670_v60 = vmul.f32 %v6380_v58, %v6287_v18  ;;  %v6395_v0 = vsel %vm663_vm6, %v6388_v62, %v6380_v58 }
  0xad   : > { %9706 = vst [vmem:[#allocation22_spill] sm:$0xff] %v6395_v0  ;;  %v669_v4 = vmul.f32 %v6395_v0, %v6289_v19 }
  0xaf   : > { %842 = vrot.lane.b32.xlu1 %v734_v61, %s9539_s21  ;;  %v5363_v1 = vpack.i.bf16 %v669_v4, %v668_v3 }
  0xb1   : > { %774 = vrot.lane.b32.xlu0 %v670_v60, %s9520_s24  ;;  %v6415_v9 = vpop.permute.xlu0 %645 }
  0xb2   : > { %9707 = vst [vmem:[#allocation23_spill] sm:$0xff] %v6415_v9 }
  0xb4   : > { %643 = vrot.lane.b32.xlu2 %v639_v63, %s9535_s3 }
  0xb9   : > { %827 = vrot.lane.b32.xlu0 %v718_v2, %s9533_s27 }
  0xbc   : > { %5364 = vrot.lane.b32.xlu2 %v5363_v1, %s9520_s24  ;;  %s9713_s24 = sld [smem:[#allocation72_spill]] }
  0xc4   : > { %857 = vrot.lane.b32.xlu2 %v750_v5, %s9546_s23 }
  0xfe   : > { %v6411_v7 = vpop.permute.xlu2 %788 }
 0x100   : > { %v6413_v8 = vpop.permute.xlu1 %803 }
 0x106   : > { %v5335_v10 = vpop.permute.xlu2 %5334 }
 0x107   : > { %v5337_v12 = vunpack.i.h.bf16 %v5335_v10  ;;  %v5336_v13 = vunpack.i.l.bf16 %v5335_v10 }
 0x108   : > { %v873_v11 = vpop.permute.xlu1 %872 }
 0x109   : > { %v892_v14 = vpack.c.bf16 %v5336_v13, %v5336_v13  ;;  %v875_v15 = vsel %vm874_vm7, %v5336_v13, %v5337_v12 }
 0x10a   : > { %v893_v21 = vpack.c.bf16 %v875_v15, %v875_v15 }
 0x10b   : > { %v6418_v16 = vpop.permute.xlu0 %5339  ;;  %939 = vrot.lane.b32.xlu1 %v892_v14, %s9518_s26 }
 0x10c   : > { %941 = vrot.lane.b32.xlu2 %v893_v21, %s9518_s26  ;;  %v5342_v26 = vunpack.i.h.bf16 %v6418_v16  ;;  %v5341_v29 = vunpack.i.l.bf16 %v6418_v16  ;;  %v876_v16 = vsel %vm874_vm7, %v5337_v12, %v873_v11 }
 0x10e   : > { %v6424_v35 = vpop.permute.xlu2 %643  ;;  %v845_v40 = vsel %vm844_vm8, %v5341_v29, %v5342_v26 }
 0x10f   : > { %9708 = vst [vmem:[#allocation24_spill] sm:$0xff] %v6424_v35  ;;  %v6448_v21 = vsel %vm647_vm11, %v6424_v35, %v6415_v9 }
 0x110   : > { %v5345_v31 = vpop.permute.xlu1 %5344  ;;  %9709 = vst [vmem:[#allocation25_spill] sm:$0xff] %v6448_v21  ;;  %v653_v11 = vmul.f32 %v6448_v21, %v6289_v19  ;;  %v885_v19 = vpack.c.bf16 %v6413_v8, %v6411_v7 }
 0x111   : > { %v5347_v32 = vunpack.i.h.bf16 %v5345_v31  ;;  %v5346_v34 = vunpack.i.l.bf16 %v5345_v31  ;;  %v894_v31 = vpack.c.bf16 %v876_v16, %v876_v16 }
 0x113   : > { %v5350_v37 = vpop.permute.xlu0 %5349  ;;  %v889_v39 = vpack.c.bf16 %v5346_v34, %v5341_v29  ;;  %v860_v42 = vsel %vm859_vm9, %v5346_v34, %v5347_v32  ;;  %v652_v34 = vmul.f32 %v6424_v35, %v6287_v18 }
 0x114   : > { %v5352_v46 = vunpack.i.h.bf16 %v5350_v37  ;;  %v5351_v48 = vunpack.i.l.bf16 %v5350_v37  ;;  %v890_v50 = vpack.c.bf16 %v860_v42, %v845_v40 }
 0x115   : > { %933 = vrot.lane.b32.xlu0 %v889_v39, %s9518_s26 }
 0x116   : > { %935 = vrot.lane.b32.xlu1 %v890_v50, %s9518_s26  ;;  %v886_v53 = vpack.c.bf16 %v5351_v48, %v5331_v43  ;;  %v830_v54 = vsel %vm829_vm10, %v5351_v48, %v5352_v46  ;;  %v5365_v3 = vpop.permute.xlu2 %5364 }
 0x117   : > { %v887_v61 = vpack.c.bf16 %v830_v54, %v816_v56  ;;  %v5367_v14 = vunpack.i.h.bf16 %v5365_v3  ;;  %v5366_v15 = vunpack.i.l.bf16 %v5365_v3 }
 0x118   : > { %927 = vrot.lane.b32.xlu2 %v886_v53, %s9518_s26 }
 0x119   : > { %v5355_v55 = vpop.permute.xlu1 %5354  ;;  %v776_v39 = vsel %vm695_vm4, %v5366_v15, %v5367_v14 }
 0x11a   : > { %v5357_v59 = vunpack.i.h.bf16 %v5355_v55  ;;  %v5356_v60 = vunpack.i.l.bf16 %v5355_v55  ;;  %v880_v43 = vpack.c.bf16 %v776_v39, %v652_v34 }
 0x11b   : > { %v5360_v57 = vpop.permute.xlu0 %5359 }
 0x11c   : > { %v5362_v63 = vunpack.i.h.bf16 %v5360_v57  ;;  %v5361_v2 = vunpack.i.l.bf16 %v5360_v57  ;;  %v791_v4 = vsel %vm790_vm12, %v5356_v60, %v5357_v59  ;;  %v792_v1 = vsel %vm790_vm12, %v5357_v59, %v6411_v7 }
 0x11d   : > { %929 = vrot.lane.b32.xlu0 %v887_v61, %s9518_s26  ;;  %v654_v57 = vmul.f32 %v6415_v9, %v6287_v18  ;;  %v636_v61 = vld [vmem:[%s9710_s30] sm:$0xff]  ;;  %s9711_s30 = sld [smem:[#allocation70_spill]] }
 0x11e   : > { %v805_v5 = vsel %vm663_vm6, %v5361_v2, %v5362_v63  ;;  %v806_v6 = vsel %vm663_vm6, %v5362_v63, %v6413_v8  ;;  %v858_v12 = vpop.permute.xlu2 %857  ;;  %v6134_v63 = vmov 0  }
 0x11f   : > { %v883_v10 = vpack.c.bf16 %v805_v5, %v791_v4  ;;  %v884_v13 = vpack.c.bf16 %v806_v6, %v792_v1  ;;  %v861_v50 = vsel %vm859_vm9, %v5347_v32, %v858_v12  ;;  %5368 = vset.pattern.permute.xlu1 %v6134_v63  ;;  %5370 = vset.pattern.permute.xlu0 %v6134_v63 }
 0x120   : > { %5369 = vset.pattern.permute.xlu2 %v6134_v63 }
 0x121   : > { %921 = vrot.lane.b32.xlu1 %v883_v10, %s9518_s26  ;;  %923 = vrot.lane.b32.xlu2 %v884_v13, %s9518_s26  ;;  %v843_v40 = vpop.permute.xlu1 %842 }
 0x122   : > { %v846_v48 = vsel %vm844_vm8, %v5342_v26, %v843_v40 }
 0x123   : > { %v775_v29 = vpop.permute.xlu0 %774  ;;  %v891_v53 = vpack.c.bf16 %v861_v50, %v846_v48 }
 0x124   : > { %v777_v37 = vsel %vm695_vm4, %v5367_v14, %v775_v29  ;;  %v882_v26 = vpack.c.bf16 %v775_v29, %v654_v57  ;;  %v635_v29 = vld [vmem:[%s9711_s30] sm:$0xf]  ;;  %s9715_s30 = smov 127  }
 0x125   : > { %943 = vrot.lane.b32.xlu0 %v894_v31, %s9518_s26  ;;  %v881_v42 = vpack.c.bf16 %v777_v37, %v653_v11  ;;  %v1001_v57 = vld [vmem:[%s9713_s24] sm:$0xf]  ;;  %s9729_s24 = smov 96  }
 0x129   : > { %917 = vrot.lane.b32.xlu2 %v881_v42, %s9518_s26  ;;  %915 = vrot.lane.b32.xlu1 %v880_v43, %s9518_s26  ;;  %v1002_v43 = vld [vmem:[%s9501_s5] sm:$0xff] }
 0x12b   : > { %v828_v54 = vpop.permute.xlu0 %827 }
 0x12c   : > { %v831_v55 = vsel %vm829_vm10, %v5352_v46, %v828_v54 }
 0x12d   : > { %937 = vrot.lane.b32.xlu0 %v891_v53, %s9518_s26  ;;  %v888_v56 = vpack.c.bf16 %v831_v55, %v5332_v51 }
 0x131   : > { %925 = vrot.lane.b32.xlu2 %v885_v19, %s9518_s26  ;;  %931 = vrot.lane.b32.xlu1 %v888_v56, %s9518_s26 }
 0x135   : > { %919 = vrot.lane.b32.xlu0 %v882_v26, %s9518_s26  ;;  %v1004_v26 = vld [vmem:[%s9503_s7] sm:$0xff]  ;;  %s9730_s26 = smov 94  }
 0x139   : > { %897 = vperm.xlu1 %5368, %v636_v61   ;;  %1068 = vperm.xlu2 %5369, %v1004_v26  }
 0x13d   : > { %1027 = vperm.xlu0 %5370, %v1002_v43  }
 0x166   : > { %v942_v32 = vpop.permute.xlu2 %941 }
 0x172   : > { %v928_v7 = vpop.permute.xlu2 %927 }
 0x17b   : > { %v924_v4 = vpop.permute.xlu2 %923 }
 0x17d   : > { %v940_v59 = vpop.permute.xlu1 %939 }
 0x17e   : > { %v954_v46 = vsel %vm759_vm5, %v940_v59, %v942_v32 }
 0x17f   : > { %v970_v60 = vsel %vm968_vm13, %v954_v46, 0 }
 0x180   : > { %978 = vmatpush.bf16.msra.mxu0 %v970_v60 }
 0x183   : > { %v918_v14 = vpop.permute.xlu2 %917 }
 0x187   : > { %v934_v8 = vpop.permute.xlu0 %933 }
 0x188   : > { %v936_v51 = vpop.permute.xlu1 %935 }
 0x189   : > { %v952_v18 = vsel %vm759_vm5, %v934_v8, %v936_v51 }
 0x18a   : > { %979 = vmatpush.bf16.msra.mxu0 %v952_v18 }
 0x18b   : > { %v926_v40 = vpop.permute.xlu2 %925 }
 0x18c   : > { %v949_v11 = vsel %vm759_vm5, %v924_v4, %v926_v40 }
 0x18f   : > { %v930_v2 = vpop.permute.xlu0 %929 }
 0x190   : > { %v950_v3 = vsel %vm759_vm5, %v928_v7, %v930_v2 }
 0x191   : > { %980 = vmatpush.bf16.msra.mxu0 %v950_v3 }
 0x193   : > { %v922_v1 = vpop.permute.xlu1 %921  ;;  %v1069_v3 = vpop.permute.xlu2 %1068 }
 0x194   : > { %v948_v5 = vsel %vm759_vm5, %v922_v1, %v924_v4 }
 0x195   : > { %981 = vmatpush.bf16.msra.mxu0 %v948_v5 }
 0x197   : > { %v944_v6 = vpop.permute.xlu0 %943 }
 0x198   : > { %v955_v10 = vsel %vm759_vm5, %v942_v32, %v944_v6 }
 0x199   : > { %v973_v13 = vsel %vm968_vm13, %v955_v10, 0 }
 0x19a   : > { %991 = vmatpush.bf16.msra.mxu1 %v973_v13 }
 0x19b   : > { %v916_v15 = vpop.permute.xlu1 %915 }
 0x19c   : > { %v946_v16 = vsel %vm759_vm5, %v916_v15, %v918_v14 }
 0x19d   : > { %982 = vmatpush.bf16.msra.mxu0 %v946_v16 }
 0x19f   : > { %v938_v31 = vpop.permute.xlu0 %937 }
 0x1a0   : > { %5244 = vmatmul.msk.bf16.vlgmr.msra.gmra.mxu0 %vm964_vm14, %v635_v29  ;;  %v953_v34 = vsel %vm759_vm5, %v936_v51, %v938_v31  ;;  %v1003_v51 = vld [vmem:[%s9502_s6] sm:$0xf] }
 0x1a1   : > { %992 = vmatpush.bf16.msra.mxu1 %v953_v34 }
 0x1a3   : > { %v932_v37 = vpop.permute.xlu1 %931 }
 0x1a4   : > { %v951_v39 = vsel %vm759_vm5, %v930_v2, %v932_v37 }
 0x1a5   : > { %993 = vmatpush.bf16.msra.mxu1 %v951_v39 }
 0x1a7   : > { %v920_v12 = vpop.permute.xlu0 %919 }
 0x1a8   : > { %v947_v42 = vsel %vm759_vm5, %v918_v14, %v920_v12 }
 0x1a9   : > { %994 = vmatpush.bf16.msra.mxu1 %v949_v11 }
 0x1ab   : > { %v898_v48 = vpop.permute.xlu1 %897 }
 0x1ad   : > { %995 = vmatpush.bf16.msra.mxu1 %v947_v42 }
 0x1af   : > { %v1028_v63 = vpop.permute.xlu0 %1027 }
 0x1b0   : > { %5245 = vmatmul.msk.bf16.vlgmr.msra.gmra.mxu1 %vm964_vm14, %v635_v29 }
 0x21d   : > { %v984_v50 = vpop.f32.mrf.mxu0 }
 0x21e   : > { %v985_v53 = vadd.f32 %v984_v50, %v898_v48 }
 0x220   : > { %v1021_v54 = vmax.f32 %v985_v53, 0.0 }
 0x222   : > { %v1023_v55 = vpack.c.bf16 %v1021_v54, %v1021_v54 }
 0x224   : > { %v6494_v19 = vsel %vm968_vm13, %v1023_v55, 0 }
 0x225   : > { %9712 = vst [vmem:[#allocation26_spill] sm:$0xff] %v6494_v19  ;;  %v986_v56 = vpop.f32.mrf.mxu0  ;;  %1047 = vmatpush.bf16.msra.mxu2 %v6494_v19 }
 0x228   : > { %5246 = vmatmul.msk.bf16.vlgmr.msra.gmra.mxu2 %vm1030_vm15, %v1001_v57 }
 0x22d   : > { %v997_v32 = vpop.f32.mrf.mxu1 }
 0x22e   : > { %v998_v59 = vadd.f32 %v997_v32, %v898_v48 }
 0x230   : > { %v1022_v46 = vmax.f32 %v998_v59, 0.0 }
 0x232   : > { %v1024_v60 = vpack.c.bf16 %v1022_v46, %v1022_v46 }
 0x234   : > { %v6505_v7 = vsel %vm968_vm13, %v1024_v60, 0 }
 0x235   : > { %9714 = vst [vmem:[#allocation27_spill] sm:$0xff] %v6505_v7  ;;  %v999_v8 = vpop.f32.mrf.mxu1  ;;  %1060 = vmatpush.bf16.msrb.mxu2 %v6505_v7  ;;  %1094 = vmatpush.bf16.msra.mxu3 %v6505_v7 }
 0x238   : > { %5247 = vmatmul.msk.bf16.vlgmr.msrb.gmra.mxu2 %vm1030_vm15, %v1001_v57  ;;  %5249 = vmatmul.msk.bf16.vlgmr.msra.gmra.mxu3 %vm1030_vm15, %v1003_v51 }
 0x239   : > { %1081 = vmatpush.bf16.msra.mxu2 %v6494_v19 }
 0x248   : > { %5248 = vmatmul.msk.bf16.vlgmr.msra.gmra.mxu2 %vm1030_vm15, %v1003_v51 }
 0x2ab   : > { %v1049_v18 = vpop.f32.mrf.mxu2 }
 0x2ac   : > { %v1050_v2 = vadd.f32 %v1049_v18, %v1028_v63 }
 0x2ae   : > { %v6516_v4 = vmax.f32 %v1050_v2, 0.0 }
 0x2b0   : > { %v1125_v14 = vmul.f32 %v6516_v4, %v6307_v27  ;;  %v1122_v31 = vmul.f32 %v6516_v4, %v6291_v20  ;;  %v1119_v42 = vmul.f32 %v6516_v4, %v6309_v28  ;;  %v1116_v54 = vmul.f32 %v6516_v4, %v6333_v38 }
 0x2b1   : > { %v1112_v51 = vmul.f32 %v6516_v4, %v6360_v49  ;;  %v1109_v18 = vmul.f32 %v6516_v4, %v6353_v47 }
 0x2b3   : > { %v1051_v61 = vpop.f32.mrf.mxu2 }
 0x2bb   : > { %v1062_v1 = vpop.f32.mrf.mxu2  ;;  %v1096_v5 = vpop.f32.mrf.mxu3 }
 0x2bc   : > { %v1063_v6 = vadd.f32 %v1062_v1, %v1028_v63  ;;  %v1097_v13 = vadd.f32 %v1096_v5, %v1069_v3 }
 0x2be   : > { %v6518_v10 = vmax.f32 %v1063_v6, 0.0  ;;  %v6530_v34 = vmax.f32 %v1097_v13, 0.0 }
 0x2c0   : > { %v5371_v15 = vpack.i.bf16 %v6518_v10, %v6516_v4  ;;  %v1124_v16 = vmul.f32 %v6518_v10, %v6369_v52  ;;  %v1121_v29 = vmul.f32 %v6518_v10, %v6323_v33  ;;  %v1118_v12 = vmul.f32 %v6518_v10, %v6315_v30 }
 0x2c1   : > { %v1111_v43 = vmul.f32 %v6518_v10, %v6347_v45  ;;  %v1365_v48 = vmul.f32 %v6530_v34, %v6302_v25  ;;  %v1115_v50 = vmul.f32 %v6518_v10, %v6339_v41  ;;  %v1108_v26 = vmul.f32 %v6518_v10, %v6296_v22 }
 0x2c2   : > { %5372 = vrot.lane.b32.xlu0 %v5371_v15, %s9535_s3  ;;  %v5376_v37 = vpack.i.bf16 %v1125_v14, %v1124_v16  ;;  %v5386_v39 = vpack.i.bf16 %v1122_v31, %v1121_v29  ;;  %v5381_v53 = vpack.i.bf16 %v1119_v42, %v1118_v12  ;;  %v1362_v32 = vmul.f32 %v6530_v34, %v6345_v44 }
 0x2c3   : > { %v1064_v40 = vpop.f32.mrf.mxu2  ;;  %v1098_v11 = vpop.f32.mrf.mxu3  ;;  %v5396_v55 = vpack.i.bf16 %v1111_v43, %v1365_v48  ;;  %v5401_v56 = vpack.i.bf16 %v1116_v54, %v1115_v50  ;;  %v1113_v46 = vmul.f32 %v6518_v10, %v6302_v25  ;;  %v1110_v60 = vmul.f32 %v6518_v10, %v6345_v44 }
 0x2c4   : > { %5377 = vrot.lane.b32.xlu2 %v5376_v37, %s9537_s0  ;;  %5387 = vrot.lane.b32.xlu1 %v5386_v39, %s9546_s23  ;;  %v5391_v8 = vpack.i.bf16 %v1108_v26, %v1362_v32  ;;  %v1105_v1 = vmul.f32 %v6518_v10, %v6388_v62  ;;  %v1359_v5 = vmul.f32 %v6530_v34, %v6380_v58 }
 0x2c5   : > { %v5416_v63 = vpack.i.bf16 %v1113_v46, %v1112_v51  ;;  %v5411_v2 = vpack.i.bf16 %v1110_v60, %v1109_v18  ;;  %v1123_v15 = vmul.f32 %v6516_v4, %v6298_v23  ;;  %v1376_v16 = vmul.f32 %v6530_v34, %v6369_v52 }
 0x2c6   : > { %v5406_v14 = vpack.i.bf16 %v1105_v1, %v1359_v5  ;;  %v1107_v37 = vmul.f32 %v6518_v10, %v6380_v58  ;;  %v1106_v39 = vmul.f32 %v6516_v4, %v6395_v0  ;;  %v1117_v42 = vmul.f32 %v6516_v4, %v6300_v24 }
 0x2c7   : > { %v1370_v43 = vmul.f32 %v6530_v34, %v6315_v30  ;;  %v1373_v46 = vmul.f32 %v6530_v34, %v6323_v33  ;;  %v1360_v18 = vmul.f32 %v6530_v34, %v6296_v22 }
 0x2c8   : > { %v5421_v12 = vpack.i.bf16 %v1107_v37, %v1106_v39 }
 0x2ca   : > { %5382 = vrot.lane.b32.xlu0 %v5381_v53, %s9539_s21 }
 0x2cb   : > { %v1083_v57 = vpop.f32.mrf.mxu2 }
 0x2cc   : > { %5397 = vrot.lane.b32.xlu2 %v5396_v55, %s9529_s25  ;;  %5402 = vrot.lane.b32.xlu1 %v5401_v56, %s9533_s27  ;;  %v1084_v59 = vadd.f32 %v1083_v57, %v1069_v3  ;;  %v1114_v56 = vmul.f32 %v6516_v4, %v6329_v36  ;;  %v1120_v57 = vmul.f32 %v6516_v4, %v6281_v17 }
 0x2ce   : > { %v6562_v61 = vmax.f32 %v1084_v59, 0.0 }
 0x2d0   : > { %v1377_v6 = vmul.f32 %v6562_v61, %v6307_v27  ;;  %v1375_v13 = vmul.f32 %v6562_v61, %v6298_v23  ;;  %v1371_v40 = vmul.f32 %v6562_v61, %v6309_v28  ;;  %v1369_v11 = vmul.f32 %v6562_v61, %v6300_v24 }
 0x2d1   : > { %v1368_v53 = vmul.f32 %v6562_v61, %v6333_v38  ;;  %v1374_v54 = vmul.f32 %v6562_v61, %v6291_v20  ;;  %v5426_v55 = vpack.i.bf16 %v6530_v34, %v6562_v61  ;;  %v1372_v59 = vmul.f32 %v6562_v61, %v6281_v17 }
 0x2d2   : > { %5392 = vrot.lane.b32.xlu0 %v5391_v8, %s9531_s28  ;;  %v5436_v29 = vpack.i.bf16 %v1123_v15, %v1377_v6  ;;  %v5431_v31 = vpack.i.bf16 %v1376_v16, %v1375_v13  ;;  %v5446_v48 = vpack.i.bf16 %v1117_v42, %v1371_v40  ;;  %v5441_v50 = vpack.i.bf16 %v1370_v43, %v1369_v11 }
 0x2d3   : > { %v1085_v3 = vpop.f32.mrf.mxu2  ;;  %v5466_v26 = vpack.i.bf16 %v1114_v56, %v1368_v53  ;;  %v5456_v32 = vpack.i.bf16 %v1120_v57, %v1374_v54  ;;  %v1361_v60 = vmul.f32 %v6562_v61, %v6353_v47  ;;  %v1366_v8 = vmul.f32 %v6562_v61, %v6329_v36 }
 0x2d4   : > { %5417 = vrot.lane.b32.xlu2 %v5416_v63, %s9529_s25  ;;  %5412 = vrot.lane.b32.xlu1 %v5411_v2, %s9531_s28  ;;  %v5451_v51 = vpack.i.bf16 %v1373_v46, %v1372_v59  ;;  %v1367_v63 = vmul.f32 %v6530_v34, %v6339_v41  ;;  %v1358_v1 = vmul.f32 %v6562_v61, %v6395_v0 }
 0x2d5   : > { %v5471_v2 = vpack.i.bf16 %v1361_v60, %v1360_v18  ;;  %v1364_v5 = vmul.f32 %v6562_v61, %v6360_v49  ;;  %v1357_v6 = vmul.f32 %v6530_v34, %v6388_v62  ;;  %v1363_v13 = vmul.f32 %v6530_v34, %v6347_v45 }
 0x2d6   : > { %v5461_v3 = vpack.i.bf16 %v1367_v63, %v1366_v8  ;;  %v1356_v18 = vmul.f32 %v6530_v34, %v6415_v9 }
 0x2d7   : > { %v5476_v15 = vpack.i.bf16 %v1364_v5, %v1363_v13 }
 0x2da   : > { %5407 = vrot.lane.b32.xlu0 %v5406_v14, %s9715_s30  ;;  %v5481_v14 = vpack.i.bf16 %v1358_v1, %v1357_v6 }
 0x2dc   : > { %5437 = vrot.lane.b32.xlu2 %v5436_v29, %s9537_s0  ;;  %5432 = vrot.lane.b32.xlu1 %v5431_v31, %s9537_s0 }
 0x2e2   : > { %5422 = vrot.lane.b32.xlu0 %v5421_v12, %s9715_s30 }
 0x2e4   : > { %5447 = vrot.lane.b32.xlu2 %v5446_v48, %s9539_s21  ;;  %5442 = vrot.lane.b32.xlu1 %v5441_v50, %s9539_s21 }
 0x2ea   : > { %5427 = vrot.lane.b32.xlu0 %v5426_v55, %s9535_s3 }
 0x2ec   : > { %5467 = vrot.lane.b32.xlu2 %v5466_v26, %s9533_s27  ;;  %5457 = vrot.lane.b32.xlu1 %v5456_v32, %s9546_s23 }
 0x2f2   : > { %5452 = vrot.lane.b32.xlu0 %v5451_v51, %s9546_s23 }
 0x2f4   : > { %5472 = vrot.lane.b32.xlu2 %v5471_v2, %s9531_s28  ;;  %5462 = vrot.lane.b32.xlu1 %v5461_v3, %s9533_s27 }
 0x2fc   : > { %5482 = vrot.lane.b32.xlu2 %v5481_v14, %s9715_s30  ;;  %5477 = vrot.lane.b32.xlu1 %v5476_v15, %s9529_s25  ;;  %v6680_v14 = vmul.f32 %v6562_v61, %v6448_v21  ;;  %s9723_s25 = smov 112  }
 0x31e   : > { %v5378_v16 = vpop.permute.xlu2 %5377 }
 0x31f   : > { %v5379_v11 = vunpack.i.l.bf16 %v5378_v16  ;;  %v5380_v2 = vunpack.i.h.bf16 %v5378_v16 }
 0x321   : > { %v1230_v3 = vsel %vm874_vm7, %v5379_v11, %v5380_v2 }
 0x322   : > { %v1248_v13 = vpack.c.bf16 %v1230_v3, %v1230_v3 }
 0x326   : > { %v6635_v29 = vpop.permute.xlu2 %5397 }
 0x327   : > { %v9523_v57 = vunpack.i.l.bf16 %v6635_v29  ;;  %v9719_v19 = vunpack.i.l.bf16 %v6635_v29 }
 0x32e   : > { %v6637_v31 = vpop.permute.xlu2 %5417 }
 0x334   : > { %v6639_v37 = vpop.permute.xlu0 %5372 }
 0x336   : > { %v5388_v39 = vpop.permute.xlu1 %5387  ;;  %v6641_v40 = vpop.permute.xlu2 %5437 }
 0x337   : > { %v5440_v12 = vunpack.i.h.bf16 %v6641_v40 }
 0x339   : > { %v1246_v42 = vpack.c.bf16 %v5440_v12, %v5440_v12  ;;  %v1229_v43 = vsel %vm874_vm7, %v5440_v12, %v5379_v11 }
 0x33a   : > { %v1247_v48 = vpack.c.bf16 %v1229_v43, %v1229_v43  ;;  %v5390_v43 = vunpack.i.h.bf16 %v5388_v39 }
 0x33b   : > { %1293 = vrot.lane.b32.xlu1 %v1246_v42, %s9716_s4 }
 0x33c   : > { %v5383_v50 = vpop.permute.xlu0 %5382  ;;  %1295 = vrot.lane.b32.xlu2 %v1247_v48, %s9716_s4  ;;  %v5389_v48 = vunpack.i.l.bf16 %v5388_v39 }
 0x33d   : > { %v5385_v15 = vunpack.i.h.bf16 %v5383_v50  ;;  %v5384_v12 = vunpack.i.l.bf16 %v5383_v50 }
 0x33e   : > { %v5403_v53 = vpop.permute.xlu1 %5402  ;;  %v6647_v54 = vpop.permute.xlu2 %5447 }
 0x33f   : > { %v1202_v61 = vsel %vm844_vm8, %v5384_v12, %v5385_v15  ;;  %v5405_v2 = vunpack.i.h.bf16 %v5403_v53  ;;  %v5404_v3 = vunpack.i.l.bf16 %v5403_v53  ;;  %v5374_v53 = vunpack.i.l.bf16 %v6639_v37 }
 0x344   : > { %v6649_v55 = vpop.permute.xlu0 %5392 }
 0x345   : > { %v9524_v56 = vunpack.i.l.bf16 %v6649_v55 }
 0x346   : > { %v6653_v26 = vpop.permute.xlu2 %5467  ;;  %v6655_v32 = vpop.permute.xlu1 %5412 }
 0x347   : > { %v1491_v59 = vpack.c.bf16 %v9523_v57, %v9524_v56  ;;  %v5470_v39 = vunpack.i.h.bf16 %v6653_v26 }
 0x349   : > { %1531 = vrot.lane.b32.xlu0 %v1491_v59, %s9716_s4  ;;  %v5450_v59 = vunpack.i.h.bf16 %v6647_v54 }
 0x34b   : > { %v1201_v57 = vsel %vm844_vm8, %v5450_v59, %v5384_v12 }
 0x34c   : > { %v6662_v46 = vpop.permute.xlu0 %5407 }
 0x34d   : > { %v5409_v60 = vunpack.i.l.bf16 %v6662_v46 }
 0x34e   : > { %v6665_v8 = vpop.permute.xlu2 %5472  ;;  %v6667_v51 = vpop.permute.xlu1 %5432 }
 0x34f   : > { %v1488_v63 = vpack.c.bf16 %v5409_v60, %v1356_v18 }
 0x351   : > { %1525 = vrot.lane.b32.xlu0 %v1488_v63, %s9716_s4  ;;  %v1216_v63 = vsel %vm859_vm9, %v5389_v48, %v5390_v43  ;;  %v5375_v43 = vunpack.i.h.bf16 %v6639_v37  ;;  %v5415_v37 = vunpack.i.h.bf16 %v6655_v32 }
 0x354   : > { %v6687_v42 = vpop.permute.xlu0 %5422 }
 0x356   : > { %v6673_v1 = vpop.permute.xlu2 %5482  ;;  %v6675_v5 = vpop.permute.xlu1 %5442 }
 0x357   : > { %v9522_v6 = vunpack.i.h.bf16 %v6673_v1 }
 0x359   : > { %v6685_v16 = vsel %vm695_vm4, %v9522_v6, %v5409_v60  ;;  %1297 = vrot.lane.b32.xlu0 %v1248_v13, %s9716_s4  ;;  %v1245_v60 = vpack.c.bf16 %v1216_v63, %v1202_v61  ;;  %v1188_v61 = vsel %vm829_vm10, %v5404_v3, %v5405_v2  ;;  %v5414_v63 = vunpack.i.l.bf16 %v6655_v32 }
 0x35a   : > { %v5420_v2 = vunpack.i.h.bf16 %v6637_v31 }
 0x35c   : > { %v6700_v15 = vpop.permute.xlu0 %5427 }
 0x35e   : > { %v5458_v18 = vpop.permute.xlu1 %5457 }
 0x35f   : > { %v5460_v50 = vunpack.i.h.bf16 %v5458_v18  ;;  %v5459_v58 = vunpack.i.l.bf16 %v5458_v18  ;;  %v5469_v18 = vunpack.i.l.bf16 %v6653_v26 }
 0x361   : > { %v1243_v6 = vpack.c.bf16 %v5460_v50, %v5450_v59  ;;  %v1215_v13 = vsel %vm859_vm9, %v5460_v50, %v5389_v48  ;;  %1291 = vrot.lane.b32.xlu0 %v1245_v60, %s9716_s4  ;;  %v1187_v48 = vsel %vm829_vm10, %v5470_v39, %v5404_v3  ;;  %v1242_v59 = vpack.c.bf16 %v1188_v61, %v5375_v43 }
 0x362   : > { %v1244_v11 = vpack.c.bf16 %v1215_v13, %v1201_v57  ;;  %v5435_v57 = vunpack.i.h.bf16 %v6667_v51  ;;  %v1240_v50 = vpack.c.bf16 %v5470_v39, %v5374_v53  ;;  %v5439_v60 = vunpack.i.l.bf16 %v6641_v40 }
 0x363   : > { %1287 = vrot.lane.b32.xlu1 %v1243_v6, %s9716_s4  ;;  %v1174_v6 = vsel %vm647_vm11, %v5374_v53, %v5375_v43  ;;  %v5419_v3 = vunpack.i.l.bf16 %v6637_v31  ;;  %v5395_v13 = vunpack.i.h.bf16 %v6649_v55  ;;  %v5400_v53 = vunpack.i.h.bf16 %v6635_v29 }
 0x364   : > { %1289 = vrot.lane.b32.xlu2 %v1244_v11, %s9716_s4  ;;  %v1241_v11 = vpack.c.bf16 %v1187_v48, %v1174_v6  ;;  %v1482_v43 = vsel %vm874_vm7, %v5435_v57, %v5439_v60  ;;  %v5453_v61 = vpop.permute.xlu0 %5452  ;;  %v9717_v39 = vunpack.i.l.bf16 %v6649_v55  ;;  %v9718_v60 = vunpack.i.h.bf16 %v6665_v8 }
 0x365   : > { %v1149_v32 = vsel %vm790_vm12, %v5395_v13, %v5414_v63  ;;  %v1163_v31 = vsel %vm663_vm6, %v5400_v53, %v5419_v3  ;;  %v1164_v6 = vsel %vm663_vm6, %v5419_v3, %v5420_v2  ;;  %v5455_v56 = vunpack.i.h.bf16 %v5453_v61 }
 0x366   : > { %v6706_v12 = vpop.permute.xlu1 %5462  ;;  %v1402_v7 = vsel %vm790_vm12, %v9718_v60, %v9717_v39  ;;  %v5434_v53 = vunpack.i.l.bf16 %v6667_v51  ;;  %v5445_v3 = vunpack.i.h.bf16 %v6675_v5  ;;  %v5449_v55 = vunpack.i.l.bf16 %v6647_v54 }
 0x367   : > { %v1468_v39 = vsel %vm859_vm9, %v5455_v56, %v5459_v58  ;;  %v5444_v58 = vunpack.i.l.bf16 %v6675_v5  ;;  %v5429_v5 = vunpack.i.l.bf16 %v6700_v15 }
 0x368   : > { %v1454_v29 = vsel %vm844_vm8, %v5445_v3, %v5449_v55 }
 0x369   : > { %1285 = vrot.lane.b32.xlu0 %v1242_v59, %s9716_s4  ;;  %v1150_v59 = vsel %vm790_vm12, %v5414_v63, %v5415_v37  ;;  %v1453_v60 = vsel %vm844_vm8, %v5444_v58, %v5445_v3 }
 0x36a   : > { %v1238_v63 = vpack.c.bf16 %v1164_v6, %v1150_v59  ;;  %v1498_v59 = vpack.c.bf16 %v5434_v53, %v5434_v53 }
 0x36b   : > { %1281 = vrot.lane.b32.xlu1 %v1240_v50, %s9716_s4  ;;  %v1500_v50 = vpack.c.bf16 %v1482_v43, %v1482_v43 }
 0x36c   : > { %1283 = vrot.lane.b32.xlu2 %v1241_v11, %s9716_s4  ;;  %v1237_v11 = vpack.c.bf16 %v1163_v31, %v1149_v32  ;;  %v1497_v32 = vpack.c.bf16 %v1468_v39, %v1454_v29  ;;  %v5425_v39 = vunpack.i.h.bf16 %v6687_v42  ;;  %v9720_v29 = vunpack.i.h.bf16 %v6665_v8 }
 0x36e   : > { %v5478_v40 = vpop.permute.xlu1 %5477 }
 0x36f   : > { %v5480_v48 = vunpack.i.h.bf16 %v5478_v40  ;;  %v5479_v55 = vunpack.i.l.bf16 %v5478_v40 }
 0x371   : > { %v1416_v13 = vsel %vm663_vm6, %v5480_v48, %v9719_v19  ;;  %1549 = vrot.lane.b32.xlu0 %v1500_v50, %s9716_s4  ;;  %v1481_v19 = vsel %vm874_vm7, %v5434_v53, %v5435_v57  ;;  %v5454_v50 = vunpack.i.l.bf16 %v5453_v61  ;;  %v5430_v57 = vunpack.i.h.bf16 %v6700_v15 }
 0x372   : > { %v1490_v43 = vpack.c.bf16 %v1416_v13, %v1402_v7  ;;  %v5465_v7 = vunpack.i.h.bf16 %v6706_v12  ;;  %v1499_v51 = vpack.c.bf16 %v1481_v19, %v1481_v19  ;;  %v5464_v61 = vunpack.i.l.bf16 %v6706_v12 }
 0x373   : > { %1275 = vrot.lane.b32.xlu1 %v1237_v11, %s9716_s4  ;;  %v1467_v31 = vsel %vm859_vm9, %v5454_v50, %v5455_v56  ;;  %v1495_v11 = vpack.c.bf16 %v5454_v50, %v5444_v58  ;;  %v1426_v56 = vsel %vm647_vm11, %v5429_v5, %v5430_v57  ;;  %v5474_v12 = vunpack.i.l.bf16 %v6665_v8 }
 0x374   : > { %1277 = vrot.lane.b32.xlu2 %v1238_v63, %s9716_s4  ;;  %v1440_v54 = vsel %vm829_vm10, %v5465_v7, %v5469_v18  ;;  %v1496_v26 = vpack.c.bf16 %v1467_v31, %v1453_v60  ;;  %v1439_v13 = vsel %vm829_vm10, %v5464_v61, %v5465_v7  ;;  %v1239_v63 = vpack.c.bf16 %v5420_v2, %v5415_v37 }
 0x375   : > { %v1494_v6 = vpack.c.bf16 %v1440_v54, %v5430_v57  ;;  %v1492_v53 = vpack.c.bf16 %v5464_v61, %v5429_v5  ;;  %v1493_v3 = vpack.c.bf16 %v1439_v13, %v1426_v56  ;;  %v1104_v15 = vmul.f32 %v6518_v10, %v6415_v9 }
 0x376   : > { %v1415_v37 = vsel %vm663_vm6, %v5479_v55, %v5480_v48  ;;  %v1401_v40 = vsel %vm790_vm12, %v5474_v12, %v9720_v29  ;;  %v9721_v7 = vunpack.i.h.bf16 %v6673_v1  ;;  %v1354_v48 = vmul.f32 %v6530_v34, %v6424_v35 }
 0x377   : > { %v1236_v2 = vpack.c.bf16 %v5425_v39, %v1104_v15  ;;  %v1489_v19 = vpack.c.bf16 %v1415_v37, %v1401_v40  ;;  %v5424_v8 = vunpack.i.l.bf16 %v6687_v42  ;;  %v5410_v18 = vunpack.i.h.bf16 %v6662_v46  ;;  %v1013_v46 = vld [vmem:[%s9505_s9] sm:$0xff] }
 0x378   : > { %v9722_v50 = vpack.c.bf16 %v6685_v16, %v6680_v14  ;;  %v1103_v34 = vmul.f32 %v6516_v4, %v6448_v21  ;;  %v1014_v14 = vld [vmem:[%s9505_s9 + $0x8] sm:$0xff] }
 0x379   : > { %1543 = vrot.lane.b32.xlu0 %v1497_v32, %s9716_s4  ;;  %v5484_v32 = vunpack.i.l.bf16 %v6673_v1  ;;  %v1102_v1 = vmul.f32 %v6518_v10, %v6424_v35  ;;  %v1136_v58 = vsel %vm695_vm4, %v5424_v8, %v5425_v39 }
 0x37a   : > { %v1235_v54 = vpack.c.bf16 %v1136_v58, %v1103_v34 }
 0x37b   : > { %1545 = vrot.lane.b32.xlu1 %v1498_v59, %s9716_s4  ;;  %v1387_v59 = vsel %vm695_vm4, %v5484_v32, %v9721_v7 }
 0x37c   : > { %1547 = vrot.lane.b32.xlu2 %v1499_v51, %s9716_s4  ;;  %v1486_v51 = vpack.c.bf16 %v1387_v59, %v1354_v48 }
 0x381   : > { %1537 = vrot.lane.b32.xlu0 %v1494_v6, %s9716_s4 }
 0x383   : > { %1539 = vrot.lane.b32.xlu1 %v1495_v11, %s9716_s4 }
 0x384   : > { %1541 = vrot.lane.b32.xlu2 %v1496_v26, %s9716_s4 }
 0x389   : > { %1279 = vrot.lane.b32.xlu0 %v1239_v63, %s9716_s4 }
 0x38b   : > { %1533 = vrot.lane.b32.xlu1 %v1492_v53, %s9716_s4 }
 0x38c   : > { %1535 = vrot.lane.b32.xlu2 %v1493_v3, %s9716_s4 }
 0x391   : > { %1273 = vrot.lane.b32.xlu0 %v1236_v2, %s9716_s4 }
 0x393   : > { %1527 = vrot.lane.b32.xlu1 %v1489_v19, %s9716_s4 }
 0x394   : > { %1529 = vrot.lane.b32.xlu2 %v1490_v43, %s9716_s4  ;;  %v1135_v43 = vsel %vm695_vm4, %v5410_v18, %v5424_v8 }
 0x395   : > { %v1234_v42 = vpack.c.bf16 %v1135_v43, %v1102_v1 }
 0x396   : > { %v1296_v10 = vpop.permute.xlu2 %1295 }
 0x39b   : > { %1521 = vrot.lane.b32.xlu1 %v1486_v51, %s9716_s4 }
 0x39c   : > { %1523 = vrot.lane.b32.xlu2 %v9722_v50, %s9716_s4 }
 0x3a3   : > { %1269 = vrot.lane.b32.xlu1 %v1234_v42, %s9716_s4 }
 0x3a4   : > { %1271 = vrot.lane.b32.xlu2 %v1235_v54, %s9716_s4 }
 0x3ab   : > { %1251 = vperm.xlu1 %5368, %v1013_v46  }
 0x3ac   : > { %1503 = vperm.xlu2 %5369, %v1014_v14  }
 0x3ad   : > { %v1294_v16 = vpop.permute.xlu1 %1293 }
 0x3ae   : > { %v1307_v4 = vsel %vm759_vm5, %v1294_v16, %v1296_v10 }
 0x3af   : > { %v1321_v57 = vsel %vm968_vm13, %v1307_v4, 0 }
 0x3b0   : > { %1329 = vmatpush.bf16.msrb.mxu0 %v1321_v57 }
 0x3bb   : > { %v1532_v31 = vpop.permute.xlu0 %1531 }
 0x3be   : > { %v1290_v6 = vpop.permute.xlu2 %1289 }
 0x3c3   : > { %v1526_v11 = vpop.permute.xlu0 %1525 }
 0x3c6   : > { %v1284_v60 = vpop.permute.xlu2 %1283 }
 0x3cb   : > { %v1298_v26 = vpop.permute.xlu0 %1297 }
 0x3cc   : > { %v1308_v61 = vsel %vm759_vm5, %v1296_v10, %v1298_v26 }
 0x3cd   : > { %v1324_v13 = vsel %vm968_vm13, %v1308_v61, 0 }
 0x3ce   : > { %v1278_v5 = vpop.permute.xlu2 %1277  ;;  %1342 = vmatpush.bf16.msrb.mxu1 %v1324_v13 }
 0x3d3   : > { %v1292_v63 = vpop.permute.xlu0 %1291 }
 0x3d4   : > { %v1306_v56 = vsel %vm759_vm5, %v1290_v6, %v1292_v63 }
 0x3d5   : > { %v1288_v53 = vpop.permute.xlu1 %1287  ;;  %1343 = vmatpush.bf16.msrb.mxu1 %v1306_v56 }
 0x3d6   : > { %v1548_v55 = vpop.permute.xlu2 %1547  ;;  %v1305_v3 = vsel %vm759_vm5, %v1288_v53, %v1290_v6  ;;  %v1006_v6 = vld [vmem:[%s9504_s8 + $0x4] sm:$0xf] }
 0x3d7   : > { %1330 = vmatpush.bf16.msrb.mxu0 %v1305_v3 }
 0x3db   : > { %v1286_v12 = vpop.permute.xlu0 %1285 }
 0x3dc   : > { %v1304_v15 = vsel %vm759_vm5, %v1284_v60, %v1286_v12 }
 0x3dd   : > { %v1282_v39 = vpop.permute.xlu1 %1281  ;;  %1344 = vmatpush.bf16.msrb.mxu1 %v1304_v15 }
 0x3de   : > { %v1542_v37 = vpop.permute.xlu2 %1541  ;;  %v1303_v2 = vsel %vm759_vm5, %v1282_v39, %v1284_v60 }
 0x3df   : > { %1331 = vmatpush.bf16.msrb.mxu0 %v1303_v2 }
 0x3e3   : > { %v1550_v29 = vpop.permute.xlu0 %1549 }
 0x3e4   : > { %v1560_v19 = vsel %vm759_vm5, %v1548_v55, %v1550_v29 }
 0x3e5   : > { %v1276_v40 = vpop.permute.xlu1 %1275  ;;  %v1576_v32 = vsel %vm968_vm13, %v1560_v19, 0 }
 0x3e6   : > { %v1536_v7 = vpop.permute.xlu2 %1535  ;;  %v1301_v59 = vsel %vm759_vm5, %v1276_v40, %v1278_v5  ;;  %1594 = vmatpush.bf16.msrb.mxu3 %v1576_v32 }
 0x3e7   : > { %1332 = vmatpush.bf16.msrb.mxu0 %v1301_v59 }
 0x3eb   : > { %v1544_v48 = vpop.permute.xlu0 %1543 }
 0x3ec   : > { %v1558_v8 = vsel %vm759_vm5, %v1542_v37, %v1544_v48 }
 0x3ed   : > { %v1546_v51 = vpop.permute.xlu1 %1545  ;;  %1595 = vmatpush.bf16.msrb.mxu3 %v1558_v8 }
 0x3ee   : > { %v1559_v18 = vsel %vm759_vm5, %v1546_v51, %v1548_v55  ;;  %v1530_v43 = vpop.permute.xlu2 %1529 }
 0x3ef   : > { %v1573_v50 = vsel %vm968_vm13, %v1559_v18, 0  ;;  %v1554_v54 = vsel %vm759_vm5, %v1530_v43, %v1532_v31 }
 0x3f0   : > { %1581 = vmatpush.bf16.msrb.mxu2 %v1573_v50 }
 0x3f3   : > { %v1538_v1 = vpop.permute.xlu0 %1537 }
 0x3f4   : > { %v1556_v34 = vsel %vm759_vm5, %v1536_v7, %v1538_v1 }
 0x3f5   : > { %v1540_v58 = vpop.permute.xlu1 %1539  ;;  %1596 = vmatpush.bf16.msrb.mxu3 %v1556_v34 }
 0x3f6   : > { %v1557_v42 = vsel %vm759_vm5, %v1540_v58, %v1542_v37  ;;  %v1524_v46 = vpop.permute.xlu2 %1523 }
 0x3f7   : > { %1582 = vmatpush.bf16.msrb.mxu2 %v1557_v42  ;;  %v1552_v4 = vsel %vm759_vm5, %v1524_v46, %v1526_v11  ;;  %v1005_v11 = vld [vmem:[%s9504_s8] sm:$0xf] }
 0x3f9   : > { %1597 = vmatpush.bf16.msrb.mxu3 %v1554_v54 }
 0x3fb   : > { %v1280_v14 = vpop.permute.xlu0 %1279 }
 0x3fc   : > { %v1302_v10 = vsel %vm759_vm5, %v1278_v5, %v1280_v14 }
 0x3fd   : > { %v1534_v16 = vpop.permute.xlu1 %1533  ;;  %1345 = vmatpush.bf16.msrb.mxu1 %v1302_v10  ;;  %1598 = vmatpush.bf16.msrb.mxu3 %v1552_v4 }
 0x3fe   : > { %v1555_v57 = vsel %vm759_vm5, %v1534_v16, %v1536_v7  ;;  %v1272_v31 = vpop.permute.xlu2 %1271 }
 0x3ff   : > { %1583 = vmatpush.bf16.msrb.mxu2 %v1555_v57 }
 0x400   : > { %5253 = vmatmul.msk.bf16.vlgmr.msrb.gmra.mxu3 %vm964_vm14, %v1006_v6 }
 0x403   : > { %v1274_v60 = vpop.permute.xlu0 %1273 }
 0x404   : > { %v1300_v61 = vsel %vm759_vm5, %v1272_v31, %v1274_v60 }
 0x405   : > { %v1528_v26 = vpop.permute.xlu1 %1527  ;;  %1346 = vmatpush.bf16.msrb.mxu1 %v1300_v61 }
 0x406   : > { %v1553_v5 = vsel %vm759_vm5, %v1528_v26, %v1530_v43  ;;  %v1504_v2 = vpop.permute.xlu2 %1503 }
 0x407   : > { %1584 = vmatpush.bf16.msrb.mxu2 %v1553_v5 }
 0x408   : > { %5251 = vmatmul.msk.bf16.vlgmr.msrb.gmra.mxu1 %vm964_vm14, %v1005_v11 }
 0x409   : > { %1630 = vmatpush.bf16.msra.mxu1 %v1576_v32 }
 0x40d   : > { %1631 = vmatpush.bf16.msra.mxu1 %v1558_v8  ;;  %v1522_v13 = vpop.permute.xlu1 %1521 }
 0x40e   : > { %v1551_v63 = vsel %vm759_vm5, %v1522_v13, %v1524_v46 }
 0x40f   : > { %1585 = vmatpush.bf16.msrb.mxu2 %v1551_v63 }
 0x411   : > { %1632 = vmatpush.bf16.msra.mxu1 %v1556_v34 }
 0x412   : > { %5252 = vmatmul.msk.bf16.vlgmr.msrb.gmra.mxu2 %vm964_vm14, %v1006_v6 }
 0x415   : > { %1633 = vmatpush.bf16.msra.mxu1 %v1554_v54  ;;  %v1270_v53 = vpop.permute.xlu1 %1269 }
 0x416   : > { %v1299_v56 = vsel %vm759_vm5, %v1270_v53, %v1272_v31 }
 0x417   : > { %1333 = vmatpush.bf16.msrb.mxu0 %v1299_v56 }
 0x419   : > { %1634 = vmatpush.bf16.msra.mxu1 %v1552_v4 }
 0x41a   : > { %5250 = vmatmul.msk.bf16.vlgmr.msrb.gmra.mxu0 %vm964_vm14, %v1005_v11 }
 0x41b   : > { %1617 = vmatpush.bf16.msra.mxu0 %v1573_v50 }
 0x41d   : > { %v1252_v15 = vpop.permute.xlu1 %1251 }
 0x41f   : > { %1618 = vmatpush.bf16.msra.mxu0 %v1557_v42 }
 0x423   : > { %1619 = vmatpush.bf16.msra.mxu0 %v1555_v57 }
 0x427   : > { %1620 = vmatpush.bf16.msra.mxu0 %v1553_v5 }
 0x42b   : > { %1621 = vmatpush.bf16.msra.mxu0 %v1551_v63 }
 0x483   : > { %v1600_v55 = vpop.f32.mrf.mxu3 }
 0x484   : > { %v1601_v29 = vadd.f32 %v1600_v55, %v1504_v2 }
 0x485   : > { %v1348_v3 = vpop.f32.mrf.mxu1 }
 0x486   : > { %v1349_v37 = vadd.f32 %v1348_v3, %v1252_v15 }
 0x488   : > { %v1605_v19 = vadd.f32 %v1601_v29, %v1349_v37  ;;  %v9724_v37 = vld [vmem:[#allocation20_spill] sm:$0xff] }
 0x48a   : > { %v6836_v48 = vmax.f32 %v1605_v19, 0.0 }
 0x48b   : > { %v1602_v12 = vpop.f32.mrf.mxu3 }
 0x48c   : > { %v1658_v58 = vmul.f32 %v6836_v48, %v6315_v30  ;;  %v1664_v14 = vmul.f32 %v6836_v48, %v6369_v52  ;;  %v1661_v10 = vmul.f32 %v6836_v48, %v6323_v33  ;;  %v1655_v31 = vmul.f32 %v6836_v48, %v6339_v41 }
 0x48d   : > { %v1350_v39 = vpop.f32.mrf.mxu1  ;;  %v1648_v11 = vmul.f32 %v6836_v48, %v6296_v22  ;;  %v1650_v63 = vmul.f32 %v6836_v48, %v6345_v44  ;;  %v1651_v56 = vmul.f32 %v6836_v48, %v6347_v45  ;;  %v1645_v12 = vmul.f32 %v6836_v48, %v6388_v62 }
 0x48e   : > { %v1653_v39 = vmul.f32 %v6836_v48, %v6302_v25 }
 0x495   : > { %v1587_v40 = vpop.f32.mrf.mxu2 }
 0x496   : > { %v1588_v7 = vadd.f32 %v1587_v40, %v1504_v2  ;;  %v1647_v2 = vmul.f32 %v6836_v48, %v9724_v37 }
 0x497   : > { %v1335_v32 = vpop.f32.mrf.mxu0 }
 0x498   : > { %v1336_v59 = vadd.f32 %v1335_v32, %v1252_v15  ;;  %v1007_v32 = vld [vmem:[%s9504_s8 + $0x8] sm:$0xf] }
 0x499   : > { %5254 = vmatmul.msk.bf16.vlgmr.msra.gmra.mxu0 %vm964_vm14, %v1007_v32  ;;  %5255 = vmatmul.msk.bf16.vlgmr.msra.gmra.mxu1 %vm964_vm14, %v1007_v32 }
 0x49a   : > { %v1604_v51 = vadd.f32 %v1588_v7, %v1336_v59 }
 0x49c   : > { %v6838_v8 = vmax.f32 %v1604_v51, 0.0 }
 0x49d   : > { %v1589_v18 = vpop.f32.mrf.mxu2 }
 0x49e   : > { %v5486_v50 = vpack.i.bf16 %v6836_v48, %v6838_v8  ;;  %v1665_v43 = vmul.f32 %v6838_v8, %v6307_v27  ;;  %v1657_v1 = vmul.f32 %v6838_v8, %v6300_v24  ;;  %v1663_v54 = vmul.f32 %v6838_v8, %v6298_v23 }
 0x49f   : > { %v1337_v34 = vpop.f32.mrf.mxu0  ;;  %v1660_v46 = vmul.f32 %v6838_v8, %v6281_v17  ;;  %v1662_v57 = vmul.f32 %v6838_v8, %v6291_v20  ;;  %v1654_v6 = vmul.f32 %v6838_v8, %v6329_v36  ;;  %v1659_v60 = vmul.f32 %v6838_v8, %v6309_v28 }
 0x4a0   : > { %5487 = vrot.lane.b32.xlu0 %v5486_v50, %s9535_s3  ;;  %1767 = vrot.lane.b32.xlu1 %v1665_v43, %s9537_s0  ;;  %v5496_v42 = vpack.i.bf16 %v1658_v58, %v1657_v1  ;;  %v5491_v16 = vpack.i.bf16 %v1664_v14, %v1663_v54  ;;  %v1656_v61 = vmul.f32 %v6838_v8, %v6333_v38 }
 0x4a1   : > { %v5501_v4 = vpack.i.bf16 %v1661_v10, %v1660_v46  ;;  %v5506_v26 = vpack.i.bf16 %v1655_v31, %v1654_v6  ;;  %v1649_v5 = vmul.f32 %v6838_v8, %v6353_v47  ;;  %v1652_v13 = vmul.f32 %v6838_v8, %v6360_v49 }
 0x4a2   : > { %5497 = vrot.lane.b32.xlu2 %v5496_v42, %s9539_s21  ;;  %v1646_v3 = vmul.f32 %v6838_v8, %v6395_v0 }
 0x4a3   : > { %v5511_v53 = vpack.i.bf16 %v1649_v5, %v1648_v11  ;;  %v5516_v55 = vpack.i.bf16 %v1652_v13, %v1651_v56 }
 0x4a4   : > { %v5521_v15 = vpack.i.bf16 %v1646_v3, %v1645_v12 }
 0x4a8   : > { %5492 = vrot.lane.b32.xlu0 %v5491_v16, %s9537_s0  ;;  %5502 = vrot.lane.b32.xlu1 %v5501_v4, %s9546_s23 }
 0x4aa   : > { %1753 = vrot.lane.b32.xlu2 %v1662_v57, %s9546_s23 }
 0x4b0   : > { %1739 = vrot.lane.b32.xlu0 %v1659_v60, %s9539_s21  ;;  %5507 = vrot.lane.b32.xlu1 %v5506_v26, %s9533_s27 }
 0x4b2   : > { %1725 = vrot.lane.b32.xlu2 %v1656_v61, %s9533_s27 }
 0x4b8   : > { %1687 = vrot.lane.b32.xlu1 %v1650_v63, %s9531_s28  ;;  %5512 = vrot.lane.b32.xlu0 %v5511_v53, %s9531_s28 }
 0x4ba   : > { %5517 = vrot.lane.b32.xlu2 %v5516_v55, %s9723_s25 }
 0x4c0   : > { %1701 = vrot.lane.b32.xlu0 %v1653_v39, %s9723_s25  ;;  %5522 = vrot.lane.b32.xlu1 %v5521_v15, %s9715_s30 }
 0x4c2   : > { %1673 = vrot.lane.b32.xlu2 %v1647_v2, %s9715_s30 }
 0x4fc   : > { %v6899_v29 = vpop.permute.xlu2 %5497 }
 0x4fd   : > { %v5500_v54 = vunpack.i.h.bf16 %v6899_v29  ;;  %v5499_v46 = vunpack.i.l.bf16 %v6899_v29 }
 0x4ff   : > { %v1741_v6 = vsel %vm844_vm8, %v5499_v46, %v5500_v54 }
 0x504   : > { %v6906_v7 = vpop.permute.xlu2 %1753 }
 0x50c   : > { %v1726_v16 = vpop.permute.xlu2 %1725 }
 0x512   : > { %v6901_v40 = vpop.permute.xlu0 %5487  ;;  %v1768_v19 = vpop.permute.xlu1 %1767 }
 0x513   : > { %v5490_v61 = vunpack.i.h.bf16 %v6901_v40  ;;  %v5489_v5 = vunpack.i.l.bf16 %v6901_v40 }
 0x514   : > { %v5518_v53 = vpop.permute.xlu2 %5517 }
 0x515   : > { %v1714_v55 = vsel %vm647_vm11, %v5489_v5, %v5490_v61  ;;  %v5520_v15 = vunpack.i.h.bf16 %v5518_v53  ;;  %v5519_v2 = vunpack.i.l.bf16 %v5518_v53  ;;  %v1015_v53 = vld [vmem:[%s9505_s9 + $0x10] sm:$0xff] }
 0x51a   : > { %v5493_v59 = vpop.permute.xlu0 %5492  ;;  %v6910_v51 = vpop.permute.xlu1 %5502 }
 0x51b   : > { %v5495_v18 = vunpack.i.h.bf16 %v5493_v59  ;;  %v5494_v50 = vunpack.i.l.bf16 %v5493_v59  ;;  %v5505_v34 = vunpack.i.h.bf16 %v6910_v51  ;;  %v5504_v42 = vunpack.i.l.bf16 %v6910_v51 }
 0x51d   : > { %v1786_v43 = vpack.c.bf16 %v5494_v50, %v5494_v50  ;;  %v1769_v1 = vsel %vm874_vm7, %v5494_v50, %v5495_v18  ;;  %v1755_v4 = vsel %vm859_vm9, %v5504_v42, %v5505_v34  ;;  %v1783_v57 = vpack.c.bf16 %v5504_v42, %v5499_v46 }
 0x51e   : > { %v1787_v58 = vpack.c.bf16 %v1769_v1, %v1769_v1  ;;  %v1784_v31 = vpack.c.bf16 %v1755_v4, %v1741_v6  ;;  %v1703_v50 = vsel %vm663_vm6, %v5519_v2, %v5520_v15  ;;  %v1674_v4 = vpop.permute.xlu2 %1673 }
 0x51f   : > { %1833 = vrot.lane.b32.xlu0 %v1786_v43, %s9716_s4 }
 0x520   : > { %1835 = vrot.lane.b32.xlu1 %v1787_v58, %s9716_s4 }
 0x522   : > { %v1740_v14 = vpop.permute.xlu0 %1739  ;;  %v5508_v10 = vpop.permute.xlu1 %5507 }
 0x523   : > { %v5510_v60 = vunpack.i.h.bf16 %v5508_v10  ;;  %v5509_v26 = vunpack.i.l.bf16 %v5508_v10  ;;  %v1770_v10 = vsel %vm874_vm7, %v5495_v18, %v1768_v19  ;;  %v1742_v19 = vsel %vm844_vm8, %v5500_v54, %v1740_v14 }
 0x524   : > { %v1788_v6 = vpack.c.bf16 %v1770_v10, %v1770_v10  ;;  %v1756_v18 = vsel %vm859_vm9, %v5505_v34, %v6906_v7  ;;  %v1644_v7 = vmul.f32 %v6836_v48, %v6415_v9 }
 0x525   : > { %v1727_v63 = vsel %vm829_vm10, %v5509_v26, %v5510_v60  ;;  %v1780_v56 = vpack.c.bf16 %v5509_v26, %v5489_v5  ;;  %v1643_v5 = vmul.f32 %v6838_v8, %v6448_v21  ;;  %v1728_v54 = vsel %vm829_vm10, %v5510_v60, %v1726_v16  ;;  %v1623_v16 = vpop.f32.mrf.mxu0 }
 0x526   : > { %v1781_v39 = vpack.c.bf16 %v1727_v63, %v1714_v55  ;;  %v1785_v63 = vpack.c.bf16 %v1756_v18, %v1742_v19  ;;  %v1782_v14 = vpack.c.bf16 %v1728_v54, %v5490_v61  ;;  %v1776_v34 = vpack.c.bf16 %v1674_v4, %v1644_v7  ;;  %v1636_v61 = vpop.f32.mrf.mxu1 }
 0x527   : > { %1827 = vrot.lane.b32.xlu0 %v1783_v57, %s9716_s4 }
 0x528   : > { %1829 = vrot.lane.b32.xlu1 %v1784_v31, %s9716_s4  ;;  %v1642_v31 = vmul.f32 %v6836_v48, %v6424_v35 }
 0x52a   : > { %v1688_v11 = vpop.permute.xlu1 %1687  ;;  %v5513_v13 = vpop.permute.xlu0 %5512 }
 0x52b   : > { %v5515_v3 = vunpack.i.h.bf16 %v5513_v13  ;;  %v5514_v12 = vunpack.i.l.bf16 %v5513_v13 }
 0x52d   : > { %v1689_v40 = vsel %vm790_vm12, %v5514_v12, %v5515_v3  ;;  %v1690_v1 = vsel %vm790_vm12, %v5515_v3, %v1688_v11 }
 0x52e   : > { %v1777_v43 = vpack.c.bf16 %v1703_v50, %v1689_v40  ;;  %v1625_v50 = vpop.f32.mrf.mxu0 }
 0x52f   : > { %1821 = vrot.lane.b32.xlu0 %v1780_v56, %s9716_s4  ;;  %v1016_v56 = vld [vmem:[%s9505_s9 + $0x18] sm:$0xff] }
 0x530   : > { %1823 = vrot.lane.b32.xlu1 %v1781_v39, %s9716_s4 }
 0x532   : > { %v1702_v29 = vpop.permute.xlu0 %1701  ;;  %v5523_v51 = vpop.permute.xlu1 %5522 }
 0x533   : > { %v1704_v32 = vsel %vm663_vm6, %v5520_v15, %v1702_v29  ;;  %v1779_v59 = vpack.c.bf16 %v1702_v29, %v1688_v11  ;;  %v5525_v58 = vunpack.i.h.bf16 %v5523_v51  ;;  %v5524_v42 = vunpack.i.l.bf16 %v5523_v51 }
 0x534   : > { %v1778_v46 = vpack.c.bf16 %v1704_v32, %v1690_v1  ;;  %v1638_v1 = vpop.f32.mrf.mxu1 }
 0x535   : > { %1819 = vrot.lane.b32.xlu2 %v1779_v59, %s9716_s4  ;;  %v1675_v57 = vsel %vm695_vm4, %v5524_v42, %v5525_v58  ;;  %v1676_v26 = vsel %vm695_vm4, %v5525_v58, %v1674_v4 }
 0x536   : > { %v1774_v11 = vpack.c.bf16 %v1675_v57, %v1642_v31  ;;  %v1775_v13 = vpack.c.bf16 %v1676_v26, %v1643_v5 }
 0x537   : > { %1815 = vrot.lane.b32.xlu0 %v1777_v43, %s9716_s4 }
 0x538   : > { %1817 = vrot.lane.b32.xlu1 %v1778_v46, %s9716_s4 }
 0x53d   : > { %1837 = vrot.lane.b32.xlu2 %v1788_v6, %s9716_s4 }
 0x53f   : > { %1809 = vrot.lane.b32.xlu0 %v1774_v11, %s9716_s4 }
 0x540   : > { %1811 = vrot.lane.b32.xlu1 %v1775_v13, %s9716_s4 }
 0x545   : > { %1831 = vrot.lane.b32.xlu2 %v1785_v63, %s9716_s4  ;;  %v1008_v63 = vld [vmem:[%s9504_s8 + $0xc] sm:$0xf] }
 0x547   : > { %1608 = vperm.xlu0 %5370, %v1015_v53  }
 0x548   : > { %1791 = vperm.xlu1 %5368, %v1016_v56  }
 0x54d   : > { %1825 = vrot.lane.b32.xlu2 %v1782_v14, %s9716_s4 }
 0x555   : > { %1813 = vrot.lane.b32.xlu2 %v1776_v34, %s9716_s4 }
 0x58f   : > { %v1820_v55 = vpop.permute.xlu2 %1819 }
 0x591   : > { %v1834_v3 = vpop.permute.xlu0 %1833 }
 0x592   : > { %v1836_v12 = vpop.permute.xlu1 %1835 }
 0x593   : > { %v1847_v39 = vsel %vm759_vm5, %v1834_v3, %v1836_v12 }
 0x594   : > { %v1861_v15 = vsel %vm968_vm13, %v1847_v39, 0 }
 0x595   : > { %1869 = vmatpush.bf16.msra.mxu2 %v1861_v15  ;;  %1905 = vmatpush.bf16.msrb.mxu0 %v1861_v15 }
 0x597   : > { %v1838_v2 = vpop.permute.xlu2 %1837 }
 0x598   : > { %v1848_v60 = vsel %vm759_vm5, %v1836_v12, %v1838_v2 }
 0x599   : > { %v1864_v29 = vsel %vm968_vm13, %v1848_v60, 0  ;;  %v1828_v40 = vpop.permute.xlu0 %1827 }
 0x59a   : > { %1882 = vmatpush.bf16.msra.mxu3 %v1864_v29  ;;  %1918 = vmatpush.bf16.msrb.mxu1 %v1864_v29  ;;  %v1830_v32 = vpop.permute.xlu1 %1829 }
 0x59b   : > { %v1845_v59 = vsel %vm759_vm5, %v1828_v40, %v1830_v32 }
 0x59c   : > { %1870 = vmatpush.bf16.msra.mxu2 %v1845_v59  ;;  %1906 = vmatpush.bf16.msrb.mxu0 %v1845_v59 }
 0x59f   : > { %v1832_v51 = vpop.permute.xlu2 %1831 }
 0x5a0   : > { %v1846_v43 = vsel %vm759_vm5, %v1830_v32, %v1832_v51 }
 0x5a1   : > { %v1822_v58 = vpop.permute.xlu0 %1821  ;;  %1883 = vmatpush.bf16.msra.mxu3 %v1846_v43  ;;  %1919 = vmatpush.bf16.msrb.mxu1 %v1846_v43 }
 0x5a2   : > { %v1824_v42 = vpop.permute.xlu1 %1823 }
 0x5a3   : > { %v1843_v46 = vsel %vm759_vm5, %v1822_v58, %v1824_v42 }
 0x5a4   : > { %1871 = vmatpush.bf16.msra.mxu2 %v1843_v46  ;;  %1907 = vmatpush.bf16.msrb.mxu0 %v1843_v46 }
 0x5a7   : > { %v1826_v10 = vpop.permute.xlu2 %1825 }
 0x5a8   : > { %v1844_v4 = vsel %vm759_vm5, %v1824_v42, %v1826_v10 }
 0x5a9   : > { %v1816_v57 = vpop.permute.xlu0 %1815  ;;  %1884 = vmatpush.bf16.msra.mxu3 %v1844_v4  ;;  %1920 = vmatpush.bf16.msrb.mxu1 %v1844_v4 }
 0x5aa   : > { %v1818_v6 = vpop.permute.xlu1 %1817 }
 0x5ab   : > { %v1841_v31 = vsel %vm759_vm5, %v1816_v57, %v1818_v6  ;;  %v1842_v26 = vsel %vm759_vm5, %v1818_v6, %v1820_v55 }
 0x5ac   : > { %1872 = vmatpush.bf16.msra.mxu2 %v1841_v31  ;;  %1908 = vmatpush.bf16.msrb.mxu0 %v1841_v31 }
 0x5ad   : > { %1885 = vmatpush.bf16.msra.mxu3 %v1842_v26  ;;  %1921 = vmatpush.bf16.msrb.mxu1 %v1842_v26 }
 0x5af   : > { %v1814_v11 = vpop.permute.xlu2 %1813 }
 0x5b1   : > { %v1810_v5 = vpop.permute.xlu0 %1809 }
 0x5b2   : > { %v1812_v13 = vpop.permute.xlu1 %1811 }
 0x5b3   : > { %v1839_v19 = vsel %vm759_vm5, %v1810_v5, %v1812_v13  ;;  %v1840_v18 = vsel %vm759_vm5, %v1812_v13, %v1814_v11 }
 0x5b4   : > { %1873 = vmatpush.bf16.msra.mxu2 %v1839_v19  ;;  %1886 = vmatpush.bf16.msra.mxu3 %v1840_v18 }
 0x5b5   : > { %1909 = vmatpush.bf16.msrb.mxu0 %v1839_v19  ;;  %1922 = vmatpush.bf16.msrb.mxu1 %v1840_v18 }
 0x5b7   : > { %5256 = vmatmul.msk.bf16.vlgmr.msra.gmra.mxu2 %vm964_vm14, %v1008_v63  ;;  %5257 = vmatmul.msk.bf16.vlgmr.msra.gmra.mxu3 %vm964_vm14, %v1008_v63 }
 0x5b9   : > { %v1609_v53 = vpop.permute.xlu0 %1608 }
 0x5ba   : > { %v1792_v56 = vpop.permute.xlu1 %1791  ;;  %v1624_v7 = vadd.f32 %v1623_v16, %v1609_v53  ;;  %v1637_v34 = vadd.f32 %v1636_v61, %v1609_v53 }
 0x63a   : > { %v1875_v54 = vpop.f32.mrf.mxu2  ;;  %v1888_v14 = vpop.f32.mrf.mxu3 }
 0x63b   : > { %v1876_v55 = vadd.f32 %v1875_v54, %v1792_v56  ;;  %v1889_v3 = vadd.f32 %v1888_v14, %v1792_v56 }
 0x63d   : > { %v1892_v12 = vadd.f32 %v1876_v55, %v1624_v7  ;;  %v1893_v39 = vadd.f32 %v1889_v3, %v1637_v34  ;;  %v1009_v55 = vld [vmem:[%s9504_s8 + $0x10] sm:$0xf] }
 0x63e   : > { %5258 = vmatmul.msk.bf16.vlgmr.msrb.gmra.mxu0 %vm964_vm14, %v1009_v55  ;;  %5259 = vmatmul.msk.bf16.vlgmr.msrb.gmra.mxu1 %vm964_vm14, %v1009_v55 }
 0x63f   : > { %v6978_v15 = vmax.f32 %v1892_v12, 0.0  ;;  %v6980_v2 = vmax.f32 %v1893_v39, 0.0 }
 0x641   : > { %v5526_v60 = vpack.i.bf16 %v6980_v2, %v6978_v15  ;;  %v1953_v29 = vmul.f32 %v6978_v15, %v6307_v27  ;;  %v1945_v40 = vmul.f32 %v6978_v15, %v6300_v24  ;;  %v1946_v16 = vmul.f32 %v6980_v2, %v6315_v30 }
 0x642   : > { %v1877_v61 = vpop.f32.mrf.mxu2  ;;  %v1890_v32 = vpop.f32.mrf.mxu3  ;;  %v1951_v59 = vmul.f32 %v6978_v15, %v6298_v23  ;;  %v1952_v51 = vmul.f32 %v6980_v2, %v6369_v52  ;;  %v1948_v50 = vmul.f32 %v6978_v15, %v6281_v17  ;;  %v1949_v43 = vmul.f32 %v6980_v2, %v6323_v33 }
 0x643   : > { %5527 = vrot.lane.b32.xlu2 %v5526_v60, %s9535_s3  ;;  %2055 = vrot.lane.b32.xlu0 %v1953_v29, %s9537_s0  ;;  %v5536_v1 = vpack.i.bf16 %v1946_v16, %v1945_v40  ;;  %v1942_v46 = vmul.f32 %v6978_v15, %v6329_v36  ;;  %v1943_v10 = vmul.f32 %v6980_v2, %v6339_v41 }
 0x644   : > { %v5531_v58 = vpack.i.bf16 %v1952_v51, %v1951_v59  ;;  %v5541_v42 = vpack.i.bf16 %v1949_v43, %v1948_v50  ;;  %v1936_v4 = vmul.f32 %v6980_v2, %v6296_v22  ;;  %v1937_v57 = vmul.f32 %v6978_v15, %v6353_v47 }
 0x645   : > { %5537 = vrot.lane.b32.xlu1 %v5536_v1, %s9539_s21  ;;  %v5546_v6 = vpack.i.bf16 %v1943_v10, %v1942_v46  ;;  %v1939_v31 = vmul.f32 %v6980_v2, %v6347_v45  ;;  %v1940_v26 = vmul.f32 %v6978_v15, %v6360_v49  ;;  %v1933_v11 = vmul.f32 %v6980_v2, %v6388_v62 }
 0x646   : > { %v5551_v5 = vpack.i.bf16 %v1937_v57, %v1936_v4  ;;  %v1934_v13 = vmul.f32 %v6978_v15, %v6395_v0  ;;  %v1950_v63 = vmul.f32 %v6978_v15, %v6291_v20  ;;  %v1947_v53 = vmul.f32 %v6978_v15, %v6309_v28 }
 0x647   : > { %v5556_v19 = vpack.i.bf16 %v1940_v26, %v1939_v31  ;;  %v1944_v56 = vmul.f32 %v6978_v15, %v6333_v38  ;;  %v1938_v54 = vmul.f32 %v6980_v2, %v6345_v44  ;;  %v1941_v14 = vmul.f32 %v6980_v2, %v6302_v25 }
 0x648   : > { %v5561_v18 = vpack.i.bf16 %v1934_v13, %v1933_v11  ;;  %v1935_v7 = vmul.f32 %v6980_v2, %v9724_v37 }
 0x64b   : > { %5532 = vrot.lane.b32.xlu2 %v5531_v58, %s9537_s0  ;;  %5542 = vrot.lane.b32.xlu0 %v5541_v42, %s9546_s23 }
 0x64d   : > { %2041 = vrot.lane.b32.xlu1 %v1950_v63, %s9546_s23 }
 0x653   : > { %2027 = vrot.lane.b32.xlu2 %v1947_v53, %s9539_s21  ;;  %5547 = vrot.lane.b32.xlu0 %v5546_v6, %s9533_s27 }
 0x655   : > { %2013 = vrot.lane.b32.xlu1 %v1944_v56, %s9533_s27  ;;  %s9728_s27 = smov 110  }
 0x65b   : > { %1975 = vrot.lane.b32.xlu0 %v1938_v54, %s9725_s29  ;;  %5552 = vrot.lane.b32.xlu2 %v5551_v5, %s9725_s29 }
 0x65d   : > { %5557 = vrot.lane.b32.xlu1 %v5556_v19, %s9723_s25 }
 0x663   : > { %1989 = vrot.lane.b32.xlu2 %v1941_v14, %s9723_s25  ;;  %5562 = vrot.lane.b32.xlu0 %v5561_v18, %s9715_s30 }
 0x665   : > { %1961 = vrot.lane.b32.xlu1 %v1935_v7, %s9715_s30 }
 0x69d   : > { %v7041_v34 = vpop.permute.xlu2 %5527 }
 0x69e   : > { %v5530_v6 = vunpack.i.h.bf16 %v7041_v34  ;;  %v5529_v31 = vunpack.i.l.bf16 %v7041_v34 }
 0x6a0   : > { %v2002_v19 = vsel %vm647_vm11, %v5529_v31, %v5530_v6 }
 0x6a5   : > { %v5533_v3 = vpop.permute.xlu2 %5532 }
 0x6a6   : > { %v5535_v12 = vunpack.i.h.bf16 %v5533_v3  ;;  %v5534_v39 = vunpack.i.l.bf16 %v5533_v3 }
 0x6a8   : > { %v2074_v60 = vpack.c.bf16 %v5534_v39, %v5534_v39  ;;  %v2057_v29 = vsel %vm874_vm7, %v5534_v39, %v5535_v12 }
 0x6a9   : > { %v2075_v40 = vpack.c.bf16 %v2057_v29, %v2057_v29 }
 0x6aa   : > { %2121 = vrot.lane.b32.xlu2 %v2074_v60, %s9716_s4 }
 0x6ab   : > { %2123 = vrot.lane.b32.xlu0 %v2075_v40, %s9716_s4 }
 0x6ad   : > { %v2028_v32 = vpop.permute.xlu2 %2027 }
 0x6b5   : > { %v2056_v16 = vpop.permute.xlu0 %2055  ;;  %v5553_v57 = vpop.permute.xlu2 %5552 }
 0x6b6   : > { %v5555_v14 = vunpack.i.h.bf16 %v5553_v57  ;;  %v5554_v7 = vunpack.i.l.bf16 %v5553_v57 }
 0x6b7   : > { %v5538_v61 = vpop.permute.xlu1 %5537 }
 0x6b8   : > { %v5540_v59 = vunpack.i.h.bf16 %v5538_v61  ;;  %v5539_v51 = vunpack.i.l.bf16 %v5538_v61  ;;  %v1977_v60 = vsel %vm790_vm12, %v5554_v7, %v5555_v14 }
 0x6ba   : > { %v2029_v42 = vsel %vm844_vm8, %v5539_v51, %v5540_v59 }
 0x6bd   : > { %v5543_v50 = vpop.permute.xlu0 %5542  ;;  %v1990_v56 = vpop.permute.xlu2 %1989 }
 0x6be   : > { %v5545_v43 = vunpack.i.h.bf16 %v5543_v50  ;;  %v5544_v1 = vunpack.i.l.bf16 %v5543_v50 }
 0x6bf   : > { %v2042_v58 = vpop.permute.xlu1 %2041 }
 0x6c0   : > { %v2043_v46 = vsel %vm859_vm9, %v5544_v1, %v5545_v43  ;;  %v2071_v10 = vpack.c.bf16 %v5544_v1, %v5539_v51  ;;  %v2058_v51 = vsel %vm874_vm7, %v5535_v12, %v2056_v16  ;;  %v1931_v12 = vmul.f32 %v6978_v15, %v6448_v21 }
 0x6c1   : > { %v2072_v4 = vpack.c.bf16 %v2043_v46, %v2029_v42  ;;  %v2076_v46 = vpack.c.bf16 %v2058_v51, %v2058_v51  ;;  %v1930_v16 = vmul.f32 %v6980_v2, %v6424_v35 }
 0x6c2   : > { %2115 = vrot.lane.b32.xlu2 %v2071_v10, %s9716_s4 }
 0x6c3   : > { %2117 = vrot.lane.b32.xlu0 %v2072_v4, %s9716_s4 }
 0x6c5   : > { %v5548_v26 = vpop.permute.xlu0 %5547 }
 0x6c6   : > { %v5550_v5 = vunpack.i.h.bf16 %v5548_v26  ;;  %v5549_v11 = vunpack.i.l.bf16 %v5548_v26 }
 0x6c7   : > { %v2014_v13 = vpop.permute.xlu1 %2013 }
 0x6c8   : > { %v2015_v18 = vsel %vm829_vm10, %v5549_v11, %v5550_v5  ;;  %v2068_v63 = vpack.c.bf16 %v5549_v11, %v5529_v31  ;;  %v2044_v11 = vsel %vm859_vm9, %v5545_v43, %v2042_v58  ;;  %v2016_v43 = vsel %vm829_vm10, %v5550_v5, %v2014_v13 }
 0x6c9   : > { %v2069_v53 = vpack.c.bf16 %v2015_v18, %v2002_v19 }
 0x6ca   : > { %2109 = vrot.lane.b32.xlu2 %v2068_v63, %s9716_s4  ;;  %v2030_v63 = vsel %vm844_vm8, %v5540_v59, %v2028_v32  ;;  %v2070_v32 = vpack.c.bf16 %v2016_v43, %v5530_v6  ;;  %v1932_v59 = vmul.f32 %v6980_v2, %v6415_v9 }
 0x6cb   : > { %2111 = vrot.lane.b32.xlu0 %v2069_v53, %s9716_s4  ;;  %v2073_v53 = vpack.c.bf16 %v2044_v11, %v2030_v63 }
 0x6cd   : > { %v1976_v54 = vpop.permute.xlu0 %1975 }
 0x6ce   : > { %v2067_v55 = vpack.c.bf16 %v1990_v56, %v1976_v54  ;;  %v1978_v29 = vsel %vm790_vm12, %v5555_v14, %v1976_v54  ;;  %v1018_v54 = vld [vmem:[%s9505_s9 + $0x28] sm:$0xff] }
 0x6cf   : > { %v5558_v34 = vpop.permute.xlu1 %5557 }
 0x6d0   : > { %v5560_v3 = vunpack.i.h.bf16 %v5558_v34  ;;  %v5559_v39 = vunpack.i.l.bf16 %v5558_v34  ;;  %2107 = vrot.lane.b32.xlu1 %v2067_v55, %s9716_s4 }
 0x6d2   : > { %v1991_v40 = vsel %vm663_vm6, %v5559_v39, %v5560_v3  ;;  %v1992_v61 = vsel %vm663_vm6, %v5560_v3, %v1990_v56  ;;  %v1017_v56 = vld [vmem:[%s9505_s9 + $0x20] sm:$0xff]  ;;  %v1911_v3 = vpop.f32.mrf.mxu0  ;;  %v7094_v39 = vpop.f32.mrf.mxu1 }
 0x6d3   : > { %v2065_v50 = vpack.c.bf16 %v1991_v40, %v1977_v60  ;;  %v2066_v1 = vpack.c.bf16 %v1992_v61, %v1978_v29 }
 0x6d5   : > { %2103 = vrot.lane.b32.xlu2 %v2065_v50, %s9716_s4  ;;  %2105 = vrot.lane.b32.xlu0 %v2066_v1, %s9716_s4  ;;  %v5563_v42 = vpop.permute.xlu0 %5562 }
 0x6d6   : > { %v5565_v10 = vunpack.i.h.bf16 %v5563_v42  ;;  %v5564_v4 = vunpack.i.l.bf16 %v5563_v42 }
 0x6d7   : > { %v1962_v57 = vpop.permute.xlu1 %1961 }
 0x6d8   : > { %v1963_v31 = vsel %vm695_vm4, %v5564_v4, %v5565_v10  ;;  %v1964_v26 = vsel %vm695_vm4, %v5565_v10, %v1962_v57  ;;  %2125 = vrot.lane.b32.xlu1 %v2076_v46, %s9716_s4  ;;  %v2064_v58 = vpack.c.bf16 %v1962_v57, %v1932_v59 }
 0x6d9   : > { %v2063_v19 = vpack.c.bf16 %v1964_v26, %v1931_v12  ;;  %v2062_v18 = vpack.c.bf16 %v1963_v31, %v1930_v16  ;;  %v1010_v16 = vld [vmem:[%s9504_s8 + $0x14] sm:$0xf] }
 0x6da   : > { %v1913_v6 = vpop.f32.mrf.mxu0  ;;  %v1926_v5 = vpop.f32.mrf.mxu1 }
 0x6dd   : > { %2097 = vrot.lane.b32.xlu2 %v2062_v18, %s9716_s4  ;;  %2099 = vrot.lane.b32.xlu0 %v2063_v19, %s9716_s4  ;;  %v9726_v19 = vld [vmem:[#allocation26_spill] sm:$0xff]  ;;  %v1011_v18 = vld [vmem:[%s9504_s8 + $0x18] sm:$0xf] }
 0x6e0   : > { %2119 = vrot.lane.b32.xlu1 %v2073_v53, %s9716_s4  ;;  %v9727_v53 = vld [vmem:[#allocation27_spill] sm:$0xff] }
 0x6e5   : > { %1896 = vperm.xlu2 %5369, %v1017_v56   ;;  %2079 = vperm.xlu0 %5370, %v1018_v54  }
 0x6e8   : > { %2113 = vrot.lane.b32.xlu1 %v2070_v32, %s9716_s4 }
 0x6f0   : > { %2101 = vrot.lane.b32.xlu1 %v2064_v58, %s9716_s4 }
 0x704   : > { %v2122_v14 = vpop.permute.xlu2 %2121 }
 0x71c   : > { %v2116_v13 = vpop.permute.xlu2 %2115 }
 0x71d   : > { %v2124_v7 = vpop.permute.xlu0 %2123 }
 0x71e   : > { %v2135_v55 = vsel %vm759_vm5, %v2122_v14, %v2124_v7 }
 0x71f   : > { %v2149_v34 = vsel %vm968_vm13, %v2135_v55, 0 }
 0x720   : > { %2157 = vmatpush.bf16.msrb.mxu2 %v2149_v34  ;;  %2193 = vmatpush.bf16.msra.mxu0 %v2149_v34 }
 0x724   : > { %v2110_v40 = vpop.permute.xlu2 %2109 }
 0x72f   : > { %v2104_v1 = vpop.permute.xlu2 %2103 }
 0x735   : > { %v2118_v60 = vpop.permute.xlu0 %2117 }
 0x736   : > { %v2133_v29 = vsel %vm759_vm5, %v2116_v13, %v2118_v60 }
 0x737   : > { %2158 = vmatpush.bf16.msrb.mxu2 %v2133_v29  ;;  %2194 = vmatpush.bf16.msra.mxu0 %v2133_v29  ;;  %v2098_v31 = vpop.permute.xlu2 %2097 }
 0x73d   : > { %v2112_v61 = vpop.permute.xlu0 %2111 }
 0x73e   : > { %v2131_v51 = vsel %vm759_vm5, %v2110_v40, %v2112_v61 }
 0x73f   : > { %2159 = vmatpush.bf16.msrb.mxu2 %v2131_v51  ;;  %2195 = vmatpush.bf16.msra.mxu0 %v2131_v51  ;;  %v1897_v58 = vpop.permute.xlu2 %1896 }
 0x740   : > { %v1912_v55 = vadd.f32 %v1911_v3, %v1897_v58  ;;  %v1925_v40 = vadd.f32 %v7094_v39, %v1897_v58 }
 0x742   : > { %v2108_v50 = vpop.permute.xlu1 %2107 }
 0x747   : > { %v2106_v42 = vpop.permute.xlu0 %2105 }
 0x748   : > { %v2129_v46 = vsel %vm759_vm5, %v2104_v1, %v2106_v42  ;;  %v2130_v43 = vsel %vm759_vm5, %v2106_v42, %v2108_v50 }
 0x749   : > { %2160 = vmatpush.bf16.msrb.mxu2 %v2129_v46  ;;  %2196 = vmatpush.bf16.msra.mxu0 %v2129_v46 }
 0x74a   : > { %v2126_v10 = vpop.permute.xlu1 %2125 }
 0x74b   : > { %v2136_v4 = vsel %vm759_vm5, %v2124_v7, %v2126_v10 }
 0x74c   : > { %v2152_v57 = vsel %vm968_vm13, %v2136_v4, 0 }
 0x74d   : > { %2170 = vmatpush.bf16.msrb.mxu3 %v2152_v57  ;;  %2206 = vmatpush.bf16.msra.mxu1 %v2152_v57 }
 0x74f   : > { %v2100_v26 = vpop.permute.xlu0 %2099 }
 0x750   : > { %v2127_v12 = vsel %vm759_vm5, %v2098_v31, %v2100_v26 }
 0x751   : > { %2161 = vmatpush.bf16.msrb.mxu2 %v2127_v12  ;;  %2197 = vmatpush.bf16.msra.mxu0 %v2127_v12 }
 0x752   : > { %v2120_v11 = vpop.permute.xlu1 %2119 }
 0x753   : > { %v2134_v63 = vsel %vm759_vm5, %v2118_v60, %v2120_v11 }
 0x754   : > { %5260 = vmatmul.msk.bf16.vlgmr.msrb.gmra.mxu2 %vm964_vm14, %v1010_v16  ;;  %2171 = vmatpush.bf16.msrb.mxu3 %v2134_v63 }
 0x755   : > { %2505 = vmatpush.bf16.msrb.mxu0 %v9726_v19  ;;  %2207 = vmatpush.bf16.msra.mxu1 %v2134_v63 }
 0x756   : > { %5262 = vmatmul.msk.bf16.vlgmr.msra.gmra.mxu0 %vm964_vm14, %v1011_v18 }
 0x757   : > { %v2080_v14 = vpop.permute.xlu0 %2079 }
 0x759   : > { %2518 = vmatpush.bf16.msra.mxu0 %v9727_v53 }
 0x75a   : > { %v2114_v56 = vpop.permute.xlu1 %2113 }
 0x75b   : > { %v2132_v54 = vsel %vm759_vm5, %v2112_v61, %v2114_v56 }
 0x75c   : > { %2172 = vmatpush.bf16.msrb.mxu3 %v2132_v54  ;;  %2208 = vmatpush.bf16.msra.mxu1 %v2132_v54 }
 0x760   : > { %2173 = vmatpush.bf16.msrb.mxu3 %v2130_v43  ;;  %2209 = vmatpush.bf16.msra.mxu1 %v2130_v43 }
 0x762   : > { %v2102_v32 = vpop.permute.xlu1 %2101 }
 0x763   : > { %v2128_v59 = vsel %vm759_vm5, %v2100_v26, %v2102_v32 }
 0x764   : > { %2174 = vmatpush.bf16.msrb.mxu3 %v2128_v59  ;;  %2210 = vmatpush.bf16.msra.mxu1 %v2128_v59 }
 0x767   : > { %5261 = vmatmul.msk.bf16.vlgmr.msrb.gmra.mxu3 %vm964_vm14, %v1010_v16  ;;  %5263 = vmatmul.msk.bf16.vlgmr.msra.gmra.mxu1 %vm964_vm14, %v1011_v18 }
 0x7d7   : > { %v2163_v7 = vpop.f32.mrf.mxu2 }
 0x7d8   : > { %v2164_v34 = vadd.f32 %v2163_v7, %v2080_v14 }
 0x7da   : > { %v2180_v6 = vadd.f32 %v2164_v34, %v1912_v55 }
 0x7dc   : > { %v7118_v5 = vmax.f32 %v2180_v6, 0.0 }
 0x7de   : > { %v2241_v13 = vmul.f32 %v7118_v5, %v6307_v27  ;;  %v2236_v3 = vmul.f32 %v7118_v5, %v6281_v17  ;;  %v2233_v46 = vmul.f32 %v7118_v5, %v6300_v24  ;;  %v2239_v26 = vmul.f32 %v7118_v5, %v6298_v23 }
 0x7df   : > { %v2165_v60 = vpop.f32.mrf.mxu2  ;;  %v2230_v11 = vmul.f32 %v7118_v5, %v6329_v36  ;;  %v2238_v19 = vmul.f32 %v7118_v5, %v6291_v20  ;;  %v2235_v63 = vmul.f32 %v7118_v5, %v6309_v28  ;;  %v2232_v53 = vmul.f32 %v7118_v5, %v6333_v38 }
 0x7e0   : > { %2343 = vrot.lane.b32.xlu2 %v2241_v13, %s9537_s0  ;;  %v2225_v43 = vmul.f32 %v7118_v5, %v6353_v47  ;;  %v2222_v7 = vmul.f32 %v7118_v5, %v6395_v0 }
 0x7ea   : > { %v2176_v29 = vpop.f32.mrf.mxu3 }
 0x7eb   : > { %v2177_v61 = vadd.f32 %v2176_v29, %v2080_v14  ;;  %v2228_v14 = vmul.f32 %v7118_v5, %v6360_v49 }
 0x7ed   : > { %v2181_v51 = vadd.f32 %v2177_v61, %v1925_v40  ;;  %v2470_v61 = vld [vmem:[%s9506_s10] sm:$0xf] }
 0x7ee   : > { %5266 = vmatmul.msk.bf16.vlgmr.msrb.gmra.mxu0 %vm1030_vm15, %v2470_v61 }
 0x7ef   : > { %v7124_v50 = vmax.f32 %v2181_v51, 0.0 }
 0x7f1   : > { %v5566_v1 = vpack.i.bf16 %v7124_v50, %v7118_v5  ;;  %v2237_v42 = vmul.f32 %v7124_v50, %v6323_v33  ;;  %v2234_v10 = vmul.f32 %v7124_v50, %v6315_v30  ;;  %v2240_v31 = vmul.f32 %v7124_v50, %v6369_v52 }
 0x7f2   : > { %v2178_v39 = vpop.f32.mrf.mxu3  ;;  %v2231_v12 = vmul.f32 %v7124_v50, %v6339_v41  ;;  %v2226_v56 = vmul.f32 %v7124_v50, %v6345_v44  ;;  %v2224_v54 = vmul.f32 %v7124_v50, %v6296_v22  ;;  %v2227_v32 = vmul.f32 %v7124_v50, %v6347_v45 }
 0x7f3   : > { %5567 = vrot.lane.b32.xlu1 %v5566_v1, %s9535_s3  ;;  %v5581_v4 = vpack.i.bf16 %v2237_v42, %v2236_v3  ;;  %v5576_v57 = vpack.i.bf16 %v2234_v10, %v2233_v46  ;;  %v5571_v16 = vpack.i.bf16 %v2240_v31, %v2239_v26  ;;  %v2221_v59 = vmul.f32 %v7124_v50, %v6388_v62  ;;  %s9731_s3 = smov 111  }
 0x7f4   : > { %v5586_v18 = vpack.i.bf16 %v2231_v12, %v2230_v11  ;;  %v5591_v58 = vpack.i.bf16 %v2225_v43, %v2224_v54  ;;  %v5596_v55 = vpack.i.bf16 %v2228_v14, %v2227_v32  ;;  %v2229_v6 = vmul.f32 %v7124_v50, %v6302_v25 }
 0x7f5   : > { %5582 = vrot.lane.b32.xlu2 %v5581_v4, %s9546_s23  ;;  %5577 = vrot.lane.b32.xlu0 %v5576_v57, %s9539_s21  ;;  %v5601_v34 = vpack.i.bf16 %v2222_v7, %v2221_v59  ;;  %v2223_v13 = vmul.f32 %v7124_v50, %v9724_v37 }
 0x7fb   : > { %5572 = vrot.lane.b32.xlu1 %v5571_v16, %s9537_s0  ;;  %s5303_s0 = sshll.u32 %s9992_s22, 6 }
 0x7fd   : > { %2329 = vrot.lane.b32.xlu0 %v2238_v19, %s9546_s23  ;;  %5587 = vrot.lane.b32.xlu2 %v5586_v18, %s9728_s27 }
 0x7fe   : > { %5267 = vmatmul.msk.bf16.vlgmr.msra.gmra.mxu0 %vm1030_vm15, %v2470_v61 }
 0x803   : > { %2315 = vrot.lane.b32.xlu1 %v2235_v63, %s9539_s21 }
 0x805   : > { %2301 = vrot.lane.b32.xlu0 %v2232_v53, %s9728_s27  ;;  %2263 = vrot.lane.b32.xlu2 %v2226_v56, %s9725_s29 }
 0x80b   : > { %5592 = vrot.lane.b32.xlu1 %v5591_v58, %s9725_s29 }
 0x80d   : > { %5597 = vrot.lane.b32.xlu0 %v5596_v55, %s9723_s25  ;;  %5602 = vrot.lane.b32.xlu2 %v5601_v34, %s9715_s30 }
 0x813   : > { %2277 = vrot.lane.b32.xlu1 %v2229_v6, %s9723_s25 }
 0x815   : > { %2249 = vrot.lane.b32.xlu0 %v2223_v13, %s9715_s30 }
 0x83a   : > { %v2344_v60 = vpop.permute.xlu2 %2343 }
 0x84f   : > { %v7189_v51 = vpop.permute.xlu2 %5582 }
 0x850   : > { %v5585_v12 = vunpack.i.h.bf16 %v7189_v51  ;;  %v5584_v16 = vunpack.i.l.bf16 %v7189_v51 }
 0x852   : > { %v2331_v63 = vsel %vm859_vm9, %v5584_v16, %v5585_v12 }
 0x857   : > { %v7195_v57 = vpop.permute.xlu2 %5587 }
 0x858   : > { %v5590_v32 = vunpack.i.h.bf16 %v7195_v57  ;;  %v5589_v59 = vunpack.i.l.bf16 %v7195_v57 }
 0x85a   : > { %v2303_v34 = vsel %vm829_vm10, %v5589_v59, %v5590_v32 }
 0x85f   : > { %v2264_v58 = vpop.permute.xlu2 %2263 }
 0x865   : > { %v7182_v29 = vpop.permute.xlu1 %5567 }
 0x866   : > { %v5570_v54 = vunpack.i.h.bf16 %v7182_v29  ;;  %v5569_v43 = vunpack.i.l.bf16 %v7182_v29 }
 0x867   : > { %v7184_v40 = vpop.permute.xlu0 %5577 }
 0x868   : > { %v5580_v31 = vunpack.i.h.bf16 %v7184_v40  ;;  %v5579_v26 = vunpack.i.l.bf16 %v7184_v40  ;;  %v2290_v7 = vsel %vm647_vm11, %v5569_v43, %v5570_v54  ;;  %v2356_v6 = vpack.c.bf16 %v5589_v59, %v5569_v43 }
 0x869   : > { %v2357_v61 = vpack.c.bf16 %v2303_v34, %v2290_v7 }
 0x86a   : > { %v2317_v19 = vsel %vm844_vm8, %v5579_v26, %v5580_v31  ;;  %v2359_v53 = vpack.c.bf16 %v5584_v16, %v5579_v26 }
 0x86b   : > { %v2360_v56 = vpack.c.bf16 %v2331_v63, %v2317_v19 }
 0x86d   : > { %v5573_v3 = vpop.permute.xlu1 %5572 }
 0x86e   : > { %v5575_v1 = vunpack.i.h.bf16 %v5573_v3  ;;  %v5574_v42 = vunpack.i.l.bf16 %v5573_v3 }
 0x86f   : > { %v7192_v46 = vpop.permute.xlu0 %2329 }
 0x870   : > { %v2362_v10 = vpack.c.bf16 %v5574_v42, %v5574_v42  ;;  %v2345_v39 = vsel %vm874_vm7, %v5574_v42, %v5575_v1  ;;  %v2346_v43 = vsel %vm874_vm7, %v5575_v1, %v2344_v60  ;;  %v2332_v60 = vsel %vm859_vm9, %v5585_v12, %v7192_v46  ;;  %v2471_v46 = vld [vmem:[%s9507_s11] sm:$0xff] }
 0x871   : > { %v2363_v4 = vpack.c.bf16 %v2345_v39, %v2345_v39  ;;  %v2364_v7 = vpack.c.bf16 %v2346_v43, %v2346_v43  ;;  %v2220_v12 = vmul.f32 %v7124_v50, %v6415_v9 }
 0x872   : > { %2409 = vrot.lane.b32.xlu1 %v2362_v10, %s9716_s4  ;;  %v5603_v10 = vpop.permute.xlu2 %5602 }
 0x873   : > { %2411 = vrot.lane.b32.xlu2 %v2363_v4, %s9716_s4  ;;  %v5605_v19 = vunpack.i.h.bf16 %v5603_v10  ;;  %v5604_v63 = vunpack.i.l.bf16 %v5603_v10 }
 0x875   : > { %v2316_v11 = vpop.permute.xlu1 %2315  ;;  %v2251_v59 = vsel %vm695_vm4, %v5604_v63, %v5605_v19 }
 0x877   : > { %v2302_v18 = vpop.permute.xlu0 %2301 }
 0x87a   : > { %2403 = vrot.lane.b32.xlu1 %v2359_v53, %s9716_s4 }
 0x87b   : > { %2405 = vrot.lane.b32.xlu2 %v2360_v56, %s9716_s4 }
 0x87d   : > { %v5593_v14 = vpop.permute.xlu1 %5592 }
 0x87e   : > { %v5595_v29 = vunpack.i.h.bf16 %v5593_v14  ;;  %v5594_v51 = vunpack.i.l.bf16 %v5593_v14 }
 0x87f   : > { %v5598_v55 = vpop.permute.xlu0 %5597 }
 0x880   : > { %v5600_v13 = vunpack.i.h.bf16 %v5598_v55  ;;  %v5599_v40 = vunpack.i.l.bf16 %v5598_v55  ;;  %v2265_v57 = vsel %vm790_vm12, %v5594_v51, %v5595_v29  ;;  %v2266_v26 = vsel %vm790_vm12, %v5595_v29, %v2264_v58  ;;  %v2473_v51 = vld [vmem:[%s9509_s13] sm:$0xff] }
 0x881   : > { %v2219_v55 = vmul.f32 %v7118_v5, %v6448_v21  ;;  %v2304_v29 = vsel %vm829_vm10, %v5590_v32, %v2302_v18  ;;  %v7254_v18 = vpop.f32.mrf.mxu0 }
 0x882   : > { %2397 = vrot.lane.b32.xlu1 %v2356_v6, %s9716_s4  ;;  %v2279_v3 = vsel %vm663_vm6, %v5599_v40, %v5600_v13  ;;  %v1019_v40 = vld [vmem:[%s9505_s9 + $0x30] sm:$0xff] }
 0x883   : > { %2399 = vrot.lane.b32.xlu2 %v2357_v61, %s9716_s4  ;;  %v2353_v16 = vpack.c.bf16 %v2279_v3, %v2265_v57  ;;  %v1020_v61 = vld [vmem:[%s9505_s9 + $0x38] sm:$0xff]  ;;  %v7258_v57 = vpop.f32.mrf.mxu1 }
 0x885   : > { %v2278_v42 = vpop.permute.xlu1 %2277 }
 0x886   : > { %v2280_v39 = vsel %vm663_vm6, %v5600_v13, %v2278_v42  ;;  %v2355_v4 = vpack.c.bf16 %v2278_v42, %v2264_v58  ;;  %v2218_v58 = vmul.f32 %v7124_v50, %v6424_v35  ;;  %v2318_v13 = vsel %vm844_vm8, %v5580_v31, %v2316_v11 }
 0x887   : > { %v2354_v53 = vpack.c.bf16 %v2280_v39, %v2266_v26  ;;  %v2250_v56 = vpop.permute.xlu0 %2249  ;;  %v2361_v1 = vpack.c.bf16 %v2332_v60, %v2318_v13  ;;  %v2358_v31 = vpack.c.bf16 %v2304_v29, %v5570_v54  ;;  %v1012_v29 = vld [vmem:[%s9504_s8 + $0x1c] sm:$0xf] }
 0x888   : > { %2395 = vrot.lane.b32.xlu0 %v2355_v4, %s9716_s4  ;;  %v2252_v14 = vsel %vm695_vm4, %v5605_v19, %v2250_v56  ;;  %v2350_v34 = vpack.c.bf16 %v2251_v59, %v2218_v58  ;;  %v2352_v11 = vpack.c.bf16 %v2250_v56, %v2220_v12 }
 0x889   : > { %v2351_v6 = vpack.c.bf16 %v2252_v14, %v2219_v55  ;;  %v2201_v54 = vpop.f32.mrf.mxu0 }
 0x88a   : > { %2391 = vrot.lane.b32.xlu1 %v2353_v16, %s9716_s4 }
 0x88b   : > { %2393 = vrot.lane.b32.xlu2 %v2354_v53, %s9716_s4  ;;  %v2214_v53 = vpop.f32.mrf.mxu1 }
 0x890   : > { %2413 = vrot.lane.b32.xlu0 %v2364_v7, %s9716_s4 }
 0x891   : > { %v2507_v10 = vpop.f32.mrf.mxu0 }
 0x892   : > { %2385 = vrot.lane.b32.xlu1 %v2350_v34, %s9716_s4 }
 0x893   : > { %2387 = vrot.lane.b32.xlu2 %v2351_v6, %s9716_s4 }
 0x898   : > { %2407 = vrot.lane.b32.xlu0 %v2361_v1, %s9716_s4 }
 0x899   : > { %v2509_v19 = vpop.f32.mrf.mxu0 }
 0x89a   : > { %2184 = vperm.xlu1 %5368, %v1019_v40  }
 0x89b   : > { %2367 = vperm.xlu2 %5369, %v1020_v61  }
 0x8a0   : > { %2401 = vrot.lane.b32.xlu0 %v2358_v31, %s9716_s4 }
 0x8a1   : > { %v2520_v59 = vpop.f32.mrf.mxu0 }
 0x8a2   : > { %2492 = vperm.xlu1 %5368, %v2471_v46  }
 0x8a8   : > { %2389 = vrot.lane.b32.xlu0 %v2352_v11, %s9716_s4 }
 0x8a9   : > { %v2522_v34 = vpop.f32.mrf.mxu0 }
 0x8b0   : > { %2532 = vperm.xlu0 %5370, %v2473_v51  }
 0x8cd   : > { %v2412_v32 = vpop.permute.xlu2 %2411 }
 0x8d5   : > { %v2406_v39 = vpop.permute.xlu2 %2405 }
 0x8dd   : > { %v2400_v63 = vpop.permute.xlu2 %2399 }
 0x8e4   : > { %v2410_v3 = vpop.permute.xlu1 %2409 }
 0x8e5   : > { %v2423_v42 = vsel %vm759_vm5, %v2410_v3, %v2412_v32  ;;  %v2394_v14 = vpop.permute.xlu2 %2393 }
 0x8e6   : > { %v2437_v4 = vsel %vm968_vm13, %v2423_v42, 0 }
 0x8e7   : > { %2445 = vmatpush.bf16.msra.mxu2 %v2437_v4 }
 0x8ec   : > { %v2404_v26 = vpop.permute.xlu1 %2403 }
 0x8ed   : > { %v2421_v16 = vsel %vm759_vm5, %v2404_v26, %v2406_v39  ;;  %v2388_v60 = vpop.permute.xlu2 %2387 }
 0x8ee   : > { %2446 = vmatpush.bf16.msra.mxu2 %v2421_v16 }
 0x8f4   : > { %v2398_v56 = vpop.permute.xlu1 %2397 }
 0x8f5   : > { %v2419_v43 = vsel %vm759_vm5, %v2398_v56, %v2400_v63 }
 0x8f6   : > { %2447 = vmatpush.bf16.msra.mxu2 %v2419_v43 }
 0x8fa   : > { %v2396_v7 = vpop.permute.xlu0 %2395 }
 0x8fb   : > { %v2418_v26 = vsel %vm759_vm5, %v2394_v14, %v2396_v7 }
 0x8fc   : > { %v2392_v58 = vpop.permute.xlu1 %2391 }
 0x8fd   : > { %v2417_v55 = vsel %vm759_vm5, %v2392_v58, %v2394_v14 }
 0x8fe   : > { %2448 = vmatpush.bf16.msra.mxu2 %v2417_v55 }
 0x902   : > { %v2414_v6 = vpop.permute.xlu0 %2413 }
 0x903   : > { %v2424_v13 = vsel %vm759_vm5, %v2412_v32, %v2414_v6 }
 0x904   : > { %v2440_v1 = vsel %vm968_vm13, %v2424_v13, 0  ;;  %v2386_v40 = vpop.permute.xlu1 %2385 }
 0x905   : > { %2458 = vmatpush.bf16.msra.mxu3 %v2440_v1  ;;  %v2415_v61 = vsel %vm759_vm5, %v2386_v40, %v2388_v60 }
 0x906   : > { %2449 = vmatpush.bf16.msra.mxu2 %v2415_v61 }
 0x909   : > { %5264 = vmatmul.msk.bf16.vlgmr.msra.gmra.mxu2 %vm964_vm14, %v1012_v29 }
 0x90a   : > { %v2408_v31 = vpop.permute.xlu0 %2407 }
 0x90b   : > { %v2422_v46 = vsel %vm759_vm5, %v2406_v39, %v2408_v31 }
 0x90c   : > { %2459 = vmatpush.bf16.msra.mxu3 %v2422_v46  ;;  %v7271_v12 = vpop.permute.xlu1 %2184 }
 0x912   : > { %v2402_v11 = vpop.permute.xlu0 %2401 }
 0x913   : > { %v2420_v51 = vsel %vm759_vm5, %v2400_v63, %v2402_v11 }
 0x914   : > { %2460 = vmatpush.bf16.msra.mxu3 %v2420_v51  ;;  %v2493_v54 = vpop.permute.xlu1 %2492  ;;  %v2368_v51 = vpop.permute.xlu2 %2367 }
 0x915   : > { %v2508_v32 = vadd.f32 %v2507_v10, %v2493_v54  ;;  %v2521_v3 = vadd.f32 %v2520_v59, %v2493_v54 }
 0x917   : > { %v7274_v42 = vmax.f32 %v2508_v32, 0.0  ;;  %v7276_v4 = vmax.f32 %v2521_v3, 0.0  ;;  %v2200_v32 = vadd.f32 %v7254_v18, %v7271_v12  ;;  %v2472_v18 = vld [vmem:[%s9508_s12] sm:$0xf] }
 0x918   : > { %2461 = vmatpush.bf16.msra.mxu3 %v2418_v26 }
 0x919   : > { %v2586_v39 = vmul.f32 %v7276_v4, %v6323_v33  ;;  %v2587_v16 = vmul.f32 %v7274_v42, %v6291_v20  ;;  %v2583_v19 = vmul.f32 %v7276_v4, %v6315_v30  ;;  %v2584_v10 = vmul.f32 %v7274_v42, %v6309_v28 }
 0x91a   : > { %v2390_v63 = vpop.permute.xlu0 %2389  ;;  %v2589_v53 = vmul.f32 %v7276_v4, %v6369_v52  ;;  %v2590_v56 = vmul.f32 %v7274_v42, %v6307_v27  ;;  %v2580_v58 = vmul.f32 %v7276_v4, %v6339_v41  ;;  %v2581_v55 = vmul.f32 %v7274_v42, %v6333_v38 }
 0x91b   : > { %v2416_v43 = vsel %vm759_vm5, %v2388_v60, %v2390_v63  ;;  %v5616_v59 = vpack.i.bf16 %v2587_v16, %v2586_v39  ;;  %v5611_v14 = vpack.i.bf16 %v2584_v10, %v2583_v19  ;;  %v2577_v34 = vmul.f32 %v7274_v42, %v6360_v49 }
 0x91c   : > { %2462 = vmatpush.bf16.msra.mxu3 %v2416_v43  ;;  %v5606_v7 = vpack.i.bf16 %v2590_v56, %v2589_v53  ;;  %v2578_v6 = vmul.f32 %v7276_v4, %v6302_v25  ;;  %v5621_v13 = vpack.i.bf16 %v7276_v4, %v7274_v42  ;;  %v5626_v60 = vpack.i.bf16 %v2581_v55, %v2580_v58 }
 0x91d   : > { %5617 = vrot.lane.b32.xlu1 %v5616_v59, %s9546_s23  ;;  %5612 = vrot.lane.b32.xlu0 %v5611_v14, %s9729_s24  ;;  %v2574_v40 = vmul.f32 %v7274_v42, %v6353_v47  ;;  %v2575_v61 = vmul.f32 %v7276_v4, %v6345_v44  ;;  %v2572_v31 = vmul.f32 %v7276_v4, %v9724_v37 }
 0x91e   : > { %5607 = vrot.lane.b32.xlu2 %v5606_v7, %s9730_s26  ;;  %v5636_v1 = vpack.i.bf16 %v2578_v6, %v2577_v34  ;;  %v2526_v56 = vpack.c.bf16 %v6978_v15, %v6838_v8  ;;  %v2213_v7 = vadd.f32 %v7258_v57, %v7271_v12  ;;  %v7356_v57 = vmul.f32 %v7274_v42, %v6300_v24 }
 0x91f   : > { %5265 = vmatmul.msk.bf16.vlgmr.msra.gmra.mxu3 %vm964_vm14, %v1012_v29  ;;  %v2571_v29 = vmul.f32 %v7274_v42, %v6395_v0  ;;  %v5631_v46 = vpack.i.bf16 %v2575_v61, %v2574_v40 }
 0x921   : > { %v5641_v11 = vpack.i.bf16 %v2572_v31, %v2571_v29 }
 0x925   : > { %5622 = vrot.lane.b32.xlu0 %v5621_v13, %s9731_s3  ;;  %5627 = vrot.lane.b32.xlu1 %v5626_v60, %s9728_s27  ;;  %v2527_v60 = vpack.c.bf16 %v6980_v2, %v6836_v48  ;;  %v7372_v2 = vmul.f32 %v7274_v42, %v6329_v36 }
 0x926   : > { %5637 = vrot.lane.b32.xlu2 %v5636_v1, %s9723_s25  ;;  %v2533_v1 = vpop.permute.xlu0 %2532 }
 0x92d   : > { %5632 = vrot.lane.b32.xlu1 %v5631_v46, %s9725_s29  ;;  %5642 = vrot.lane.b32.xlu0 %v5641_v11, %s9715_s30 }
 0x978   : > { %v7323_v19 = vpop.permute.xlu2 %5607 }
 0x980   : > { %v7334_v43 = vpop.permute.xlu2 %5637 }
 0x98c   : > { %v2451_v54 = vpop.f32.mrf.mxu2 }
 0x98d   : > { %v2452_v3 = vadd.f32 %v2451_v54, %v2368_v51 }
 0x98f   : > { %v2468_v26 = vadd.f32 %v2452_v3, %v2200_v32  ;;  %v7321_v39 = vpop.permute.xlu1 %5617 }
 0x991   : > { %v2524_v16 = vmax.f32 %v2468_v26, 0.0 }
 0x993   : > { %v2528_v10 = vpack.c.bf16 %v2524_v16, %v7118_v5  ;;  %v9541_v5 = vunpack.i.h.bf16 %v7334_v43 }
 0x994   : > { %v2453_v63 = vpop.f32.mrf.mxu2 }
 0x995   : > { %2545 = vmatpush.bf16.msrb.mxu2 %v2528_v10 }
 0x997   : > { %v7326_v53 = vpop.permute.xlu1 %5627 }
 0x998   : > { %v5630_v11 = vunpack.i.h.bf16 %v7326_v53 }
 0x999   : > { %2546 = vmatpush.bf16.msrb.mxu2 %v2526_v56  ;;  %v7394_v56 = vmul.f32 %v7276_v4, %v6347_v45 }
 0x99c   : > { %5268 = vmatmul.msk.bf16.vlgmr.msrb.gmra.mxu2 %vm2535_vm0, %v2472_v18 }
 0x99f   : > { %v7336_v59 = vpop.permute.xlu1 %5632 }
 0x9a0   : > { %v9542_v14 = vunpack.i.h.bf16 %v7336_v59 }
 0x9a2   : > { %v7344_v8 = vpack.c.bf16 %v9541_v5, %v9542_v14  ;;  %v2464_v15 = vpop.f32.mrf.mxu3  ;;  %v5610_v5 = vunpack.i.h.bf16 %v7323_v19  ;;  %v5609_v14 = vunpack.i.l.bf16 %v7323_v19 }
 0x9a3   : > { %v2465_v58 = vadd.f32 %v2464_v15, %v2368_v51 }
 0x9a5   : > { %v2469_v55 = vadd.f32 %v2465_v58, %v2213_v7 }
 0x9a7   : > { %v2525_v34 = vmax.f32 %v2469_v55, 0.0 }
 0x9a9   : > { %v2529_v6 = vpack.c.bf16 %v2525_v34, %v7124_v50  ;;  %v7360_v50 = vmul.f32 %v7274_v42, %v6281_v17 }
 0x9aa   : > { %v2466_v13 = vpop.f32.mrf.mxu3 }
 0x9ab   : > { %2558 = vmatpush.bf16.msrb.mxu3 %v2529_v6 }
 0x9af   : > { %2559 = vmatpush.bf16.msrb.mxu3 %v2527_v60 }
 0x9b2   : > { %5269 = vmatmul.msk.bf16.vlgmr.msrb.gmra.mxu3 %vm2535_vm0, %v2472_v18 }
 0xa1f   : > { %v2548_v40 = vpop.f32.mrf.mxu2 }
 0xa20   : > { %v2549_v61 = vadd.f32 %v2548_v40, %v2533_v1  ;;  %v5613_v40 = vpop.permute.xlu0 %5612 }
 0xa21   : > { %v5615_v19 = vunpack.i.h.bf16 %v5613_v40  ;;  %v5614_v51 = vunpack.i.l.bf16 %v5613_v40 }
 0xa22   : > { %v7352_v29 = vmax.f32 %v2549_v61, 0.0 }
 0xa24   : > { %v7364_v12 = vmul.f32 %v7352_v29, %v6309_v28  ;;  %v7368_v48 = vmul.f32 %v7352_v29, %v6291_v20  ;;  %v7376_v31 = vmul.f32 %v7352_v29, %v6333_v38  ;;  %v2840_v10 = vmul.f32 %v7352_v29, %v6298_v23 }
 0xa25   : > { %v7398_v18 = vmul.f32 %v7352_v29, %v6300_v24  ;;  %v7406_v7 = vmul.f32 %v7352_v29, %v6329_v36  ;;  %v2842_v34 = vmul.f32 %v7352_v29, %v6307_v27  ;;  %v7421_v13 = vmul.f32 %v7352_v29, %v6360_v49 }
 0xa27   : > { %v2550_v46 = vpop.f32.mrf.mxu2 }
 0xa28   : > { %v7433_v46 = vmul.f32 %v7352_v29, %v6353_v47 }
 0xa35   : > { %v2561_v32 = vpop.f32.mrf.mxu3 }
 0xa36   : > { %v2562_v3 = vadd.f32 %v2561_v32, %v2533_v1  ;;  %v2695_v32 = vsel %vm874_vm7, %v5609_v14, %v5610_v5 }
 0xa37   : > { %v2713_v54 = vpack.c.bf16 %v2695_v32, %v2695_v32 }
 0xa38   : > { %v7384_v26 = vmax.f32 %v2562_v3, 0.0 }
 0xa3a   : > { %v5646_v16 = vpack.i.bf16 %v7384_v26, %v7352_v29  ;;  %v2841_v63 = vmul.f32 %v7384_v26, %v6369_v52  ;;  %v7402_v15 = vmul.f32 %v7384_v26, %v6315_v30  ;;  %v7410_v58 = vmul.f32 %v7384_v26, %v6339_v41 }
 0xa3b   : > { %v7417_v6 = vmul.f32 %v7384_v26, %v6347_v45  ;;  %v7429_v61 = vmul.f32 %v7384_v26, %v6296_v22  ;;  %v7440_v3 = vmul.f32 %v7384_v26, %v6302_v25  ;;  %v5629_v45 = vunpack.i.l.bf16 %v7326_v53 }
 0xa3c   : > { %5647 = vrot.lane.b32.xlu0 %v5646_v16, %s9731_s3  ;;  %v5651_v55 = vpack.i.bf16 %v2841_v63, %v2840_v10  ;;  %v5661_v1 = vpack.i.bf16 %v7402_v15, %v7398_v18  ;;  %v7444_v16 = vmul.f32 %v7384_v26, %v6388_v62  ;;  %v7448_v10 = vmul.f32 %v7352_v29, %v6395_v0 }
 0xa3d   : > { %v2563_v60 = vpop.f32.mrf.mxu3  ;;  %v2588_v18 = vmul.f32 %v7274_v42, %v6298_v23  ;;  %v2838_v63 = vmul.f32 %v7384_v26, %v6323_v33  ;;  %v2837_v15 = vmul.f32 %v7352_v29, %v6281_v17  ;;  %v2827_v40 = vmul.f32 %v7384_v26, %v6345_v44 }
 0xa3e   : > { %5652 = vrot.lane.b32.xlu2 %v5651_v55, %s9730_s26  ;;  %v2824_v53 = vmul.f32 %v7384_v26, %v9724_v37 }
 0xa3f   : > { %v5656_v60 = vpack.i.bf16 %v2588_v18, %v2842_v34  ;;  %v5671_v55 = vpack.i.bf16 %v2838_v63, %v2837_v15  ;;  %v5620_v34 = vunpack.i.h.bf16 %v7321_v39  ;;  %v5619_v18 = vunpack.i.l.bf16 %v7321_v39 }
 0xa40   : > { %v2653_v15 = vsel %vm829_vm10, %v5629_v45, %v5630_v11 }
 0xa41   : > { %v2681_v5 = vsel %vm859_vm9, %v5619_v18, %v5620_v34 }
 0xa44   : > { %5657 = vrot.lane.b32.xlu0 %v5656_v60, %s9730_s26  ;;  %v5623_v60 = vpop.permute.xlu0 %5622 }
 0xa45   : > { %v5625_v63 = vunpack.i.h.bf16 %v5623_v60 }
 0xa47   : > { %v2707_v39 = vpack.c.bf16 %v2653_v15, %v5625_v63 }
 0xa4c   : > { %2762 = vrot.lane.b32.xlu0 %v2713_v54, %s9716_s4  ;;  %v2667_v54 = vsel %vm844_vm8, %v5614_v51, %v5615_v19  ;;  %v2570_v19 = vmul.f32 %v7276_v4, %v6388_v62  ;;  %v7487_v11 = vpop.permute.xlu0 %5642 }
 0xa4d   : > { %v2710_v32 = vpack.c.bf16 %v2681_v5, %v2667_v54 }
 0xa4e   : > { %v5716_v5 = vpack.i.bf16 %v2570_v19, %v2824_v53  ;;  %v9733_v53 = vpack.i.bf16 %v7360_v50, %v7368_v48 }
 0xa54   : > { %5672 = vrot.lane.b32.xlu0 %v5671_v55, %s9546_s23  ;;  %v2573_v55 = vmul.f32 %v7276_v4, %v6296_v22 }
 0xa56   : > { %v5696_v34 = vpack.i.bf16 %v2573_v55, %v2827_v40 }
 0xa5c   : > { %2756 = vrot.lane.b32.xlu0 %v2710_v32, %s9716_s4 }
 0xa64   : > { %2750 = vrot.lane.b32.xlu0 %v2707_v39, %s9716_s4 }
 0xa6c   : > { %5697 = vrot.lane.b32.xlu0 %v5696_v34, %s9725_s29  ;;  %v9732_v34 = vpack.i.bf16 %v7356_v57, %v7364_v12 }
 0xa74   : > { %5717 = vrot.lane.b32.xlu0 %v5716_v5, %s9715_s30 }
 0xa98   : > { %v7506_v19 = vpop.permute.xlu2 %5652 }
 0xaae   : > { %v7489_v54 = vpop.permute.xlu0 %5647 }
 0xab6   : > { %v7491_v32 = vpop.permute.xlu0 %5657 }
 0xab7   : > { %v5660_v15 = vunpack.i.h.bf16 %v7491_v32 }
 0xab9   : > { %v2711_v39 = vpack.c.bf16 %v5660_v15, %v5660_v15  ;;  %v2694_v40 = vsel %vm874_vm7, %v5660_v15, %v5609_v14 }
 0xaba   : > { %v2712_v55 = vpack.c.bf16 %v2694_v40, %v2694_v40 }
 0xabb   : > { %2758 = vrot.lane.b32.xlu1 %v2711_v39, %s9716_s4 }
 0xabc   : > { %2760 = vrot.lane.b32.xlu2 %v2712_v55, %s9716_s4 }
 0xabe   : > { %v2763_v14 = vpop.permute.xlu0 %2762 }
 0xac3   : > { %5662 = vrot.lane.b32.xlu1 %v5661_v1, %s9729_s24 }
 0xac4   : > { %5667 = vrot.lane.b32.xlu2 %v9732_v34, %s9729_s24 }
 0xacb   : > { %5677 = vrot.lane.b32.xlu1 %v9733_v53, %s9546_s23  ;;  %s9756_s23 = smov 95  }
 0xb16   : > { %v2761_v5 = vpop.permute.xlu2 %2760 }
 0xb17   : > { %v2773_v15 = vsel %vm759_vm5, %v2761_v5, %v2763_v14 }
 0xb18   : > { %v2789_v39 = vsel %vm968_vm13, %v2773_v15, 0 }
 0xb19   : > { %2807 = vmatpush.bf16.msrb.mxu1 %v2789_v39 }
 0xb1e   : > { %v7514_v55 = vpop.permute.xlu2 %5667 }
 0xb1f   : > { %v5670_v50 = vunpack.i.h.bf16 %v7514_v55 }
 0xb21   : > { %v2666_v53 = vsel %vm844_vm8, %v5670_v50, %v5614_v51 }
 0xb2d   : > { %v2759_v1 = vpop.permute.xlu1 %2758 }
 0xb2e   : > { %v2772_v40 = vsel %vm759_vm5, %v2759_v1, %v2761_v5  ;;  %v9734_v5 = vpack.i.bf16 %v7410_v58, %v7406_v7  ;;  %v9735_v1 = vpack.i.bf16 %v7372_v2, %v7376_v31  ;;  %v9736_v2 = vpack.i.bf16 %v7421_v13, %v7417_v6 }
 0xb2f   : > { %v2786_v57 = vsel %vm968_vm13, %v2772_v40, 0  ;;  %v7532_v40 = vpop.permute.xlu0 %5672  ;;  %v9737_v31 = vpack.i.bf16 %v7433_v46, %v7429_v61  ;;  %v9739_v6 = vunpack.i.h.bf16 %v7336_v59  ;;  %v9740_v61 = vunpack.i.h.bf16 %v7334_v43 }
 0xb30   : > { %2794 = vmatpush.bf16.msrb.mxu0 %v2786_v57 }
 0xb35   : > { %v7512_v12 = vpop.permute.xlu1 %5662 }
 0xb37   : > { %v2757_v51 = vpop.permute.xlu0 %2756 }
 0xb3d   : > { %v7517_v48 = vpop.permute.xlu1 %5677 }
 0xb3e   : > { %v5680_v34 = vunpack.i.h.bf16 %v7517_v48 }
 0xb40   : > { %v2680_v14 = vsel %vm859_vm9, %v5680_v34, %v5619_v18  ;;  %v2708_v15 = vpack.c.bf16 %v5680_v34, %v5670_v50  ;;  %v5624_v50 = vunpack.i.l.bf16 %v5623_v60 }
 0xb41   : > { %v2709_v39 = vpack.c.bf16 %v2680_v14, %v2666_v53 }
 0xb42   : > { %2752 = vrot.lane.b32.xlu1 %v2708_v15, %s9716_s4  ;;  %v2639_v7 = vsel %vm647_vm11, %v5624_v50, %v5625_v63 }
 0xb43   : > { %2754 = vrot.lane.b32.xlu2 %v2709_v39, %s9716_s4  ;;  %v9738_v39 = vpack.i.bf16 %v7394_v56, %v7440_v3  ;;  %v9741_v56 = vpack.i.bf16 %v7448_v10, %v7444_v16 }
 0xb4a   : > { %5682 = vrot.lane.b32.xlu1 %v9734_v5, %s9728_s27  ;;  %v5639_v5 = vunpack.i.l.bf16 %v7334_v43  ;;  %v5664_v43 = vunpack.i.l.bf16 %v7512_v12 }
 0xb4b   : > { %5687 = vrot.lane.b32.xlu2 %v9735_v1, %s9728_s27 }
 0xb4c   : > { %v2629_v46 = vsel %vm663_vm6, %v5639_v5, %v9740_v61 }
 0xb9d   : > { %v2755_v18 = vpop.permute.xlu2 %2754 }
 0xb9e   : > { %v2771_v57 = vsel %vm759_vm5, %v2755_v18, %v2757_v51  ;;  %v5655_v51 = vunpack.i.h.bf16 %v7506_v19 }
 0xb9f   : > { %2808 = vmatpush.bf16.msrb.mxu1 %v2771_v57  ;;  %v5665_v57 = vunpack.i.h.bf16 %v7512_v12 }
 0xba5   : > { %v7535_v34 = vpop.permute.xlu2 %5687 }
 0xba6   : > { %v5690_v53 = vunpack.i.h.bf16 %v7535_v34 }
 0xba8   : > { %v2652_v58 = vsel %vm829_vm10, %v5690_v53, %v5629_v45  ;;  %v2705_v14 = vpack.c.bf16 %v5690_v53, %v5624_v50  ;;  %v5634_v45 = vunpack.i.l.bf16 %v7336_v59  ;;  %v5675_v50 = vunpack.i.h.bf16 %v7532_v40 }
 0xba9   : > { %v2706_v15 = vpack.c.bf16 %v2652_v58, %v2639_v7  ;;  %v5674_v53 = vunpack.i.l.bf16 %v7532_v40 }
 0xbaa   : > { %2746 = vrot.lane.b32.xlu1 %v2705_v14, %s9716_s4  ;;  %v2615_v13 = vsel %vm790_vm12, %v5634_v45, %v9739_v6 }
 0xbab   : > { %2748 = vrot.lane.b32.xlu2 %v2706_v15, %s9716_s4  ;;  %v2703_v1 = vpack.c.bf16 %v2629_v46, %v2615_v13  ;;  %v2932_v16 = vsel %vm859_vm9, %v5674_v53, %v5675_v50  ;;  %v9545_v15 = vunpack.i.h.bf16 %v7489_v54 }
 0xbb2   : > { %5702 = vrot.lane.b32.xlu1 %v9736_v2, %s9723_s25  ;;  %v5649_v2 = vunpack.i.l.bf16 %v7489_v54 }
 0xbb3   : > { %5692 = vrot.lane.b32.xlu2 %v9737_v31, %s9725_s29 }
 0xbb4   : > { %v2753_v60 = vpop.permute.xlu1 %2752  ;;  %v2891_v31 = vsel %vm647_vm11, %v5649_v2, %v9545_v15 }
 0xbb5   : > { %v2770_v63 = vsel %vm759_vm5, %v2753_v60, %v2755_v18  ;;  %v5654_v18 = vunpack.i.l.bf16 %v7506_v19  ;;  %v2918_v19 = vsel %vm844_vm8, %v5664_v43, %v5665_v57 }
 0xbb6   : > { %2795 = vmatpush.bf16.msrb.mxu0 %v2770_v63  ;;  %v2961_v10 = vpack.c.bf16 %v2932_v16, %v2918_v19  ;;  %v2751_v63 = vpop.permute.xlu0 %2750 }
 0xbb7   : > { %v2946_v59 = vsel %vm874_vm7, %v5654_v18, %v5655_v51 }
 0xbb8   : > { %v2964_v3 = vpack.c.bf16 %v2946_v59, %v2946_v59 }
 0xbbb   : > { %5707 = vrot.lane.b32.xlu2 %v9738_v39, %s9723_s25 }
 0xbbc   : > { %v7579_v7 = vpop.permute.xlu1 %5682 }
 0xbbd   : > { %v5685_v58 = vunpack.i.h.bf16 %v7579_v7  ;;  %v5684_v14 = vunpack.i.l.bf16 %v7579_v7 }
 0xbbe   : > { %v5698_v61 = vpop.permute.xlu0 %5697 }
 0xbbf   : > { %v2904_v40 = vsel %vm829_vm10, %v5684_v14, %v5685_v58  ;;  %v5700_v46 = vunpack.i.h.bf16 %v5698_v61 }
 0xbc0   : > { %v2958_v60 = vpack.c.bf16 %v2904_v40, %v2891_v31 }
 0xbc1   : > { %v2614_v19 = vsel %vm790_vm12, %v5700_v46, %v5634_v45  ;;  %v2821_v45 = vmul.f32 %v7384_v26, %v6415_v9  ;;  %v2963_v46 = vpack.c.bf16 %v5654_v18, %v5654_v18  ;;  %v5679_v18 = vunpack.i.l.bf16 %v7517_v48 }
 0xbc3   : > { %2742 = vrot.lane.b32.xlu2 %v2703_v1, %s9716_s4 }
 0xbc6   : > { %v7597_v40 = vpop.permute.xlu0 %5717 }
 0xbcb   : > { %5712 = vrot.lane.b32.xlu2 %v9741_v56, %s9715_s30  ;;  %v5699_v56 = vunpack.i.l.bf16 %v5698_v61 }
 0xbd3   : > { %3012 = vrot.lane.b32.xlu2 %v2964_v3, %s9716_s4 }
 0xbdb   : > { %3006 = vrot.lane.b32.xlu2 %v2961_v10, %s9716_s4 }
 0xbe3   : > { %3000 = vrot.lane.b32.xlu2 %v2958_v60, %s9716_s4  ;;  %v5719_v60 = vunpack.i.l.bf16 %v7597_v40 }
 0xc05   : > { %v2749_v39 = vpop.permute.xlu2 %2748 }
 0xc06   : > { %v2769_v6 = vsel %vm759_vm5, %v2749_v39, %v2751_v63 }
 0xc07   : > { %2809 = vmatpush.bf16.msrb.mxu1 %v2769_v6 }
 0xc0d   : > { %v5693_v13 = vpop.permute.xlu2 %5692 }
 0xc15   : > { %v5708_v1 = vpop.permute.xlu2 %5707 }
 0xc16   : > { %v5710_v59 = vunpack.i.h.bf16 %v5708_v1  ;;  %v5709_v3 = vunpack.i.l.bf16 %v5708_v1  ;;  %v5659_v1 = vunpack.i.l.bf16 %v7491_v32 }
 0xc18   : > { %v2628_v16 = vsel %vm663_vm6, %v5710_v59, %v5639_v5  ;;  %v2956_v10 = vpack.c.bf16 %v5709_v3, %v5699_v56  ;;  %v2953_v5 = vpack.c.bf16 %v5719_v60, %v2821_v45  ;;  %v5695_v59 = vunpack.i.h.bf16 %v5693_v13 }
 0xc19   : > { %v2702_v31 = vpack.c.bf16 %v2628_v16, %v2614_v19  ;;  %v2960_v45 = vpack.c.bf16 %v5674_v53, %v5664_v43 }
 0xc1a   : > { %2996 = vrot.lane.b32.xlu0 %v2956_v10, %s9716_s4  ;;  %v2947_v10 = vsel %vm874_vm7, %v5655_v51, %v5659_v1  ;;  %v2933_v51 = vsel %vm859_vm9, %v5675_v50, %v5679_v18  ;;  %v2957_v1 = vpack.c.bf16 %v5684_v14, %v5649_v2 }
 0xc1b   : > { %2740 = vrot.lane.b32.xlu1 %v2702_v31, %s9716_s4  ;;  %v2965_v15 = vpack.c.bf16 %v2947_v10, %v2947_v10 }
 0xc1c   : > { %v2747_v63 = vpop.permute.xlu1 %2746 }
 0xc1d   : > { %v7602_v6 = vpop.permute.xlu2 %2742  ;;  %v2768_v61 = vsel %vm759_vm5, %v2747_v63, %v2749_v39  ;;  %v2867_v39 = vsel %vm790_vm12, %v5695_v59, %v5699_v56 }
 0xc1e   : > { %2796 = vmatpush.bf16.msrb.mxu0 %v2768_v61 }
 0xc22   : > { %2990 = vrot.lane.b32.xlu0 %v2953_v5, %s9716_s4  ;;  %v5669_v5 = vunpack.i.l.bf16 %v7514_v55  ;;  %v5689_v55 = vunpack.i.l.bf16 %v7535_v34 }
 0xc23   : > { %3010 = vrot.lane.b32.xlu1 %v2963_v46, %s9716_s4  ;;  %v5644_v46 = vunpack.i.l.bf16 %v7487_v11 }
 0xc24   : > { %v5703_v19 = vpop.permute.xlu1 %5702  ;;  %v2919_v48 = vsel %vm844_vm8, %v5665_v57, %v5669_v5  ;;  %v2905_v57 = vsel %vm829_vm10, %v5685_v58, %v5689_v55  ;;  %v2819_v58 = vmul.f32 %v7384_v26, %v6424_v35 }
 0xc25   : > { %v5705_v16 = vunpack.i.h.bf16 %v5703_v19  ;;  %v5713_v31 = vpop.permute.xlu2 %5712  ;;  %v2962_v53 = vpack.c.bf16 %v2933_v51, %v2919_v48  ;;  %v5704_v10 = vunpack.i.l.bf16 %v5703_v19 }
 0xc26   : > { %v5715_v32 = vunpack.i.h.bf16 %v5713_v31 }
 0xc27   : > { %v2881_v63 = vsel %vm663_vm6, %v5705_v16, %v5709_v3  ;;  %v2820_v3 = vmul.f32 %v7352_v29, %v6448_v21  ;;  %v5694_v29 = vunpack.i.l.bf16 %v5693_v13  ;;  %v2880_v50 = vsel %vm663_vm6, %v5704_v10, %v5705_v16 }
 0xc28   : > { %v2955_v61 = vpack.c.bf16 %v2881_v63, %v2867_v39  ;;  %v2853_v56 = vsel %vm695_vm4, %v5715_v32, %v5719_v60  ;;  %v9742_v60 = vunpack.i.h.bf16 %v7489_v54  ;;  %v5714_v39 = vunpack.i.l.bf16 %v5713_v31 }
 0xc29   : > { %v2952_v43 = vpack.c.bf16 %v2853_v56, %v2820_v3  ;;  %v2866_v14 = vsel %vm790_vm12, %v5694_v29, %v5695_v59  ;;  %v5720_v54 = vunpack.i.h.bf16 %v7597_v40  ;;  %v2569_v59 = vmul.f32 %v7276_v4, %v6415_v9 }
 0xc2a   : > { %3014 = vrot.lane.b32.xlu0 %v2965_v15, %s9716_s4  ;;  %2994 = vrot.lane.b32.xlu2 %v2955_v61, %s9716_s4  ;;  %v5645_v15 = vunpack.i.h.bf16 %v7487_v11  ;;  %v2568_v11 = vmul.f32 %v7274_v42, %v6448_v21  ;;  %v2959_v34 = vpack.c.bf16 %v2905_v57, %v9742_v60  ;;  %v2954_v19 = vpack.c.bf16 %v2880_v50, %v2866_v14  ;;  %v2483_v42 = vld [vmem:[%s9511_s15 + $0x8] sm:$0xff] }
 0xc2b   : > { %3004 = vrot.lane.b32.xlu1 %v2960_v45, %s9716_s4  ;;  %v2852_v7 = vsel %vm695_vm4, %v5714_v39, %v5715_v32  ;;  %v2600_v16 = vsel %vm695_vm4, %v5720_v54, %v5644_v46  ;;  %v2567_v31 = vmul.f32 %v7276_v4, %v6424_v35 }
 0xc2c   : > { %v2601_v12 = vsel %vm695_vm4, %v5644_v46, %v5645_v15  ;;  %v2951_v13 = vpack.c.bf16 %v2852_v7, %v2819_v58  ;;  %v2701_v63 = vpack.c.bf16 %v5645_v15, %v2569_v59  ;;  %v2475_v58 = vld [vmem:[%s9510_s14 + $0x4] sm:$0xf] }
 0xc2d   : > { %v2700_v2 = vpack.c.bf16 %v2601_v12, %v2568_v11  ;;  %v2699_v61 = vpack.c.bf16 %v2600_v16, %v2567_v31  ;;  %v3013_v26 = vpop.permute.xlu2 %3012  ;;  %v2474_v31 = vld [vmem:[%s9510_s14] sm:$0xf] }
 0xc32   : > { %2988 = vrot.lane.b32.xlu2 %v2952_v43, %s9716_s4  ;;  %3008 = vrot.lane.b32.xlu0 %v2962_v53, %s9716_s4 }
 0xc33   : > { %2998 = vrot.lane.b32.xlu1 %v2957_v1, %s9716_s4 }
 0xc35   : > { %v3007_v5 = vpop.permute.xlu2 %3006 }
 0xc3a   : > { %2736 = vrot.lane.b32.xlu2 %v2700_v2, %s9716_s4  ;;  %3002 = vrot.lane.b32.xlu0 %v2959_v34, %s9716_s4 }
 0xc3b   : > { %2992 = vrot.lane.b32.xlu1 %v2954_v19, %s9716_s4 }
 0xc3d   : > { %v3001_v46 = vpop.permute.xlu2 %3000 }
 0xc42   : > { %2968 = vperm.xlu2 %5369, %v2483_v42   ;;  %2744 = vrot.lane.b32.xlu0 %v7344_v8, %s9716_s4  ;;  %v2482_v8 = vld [vmem:[%s9511_s15] sm:$0xff] }
 0xc43   : > { %2986 = vrot.lane.b32.xlu1 %v2951_v13, %s9716_s4 }
 0xc4a   : > { %2738 = vrot.lane.b32.xlu0 %v2701_v63, %s9716_s4 }
 0xc4b   : > { %2734 = vrot.lane.b32.xlu1 %v2699_v61, %s9716_s4 }
 0xc53   : > { %2716 = vperm.xlu1 %5368, %v2482_v8  }
 0xc84   : > { %v2995_v12 = vpop.permute.xlu2 %2994 }
 0xc8c   : > { %v2997_v40 = vpop.permute.xlu0 %2996  ;;  %v2989_v60 = vpop.permute.xlu2 %2988 }
 0xc8d   : > { %v2741_v45 = vpop.permute.xlu1 %2740  ;;  %v3019_v2 = vsel %vm759_vm5, %v2995_v12, %v2997_v40 }
 0xc8e   : > { %v2766_v18 = vsel %vm759_vm5, %v2741_v45, %v7602_v6 }
 0xc8f   : > { %2797 = vmatpush.bf16.msrb.mxu0 %v2766_v18 }
 0xc94   : > { %v2991_v32 = vpop.permute.xlu0 %2990  ;;  %v2737_v13 = vpop.permute.xlu2 %2736 }
 0xc95   : > { %v3011_v4 = vpop.permute.xlu1 %3010  ;;  %v3017_v7 = vsel %vm759_vm5, %v2989_v60, %v2991_v32 }
 0xc96   : > { %v3024_v51 = vsel %vm759_vm5, %v3011_v4, %v3013_v26 }
 0xc97   : > { %v3038_v56 = vsel %vm968_vm13, %v3024_v51, 0 }
 0xc98   : > { %3046 = vmatpush.bf16.msra.mxu2 %v3038_v56 }
 0xc9c   : > { %v3015_v3 = vpop.permute.xlu0 %3014  ;;  %v2969_v61 = vpop.permute.xlu2 %2968 }
 0xc9d   : > { %v3025_v48 = vsel %vm759_vm5, %v3013_v26, %v3015_v3  ;;  %v3005_v43 = vpop.permute.xlu1 %3004 }
 0xc9e   : > { %v3041_v53 = vsel %vm968_vm13, %v3025_v48, 0  ;;  %v3022_v15 = vsel %vm759_vm5, %v3005_v43, %v3007_v5 }
 0xc9f   : > { %3047 = vmatpush.bf16.msra.mxu2 %v3022_v15  ;;  %3059 = vmatpush.bf16.msra.mxu3 %v3041_v53 }
 0xca4   : > { %v3009_v1 = vpop.permute.xlu0 %3008 }
 0xca5   : > { %v2999_v10 = vpop.permute.xlu1 %2998  ;;  %v3023_v55 = vsel %vm759_vm5, %v3007_v5, %v3009_v1 }
 0xca6   : > { %3060 = vmatpush.bf16.msra.mxu3 %v3023_v55  ;;  %v3020_v29 = vsel %vm759_vm5, %v2999_v10, %v3001_v46 }
 0xca7   : > { %3048 = vmatpush.bf16.msra.mxu2 %v3020_v29 }
 0xcac   : > { %v3003_v57 = vpop.permute.xlu0 %3002 }
 0xcad   : > { %v2993_v50 = vpop.permute.xlu1 %2992  ;;  %v3021_v11 = vsel %vm759_vm5, %v3001_v46, %v3003_v57 }
 0xcae   : > { %3061 = vmatpush.bf16.msra.mxu3 %v3021_v11  ;;  %v3018_v14 = vsel %vm759_vm5, %v2993_v50, %v2995_v12 }
 0xcaf   : > { %3049 = vmatpush.bf16.msra.mxu2 %v3018_v14 }
 0xcb2   : > { %3062 = vmatpush.bf16.msra.mxu3 %v3019_v2 }
 0xcb4   : > { %v2745_v34 = vpop.permute.xlu0 %2744 }
 0xcb5   : > { %v2987_v19 = vpop.permute.xlu1 %2986  ;;  %v2767_v39 = vsel %vm759_vm5, %v7602_v6, %v2745_v34 }
 0xcb6   : > { %2810 = vmatpush.bf16.msrb.mxu1 %v2767_v39  ;;  %3063 = vmatpush.bf16.msra.mxu3 %v3017_v7  ;;  %v3016_v42 = vsel %vm759_vm5, %v2987_v19, %v2989_v60 }
 0xcb7   : > { %3050 = vmatpush.bf16.msra.mxu2 %v3016_v42 }
 0xcb9   : > { %5273 = vmatmul.msk.bf16.vlgmr.msra.gmra.mxu3 %vm964_vm14, %v2475_v58 }
 0xcba   : > { %5272 = vmatmul.msk.bf16.vlgmr.msra.gmra.mxu2 %vm964_vm14, %v2475_v58 }
 0xcbc   : > { %v2739_v54 = vpop.permute.xlu0 %2738 }
 0xcbd   : > { %v2735_v59 = vpop.permute.xlu1 %2734  ;;  %v2765_v6 = vsel %vm759_vm5, %v2737_v13, %v2739_v54 }
 0xcbe   : > { %2811 = vmatpush.bf16.msrb.mxu1 %v2765_v6  ;;  %v2764_v16 = vsel %vm759_vm5, %v2735_v59, %v2737_v13 }
 0xcbf   : > { %2798 = vmatpush.bf16.msrb.mxu0 %v2764_v16 }
 0xcc1   : > { %5271 = vmatmul.msk.bf16.vlgmr.msrb.gmra.mxu1 %vm964_vm14, %v2474_v31 }
 0xcc2   : > { %3095 = vmatpush.bf16.msra.mxu1 %v3041_v53  ;;  %5270 = vmatmul.msk.bf16.vlgmr.msrb.gmra.mxu0 %vm964_vm14, %v2474_v31 }
 0xcc3   : > { %3082 = vmatpush.bf16.msra.mxu0 %v3038_v56 }
 0xcc5   : > { %v2717_v26 = vpop.permute.xlu1 %2716 }
 0xcc6   : > { %3096 = vmatpush.bf16.msra.mxu1 %v3023_v55 }
 0xcc7   : > { %3083 = vmatpush.bf16.msra.mxu0 %v3022_v15 }
 0xcca   : > { %3097 = vmatpush.bf16.msra.mxu1 %v3021_v11 }
 0xccb   : > { %3084 = vmatpush.bf16.msra.mxu0 %v3020_v29 }
 0xcce   : > { %3098 = vmatpush.bf16.msra.mxu1 %v3019_v2 }
 0xccf   : > { %3085 = vmatpush.bf16.msra.mxu0 %v3018_v14 }
 0xcd2   : > { %3099 = vmatpush.bf16.msra.mxu1 %v3017_v7 }
 0xcd3   : > { %3086 = vmatpush.bf16.msra.mxu0 %v3016_v42 }
 0xd3c   : > { %v3065_v63 = vpop.f32.mrf.mxu3 }
 0xd3d   : > { %v3052_v8 = vpop.f32.mrf.mxu2  ;;  %v3066_v45 = vadd.f32 %v3065_v63, %v2969_v61 }
 0xd3e   : > { %v2813_v40 = vpop.f32.mrf.mxu1  ;;  %v3053_v4 = vadd.f32 %v3052_v8, %v2969_v61 }
 0xd3f   : > { %v2814_v18 = vadd.f32 %v2813_v40, %v2717_v26  ;;  %v2800_v32 = vpop.f32.mrf.mxu0 }
 0xd40   : > { %v2801_v5 = vadd.f32 %v2800_v32, %v2717_v26 }
 0xd41   : > { %v7692_v51 = vadd.f32 %v3066_v45, %v2814_v18 }
 0xd42   : > { %v7694_v56 = vadd.f32 %v3053_v4, %v2801_v5 }
 0xd43   : > { %9743 = vst [vmem:[#allocation26_spill] sm:$0xff] %v7692_v51  ;;  %v7697_v3 = vmax.f32 %v7692_v51, 0.0  ;;  %v7716_v57 = vmul.f32 %v7692_v51, %v9724_v37  ;;  %v7734_v19 = vmul.f32 %v7692_v51, %v6302_v25  ;;  %v7747_v54 = vmul.f32 %v7692_v51, %v6345_v44 }
 0xd44   : > { %9744 = vst [vmem:[#allocation27_spill] sm:$0xff] %v7694_v56  ;;  %v7700_v48 = vmax.f32 %v7694_v56, 0.0  ;;  %v3067_v43 = vpop.f32.mrf.mxu3  ;;  %v7712_v12 = vmul.f32 %v7694_v56, %v6395_v0  ;;  %v7730_v34 = vmul.f32 %v7694_v56, %v6360_v49  ;;  %v7743_v13 = vmul.f32 %v7694_v56, %v6353_v47 }
 0xd45   : > { %v3123_v53 = vmul.f32 %v7697_v3, %v6315_v30  ;;  %v3054_v15 = vpop.f32.mrf.mxu2  ;;  %v3129_v14 = vmul.f32 %v7697_v3, %v6369_v52  ;;  %v3126_v60 = vmul.f32 %v7697_v3, %v6323_v33  ;;  %9747 = vst [vmem:[#allocation30_spill] sm:$0xff] %v7734_v19  ;;  %v7751_v59 = vmul.f32 %v7694_v56, %v6300_v24 }
 0xd46   : > { %v3130_v46 = vmul.f32 %v7700_v48, %v6307_v27  ;;  %v5721_v1 = vpack.i.bf16 %v7697_v3, %v7700_v48  ;;  %v3122_v10 = vmul.f32 %v7700_v48, %v6300_v24  ;;  %v2815_v55 = vpop.f32.mrf.mxu1  ;;  %9745 = vst [vmem:[#allocation28_spill] sm:$0xff] %v7712_v12  ;;  %v3128_v11 = vmul.f32 %v7700_v48, %v6298_v23 }
 0xd47   : > { %v2802_v29 = vpop.f32.mrf.mxu0  ;;  %v3125_v2 = vmul.f32 %v7700_v48, %v6281_v17  ;;  %9746 = vst [vmem:[#allocation29_spill] sm:$0xff] %v7730_v34  ;;  %v7755_v6 = vmul.f32 %v7692_v51, %v6315_v30  ;;  %v7759_v16 = vmul.f32 %v7694_v56, %v6298_v23  ;;  %v7763_v31 = vmul.f32 %v7692_v51, %v6369_v52 }
 0xd48   : > { %3232 = vrot.lane.b32.xlu1 %v3130_v46, %s9730_s26  ;;  %5722 = vrot.lane.b32.xlu0 %v5721_v1, %s9731_s3  ;;  %v5731_v50 = vpack.i.bf16 %v3123_v53, %v3122_v10  ;;  %v5726_v39 = vpack.i.bf16 %v3129_v14, %v3128_v11  ;;  %9748 = vst [vmem:[#allocation31_spill] sm:$0xff] %v7743_v13 }
 0xd49   : > { %v5736_v7 = vpack.i.bf16 %v3126_v60, %v3125_v2  ;;  %9749 = vst [vmem:[#allocation32_spill] sm:$0xff] %v7747_v54  ;;  %v7767_v63 = vmul.f32 %v7694_v56, %v6329_v36  ;;  %v7771_v61 = vmul.f32 %v7692_v51, %v6339_v41  ;;  %v3127_v8 = vmul.f32 %v7700_v48, %v6291_v20 }
 0xd4a   : > { %5732 = vrot.lane.b32.xlu2 %v5731_v50, %s9729_s24  ;;  %9750 = vst [vmem:[#allocation33_spill] sm:$0xff] %v7751_v59  ;;  %v7787_v32 = vmul.f32 %v7692_v51, %v6323_v33  ;;  %v7791_v4 = vmul.f32 %v7694_v56, %v6291_v20  ;;  %v3119_v5 = vmul.f32 %v7700_v48, %v6329_v36  ;;  %v9759_v50 = vld [vmem:[#allocation16_spill] sm:$0xff] }
 0xd4b   : > { %9751 = vst [vmem:[#allocation34_spill] sm:$0xff] %v7755_v6  ;;  %v3120_v43 = vmul.f32 %v7697_v3, %v6339_v41  ;;  %v3124_v46 = vmul.f32 %v7700_v48, %v6309_v28  ;;  %v3121_v10 = vmul.f32 %v7700_v48, %v6333_v38  ;;  %v3113_v55 = vmul.f32 %v7697_v3, %v6296_v22 }
 0xd4c   : > { %9752 = vst [vmem:[#allocation35_spill] sm:$0xff] %v7759_v16  ;;  %v3114_v29 = vmul.f32 %v7700_v48, %v6353_v47  ;;  %v3116_v11 = vmul.f32 %v7697_v3, %v9759_v50  ;;  %v3117_v14 = vmul.f32 %v7700_v48, %v6360_v49  ;;  %v3115_v2 = vmul.f32 %v7697_v3, %v6345_v44 }
 0xd4d   : > { %9753 = vst [vmem:[#allocation36_spill] sm:$0xff] %v7763_v31  ;;  %v5741_v1 = vpack.i.bf16 %v3120_v43, %v3119_v5  ;;  %v3118_v5 = vmul.f32 %v7697_v3, %v6302_v25 }
 0xd4e   : > { %9754 = vst [vmem:[#allocation37_spill] sm:$0xff] %v7767_v63  ;;  %v5746_v60 = vpack.i.bf16 %v3114_v29, %v3113_v55 }
 0xd4f   : > { %9755 = vst [vmem:[#allocation38_spill] sm:$0xff] %v7771_v61 }
 0xd50   : > { %5727 = vrot.lane.b32.xlu0 %v5726_v39, %s9730_s26  ;;  %5737 = vrot.lane.b32.xlu1 %v5736_v7, %s9756_s23  ;;  %9757 = vst [vmem:[#allocation39_spill] sm:$0xff] %v7787_v32  ;;  %v5751_v39 = vpack.i.bf16 %v3117_v14, %v3116_v11  ;;  %v3110_v7 = vmul.f32 %v7697_v3, %v6388_v62  ;;  %v2476_v11 = vld [vmem:[%s9510_s14 + $0x8] sm:$0xf] }
 0xd51   : > { %9758 = vst [vmem:[#allocation40_spill] sm:$0xff] %v7791_v4  ;;  %5274 = vmatmul.msk.bf16.vlgmr.msra.gmra.mxu0 %vm964_vm14, %v2476_v11  ;;  %5275 = vmatmul.msk.bf16.vlgmr.msra.gmra.mxu1 %vm964_vm14, %v2476_v11 }
 0xd52   : > { %3218 = vrot.lane.b32.xlu2 %v3127_v8, %s9756_s23  ;;  %v3111_v8 = vmul.f32 %v7700_v48, %v6395_v0 }
 0xd54   : > { %v5756_v43 = vpack.i.bf16 %v3111_v8, %v3110_v7 }
 0xd58   : > { %3204 = vrot.lane.b32.xlu0 %v3124_v46, %s9729_s24  ;;  %5742 = vrot.lane.b32.xlu1 %v5741_v1, %s9728_s27  ;;  %v3112_v46 = vmul.f32 %v7697_v3, %v9724_v37 }
 0xd5a   : > { %3190 = vrot.lane.b32.xlu2 %v3121_v10, %s9728_s27 }
 0xd60   : > { %3152 = vrot.lane.b32.xlu1 %v3115_v2, %s9725_s29  ;;  %5747 = vrot.lane.b32.xlu0 %v5746_v60, %s9725_s29 }
 0xd62   : > { %5752 = vrot.lane.b32.xlu2 %v5751_v39, %s9723_s25 }
 0xd68   : > { %3166 = vrot.lane.b32.xlu0 %v3118_v5, %s9723_s25  ;;  %5757 = vrot.lane.b32.xlu1 %v5756_v43, %s9715_s30 }
 0xd6a   : > { %3138 = vrot.lane.b32.xlu2 %v3112_v46, %s9715_s30 }
 0xda4   : > { %v7833_v1 = vpop.permute.xlu2 %5732 }
 0xda5   : > { %v5735_v53 = vunpack.i.h.bf16 %v7833_v1  ;;  %v5734_v15 = vunpack.i.l.bf16 %v7833_v1 }
 0xdac   : > { %v7837_v29 = vpop.permute.xlu2 %3218 }
 0xdb4   : > { %v3191_v45 = vpop.permute.xlu2 %3190 }
 0xdba   : > { %v3233_v10 = vpop.permute.xlu1 %3232  ;;  %v7835_v55 = vpop.permute.xlu0 %5722 }
 0xdbc   : > { %v5753_v32 = vpop.permute.xlu2 %5752 }
 0xdc2   : > { %v5728_v14 = vpop.permute.xlu0 %5727  ;;  %v7842_v2 = vpop.permute.xlu1 %5737 }
 0xdc3   : > { %v5730_v60 = vunpack.i.h.bf16 %v5728_v14  ;;  %v5729_v39 = vunpack.i.l.bf16 %v5728_v14  ;;  %v5740_v43 = vunpack.i.h.bf16 %v7842_v2  ;;  %v5739_v46 = vunpack.i.l.bf16 %v7842_v2 }
 0xdc4   : > { %v5725_v2 = vunpack.i.h.bf16 %v7835_v55 }
 0xdc5   : > { %v3251_v7 = vpack.c.bf16 %v5729_v39, %v5729_v39  ;;  %v3234_v8 = vsel %vm874_vm7, %v5729_v39, %v5730_v60  ;;  %v3220_v14 = vsel %vm859_vm9, %v5739_v46, %v5740_v43  ;;  %v3248_v40 = vpack.c.bf16 %v5739_v46, %v5734_v15 }
 0xdc6   : > { %v3252_v5 = vpack.c.bf16 %v3234_v8, %v3234_v8  ;;  %v3206_v39 = vsel %vm844_vm8, %v5734_v15, %v5735_v53 }
 0xdc7   : > { %3298 = vrot.lane.b32.xlu0 %v3251_v7, %s9716_s4  ;;  %v3249_v7 = vpack.c.bf16 %v3220_v14, %v3206_v39  ;;  %v5754_v14 = vunpack.i.l.bf16 %v5753_v32 }
 0xdc8   : > { %3300 = vrot.lane.b32.xlu1 %v3252_v5, %s9716_s4  ;;  %v5724_v5 = vunpack.i.l.bf16 %v7835_v55 }
 0xdca   : > { %v3205_v18 = vpop.permute.xlu0 %3204  ;;  %v5743_v11 = vpop.permute.xlu1 %5742  ;;  %v3179_v46 = vsel %vm647_vm11, %v5724_v5, %v5725_v2 }
 0xdcb   : > { %v5745_v8 = vunpack.i.h.bf16 %v5743_v11  ;;  %v5744_v26 = vunpack.i.l.bf16 %v5743_v11  ;;  %v5755_v11 = vunpack.i.h.bf16 %v5753_v32  ;;  %v3235_v32 = vsel %vm874_vm7, %v5730_v60, %v3233_v10 }
 0xdcc   : > { %v3207_v60 = vsel %vm844_vm8, %v5735_v53, %v3205_v18  ;;  %v3109_v53 = vmul.f32 %v7697_v3, %v6415_v9 }
 0xdcd   : > { %v3192_v42 = vsel %vm829_vm10, %v5744_v26, %v5745_v8  ;;  %v3245_v4 = vpack.c.bf16 %v5744_v26, %v5724_v5  ;;  %v3168_v16 = vsel %vm663_vm6, %v5754_v14, %v5755_v11  ;;  %v3253_v14 = vpack.c.bf16 %v3235_v32, %v3235_v32 }
 0xdcf   : > { %3292 = vrot.lane.b32.xlu0 %v3248_v40, %s9716_s4  ;;  %v3246_v40 = vpack.c.bf16 %v3192_v42, %v3179_v46 }
 0xdd0   : > { %3294 = vrot.lane.b32.xlu1 %v3249_v7, %s9716_s4 }
 0xdd2   : > { %v3153_v1 = vpop.permute.xlu1 %3152  ;;  %v5748_v58 = vpop.permute.xlu0 %5747 }
 0xdd3   : > { %v5750_v15 = vunpack.i.h.bf16 %v5748_v58  ;;  %v5749_v63 = vunpack.i.l.bf16 %v5748_v58 }
 0xdd5   : > { %v3154_v39 = vsel %vm790_vm12, %v5749_v63, %v5750_v15  ;;  %v3155_v58 = vsel %vm790_vm12, %v5750_v15, %v3153_v1  ;;  %v3221_v15 = vsel %vm859_vm9, %v5740_v43, %v7837_v29 }
 0xdd6   : > { %v3242_v5 = vpack.c.bf16 %v3168_v16, %v3154_v39  ;;  %v3250_v39 = vpack.c.bf16 %v3221_v15, %v3207_v60 }
 0xdd7   : > { %3286 = vrot.lane.b32.xlu0 %v3245_v4, %s9716_s4 }
 0xdd8   : > { %3288 = vrot.lane.b32.xlu1 %v3246_v40, %s9716_s4  ;;  %v3139_v40 = vpop.permute.xlu2 %3138 }
 0xdd9   : > { %v3241_v29 = vpack.c.bf16 %v3139_v40, %v3109_v53 }
 0xdda   : > { %v3167_v55 = vpop.permute.xlu0 %3166  ;;  %v5758_v61 = vpop.permute.xlu1 %5757 }
 0xddb   : > { %v3244_v7 = vpack.c.bf16 %v3167_v55, %v3153_v1  ;;  %v3169_v26 = vsel %vm663_vm6, %v5755_v11, %v3167_v55  ;;  %v5760_v4 = vunpack.i.h.bf16 %v5758_v61  ;;  %v5759_v42 = vunpack.i.l.bf16 %v5758_v61  ;;  %v2484_v55 = vld [vmem:[%s9511_s15 + $0x10] sm:$0xff] }
 0xddc   : > { %v3243_v46 = vpack.c.bf16 %v3169_v26, %v3155_v58  ;;  %v3107_v11 = vmul.f32 %v7697_v3, %v6424_v35  ;;  %v3108_v61 = vmul.f32 %v7700_v48, %v6448_v21  ;;  %v2485_v48 = vld [vmem:[%s9511_s15 + $0x18] sm:$0xff] }
 0xddd   : > { %3284 = vrot.lane.b32.xlu2 %v3244_v7, %s9716_s4  ;;  %v3140_v63 = vsel %vm695_vm4, %v5759_v42, %v5760_v4  ;;  %v3141_v16 = vsel %vm695_vm4, %v5760_v4, %v3139_v40  ;;  %v3193_v7 = vsel %vm829_vm10, %v5745_v8, %v3191_v45  ;;  %v3101_v42 = vpop.f32.mrf.mxu1 }
 0xdde   : > { %v3239_v1 = vpack.c.bf16 %v3140_v63, %v3107_v11  ;;  %v3240_v10 = vpack.c.bf16 %v3141_v16, %v3108_v61  ;;  %v3247_v18 = vpack.c.bf16 %v3193_v7, %v5725_v2  ;;  %v3088_v2 = vpop.f32.mrf.mxu0 }
 0xddf   : > { %3280 = vrot.lane.b32.xlu0 %v3242_v5, %s9716_s4 }
 0xde0   : > { %3282 = vrot.lane.b32.xlu1 %v3243_v46, %s9716_s4 }
 0xde5   : > { %3302 = vrot.lane.b32.xlu2 %v3253_v14, %s9716_s4  ;;  %v3103_v16 = vpop.f32.mrf.mxu1 }
 0xde6   : > { %v3090_v11 = vpop.f32.mrf.mxu0 }
 0xde7   : > { %3274 = vrot.lane.b32.xlu0 %v3239_v1, %s9716_s4 }
 0xde8   : > { %3276 = vrot.lane.b32.xlu1 %v3240_v10, %s9716_s4 }
 0xded   : > { %3296 = vrot.lane.b32.xlu2 %v3250_v39, %s9716_s4 }
 0xdef   : > { %3073 = vperm.xlu0 %5370, %v2484_v55  }
 0xdf0   : > { %3256 = vperm.xlu1 %5368, %v2485_v48  }
 0xdf5   : > { %3290 = vrot.lane.b32.xlu2 %v3247_v18, %s9716_s4 }
 0xdfd   : > { %3278 = vrot.lane.b32.xlu2 %v3241_v29, %s9716_s4 }
 0xe37   : > { %v3285_v43 = vpop.permute.xlu2 %3284 }
 0xe39   : > { %v3299_v26 = vpop.permute.xlu0 %3298 }
 0xe3a   : > { %v3301_v5 = vpop.permute.xlu1 %3300 }
 0xe3b   : > { %v3312_v58 = vsel %vm759_vm5, %v3299_v26, %v3301_v5 }
 0xe3c   : > { %v3326_v4 = vsel %vm968_vm13, %v3312_v58, 0  ;;  %v2477_v58 = vld [vmem:[%s9510_s14 + $0xc] sm:$0xf] }
 0xe3d   : > { %3334 = vmatpush.bf16.msrb.mxu2 %v3326_v4  ;;  %3370 = vmatpush.bf16.msrb.mxu0 %v3326_v4 }
 0xe3f   : > { %v3303_v45 = vpop.permute.xlu2 %3302 }
 0xe40   : > { %v3313_v8 = vsel %vm759_vm5, %v3301_v5, %v3303_v45 }
 0xe41   : > { %v3329_v46 = vsel %vm968_vm13, %v3313_v8, 0  ;;  %v3293_v3 = vpop.permute.xlu0 %3292 }
 0xe42   : > { %3347 = vmatpush.bf16.msrb.mxu3 %v3329_v46  ;;  %3383 = vmatpush.bf16.msrb.mxu1 %v3329_v46  ;;  %v3295_v32 = vpop.permute.xlu1 %3294 }
 0xe43   : > { %v3310_v63 = vsel %vm759_vm5, %v3293_v3, %v3295_v32 }
 0xe44   : > { %3335 = vmatpush.bf16.msrb.mxu2 %v3310_v63  ;;  %3371 = vmatpush.bf16.msrb.mxu0 %v3310_v63 }
 0xe47   : > { %v3297_v40 = vpop.permute.xlu2 %3296 }
 0xe48   : > { %v3311_v14 = vsel %vm759_vm5, %v3295_v32, %v3297_v40 }
 0xe49   : > { %v3287_v1 = vpop.permute.xlu0 %3286  ;;  %3348 = vmatpush.bf16.msrb.mxu3 %v3311_v14  ;;  %3384 = vmatpush.bf16.msrb.mxu1 %v3311_v14 }
 0xe4a   : > { %v3289_v61 = vpop.permute.xlu1 %3288 }
 0xe4b   : > { %v3308_v10 = vsel %vm759_vm5, %v3287_v1, %v3289_v61 }
 0xe4c   : > { %3336 = vmatpush.bf16.msrb.mxu2 %v3308_v10  ;;  %3372 = vmatpush.bf16.msrb.mxu0 %v3308_v10 }
 0xe4f   : > { %v3291_v60 = vpop.permute.xlu2 %3290 }
 0xe50   : > { %v3309_v15 = vsel %vm759_vm5, %v3289_v61, %v3291_v60 }
 0xe51   : > { %v3281_v39 = vpop.permute.xlu0 %3280  ;;  %3349 = vmatpush.bf16.msrb.mxu3 %v3309_v15  ;;  %3385 = vmatpush.bf16.msrb.mxu1 %v3309_v15 }
 0xe52   : > { %v3283_v55 = vpop.permute.xlu1 %3282 }
 0xe53   : > { %v3306_v48 = vsel %vm759_vm5, %v3281_v39, %v3283_v55  ;;  %v3307_v7 = vsel %vm759_vm5, %v3283_v55, %v3285_v43 }
 0xe54   : > { %3337 = vmatpush.bf16.msrb.mxu2 %v3306_v48  ;;  %3373 = vmatpush.bf16.msrb.mxu0 %v3306_v48 }
 0xe55   : > { %3350 = vmatpush.bf16.msrb.mxu3 %v3307_v7  ;;  %3386 = vmatpush.bf16.msrb.mxu1 %v3307_v7 }
 0xe57   : > { %v3279_v53 = vpop.permute.xlu2 %3278 }
 0xe59   : > { %v3275_v18 = vpop.permute.xlu0 %3274 }
 0xe5a   : > { %v3277_v29 = vpop.permute.xlu1 %3276 }
 0xe5b   : > { %v3304_v26 = vsel %vm759_vm5, %v3275_v18, %v3277_v29  ;;  %v3305_v5 = vsel %vm759_vm5, %v3277_v29, %v3279_v53 }
 0xe5c   : > { %3338 = vmatpush.bf16.msrb.mxu2 %v3304_v26  ;;  %3351 = vmatpush.bf16.msrb.mxu3 %v3305_v5 }
 0xe5d   : > { %3374 = vmatpush.bf16.msrb.mxu0 %v3304_v26  ;;  %3387 = vmatpush.bf16.msrb.mxu1 %v3305_v5 }
 0xe5f   : > { %5276 = vmatmul.msk.bf16.vlgmr.msrb.gmra.mxu2 %vm964_vm14, %v2477_v58  ;;  %5277 = vmatmul.msk.bf16.vlgmr.msrb.gmra.mxu3 %vm964_vm14, %v2477_v58 }
 0xe61   : > { %v3074_v43 = vpop.permute.xlu0 %3073 }
 0xe62   : > { %v3257_v4 = vpop.permute.xlu1 %3256  ;;  %v3089_v46 = vadd.f32 %v3088_v2, %v3074_v43  ;;  %v3102_v3 = vadd.f32 %v3101_v42, %v3074_v43 }
 0xee2   : > { %v3340_v45 = vpop.f32.mrf.mxu2  ;;  %v3353_v8 = vpop.f32.mrf.mxu3 }
 0xee3   : > { %v3341_v32 = vadd.f32 %v3340_v45, %v3257_v4  ;;  %v3354_v63 = vadd.f32 %v3353_v8, %v3257_v4 }
 0xee5   : > { %v7912_v40 = vadd.f32 %v3341_v32, %v3089_v46  ;;  %v7914_v14 = vadd.f32 %v3354_v63, %v3102_v3 }
 0xee7   : > { %9760 = vst [vmem:[#allocation41_spill] sm:$0xff] %v7912_v40  ;;  %v7917_v11 = vmax.f32 %v7912_v40, 0.0  ;;  %v7920_v16 = vmax.f32 %v7914_v14, 0.0  ;;  %v7942_v18 = vmul.f32 %v7914_v14, %v6388_v62  ;;  %v7946_v53 = vmul.f32 %v7912_v40, %v6395_v0 }
 0xee8   : > { %9761 = vst [vmem:[#allocation42_spill] sm:$0xff] %v7914_v14  ;;  %v7959_v45 = vmul.f32 %v7914_v14, %v6296_v22  ;;  %v7963_v8 = vmul.f32 %v7912_v40, %v6353_v47  ;;  %v8070_v31 = vmul.f32 %v7914_v14, %v6424_v35 }
 0xee9   : > { %v5761_v1 = vpack.i.bf16 %v7920_v16, %v7917_v11  ;;  %v3418_v61 = vmul.f32 %v7917_v11, %v6307_v27  ;;  %v3410_v2 = vmul.f32 %v7917_v11, %v6300_v24  ;;  %v3411_v42 = vmul.f32 %v7920_v16, %v6315_v30 }
 0xeea   : > { %v3342_v10 = vpop.f32.mrf.mxu2  ;;  %v3416_v60 = vmul.f32 %v7917_v11, %v6298_v23  ;;  %v3417_v15 = vmul.f32 %v7920_v16, %v6369_v52  ;;  %v3413_v39 = vmul.f32 %v7917_v11, %v6281_v17  ;;  %v3414_v55 = vmul.f32 %v7920_v16, %v6323_v33  ;;  %v3355_v48 = vpop.f32.mrf.mxu3  ;;  %9780 = vst [vmem:[#allocation61_spill] sm:$0xff] %v8070_v31 }
 0xeeb   : > { %5762 = vrot.lane.b32.xlu2 %v5761_v1, %s9731_s3  ;;  %3520 = vrot.lane.b32.xlu0 %v3418_v61, %s9730_s26  ;;  %v5771_v7 = vpack.i.bf16 %v3411_v42, %v3410_v2  ;;  %v3407_v5 = vmul.f32 %v7917_v11, %v6329_v36  ;;  %v3408_v58 = vmul.f32 %v7920_v16, %v6339_v41 }
 0xeec   : > { %v5766_v29 = vpack.i.bf16 %v3417_v15, %v3416_v60  ;;  %v5776_v26 = vpack.i.bf16 %v3414_v55, %v3413_v39  ;;  %v3401_v43 = vmul.f32 %v7920_v16, %v6296_v22  ;;  %v3402_v4 = vmul.f32 %v7917_v11, %v6353_v47 }
 0xeed   : > { %5772 = vrot.lane.b32.xlu1 %v5771_v7, %s9729_s24  ;;  %v5781_v46 = vpack.i.bf16 %v3408_v58, %v3407_v5  ;;  %v3404_v3 = vmul.f32 %v7920_v16, %v9759_v50  ;;  %v3405_v32 = vmul.f32 %v7917_v11, %v6360_v49  ;;  %v3398_v1 = vmul.f32 %v7920_v16, %v6388_v62 }
 0xeee   : > { %v5786_v63 = vpack.i.bf16 %v3402_v4, %v3401_v43  ;;  %v3399_v61 = vmul.f32 %v7917_v11, %v6395_v0  ;;  %v7975_v2 = vmul.f32 %v7694_v56, %v6333_v38  ;;  %v7979_v10 = vmul.f32 %v7694_v56, %v6307_v27 }
 0xeef   : > { %v5791_v42 = vpack.i.bf16 %v3405_v32, %v3404_v3  ;;  %v7983_v60 = vmul.f32 %v7694_v56, %v6309_v28  ;;  %v7987_v15 = vmul.f32 %v7692_v51, %v6424_v35  ;;  %v7995_v7 = vmul.f32 %v7914_v14, %v9759_v50 }
 0xef0   : > { %9762 = vst [vmem:[#allocation43_spill] sm:$0xff] %v7975_v2  ;;  %v5796_v39 = vpack.i.bf16 %v3399_v61, %v3398_v1  ;;  %v7999_v5 = vmul.f32 %v7912_v40, %v6360_v49  ;;  %v8003_v58 = vmul.f32 %v7912_v40, %v6281_v17  ;;  %v8007_v43 = vmul.f32 %v7914_v14, %v6323_v33 }
 0xef1   : > { %9763 = vst [vmem:[#allocation44_spill] sm:$0xff] %v7979_v10  ;;  %v8011_v4 = vmul.f32 %v7694_v56, %v6448_v21  ;;  %v3415_v3 = vmul.f32 %v7917_v11, %v6291_v20  ;;  %v8019_v32 = vmul.f32 %v7914_v14, %v6315_v30  ;;  %v8023_v1 = vmul.f32 %v7912_v40, %v6309_v28 }
 0xef2   : > { %9764 = vst [vmem:[#allocation45_spill] sm:$0xff] %v7983_v60  ;;  %v8044_v61 = vmul.f32 %v7912_v40, %v6300_v24  ;;  %v8048_v48 = vmul.f32 %v7912_v40, %v6298_v23  ;;  %v8056_v55 = vmul.f32 %v7914_v14, %v6369_v52  ;;  %v8060_v56 = vmul.f32 %v7914_v14, %v6339_v41 }
 0xef3   : > { %9765 = vst [vmem:[#allocation46_spill] sm:$0xff] %v7987_v15  ;;  %5767 = vrot.lane.b32.xlu2 %v5766_v29, %s9730_s26  ;;  %5777 = vrot.lane.b32.xlu0 %v5776_v26, %s9756_s23  ;;  %v8031_v29 = vmul.f32 %v7912_v40, %v6329_v36  ;;  %v8035_v26 = vmul.f32 %v7912_v40, %v6307_v27 }
 0xef4   : > { %9766 = vst [vmem:[#allocation47_spill] sm:$0xff] %v7995_v7  ;;  %v3412_v60 = vmul.f32 %v7917_v11, %v6309_v28 }
 0xef5   : > { %9767 = vst [vmem:[#allocation48_spill] sm:$0xff] %v7999_v5  ;;  %3506 = vrot.lane.b32.xlu1 %v3415_v3, %s9756_s23  ;;  %v8074_v3 = vmul.f32 %v7912_v40, %v6448_v21 }
 0xef6   : > { %9768 = vst [vmem:[#allocation49_spill] sm:$0xff] %v8003_v58 }
 0xef7   : > { %9769 = vst [vmem:[#allocation50_spill] sm:$0xff] %v8007_v43 }
 0xef8   : > { %9770 = vst [vmem:[#allocation51_spill] sm:$0xff] %v8011_v4 }
 0xef9   : > { %9771 = vst [vmem:[#allocation52_spill] sm:$0xff] %v8019_v32  ;;  %v8084_v32 = vmul.f32 %v7914_v14, %v6415_v9 }
 0xefa   : > { %9772 = vst [vmem:[#allocation53_spill] sm:$0xff] %v8023_v1  ;;  %v8066_v1 = vmul.f32 %v7912_v40, %v6333_v38 }
 0xefb   : > { %9773 = vst [vmem:[#allocation54_spill] sm:$0xff] %v8031_v29  ;;  %3492 = vrot.lane.b32.xlu2 %v3412_v60, %s9729_s24  ;;  %5782 = vrot.lane.b32.xlu0 %v5781_v46, %s9728_s27  ;;  %v3400_v46 = vmul.f32 %v7920_v16, %v9724_v37 }
 0xefc   : > { %9774 = vst [vmem:[#allocation55_spill] sm:$0xff] %v8035_v26  ;;  %v8080_v26 = vmul.f32 %v7692_v51, %v6415_v9 }
 0xefd   : > { %9775 = vst [vmem:[#allocation56_spill] sm:$0xff] %v8044_v61  ;;  %v3403_v61 = vmul.f32 %v7920_v16, %v6345_v44 }
 0xefe   : > { %9776 = vst [vmem:[#allocation57_spill] sm:$0xff] %v8048_v48  ;;  %v3406_v48 = vmul.f32 %v7920_v16, %v6302_v25 }
 0xeff   : > { %9777 = vst [vmem:[#allocation58_spill] sm:$0xff] %v8056_v55  ;;  %v3409_v55 = vmul.f32 %v7917_v11, %v6333_v38 }
 0xf00   : > { %9778 = vst [vmem:[#allocation59_spill] sm:$0xff] %v8060_v56 }
 0xf01   : > { %9779 = vst [vmem:[#allocation60_spill] sm:$0xff] %v8066_v1  ;;  %3478 = vrot.lane.b32.xlu1 %v3409_v55, %s9728_s27 }
 0xf02   : > { %9781 = vst [vmem:[#allocation62_spill] sm:$0xff] %v8074_v3 }
 0xf03   : > { %9782 = vst [vmem:[#allocation63_spill] sm:$0xff] %v8080_v26  ;;  %3440 = vrot.lane.b32.xlu0 %v3403_v61, %s9725_s29  ;;  %5787 = vrot.lane.b32.xlu2 %v5786_v63, %s9725_s29  ;;  %v2478_v63 = vld [vmem:[%s9510_s14 + $0x10] sm:$0xf] }
 0xf04   : > { %9783 = vst [vmem:[#allocation64_spill] sm:$0xff] %v8084_v32  ;;  %5278 = vmatmul.msk.bf16.vlgmr.msrb.gmra.mxu0 %vm964_vm14, %v2478_v63  ;;  %5279 = vmatmul.msk.bf16.vlgmr.msrb.gmra.mxu1 %vm964_vm14, %v2478_v63 }
 0xf09   : > { %5792 = vrot.lane.b32.xlu1 %v5791_v42, %s9723_s25 }
 0xf0b   : > { %3454 = vrot.lane.b32.xlu2 %v3406_v48, %s9723_s25  ;;  %5797 = vrot.lane.b32.xlu0 %v5796_v39, %s9715_s30 }
 0xf11   : > { %3426 = vrot.lane.b32.xlu1 %v3400_v46, %s9715_s30 }
 0xf45   : > { %v8113_v60 = vpop.permute.xlu2 %5762 }
 0xf4d   : > { %v5768_v42 = vpop.permute.xlu2 %5767 }
 0xf4e   : > { %v5770_v55 = vunpack.i.h.bf16 %v5768_v42  ;;  %v5769_v48 = vunpack.i.l.bf16 %v5768_v42 }
 0xf50   : > { %v3539_v61 = vpack.c.bf16 %v5769_v48, %v5769_v48  ;;  %v3522_v39 = vsel %vm874_vm7, %v5769_v48, %v5770_v55 }
 0xf51   : > { %v3540_v10 = vpack.c.bf16 %v3522_v39, %v3522_v39  ;;  %v5764_v39 = vunpack.i.l.bf16 %v8113_v60 }
 0xf52   : > { %3586 = vrot.lane.b32.xlu2 %v3539_v61, %s9716_s4 }
 0xf53   : > { %3588 = vrot.lane.b32.xlu0 %v3540_v10, %s9716_s4  ;;  %v5765_v10 = vunpack.i.h.bf16 %v8113_v60 }
 0xf55   : > { %v3493_v26 = vpop.permute.xlu2 %3492  ;;  %v3467_v6 = vsel %vm647_vm11, %v5764_v39, %v5765_v10 }
 0xf5d   : > { %v3521_v46 = vpop.permute.xlu0 %3520  ;;  %v5788_v61 = vpop.permute.xlu2 %5787 }
 0xf5f   : > { %v5773_v2 = vpop.permute.xlu1 %5772 }
 0xf60   : > { %v5775_v32 = vunpack.i.h.bf16 %v5773_v2  ;;  %v5774_v4 = vunpack.i.l.bf16 %v5773_v2 }
 0xf62   : > { %v3494_v56 = vsel %vm844_vm8, %v5774_v4, %v5775_v32 }
 0xf65   : > { %v5778_v3 = vpop.permute.xlu0 %5777 }
 0xf66   : > { %v5780_v15 = vunpack.i.h.bf16 %v5778_v3  ;;  %v5779_v31 = vunpack.i.l.bf16 %v5778_v3 }
 0xf67   : > { %v3507_v63 = vpop.permute.xlu1 %3506 }
 0xf68   : > { %v3508_v42 = vsel %vm859_vm9, %v5779_v31, %v5780_v15  ;;  %v3536_v1 = vpack.c.bf16 %v5779_v31, %v5774_v4 }
 0xf69   : > { %v3537_v48 = vpack.c.bf16 %v3508_v42, %v3494_v56  ;;  %v3455_v56 = vpop.permute.xlu2 %3454  ;;  %v5789_v42 = vunpack.i.l.bf16 %v5788_v61 }
 0xf6a   : > { %3580 = vrot.lane.b32.xlu2 %v3536_v1, %s9716_s4  ;;  %v5790_v1 = vunpack.i.h.bf16 %v5788_v61 }
 0xf6b   : > { %3582 = vrot.lane.b32.xlu0 %v3537_v48, %s9716_s4 }
 0xf6d   : > { %v5783_v2 = vpop.permute.xlu0 %5782 }
 0xf6e   : > { %v5785_v29 = vunpack.i.h.bf16 %v5783_v2  ;;  %v5784_v59 = vunpack.i.l.bf16 %v5783_v2  ;;  %v3442_v2 = vsel %vm790_vm12, %v5789_v42, %v5790_v1 }
 0xf70   : > { %v3480_v58 = vsel %vm829_vm10, %v5784_v59, %v5785_v29  ;;  %v3533_v43 = vpack.c.bf16 %v5784_v59, %v5764_v39 }
 0xf71   : > { %v3534_v31 = vpack.c.bf16 %v3480_v58, %v3467_v6  ;;  %v3523_v58 = vsel %vm874_vm7, %v5770_v55, %v3521_v46 }
 0xf72   : > { %3574 = vrot.lane.b32.xlu2 %v3533_v43, %s9716_s4 }
 0xf73   : > { %v3479_v3 = vpop.permute.xlu1 %3478  ;;  %3576 = vrot.lane.b32.xlu0 %v3534_v31, %s9716_s4  ;;  %v3541_v31 = vpack.c.bf16 %v3523_v58, %v3523_v58 }
 0xf75   : > { %v3441_v4 = vpop.permute.xlu0 %3440 }
 0xf76   : > { %v3532_v48 = vpack.c.bf16 %v3455_v56, %v3441_v4  ;;  %v3443_v34 = vsel %vm790_vm12, %v5790_v1, %v3441_v4 }
 0xf78   : > { %3572 = vrot.lane.b32.xlu1 %v3532_v48, %s9716_s4 }
 0xf7b   : > { %v5793_v60 = vpop.permute.xlu1 %5792 }
 0xf7c   : > { %v5795_v13 = vunpack.i.h.bf16 %v5793_v60  ;;  %v5794_v54 = vunpack.i.l.bf16 %v5793_v60 }
 0xf7d   : > { %v5798_v61 = vpop.permute.xlu0 %5797 }
 0xf7e   : > { %v3456_v59 = vsel %vm663_vm6, %v5794_v54, %v5795_v13  ;;  %v3457_v6 = vsel %vm663_vm6, %v5795_v13, %v3455_v56  ;;  %v5800_v60 = vunpack.i.h.bf16 %v5798_v61  ;;  %v5799_v48 = vunpack.i.l.bf16 %v5798_v61 }
 0xf7f   : > { %v3530_v43 = vpack.c.bf16 %v3456_v59, %v3442_v2  ;;  %v3531_v39 = vpack.c.bf16 %v3457_v6, %v3443_v34  ;;  %v3396_v13 = vmul.f32 %v7917_v11, %v6448_v21  ;;  %v3395_v34 = vmul.f32 %v7920_v16, %v6424_v35  ;;  %v2486_v11 = vld [vmem:[%s9511_s15 + $0x20] sm:$0xff]  ;;  %v2487_v2 = vld [vmem:[%s9511_s15 + $0x28] sm:$0xff] }
 0xf80   : > { %v3428_v42 = vsel %vm695_vm4, %v5799_v48, %v5800_v60  ;;  %3590 = vrot.lane.b32.xlu1 %v3541_v31, %s9716_s4  ;;  %v3509_v54 = vsel %vm859_vm9, %v5780_v15, %v3507_v63  ;;  %v3495_v56 = vsel %vm844_vm8, %v5775_v32, %v3493_v26  ;;  %v3481_v15 = vsel %vm829_vm10, %v5785_v29, %v3479_v3 }
 0xf81   : > { %3568 = vrot.lane.b32.xlu2 %v3530_v43, %s9716_s4  ;;  %3570 = vrot.lane.b32.xlu0 %v3531_v39, %s9716_s4  ;;  %v3527_v46 = vpack.c.bf16 %v3428_v42, %v3395_v34  ;;  %v3538_v1 = vpack.c.bf16 %v3509_v54, %v3495_v56  ;;  %v3535_v32 = vpack.c.bf16 %v3481_v15, %v5765_v10  ;;  %v3376_v39 = vpop.f32.mrf.mxu0  ;;  %v3389_v61 = vpop.f32.mrf.mxu1 }
 0xf82   : > { %v3397_v26 = vmul.f32 %v7920_v16, %v6415_v9 }
 0xf83   : > { %v3427_v19 = vpop.permute.xlu1 %3426 }
 0xf84   : > { %v3429_v4 = vsel %vm695_vm4, %v5800_v60, %v3427_v19  ;;  %v3529_v63 = vpack.c.bf16 %v3427_v19, %v3397_v26 }
 0xf85   : > { %v3528_v55 = vpack.c.bf16 %v3429_v4, %v3396_v13 }
 0xf88   : > { %3584 = vrot.lane.b32.xlu1 %v3538_v1, %s9716_s4 }
 0xf89   : > { %3562 = vrot.lane.b32.xlu2 %v3527_v46, %s9716_s4  ;;  %3564 = vrot.lane.b32.xlu0 %v3528_v55, %s9716_s4  ;;  %v3378_v29 = vpop.f32.mrf.mxu0  ;;  %v3391_v10 = vpop.f32.mrf.mxu1 }
 0xf90   : > { %3578 = vrot.lane.b32.xlu1 %v3535_v32, %s9716_s4 }
 0xf91   : > { %3361 = vperm.xlu2 %5369, %v2486_v11   ;;  %3544 = vperm.xlu0 %5370, %v2487_v2   ;;  %v2479_v2 = vld [vmem:[%s9510_s14 + $0x14] sm:$0xf] }
 0xf98   : > { %3566 = vrot.lane.b32.xlu1 %v3529_v63, %s9716_s4 }
 0xfac   : > { %v3587_v59 = vpop.permute.xlu2 %3586 }
 0xfc4   : > { %v3581_v3 = vpop.permute.xlu2 %3580 }
 0xfc5   : > { %v3589_v6 = vpop.permute.xlu0 %3588 }
 0xfc6   : > { %v3600_v58 = vsel %vm759_vm5, %v3587_v59, %v3589_v6 }
 0xfc7   : > { %v3614_v43 = vsel %vm968_vm13, %v3600_v58, 0 }
 0xfc8   : > { %3622 = vmatpush.bf16.msra.mxu2 %v3614_v43  ;;  %3658 = vmatpush.bf16.msra.mxu0 %v3614_v43 }
 0xfcc   : > { %v3575_v19 = vpop.permute.xlu2 %3574 }
 0xfdb   : > { %v3569_v4 = vpop.permute.xlu2 %3568 }
 0xfdd   : > { %v3583_v31 = vpop.permute.xlu0 %3582 }
 0xfde   : > { %v3598_v60 = vsel %vm759_vm5, %v3581_v3, %v3583_v31 }
 0xfdf   : > { %3623 = vmatpush.bf16.msra.mxu2 %v3598_v60  ;;  %3659 = vmatpush.bf16.msra.mxu0 %v3598_v60 }
 0xfe3   : > { %v3563_v56 = vpop.permute.xlu2 %3562 }
 0xfe5   : > { %v3577_v16 = vpop.permute.xlu0 %3576 }
 0xfe6   : > { %v3596_v48 = vsel %vm759_vm5, %v3575_v19, %v3577_v16 }
 0xfe7   : > { %3624 = vmatpush.bf16.msra.mxu2 %v3596_v48  ;;  %3660 = vmatpush.bf16.msra.mxu0 %v3596_v48 }
 0xfea   : > { %v3573_v42 = vpop.permute.xlu1 %3572 }
 0xfeb   : > { %v3362_v43 = vpop.permute.xlu2 %3361 }
 0xfec   : > { %v3377_v3 = vadd.f32 %v3376_v39, %v3362_v43  ;;  %v8195_v39 = vmul.f32 %v7692_v51, %v6388_v62 }
 0xff2   : > { %v3591_v54 = vpop.permute.xlu1 %3590 }
 0xff3   : > { %v3571_v13 = vpop.permute.xlu0 %3570  ;;  %v3601_v55 = vsel %vm759_vm5, %v3589_v6, %v3591_v54 }
 0xff4   : > { %v3594_v34 = vsel %vm759_vm5, %v3569_v4, %v3571_v13  ;;  %v3617_v46 = vsel %vm968_vm13, %v3601_v55, 0  ;;  %v3595_v59 = vsel %vm759_vm5, %v3571_v13, %v3573_v42  ;;  %v3390_v4 = vadd.f32 %v3389_v61, %v3362_v43 }
 0xff5   : > { %3625 = vmatpush.bf16.msra.mxu2 %v3594_v34  ;;  %3661 = vmatpush.bf16.msra.mxu0 %v3594_v34  ;;  %v8191_v34 = vmul.f32 %v7692_v51, %v6296_v22  ;;  %v8203_v55 = vmul.f32 %v7914_v14, %v9724_v37  ;;  %v8207_v61 = vmul.f32 %v7914_v14, %v6345_v44 }
 0xff6   : > { %3635 = vmatpush.bf16.msra.mxu3 %v3617_v46  ;;  %3671 = vmatpush.bf16.msra.mxu1 %v3617_v46 }
 0xffa   : > { %v3585_v15 = vpop.permute.xlu1 %3584 }
 0xffb   : > { %v3565_v1 = vpop.permute.xlu0 %3564  ;;  %v3599_v32 = vsel %vm759_vm5, %v3583_v31, %v3585_v15 }
 0xffc   : > { %v3592_v11 = vsel %vm759_vm5, %v3563_v56, %v3565_v1  ;;  %3636 = vmatpush.bf16.msra.mxu3 %v3599_v32  ;;  %3672 = vmatpush.bf16.msra.mxu1 %v3599_v32 }
 0xffd   : > { %3626 = vmatpush.bf16.msra.mxu2 %v3592_v11  ;;  %3662 = vmatpush.bf16.msra.mxu0 %v3592_v11 }
0x1000   : > { %5280 = vmatmul.msk.bf16.vlgmr.msra.gmra.mxu2 %vm964_vm14, %v2479_v2 }
0x1002   : > { %v3579_v26 = vpop.permute.xlu1 %3578 }
0x1003   : > { %v3597_v63 = vsel %vm759_vm5, %v3577_v16, %v3579_v26  ;;  %v3545_v29 = vpop.permute.xlu0 %3544 }
0x1004   : > { %3637 = vmatpush.bf16.msra.mxu3 %v3597_v63  ;;  %3673 = vmatpush.bf16.msra.mxu1 %v3597_v63 }
0x1008   : > { %3638 = vmatpush.bf16.msra.mxu3 %v3595_v59  ;;  %3674 = vmatpush.bf16.msra.mxu1 %v3595_v59 }
0x100a   : > { %v3567_v6 = vpop.permute.xlu1 %3566 }
0x100b   : > { %v3593_v58 = vsel %vm759_vm5, %v3565_v1, %v3567_v6 }
0x100c   : > { %3639 = vmatpush.bf16.msra.mxu3 %v3593_v58  ;;  %3675 = vmatpush.bf16.msra.mxu1 %v3593_v58 }
0x100f   : > { %5281 = vmatmul.msk.bf16.vlgmr.msra.gmra.mxu3 %vm964_vm14, %v2479_v2 }
0x1083   : > { %v3628_v10 = vpop.f32.mrf.mxu2 }
0x1084   : > { %v3629_v31 = vadd.f32 %v3628_v10, %v3545_v29 }
0x1086   : > { %v8181_v60 = vadd.f32 %v3629_v31, %v3377_v3 }
0x1088   : > { %v8184_v19 = vmax.f32 %v8181_v60, 0.0  ;;  %v8199_v54 = vmul.f32 %v8181_v60, %v6281_v17  ;;  %v8211_v46 = vmul.f32 %v8181_v60, %v6360_v49  ;;  %v8221_v2 = vmul.f32 %v8181_v60, %v6395_v0 }
0x108a   : > { %v3706_v16 = vmul.f32 %v8184_v19, %v6307_v27  ;;  %v3701_v1 = vmul.f32 %v8184_v19, %v6281_v17  ;;  %v3698_v11 = vmul.f32 %v8184_v19, %v6300_v24  ;;  %v3704_v15 = vmul.f32 %v8184_v19, %v6298_v23 }
0x108b   : > { %v3630_v48 = vpop.f32.mrf.mxu2  ;;  %v3695_v32 = vmul.f32 %v8184_v19, %v6329_v36  ;;  %v3690_v26 = vmul.f32 %v8184_v19, %v6353_v47  ;;  %v3693_v63 = vmul.f32 %v8184_v19, %v6360_v49  ;;  %v3687_v6 = vmul.f32 %v8184_v19, %v6395_v0 }
0x108c   : > { %3808 = vrot.lane.b32.xlu2 %v3706_v16, %s9730_s26 }
0x1092   : > { %v3641_v42 = vpop.f32.mrf.mxu3 }
0x1093   : > { %v3642_v13 = vadd.f32 %v3641_v42, %v3545_v29 }
0x1095   : > { %v8213_v56 = vadd.f32 %v3642_v13, %v3390_v4 }
0x1097   : > { %v8232_v59 = vmax.f32 %v8213_v56, 0.0  ;;  %v8238_v58 = vmul.f32 %v8213_v56, %v6388_v62  ;;  %v8242_v43 = vmul.f32 %v8213_v56, %v6296_v22  ;;  %v8246_v29 = vmul.f32 %v8213_v56, %v6302_v25 }
0x1098   : > { %v8250_v10 = vmul.f32 %v8213_v56, %v9724_v37  ;;  %v8254_v3 = vmul.f32 %v8213_v56, %v6345_v44  ;;  %v8258_v31 = vmul.f32 %v8213_v56, %v6339_v41 }
0x1099   : > { %v5801_v16 = vpack.i.bf16 %v8232_v59, %v8184_v19  ;;  %v3702_v48 = vmul.f32 %v8232_v59, %v6323_v33  ;;  %v3699_v42 = vmul.f32 %v8232_v59, %v6315_v30  ;;  %v3705_v4 = vmul.f32 %v8232_v59, %v6369_v52 }
0x109a   : > { %v3643_v13 = vpop.f32.mrf.mxu3  ;;  %v3696_v49 = vmul.f32 %v8232_v59, %v6339_v41  ;;  %v3691_v0 = vmul.f32 %v8232_v59, %v6345_v44  ;;  %v3689_v27 = vmul.f32 %v8232_v59, %v6296_v22  ;;  %v3692_v17 = vmul.f32 %v8232_v59, %v9759_v50 }
0x109b   : > { %5802 = vrot.lane.b32.xlu1 %v5801_v16, %s9731_s3  ;;  %v5816_v51 = vpack.i.bf16 %v3702_v48, %v3701_v1  ;;  %v5811_v14 = vpack.i.bf16 %v3699_v42, %v3698_v11  ;;  %v5806_v40 = vpack.i.bf16 %v3705_v4, %v3704_v15  ;;  %v3686_v13 = vmul.f32 %v8232_v59, %v6388_v62 }
0x109c   : > { %v5826_v7 = vpack.i.bf16 %v3696_v49, %v3695_v32  ;;  %v5836_v41 = vpack.i.bf16 %v8191_v34, %v3691_v0  ;;  %v5831_v5 = vpack.i.bf16 %v3690_v26, %v3689_v27  ;;  %v5841_v12 = vpack.i.bf16 %v3693_v63, %v3692_v17 }
0x109d   : > { %5817 = vrot.lane.b32.xlu2 %v5816_v51, %s9756_s23  ;;  %5812 = vrot.lane.b32.xlu0 %v5811_v14, %s9729_s24  ;;  %v5851_v44 = vpack.i.bf16 %v3687_v6, %v3686_v13  ;;  %v3688_v22 = vmul.f32 %v8232_v59, %v9724_v37  ;;  %v8286_v1 = vmul.f32 %v8181_v60, %v6353_v47 }
0x109e   : > { %v8294_v17 = vmul.f32 %v8181_v60, %v6329_v36  ;;  %v8298_v27 = vmul.f32 %v8181_v60, %v6291_v20  ;;  %v3703_v0 = vmul.f32 %v8184_v19, %v6291_v20  ;;  %v8313_v26 = vmul.f32 %v8213_v56, %v6323_v33  ;;  %v2488_v33 = vld [vmem:[%s9511_s15 + $0x30] sm:$0xff] }
0x109f   : > { %v5856_v51 = vpack.i.bf16 %v8195_v39, %v3688_v22  ;;  %v8319_v22 = vmul.f32 %v8181_v60, %v6300_v24  ;;  %v8323_v39 = vmul.f32 %v8213_v56, %v6315_v30  ;;  %v8327_v6 = vmul.f32 %v8181_v60, %v6298_v23 }
0x10a0   : > { %v8331_v16 = vmul.f32 %v8213_v56, %v6369_v52  ;;  %v5821_v42 = vpack.i.bf16 %v8199_v54, %v3703_v0  ;;  %v3700_v63 = vmul.f32 %v8184_v19, %v6309_v28  ;;  %v3988_v54 = vmul.f32 %v8213_v56, %v9759_v50 }
0x10a3   : > { %5807 = vrot.lane.b32.xlu1 %v5806_v40, %s9730_s26  ;;  %v3697_v40 = vmul.f32 %v8184_v19, %v6333_v38 }
0x10a5   : > { %5822 = vrot.lane.b32.xlu0 %v5821_v42, %s9756_s23  ;;  %5827 = vrot.lane.b32.xlu2 %v5826_v7, %s9728_s27  ;;  %v3694_v7 = vmul.f32 %v8232_v59, %v6302_v25 }
0x10a7   : > { %v5846_v0 = vpack.i.bf16 %v3988_v54, %v3694_v7 }
0x10ab   : > { %3780 = vrot.lane.b32.xlu1 %v3700_v63, %s9729_s24 }
0x10ad   : > { %3766 = vrot.lane.b32.xlu0 %v3697_v40, %s9728_s27  ;;  %5837 = vrot.lane.b32.xlu2 %v5836_v41, %s9725_s29  ;;  %v2480_v41 = vld [vmem:[%s9510_s14 + $0x18] sm:$0xf] }
0x10ae   : > { %5282 = vmatmul.msk.bf16.vlgmr.msra.gmra.mxu0 %vm964_vm14, %v2480_v41  ;;  %5283 = vmatmul.msk.bf16.vlgmr.msra.gmra.mxu1 %vm964_vm14, %v2480_v41 }
0x10b3   : > { %5832 = vrot.lane.b32.xlu1 %v5831_v5, %s9725_s29 }
0x10b5   : > { %5842 = vrot.lane.b32.xlu0 %v5841_v12, %s9723_s25  ;;  %5852 = vrot.lane.b32.xlu2 %v5851_v44, %s9715_s30 }
0x10bb   : > { %5847 = vrot.lane.b32.xlu1 %v5846_v0, %s9723_s25 }
0x10bd   : > { %5857 = vrot.lane.b32.xlu0 %v5856_v51, %s9715_s30 }
0x10e6   : > { %v3809_v44 = vpop.permute.xlu2 %3808 }
0x10f7   : > { %v8368_v63 = vpop.permute.xlu2 %5817 }
0x10f8   : > { %v5820_v48 = vunpack.i.h.bf16 %v8368_v63  ;;  %v5819_v32 = vunpack.i.l.bf16 %v8368_v63 }
0x10ff   : > { %v8379_v15 = vpop.permute.xlu2 %5827 }
0x1100   : > { %v5829_v63 = vunpack.i.l.bf16 %v8379_v15 }
0x1107   : > { %v8390_v52 = vpop.permute.xlu2 %5837 }
0x1108   : > { %9785 = vst [vmem:[#allocation66_spill] sm:$0xff] %v8390_v52 }
0x110d   : > { %v8364_v12 = vpop.permute.xlu1 %5802 }
0x110f   : > { %v8366_v5 = vpop.permute.xlu0 %5812 }
0x1110   : > { %v5815_v4 = vunpack.i.h.bf16 %v8366_v5  ;;  %v5814_v41 = vunpack.i.l.bf16 %v8366_v5  ;;  %v5805_v5 = vunpack.i.h.bf16 %v8364_v12 }
0x1112   : > { %v3782_v34 = vsel %vm844_vm8, %v5814_v41, %v5815_v4 }
0x1115   : > { %v5808_v42 = vpop.permute.xlu1 %5807 }
0x1116   : > { %v5810_v40 = vunpack.i.h.bf16 %v5808_v42  ;;  %v5809_v7 = vunpack.i.l.bf16 %v5808_v42 }
0x1117   : > { %v8370_v54 = vpop.permute.xlu0 %5822 }
0x1118   : > { %9784 = vst [vmem:[#allocation65_spill] sm:$0xff] %v8370_v54  ;;  %v3827_v51 = vpack.c.bf16 %v5809_v7, %v5809_v7  ;;  %v3810_v0 = vsel %vm874_vm7, %v5809_v7, %v5810_v40  ;;  %v3796_v7 = vsel %vm859_vm9, %v5819_v32, %v5820_v48  ;;  %v3811_v50 = vsel %vm874_vm7, %v5810_v40, %v3809_v44 }
0x1119   : > { %v3828_v13 = vpack.c.bf16 %v3810_v0, %v3810_v0  ;;  %v3824_v0 = vpack.c.bf16 %v5819_v32, %v5814_v41  ;;  %v3825_v49 = vpack.c.bf16 %v3796_v7, %v3782_v34  ;;  %v5839_v7 = vunpack.i.l.bf16 %v8390_v52 }
0x111a   : > { %3874 = vrot.lane.b32.xlu1 %v3827_v51, %s9716_s4  ;;  %v5804_v51 = vunpack.i.l.bf16 %v8364_v12 }
0x111b   : > { %3876 = vrot.lane.b32.xlu2 %v3828_v13, %s9716_s4  ;;  %v5830_v13 = vunpack.i.h.bf16 %v8379_v15 }
0x111c   : > { %v3755_v37 = vsel %vm647_vm11, %v5804_v51, %v5805_v5  ;;  %v3821_v32 = vpack.c.bf16 %v5829_v63, %v5804_v51 }
0x111d   : > { %v3781_v42 = vpop.permute.xlu1 %3780  ;;  %v3768_v34 = vsel %vm829_vm10, %v5829_v63, %v5830_v13 }
0x111e   : > { %v3822_v41 = vpack.c.bf16 %v3768_v34, %v3755_v37  ;;  %v5853_v34 = vpop.permute.xlu2 %5852  ;;  %v3783_v40 = vsel %vm844_vm8, %v5815_v4, %v3781_v42  ;;  %v9788_v4 = vpack.i.bf16 %v8238_v58, %v8203_v55  ;;  %v3685_v42 = vmul.f32 %v8232_v59, %v6415_v9  ;;  %v9795_v58 = vld [vmem:[#allocation47_spill] sm:$0xff] }
0x111f   : > { %v3767_v14 = vpop.permute.xlu0 %3766  ;;  %v5855_v52 = vunpack.i.h.bf16 %v5853_v34 }
0x1122   : > { %3868 = vrot.lane.b32.xlu1 %v3824_v0, %s9716_s4 }
0x1123   : > { %3870 = vrot.lane.b32.xlu2 %v3825_v49, %s9716_s4 }
0x1125   : > { %v5833_v11 = vpop.permute.xlu1 %5832 }
0x1126   : > { %v5835_v12 = vunpack.i.h.bf16 %v5833_v11 }
0x1127   : > { %v5843_v30 = vpop.permute.xlu0 %5842 }
0x1128   : > { %v5845_v15 = vunpack.i.h.bf16 %v5843_v30  ;;  %v3731_v37 = vsel %vm790_vm12, %v5835_v12, %v5839_v7 }
0x112a   : > { %3862 = vrot.lane.b32.xlu1 %v3821_v32, %s9716_s4  ;;  %v5844_v32 = vunpack.i.l.bf16 %v5843_v30  ;;  %v3684_v30 = vmul.f32 %v8184_v19, %v6448_v21 }
0x112b   : > { %3864 = vrot.lane.b32.xlu2 %v3822_v41, %s9716_s4 }
0x112c   : > { %v3744_v47 = vsel %vm663_vm6, %v5844_v32, %v5845_v15  ;;  %v9806_v32 = vld [vmem:[#allocation49_spill] sm:$0xff] }
0x112d   : > { %v8395_v49 = vpop.permute.xlu1 %5847 }
0x112e   : > { %9786 = vst [vmem:[#allocation67_spill] sm:$0xff] %v8395_v49  ;;  %v5849_v0 = vunpack.i.l.bf16 %v8395_v49  ;;  %v5834_v49 = vunpack.i.l.bf16 %v5833_v11  ;;  %v5824_v11 = vunpack.i.l.bf16 %v8370_v54 }
0x112f   : > { %v8399_v23 = vpop.permute.xlu0 %5857 }
0x1130   : > { %v3745_v51 = vsel %vm663_vm6, %v5845_v15, %v5849_v0  ;;  %v3820_v63 = vpack.c.bf16 %v5849_v0, %v5839_v7  ;;  %v5859_v62 = vunpack.i.l.bf16 %v8399_v23  ;;  %v3730_v7 = vsel %vm790_vm12, %v5834_v49, %v5835_v12 }
0x1131   : > { %v3819_v41 = vpack.c.bf16 %v3745_v51, %v3731_v37  ;;  %v3829_v0 = vpack.c.bf16 %v3811_v50, %v3811_v50  ;;  %v3818_v37 = vpack.c.bf16 %v3744_v47, %v3730_v7  ;;  %v3683_v12 = vmul.f32 %v8232_v59, %v6424_v35  ;;  %v9794_v59 = vld [vmem:[#allocation48_spill] sm:$0xff] }
0x1132   : > { %3649 = vperm.xlu1 %5368, %v2488_v33   ;;  %3860 = vrot.lane.b32.xlu0 %v3820_v63, %s9716_s4  ;;  %v3717_v24 = vsel %vm695_vm4, %v5855_v52, %v5859_v62  ;;  %v5854_v33 = vunpack.i.l.bf16 %v5853_v34  ;;  %v3797_v50 = vsel %vm859_vm9, %v5820_v48, %v5824_v11  ;;  %v9787_v48 = vpack.i.bf16 %v7946_v53, %v7942_v18  ;;  %v9791_v53 = vld [vmem:[#allocation28_spill] sm:$0xff]  ;;  %v9805_v34 = vld [vmem:[#allocation50_spill] sm:$0xff]  ;;  %v9816_v11 = vld [vmem:[#allocation35_spill] sm:$0xff] }
0x1133   : > { %3858 = vrot.lane.b32.xlu2 %v3819_v41, %s9716_s4  ;;  %v3816_v51 = vpack.c.bf16 %v3717_v24, %v3684_v30  ;;  %v3826_v47 = vpack.c.bf16 %v3797_v50, %v3783_v40  ;;  %v2489_v24 = vld [vmem:[%s9511_s15 + $0x38] sm:$0xff]  ;;  %v3817_v15 = vpack.c.bf16 %v5859_v62, %v3685_v42  ;;  %v9790_v18 = vpack.i.bf16 %v8242_v43, %v8207_v61  ;;  %v9827_v42 = vld [vmem:[#allocation55_spill] sm:$0xff] }
0x1134   : > { %v3716_v44 = vsel %vm695_vm4, %v5854_v33, %v5855_v52  ;;  %v3769_v52 = vsel %vm829_vm10, %v5830_v13, %v3767_v14  ;;  %v9789_v14 = vpack.i.bf16 %v7963_v8, %v7959_v45  ;;  %v9792_v55 = vpack.i.bf16 %v7716_v57, %v9791_v53  ;;  %v9797_v8 = vld [vmem:[#allocation41_spill] sm:$0xff]  ;;  %v9799_v57 = vld [vmem:[#allocation30_spill] sm:$0xff]  ;;  %v9830_v53 = vld [vmem:[#allocation40_spill] sm:$0xff] }
0x1135   : > { %v3815_v19 = vpack.c.bf16 %v3716_v44, %v3683_v12  ;;  %v3823_v49 = vpack.c.bf16 %v3769_v52, %v5805_v5  ;;  %v9793_v62 = vpack.i.bf16 %v8246_v29, %v8211_v46  ;;  %v9796_v45 = vpack.i.bf16 %v9794_v59, %v9795_v58  ;;  %v9800_v43 = vld [vmem:[#allocation29_spill] sm:$0xff]  ;;  %v9802_v46 = vld [vmem:[#allocation32_spill] sm:$0xff]  ;;  %v9803_v29 = vld [vmem:[#allocation31_spill] sm:$0xff] }
0x1136   : > { %v4023_v5 = vmul.f32 %v9797_v8, %v6291_v20  ;;  %v9798_v61 = vpack.i.bf16 %v8250_v10, %v8221_v2  ;;  %v9801_v13 = vpack.i.bf16 %v9799_v57, %v9800_v43  ;;  %v9804_v63 = vpack.i.bf16 %v9802_v46, %v9803_v29  ;;  %v9808_v2 = vld [vmem:[#allocation34_spill] sm:$0xff]  ;;  %v9809_v10 = vld [vmem:[#allocation33_spill] sm:$0xff] }
0x1137   : > { %v9807_v41 = vpack.i.bf16 %v9805_v34, %v9806_v32  ;;  %v9810_v7 = vpack.i.bf16 %v9808_v2, %v9809_v10  ;;  %v9811_v30 = vpack.i.bf16 %v8254_v3, %v8286_v1  ;;  %v9818_v12 = vld [vmem:[#allocation42_spill] sm:$0xff]  ;;  %v9819_v3 = vpack.i.bf16 %v8258_v31, %v8294_v17  ;;  %v9828_v31 = vld [vmem:[#allocation44_spill] sm:$0xff] }
0x1138   : > { %v3987_v50 = vmul.f32 %v9818_v12, %v6302_v25  ;;  %v9820_v1 = vld [vmem:[#allocation54_spill] sm:$0xff]  ;;  %v9823_v52 = vpack.i.bf16 %v8298_v27, %v8313_v26  ;;  %v9829_v17 = vpack.i.bf16 %v9827_v42, %v9828_v31  ;;  %v9833_v27 = vpack.i.bf16 %v8213_v56, %v8181_v60  ;;  %v2481_v31 = vld [vmem:[%s9510_s14 + $0x1c] sm:$0xf] }
0x1139   : > { %v9834_v57 = vpack.i.bf16 %v8323_v39, %v8319_v22  ;;  %v9835_v43 = vpack.i.bf16 %v9818_v12, %v9797_v8  ;;  %v9837_v39 = vld [vmem:[#allocation56_spill] sm:$0xff]  ;;  %v9838_v8 = vld [vmem:[#allocation45_spill] sm:$0xff] }
0x113a   : > { %3878 = vrot.lane.b32.xlu0 %v3829_v0, %s9716_s4  ;;  %3856 = vrot.lane.b32.xlu1 %v3818_v37, %s9716_s4  ;;  %v9812_v0 = vld [vmem:[#allocation53_spill] sm:$0xff]  ;;  %v9813_v37 = vld [vmem:[#allocation52_spill] sm:$0xff] }
0x113b   : > { %3852 = vrot.lane.b32.xlu2 %v3816_v51, %s9716_s4  ;;  %v9814_v33 = vpack.i.bf16 %v9812_v0, %v9813_v37  ;;  %v9815_v51 = vld [vmem:[#allocation36_spill] sm:$0xff] }
0x113c   : > { %v9817_v44 = vpack.i.bf16 %v9815_v51, %v9816_v11 }
0x1142   : > { %3872 = vrot.lane.b32.xlu0 %v3826_v47, %s9716_s4  ;;  %3850 = vrot.lane.b32.xlu1 %v3815_v19, %s9716_s4  ;;  %v9821_v47 = vld [vmem:[#allocation43_spill] sm:$0xff] }
0x1143   : > { %3832 = vperm.xlu2 %5369, %v2489_v24   ;;  %v9822_v19 = vpack.i.bf16 %v9820_v1, %v9821_v47  ;;  %v9844_v1 = vld [vmem:[#allocation59_spill] sm:$0xff] }
0x114a   : > { %3866 = vrot.lane.b32.xlu0 %v3823_v49, %s9716_s4  ;;  %5867 = vrot.lane.b32.xlu1 %v9787_v48, %s9715_s30  ;;  %v9824_v49 = vld [vmem:[#allocation38_spill] sm:$0xff]  ;;  %v9825_v48 = vld [vmem:[#allocation37_spill] sm:$0xff] }
0x114b   : > { %5872 = vrot.lane.b32.xlu2 %v9788_v4, %s9715_s30  ;;  %v9826_v4 = vpack.i.bf16 %v9824_v49, %v9825_v48 }
0x1152   : > { %3854 = vrot.lane.b32.xlu0 %v3817_v15, %s9716_s4  ;;  %5887 = vrot.lane.b32.xlu1 %v9789_v14, %s9725_s29  ;;  %v3664_v14 = vpop.f32.mrf.mxu0 }
0x1153   : > { %5892 = vrot.lane.b32.xlu2 %v9790_v18, %s9725_s29  ;;  %v3677_v18 = vpop.f32.mrf.mxu1 }
0x115a   : > { %5862 = vrot.lane.b32.xlu0 %v9792_v55, %s9715_s30  ;;  %5902 = vrot.lane.b32.xlu1 %v9793_v62, %s9723_s25  ;;  %v9831_v55 = vld [vmem:[#allocation39_spill] sm:$0xff] }
0x115b   : > { %5912 = vrot.lane.b32.xlu2 %v9796_v45, %s9723_s25  ;;  %v9832_v62 = vpack.i.bf16 %v9830_v53, %v9831_v55 }
0x1162   : > { %5877 = vrot.lane.b32.xlu0 %v9798_v61, %s9715_s30  ;;  %5907 = vrot.lane.b32.xlu1 %v9801_v13, %s9723_s25  ;;  %v3679_v61 = vpop.f32.mrf.mxu1 }
0x1163   : > { %4384 = vrot.lane.b32.xlu2 %v4023_v5, %s9756_s23  ;;  %v3666_v5 = vpop.f32.mrf.mxu0 }
0x116a   : > { %5882 = vrot.lane.b32.xlu0 %v9804_v63, %s9725_s29  ;;  %5927 = vrot.lane.b32.xlu1 %v9807_v41, %s9756_s23  ;;  %v9836_v63 = vpack.i.bf16 %v8331_v16, %v8327_v6  ;;  %v9839_v41 = vpack.i.bf16 %v9837_v39, %v9838_v8  ;;  %v9840_v6 = vld [vmem:[#allocation58_spill] sm:$0xff]  ;;  %v9841_v16 = vld [vmem:[#allocation57_spill] sm:$0xff] }
0x116b   : > { %5942 = vrot.lane.b32.xlu2 %v9810_v7, %s9729_s24  ;;  %v9842_v37 = vpack.i.bf16 %v9840_v6, %v9841_v16 }
0x1172   : > { %5897 = vrot.lane.b32.xlu0 %v9811_v30, %s9725_s29  ;;  %5952 = vrot.lane.b32.xlu1 %v9814_v33, %s9729_s24 }
0x1173   : > { %5957 = vrot.lane.b32.xlu2 %v9817_v44, %s9730_s26 }
0x1175   : > { %v3877_v40 = vpop.permute.xlu2 %3876 }
0x117a   : > { %4176 = vrot.lane.b32.xlu0 %v3987_v50, %s9723_s25  ;;  %5967 = vrot.lane.b32.xlu1 %v9819_v3, %s9728_s27  ;;  %v9843_v3 = vld [vmem:[#allocation60_spill] sm:$0xff] }
0x117b   : > { %5977 = vrot.lane.b32.xlu2 %v9822_v19, %s9728_s27  ;;  %v9845_v47 = vpack.i.bf16 %v9843_v3, %v9844_v1 }
0x117d   : > { %v3871_v24 = vpop.permute.xlu2 %3870 }
0x1182   : > { %5917 = vrot.lane.b32.xlu0 %v9823_v52, %s9756_s23  ;;  %5972 = vrot.lane.b32.xlu1 %v9826_v4, %s9728_s27 }
0x1183   : > { %6002 = vrot.lane.b32.xlu2 %v9829_v17, %s9730_s26 }
0x1185   : > { %v3865_v15 = vpop.permute.xlu2 %3864 }
0x118a   : > { %5922 = vrot.lane.b32.xlu0 %v9832_v62, %s9756_s23  ;;  %5987 = vrot.lane.b32.xlu1 %v9833_v27, %s9731_s3 }
0x118c   : > { %v3875_v26 = vpop.permute.xlu1 %3874 }
0x118d   : > { %v3888_v59 = vsel %vm759_vm5, %v3875_v26, %v3877_v40  ;;  %v3859_v58 = vpop.permute.xlu2 %3858 }
0x118e   : > { %v3902_v45 = vsel %vm968_vm13, %v3888_v59, 0 }
0x118f   : > { %3910 = vmatpush.bf16.msrb.mxu2 %v3902_v45 }
0x1192   : > { %5932 = vrot.lane.b32.xlu0 %v9834_v57, %s9729_s24  ;;  %5997 = vrot.lane.b32.xlu1 %v9835_v43, %s9731_s3 }
0x1194   : > { %v3869_v13 = vpop.permute.xlu1 %3868 }
0x1195   : > { %v3853_v46 = vpop.permute.xlu2 %3852  ;;  %v3886_v29 = vsel %vm759_vm5, %v3869_v13, %v3871_v24 }
0x1196   : > { %3911 = vmatpush.bf16.msrb.mxu2 %v3886_v29 }
0x119a   : > { %5937 = vrot.lane.b32.xlu0 %v9836_v63, %s9730_s26 }
0x119c   : > { %v3863_v34 = vpop.permute.xlu1 %3862 }
0x119d   : > { %v8543_v32 = vpop.permute.xlu2 %3832  ;;  %v3884_v22 = vsel %vm759_vm5, %v3863_v34, %v3865_v15 }
0x119e   : > { %3912 = vmatpush.bf16.msrb.mxu2 %v3884_v22  ;;  %v5860_v22 = vunpack.i.h.bf16 %v8399_v23 }
0x11a2   : > { %5947 = vrot.lane.b32.xlu0 %v9839_v41, %s9729_s24 }
0x11a4   : > { %v3650_v2 = vpop.permute.xlu1 %3649  ;;  %v3861_v10 = vpop.permute.xlu0 %3860 }
0x11a5   : > { %v8550_v7 = vadd.f32 %v3664_v14, %v3650_v2  ;;  %v8552_v30 = vadd.f32 %v3677_v18, %v3650_v2  ;;  %v5873_v0 = vpop.permute.xlu2 %5872  ;;  %v9846_v14 = vld [vmem:[#allocation26_spill] sm:$0xff]  ;;  %v3883_v61 = vsel %vm759_vm5, %v3859_v58, %v3861_v10 }
0x11a6   : > { %v5874_v62 = vunpack.i.l.bf16 %v5873_v0 }
0x11aa   : > { %5962 = vrot.lane.b32.xlu0 %v9842_v37, %s9730_s26 }
0x11ac   : > { %v3879_v33 = vpop.permute.xlu0 %3878  ;;  %v3857_v51 = vpop.permute.xlu1 %3856 }
0x11ad   : > { %v3889_v11 = vsel %vm759_vm5, %v3877_v40, %v3879_v33  ;;  %v8559_v44 = vpop.permute.xlu2 %5892  ;;  %v3882_v12 = vsel %vm759_vm5, %v3857_v51, %v3859_v58  ;;  %v5875_v33 = vunpack.i.h.bf16 %v5873_v0 }
0x11ae   : > { %v3905_v50 = vsel %vm968_vm13, %v3889_v11, 0  ;;  %3913 = vmatpush.bf16.msrb.mxu2 %v3882_v12  ;;  %v9628_v13 = vunpack.i.l.bf16 %v8559_v44 }
0x11af   : > { %3923 = vmatpush.bf16.msrb.mxu3 %v3905_v50 }
0x11b2   : > { %5982 = vrot.lane.b32.xlu0 %v9845_v47, %s9728_s27 }
0x11b4   : > { %v3873_v19 = vpop.permute.xlu0 %3872  ;;  %v3851_v52 = vpop.permute.xlu1 %3850 }
0x11b5   : > { %v8567_v49 = vpop.permute.xlu2 %5912  ;;  %v3880_v48 = vsel %vm759_vm5, %v3851_v52, %v3853_v46  ;;  %v3887_v40 = vsel %vm759_vm5, %v3871_v24, %v3873_v19  ;;  %v9847_v24 = vld [vmem:[#allocation27_spill] sm:$0xff] }
0x11b6   : > { %v9636_v4 = vunpack.i.h.bf16 %v8567_v49  ;;  %v5914_v42 = vunpack.i.l.bf16 %v8567_v49  ;;  %3914 = vmatpush.bf16.msrb.mxu2 %v3880_v48  ;;  %3924 = vmatpush.bf16.msrb.mxu3 %v3887_v40  ;;  %v9848_v18 = vpack.i.bf16 %v9846_v14, %v9847_v24 }
0x11b8   : > { %v8579_v17 = vsel %vm663_vm6, %v5914_v42, %v9636_v4 }
0x11b9   : > { %5284 = vmatmul.msk.bf16.vlgmr.msrb.gmra.mxu2 %vm964_vm14, %v2481_v31 }
0x11ba   : > { %5992 = vrot.lane.b32.xlu0 %v9848_v18, %s9731_s3  ;;  %v5895_v18 = vunpack.i.h.bf16 %v8559_v44 }
0x11bc   : > { %v3867_v53 = vpop.permute.xlu0 %3866  ;;  %v5868_v55 = vpop.permute.xlu1 %5867 }
0x11bd   : > { %v5870_v27 = vunpack.i.h.bf16 %v5868_v55  ;;  %v5869_v26 = vunpack.i.l.bf16 %v5868_v55  ;;  %v3885_v59 = vsel %vm759_vm5, %v3865_v15, %v3867_v53  ;;  %v8622_v16 = vpop.permute.xlu2 %4384 }
0x11be   : > { %3925 = vmatpush.bf16.msrb.mxu3 %v3885_v59 }
0x11bf   : > { %v8588_v45 = vsel %vm695_vm4, %v5869_v26, %v5870_v27  ;;  %v8591_v5 = vsel %vm695_vm4, %v5870_v27, %v5874_v62 }
0x11c0   : > { %9849 = vst [vmem:[#allocation28_spill] sm:$0xff] %v8588_v45  ;;  %v9886_v45 = vld [vmem:[#allocation14_spill] sm:$0xff] }
0x11c2   : > { %3926 = vmatpush.bf16.msrb.mxu3 %v3883_v61 }
0x11c4   : > { %v3855_v57 = vpop.permute.xlu0 %3854  ;;  %v8594_v43 = vpop.permute.xlu1 %5887 }
0x11c5   : > { %v9633_v29 = vunpack.i.h.bf16 %v8594_v43  ;;  %v3881_v63 = vsel %vm759_vm5, %v3853_v46, %v3855_v57  ;;  %v8642_v0 = vpop.permute.xlu2 %5942 }
0x11c6   : > { %3927 = vmatpush.bf16.msrb.mxu3 %v3881_v63  ;;  %v9635_v40 = vunpack.i.l.bf16 %v8642_v0 }
0x11c7   : > { %v8604_v15 = vsel %vm790_vm12, %v9633_v29, %v9628_v13 }
0x11c9   : > { %5285 = vmatmul.msk.bf16.vlgmr.msrb.gmra.mxu3 %vm964_vm14, %v2481_v31 }
0x11cc   : > { %v5863_v58 = vpop.permute.xlu0 %5862  ;;  %v8607_v34 = vpop.permute.xlu1 %5902 }
0x11cd   : > { %v5865_v39 = vunpack.i.h.bf16 %v5863_v58  ;;  %v5864_v8 = vunpack.i.l.bf16 %v5863_v58 }
0x11cf   : > { %v8611_v41 = vsel %vm695_vm4, %v5860_v22, %v5864_v8  ;;  %v8614_v46 = vsel %vm695_vm4, %v5864_v8, %v5865_v39  ;;  %v8616_v2 = vpack.c.bf16 %v5874_v62, %v5865_v39  ;;  %v8669_v62 = vpop.permute.xlu2 %5957 }
0x11d0   : > { %9850 = vst [vmem:[#allocation48_spill] sm:$0xff] %v8611_v41  ;;  %v9885_v41 = vld [vmem:[#allocation10_spill] sm:$0xff] }
0x11d1   : > { %9851 = vst [vmem:[#allocation47_spill] sm:$0xff] %v8616_v2 }
0x11d4   : > { %v8624_v37 = vpop.permute.xlu0 %5877  ;;  %v8626_v23 = vpop.permute.xlu1 %5907 }
0x11d5   : > { %v9626_v51 = vunpack.i.l.bf16 %v8624_v37 }
0x11d7   : > { %v8632_v11 = vsel %vm695_vm4, %v5875_v33, %v9626_v51  ;;  %v8675_v59 = vpop.permute.xlu2 %5977 }
0x11d8   : > { %v5979_v63 = vunpack.i.l.bf16 %v8675_v59  ;;  %v9630_v39 = vunpack.i.h.bf16 %v8675_v59 }
0x11dc   : > { %v8634_v12 = vpop.permute.xlu0 %5882  ;;  %v8636_v50 = vpop.permute.xlu1 %5927 }
0x11dd   : > { %v9631_v3 = vunpack.i.h.bf16 %v8634_v12  ;;  %v9634_v1 = vunpack.i.l.bf16 %v8634_v12  ;;  %v9632_v47 = vunpack.i.h.bf16 %v8636_v50  ;;  %v9625_v19 = vunpack.i.l.bf16 %v8636_v50 }
0x11df   : > { %v8649_v52 = vsel %vm790_vm12, %v9634_v1, %v9631_v3  ;;  %v8656_v48 = vsel %vm859_vm9, %v9625_v19, %v9632_v47  ;;  %v5945_v19 = vunpack.i.h.bf16 %v8642_v0  ;;  %v6003_v47 = vpop.permute.xlu2 %6002 }
0x11e0   : > { %9852 = vst [vmem:[#allocation41_spill] sm:$0xff] %v8649_v52  ;;  %v6004_v4 = vunpack.i.l.bf16 %v6003_v47  ;;  %v9887_v52 = vld [vmem:[#allocation19_spill] sm:$0xff] }
0x11e1   : > { %9853 = vst [vmem:[#allocation30_spill] sm:$0xff] %v8656_v48 }
0x11e4   : > { %v8660_v42 = vpop.permute.xlu0 %5897  ;;  %v5953_v31 = vpop.permute.xlu1 %5952 }
0x11e5   : > { %v9624_v53 = vunpack.i.l.bf16 %v8660_v42  ;;  %v5955_v51 = vunpack.i.h.bf16 %v5953_v31  ;;  %v5954_v6 = vunpack.i.l.bf16 %v5953_v31 }
0x11e7   : > { %v8667_v55 = vsel %vm790_vm12, %v5895_v18, %v9624_v53 }
0x11e8   : > { %9854 = vst [vmem:[#allocation29_spill] sm:$0xff] %v8667_v55 }
0x11ec   : > { %v8671_v27 = vpop.permute.xlu0 %4176  ;;  %v8673_v26 = vpop.permute.xlu1 %5967 }
0x11ed   : > { %9855 = vst [vmem:[#allocation32_spill] sm:$0xff] %v8673_v26 }
0x11f4   : > { %v8677_v61 = vpop.permute.xlu0 %5917  ;;  %v8679_v57 = vpop.permute.xlu1 %5972 }
0x11f5   : > { %9856 = vst [vmem:[#allocation31_spill] sm:$0xff] %v8677_v61  ;;  %v9627_v58 = vunpack.i.h.bf16 %v8679_v57  ;;  %v9629_v22 = vunpack.i.l.bf16 %v8679_v57 }
0x11f7   : > { %v8688_v8 = vsel %vm829_vm10, %v9627_v58, %v5979_v63  ;;  %v8694_v33 = vpack.c.bf16 %v9630_v39, %v9629_v22  ;;  %v8711_v22 = vsel %vm844_vm8, %v9635_v40, %v5945_v19  ;;  %v8714_v39 = vsel %vm844_vm8, %v5954_v6, %v5955_v51 }
0x11f8   : > { %9857 = vst [vmem:[#allocation50_spill] sm:$0xff] %v8688_v8  ;;  %v5960_v40 = vunpack.i.h.bf16 %v8669_v62  ;;  %v9641_v51 = vunpack.i.l.bf16 %v8669_v62 }
0x11f9   : > { %9858 = vst [vmem:[#allocation49_spill] sm:$0xff] %v8694_v33 }
0x11fa   : > { %9861 = vst [vmem:[#allocation53_spill] sm:$0xff] %v8711_v22  ;;  %v8740_v29 = vsel %vm874_vm7, %v5960_v40, %v6004_v4 }
0x11fb   : > { %9862 = vst [vmem:[#allocation52_spill] sm:$0xff] %v8714_v39  ;;  %v9878_v39 = vld [vmem:[#allocation22_spill] sm:$0xff] }
0x11fc   : > { %v8696_v18 = vpop.permute.xlu0 %5922  ;;  %9866 = vst [vmem:[#allocation54_spill] sm:$0xff] %v8740_v29 }
0x1204   : > { %v8698_v10 = vpop.permute.xlu0 %5932 }
0x1205   : > { %9859 = vst [vmem:[#allocation34_spill] sm:$0xff] %v8698_v10 }
0x120c   : > { %v8700_v53 = vpop.permute.xlu0 %5937 }
0x120d   : > { %9860 = vst [vmem:[#allocation33_spill] sm:$0xff] %v8700_v53  ;;  %v9870_v53 = vld [vmem:[#allocation2_spill] sm:$0xff] }
0x120e   : > { %v8769_v29 = vmul.f32 %v9847_v24, %v9870_v53  ;;  %v8790_v24 = vmul.f32 %v8181_v60, %v6309_v28 }
0x1210   : > { %9872 = vst [vmem:[#allocation55_spill] sm:$0xff] %v8790_v24 }
0x1214   : > { %v8704_v63 = vpop.permute.xlu0 %5947 }
0x1215   : > { %v9637_v58 = vunpack.i.h.bf16 %v8704_v63  ;;  %v5949_v13 = vunpack.i.l.bf16 %v8704_v63 }
0x1217   : > { %v8717_v3 = vsel %vm844_vm8, %v5945_v19, %v5949_v13  ;;  %v8722_v31 = vsel %vm844_vm8, %v9637_v58, %v5954_v6  ;;  %v6005_v13 = vunpack.i.h.bf16 %v6003_v47  ;;  %v8737_v58 = vsel %vm874_vm7, %v9641_v51, %v5960_v40 }
0x1218   : > { %9863 = vst [vmem:[#allocation36_spill] sm:$0xff] %v8717_v3  ;;  %v9877_v3 = vld [vmem:[#allocation16_spill] sm:$0xff] }
0x1219   : > { %9864 = vst [vmem:[#allocation35_spill] sm:$0xff] %v8722_v31 }
0x121a   : > { %9865 = vst [vmem:[#allocation42_spill] sm:$0xff] %v8737_v58  ;;  %v9879_v58 = vld [vmem:[#allocation18_spill] sm:$0xff] }
0x121c   : > { %v8730_v33 = vpop.permute.xlu0 %5962 }
0x121d   : > { %v5965_v19 = vunpack.i.h.bf16 %v8730_v33  ;;  %v9642_v6 = vunpack.i.l.bf16 %v8730_v33 }
0x121f   : > { %v8745_v1 = vsel %vm874_vm7, %v9642_v6, %v5965_v19  ;;  %v8748_v26 = vsel %vm874_vm7, %v5965_v19, %v6005_v13  ;;  %v9871_v13 = vld [vmem:[#allocation8_spill] sm:$0xff] }
0x1220   : > { %9867 = vst [vmem:[#allocation43_spill] sm:$0xff] %v8745_v1 }
0x1221   : > { %9868 = vst [vmem:[#allocation38_spill] sm:$0xff] %v8748_v26  ;;  %v8773_v26 = vmul.f32 %v8181_v60, %v6333_v38 }
0x1224   : > { %v8754_v10 = vpop.permute.xlu0 %5982 }
0x1225   : > { %v5985_v51 = vunpack.i.h.bf16 %v8754_v10  ;;  %v9645_v4 = vunpack.i.l.bf16 %v8754_v10 }
0x1227   : > { %v8761_v40 = vsel %vm829_vm10, %v9645_v4, %v5985_v51  ;;  %v8783_v4 = vmul.f32 %v8181_v60, %v9871_v13 }
0x1228   : > { %9869 = vst [vmem:[#allocation37_spill] sm:$0xff] %v8761_v40 }
0x123c   : > { %v3916_v19 = vpop.f32.mrf.mxu2 }
0x123d   : > { %v3917_v47 = vadd.f32 %v3916_v19, %v8543_v32 }
0x123f   : > { %v3933_v6 = vadd.f32 %v3917_v47, %v8550_v7  ;;  %v9873_v47 = vld [vmem:[#allocation6_spill] sm:$0xff] }
0x1241   : > { %v8776_v2 = vmul.f32 %v3933_v6, %v6291_v20  ;;  %v8779_v51 = vmul.f32 %v3933_v6, %v6329_v36  ;;  %v8786_v7 = vmul.f32 %v3933_v6, %v9871_v13  ;;  %v8793_v19 = vmul.f32 %v3933_v6, %v9873_v47 }
0x1242   : > { %v8797_v20 = vmul.f32 %v8181_v60, %v6448_v21  ;;  %v8800_v36 = vmul.f32 %v3933_v6, %v6448_v21  ;;  %v3968_v54 = vmul.f32 %v3933_v6, %v9878_v39  ;;  %v8819_v13 = vmul.f32 %v8213_v56, %v6424_v35 }
0x1243   : > { %9874 = vst [vmem:[#allocation44_spill] sm:$0xff] %v8793_v19  ;;  %v8823_v47 = vmul.f32 %v8213_v56, %v6415_v9  ;;  %v3992_v60 = vmul.f32 %v3933_v6, %v9879_v58  ;;  %v8834_v24 = vmul.f32 %v3933_v6, %v6333_v38  ;;  %v9882_v19 = vld [vmem:[#allocation4_spill] sm:$0xff]  ;;  %v9883_v58 = vld [vmem:[#allocation11_spill] sm:$0xff] }
0x1244   : > { %9875 = vst [vmem:[#allocation40_spill] sm:$0xff] %v8797_v20  ;;  %v3918_v8 = vpop.f32.mrf.mxu2  ;;  %v9880_v20 = vld [vmem:[#allocation17_spill] sm:$0xff] }
0x1245   : > { %9876 = vst [vmem:[#allocation39_spill] sm:$0xff] %v8800_v36  ;;  %v3982_v8 = vmul.f32 %v9846_v14, %v9877_v3  ;;  %v3980_v36 = vmul.f32 %v3933_v6, %v9880_v20  ;;  %v8829_v14 = vmul.f32 %v3933_v6, %v6309_v28  ;;  %v9884_v20 = vld [vmem:[#allocation5_spill] sm:$0xff] }
0x1246   : > { %v8840_v31 = vmul.f32 %v3933_v6, %v9884_v20 }
0x124c   : > { %v3929_v1 = vpop.f32.mrf.mxu3 }
0x124d   : > { %v3930_v21 = vadd.f32 %v3929_v1, %v8543_v32  ;;  %v4027_v32 = vmul.f32 %v3933_v6, %v9870_v53  ;;  %v9881_v1 = vld [vmem:[#allocation21_spill] sm:$0xff] }
0x124f   : > { %v3934_v40 = vadd.f32 %v3930_v21, %v8552_v30 }
0x1251   : > { %v6006_v21 = vpack.i.bf16 %v3934_v40, %v3933_v6  ;;  %v3993_v30 = vmul.f32 %v3934_v40, %v6302_v25  ;;  %v3967_v39 = vmul.f32 %v3934_v40, %v9881_v1  ;;  %v3991_v56 = vmul.f32 %v3934_v40, %v9877_v3 }
0x1252   : > { %v3979_v61 = vmul.f32 %v3934_v40, %v9882_v19  ;;  %v4028_v22 = vmul.f32 %v3934_v40, %v9883_v58  ;;  %v4016_v25 = vmul.f32 %v3934_v40, %v9885_v41  ;;  %v8845_v1 = vmul.f32 %v3934_v40, %v9886_v45 }
0x1253   : > { %6007 = vrot.lane.b32.xlu2 %v6006_v21, %s9731_s3  ;;  %v6021_v53 = vpack.i.bf16 %v3982_v8, %v3993_v30  ;;  %v6011_v28 = vpack.i.bf16 %v3968_v54, %v3967_v39  ;;  %v6016_v55 = vpack.i.bf16 %v3992_v60, %v3991_v56  ;;  %v8848_v19 = vmul.f32 %v3934_v40, %v9887_v52  ;;  %v9889_v8 = vld [vmem:[#allocation20_spill] sm:$0xff] }
0x1254   : > { %v3931_v38 = vpop.f32.mrf.mxu3  ;;  %v6026_v48 = vpack.i.bf16 %v3980_v36, %v3979_v61  ;;  %v6031_v3 = vpack.i.bf16 %v4028_v22, %v4027_v32  ;;  %v6046_v6 = vpack.i.bf16 %v8829_v14, %v4016_v25  ;;  %v6061_v54 = vpack.i.bf16 %v8834_v24, %v8845_v1  ;;  %v9946_v1 = vld [vmem:[#allocation40_spill] sm:$0xff] }
0x1255   : > { %6022 = vrot.lane.b32.xlu0 %v6021_v53, %s9723_s25  ;;  %6012 = vrot.lane.b32.xlu1 %v6011_v28, %s9715_s30  ;;  %v8856_v39 = vmul.f32 %v3934_v40, %v6424_v35  ;;  %v5910_v38 = vunpack.i.h.bf16 %v8626_v23  ;;  %v5909_v36 = vunpack.i.l.bf16 %v8626_v23  ;;  %v6051_v61 = vpack.i.bf16 %v8848_v19, %v8840_v31 }
0x1256   : > { %v8863_v22 = vmul.f32 %v3934_v40, %v6415_v9  ;;  %v9888_v25 = vunpack.i.h.bf16 %v8567_v49  ;;  %v3969_v32 = vmul.f32 %v3934_v40, %v9889_v8  ;;  %v9890_v49 = vld [vmem:[#allocation66_spill] sm:$0xff]  ;;  %v9891_v60 = vunpack.i.l.bf16 %v8634_v12 }
0x1257   : > { %v4191_v14 = vsel %vm663_vm6, %v5909_v36, %v5910_v38  ;;  %v4494_v30 = vpack.c.bf16 %v8671_v27, %v5910_v38  ;;  %v5840_v56 = vunpack.i.h.bf16 %v9890_v49  ;;  %v5925_v38 = vunpack.i.h.bf16 %v8696_v18 }
0x1258   : > { %v4193_v53 = vsel %vm663_vm6, %v9888_v25, %v8671_v27  ;;  %v5889_v25 = vunpack.i.l.bf16 %v8594_v43 }
0x1259   : > { %v4493_v21 = vpack.c.bf16 %v4193_v53, %v4191_v14  ;;  %v4134_v28 = vsel %vm790_vm12, %v5840_v56, %v9891_v60  ;;  %v9892_v53 = vunpack.i.h.bf16 %v8594_v43  ;;  %v9894_v43 = vpack.i.bf16 %v8769_v29, %v8776_v2 }
0x125a   : > { %v9898_v29 = vpack.c.bf16 %v8591_v5, %v8614_v46  ;;  %v9899_v2 = vunpack.i.l.bf16 %v8669_v62  ;;  %v9900_v56 = vunpack.i.l.bf16 %v8730_v33  ;;  %v9905_v46 = vunpack.i.h.bf16 %v8679_v57 }
0x125b   : > { %4076 = vrot.lane.b32.xlu2 %v3969_v32, %s9715_s30  ;;  %v4136_v32 = vsel %vm790_vm12, %v5889_v25, %v9892_v53  ;;  %v9901_v25 = vunpack.i.l.bf16 %v8642_v0  ;;  %v9903_v53 = vunpack.i.l.bf16 %v8754_v10  ;;  %v9906_v62 = vunpack.i.l.bf16 %v8679_v57 }
0x125c   : > { %v4486_v14 = vpack.c.bf16 %v4136_v32, %v4134_v28  ;;  %v9904_v32 = vunpack.i.h.bf16 %v8675_v59  ;;  %v9907_v59 = vpack.i.bf16 %v8779_v51, %v8773_v26  ;;  %v5904_v57 = vunpack.i.l.bf16 %v8607_v34 }
0x125d   : > { %4635 = vrot.lane.b32.xlu1 %v4493_v21, %s9716_s4  ;;  %v5924_v21 = vunpack.i.l.bf16 %v8696_v18  ;;  %v4286_v33 = vsel %vm829_vm10, %v9906_v62, %v9905_v46  ;;  %v9909_v51 = vpack.i.bf16 %v8786_v7, %v8783_v4  ;;  %v9910_v4 = vunpack.i.l.bf16 %v8624_v37 }
0x125e   : > { %v4288_v5 = vsel %vm829_vm10, %v9904_v32, %v9903_v53 }
0x125f   : > { %v4399_v28 = vsel %vm859_vm9, %v5924_v21, %v5925_v38  ;;  %v9908_v38 = vld [vmem:[#allocation67_spill] sm:$0xff] }
0x1263   : > { %6017 = vrot.lane.b32.xlu2 %v6016_v55, %s9723_s25  ;;  %v9893_v55 = vld [vmem:[#allocation15_spill] sm:$0xff] }
0x1264   : > { %v3981_v27 = vmul.f32 %v3934_v40, %v9893_v55 }
0x1265   : > { %4637 = vrot.lane.b32.xlu1 %v4494_v30, %s9716_s4  ;;  %v9897_v30 = vunpack.i.l.bf16 %v8559_v44 }
0x126b   : > { %4621 = vrot.lane.b32.xlu2 %v4486_v14, %s9716_s4  ;;  %v4505_v14 = vpack.c.bf16 %v4288_v5, %v4286_v33 }
0x126d   : > { %6027 = vrot.lane.b32.xlu1 %v6026_v48, %s9725_s29  ;;  %v9895_v48 = vunpack.i.h.bf16 %v8636_v50 }
0x126f   : > { %v4401_v40 = vsel %vm859_vm9, %v9895_v48, %v8622_v16  ;;  %v4522_v16 = vpack.c.bf16 %v9900_v56, %v9899_v2 }
0x1270   : > { %v4518_v60 = vpack.c.bf16 %v4401_v40, %v4399_v28 }
0x1273   : > { %4132 = vrot.lane.b32.xlu2 %v3981_v27, %s9725_s29 }
0x1275   : > { %6032 = vrot.lane.b32.xlu1 %v6031_v3, %s9756_s23  ;;  %v9896_v3 = vunpack.i.h.bf16 %v8634_v12  ;;  %v9902_v12 = vunpack.i.h.bf16 %v8704_v63  ;;  %v8942_v63 = vpop.permute.xlu1 %5987 }
0x1277   : > { %v4488_v49 = vpack.c.bf16 %v9897_v30, %v9896_v3  ;;  %v4510_v44 = vpack.c.bf16 %v9902_v12, %v9901_v25  ;;  %v5905_v30 = vunpack.i.h.bf16 %v8607_v34 }
0x1279   : > { %v8973_v53 = vsel %vm663_vm6, %v5904_v57, %v5905_v30 }
0x127b   : > { %6037 = vrot.lane.b32.xlu2 %v9894_v43, %s9756_s23  ;;  %v5850_v43 = vunpack.i.h.bf16 %v9908_v38 }
0x127d   : > { %v8952_v40 = vpop.permute.xlu1 %5997 }
0x1283   : > { %4685 = vrot.lane.b32.xlu2 %v4518_v60, %s9716_s4  ;;  %v8954_v60 = vpop.permute.xlu0 %5992 }
0x1284   : > { %v5995_v52 = vunpack.i.h.bf16 %v8954_v60 }
0x128b   : > { %4625 = vrot.lane.b32.xlu2 %v4488_v49, %s9716_s4  ;;  %v5880_v49 = vunpack.i.h.bf16 %v8624_v37 }
0x128d   : > { %v8980_v7 = vsel %vm695_vm4, %v9910_v4, %v5880_v49  ;;  %v9915_v4 = vunpack.i.l.bf16 %v8660_v42 }
0x1293   : > { %4611 = vrot.lane.b32.xlu2 %v9898_v29, %s9716_s4 }
0x129b   : > { %4693 = vrot.lane.b32.xlu2 %v4522_v16, %s9716_s4 }
0x12a3   : > { %4669 = vrot.lane.b32.xlu2 %v4510_v44, %s9716_s4 }
0x12ab   : > { %4659 = vrot.lane.b32.xlu2 %v4505_v14, %s9716_s4 }
0x12ad   : > { %v8939_v0 = vpop.permute.xlu2 %6007 }
0x12ae   : > { %v9953_v45 = vunpack.i.h.bf16 %v8939_v0 }
0x12b3   : > { %6047 = vrot.lane.b32.xlu2 %v6046_v6, %s9729_s24  ;;  %v8957_v6 = vsel %vm663_vm6, %v5850_v43, %v5904_v57  ;;  %v9911_v43 = vld [vmem:[#allocation41_spill] sm:$0xff] }
0x12b5   : > { %v8944_v10 = vpop.permute.xlu2 %4076 }
0x12bb   : > { %6057 = vrot.lane.b32.xlu2 %v9907_v59, %s9728_s27  ;;  %v9935_v59 = vld [vmem:[#allocation62_spill] sm:$0xff] }
0x12bd   : > { %v6018_v27 = vpop.permute.xlu2 %6017 }
0x12be   : > { %v6020_v28 = vunpack.i.h.bf16 %v6018_v27  ;;  %v6019_v48 = vunpack.i.l.bf16 %v6018_v27 }
0x12c0   : > { %v8960_v3 = vsel %vm663_vm6, %v6019_v48, %v6020_v28 }
0x12c3   : > { %6067 = vrot.lane.b32.xlu2 %v9909_v51, %s9730_s26 }
0x12c5   : > { %v8970_v29 = vpop.permute.xlu2 %4621 }
0x12c7   : > { %v6023_v2 = vpop.permute.xlu0 %6022  ;;  %v6013_v56 = vpop.permute.xlu1 %6012 }
0x12c8   : > { %v6025_v16 = vunpack.i.h.bf16 %v6023_v2  ;;  %v6024_v25 = vunpack.i.l.bf16 %v6023_v2  ;;  %v6015_v12 = vunpack.i.h.bf16 %v6013_v56  ;;  %v6014_v44 = vunpack.i.l.bf16 %v6013_v56  ;;  %v9913_v2 = vld [vmem:[#allocation30_spill] sm:$0xff] }
0x12ca   : > { %v4190_v34 = vsel %vm663_vm6, %v6025_v16, %v5909_v36  ;;  %v8986_v32 = vsel %vm663_vm6, %v6020_v28, %v6024_v25  ;;  %v4497_v5 = vpack.c.bf16 %v6024_v25, %v5905_v30  ;;  %v8989_v46 = vsel %vm695_vm4, %v6014_v44, %v6015_v12 }
0x12cb   : > { %v4492_v62 = vpack.c.bf16 %v8579_v17, %v4190_v34  ;;  %v4496_v33 = vpack.c.bf16 %v8986_v32, %v8973_v53  ;;  %v8996_v14 = vsel %vm695_vm4, %v6015_v12, %v8944_v10  ;;  %v5900_v36 = vunpack.i.h.bf16 %v8660_v42 }
0x12cc   : > { %4643 = vrot.lane.b32.xlu2 %v4497_v5, %s9716_s4  ;;  %v9912_v28 = vpack.c.bf16 %v8604_v15, %v9911_v43  ;;  %v9914_v16 = vunpack.i.l.bf16 %v8636_v50  ;;  %v9917_v43 = vld [vmem:[#allocation28_spill] sm:$0xff]  ;;  %v9950_v50 = vld [vmem:[#allocation33_spill] sm:$0xff] }
0x12cd   : > { %v4133_v57 = vpop.permute.xlu2 %4132  ;;  %4633 = vrot.lane.b32.xlu0 %v4492_v62, %s9716_s4  ;;  %v4139_v34 = vsel %vm790_vm12, %v9915_v4, %v5900_v36  ;;  %v9916_v62 = vld [vmem:[#allocation29_spill] sm:$0xff] }
0x12ce   : > { %v4491_v17 = vpack.c.bf16 %v4133_v57, %v5900_v36  ;;  %v9923_v36 = vld [vmem:[#allocation31_spill] sm:$0xff] }
0x12cf   : > { %v9005_v27 = vpop.permute.xlu1 %4635 }
0x12d5   : > { %v6038_v38 = vpop.permute.xlu2 %6037  ;;  %4623 = vrot.lane.b32.xlu0 %v9912_v28, %s9716_s4  ;;  %v9918_v28 = vld [vmem:[#allocation48_spill] sm:$0xff] }
0x12d6   : > { %v6040_v48 = vunpack.i.h.bf16 %v6038_v38 }
0x12d7   : > { %v9011_v51 = vpop.permute.xlu1 %4637 }
0x12d8   : > { %v4398_v30 = vsel %vm859_vm9, %v6040_v48, %v5924_v21  ;;  %v4516_v25 = vpack.c.bf16 %v9914_v16, %v6040_v48  ;;  %v9919_v48 = vpack.c.bf16 %v9917_v43, %v9918_v28 }
0x12d9   : > { %v4517_v56 = vpack.c.bf16 %v9913_v2, %v4398_v30  ;;  %v9920_v30 = vld [vmem:[#allocation35_spill] sm:$0xff]  ;;  %v9921_v2 = vld [vmem:[#allocation53_spill] sm:$0xff] }
0x12da   : > { %v9922_v42 = vpack.c.bf16 %v9920_v30, %v9921_v2  ;;  %v9925_v30 = vld [vmem:[#allocation52_spill] sm:$0xff] }
0x12db   : > { %4683 = vrot.lane.b32.xlu1 %v4517_v56, %s9716_s4  ;;  %v5920_v56 = vunpack.i.h.bf16 %v9923_v36  ;;  %v9926_v2 = vld [vmem:[#allocation36_spill] sm:$0xff] }
0x12dd   : > { %4681 = vrot.lane.b32.xlu0 %v4516_v25, %s9716_s4  ;;  %v9924_v25 = vld [vmem:[#allocation65_spill] sm:$0xff] }
0x12df   : > { %v6028_v12 = vpop.permute.xlu1 %6027 }
0x12e0   : > { %v6030_v44 = vunpack.i.h.bf16 %v6028_v12  ;;  %v6029_v15 = vunpack.i.l.bf16 %v6028_v12  ;;  %v5825_v12 = vunpack.i.h.bf16 %v9924_v25  ;;  %v9932_v25 = vld [vmem:[#allocation61_spill] sm:$0xff] }
0x12e2   : > { %v4141_v18 = vsel %vm790_vm12, %v6030_v44, %v4133_v57  ;;  %v9026_v21 = vsel %vm790_vm12, %v6029_v15, %v6030_v44  ;;  %v5919_v57 = vunpack.i.l.bf16 %v9923_v36  ;;  %v6039_v44 = vunpack.i.l.bf16 %v6038_v38  ;;  %v9928_v36 = vld [vmem:[#allocation43_spill] sm:$0xff] }
0x12e3   : > { %v4490_v5 = vpack.c.bf16 %v4141_v18, %v4139_v34  ;;  %4609 = vrot.lane.b32.xlu1 %v9919_v48, %s9716_s4  ;;  %v9936_v48 = vld [vmem:[#allocation51_spill] sm:$0xff]  ;;  %v5940_v38 = vunpack.i.h.bf16 %v9950_v50 }
0x12e4   : > { %v9042_v34 = vsel %vm859_vm9, %v5825_v12, %v5919_v57  ;;  %v9045_v18 = vsel %vm859_vm9, %v5919_v57, %v5920_v56  ;;  %v9929_v56 = vld [vmem:[#allocation42_spill] sm:$0xff]  ;;  %v9937_v23 = vpack.c.bf16 %v9935_v59, %v9936_v48  ;;  %v9673_v59 = vunpack.i.l.bf16 %v8939_v0 }
0x12e5   : > { %4671 = vrot.lane.b32.xlu0 %v9922_v42, %s9716_s4  ;;  %v9927_v42 = vpack.c.bf16 %v9925_v30, %v9926_v2  ;;  %v9930_v57 = vpack.c.bf16 %v9928_v36, %v9929_v56  ;;  %v9938_v30 = vld [vmem:[#allocation37_spill] sm:$0xff]  ;;  %v9939_v2 = vld [vmem:[#allocation50_spill] sm:$0xff]  ;;  %v9941_v36 = vld [vmem:[#allocation44_spill] sm:$0xff]  ;;  %v9944_v48 = vpack.c.bf16 %v8856_v39, %v8819_v13  ;;  %v9948_v39 = vpack.c.bf16 %v8863_v22, %v8823_v47 }
0x12e6   : > { %v9942_v56 = vld [vmem:[#allocation55_spill] sm:$0xff] }
0x12e7   : > { %v6033_v16 = vpop.permute.xlu1 %6032  ;;  %v9945_v13 = vld [vmem:[#allocation39_spill] sm:$0xff] }
0x12e8   : > { %v6035_v15 = vunpack.i.h.bf16 %v6033_v16  ;;  %v6034_v4 = vunpack.i.l.bf16 %v6033_v16  ;;  %v9931_v16 = vld [vmem:[#allocation47_spill] sm:$0xff] }
0x12ea   : > { %v9048_v43 = vsel %vm859_vm9, %v6035_v15, %v6039_v44  ;;  %v9051_v28 = vsel %vm859_vm9, %v6034_v4, %v6035_v15  ;;  %v9933_v44 = vld [vmem:[#allocation46_spill] sm:$0xff] }
0x12eb   : > { %4673 = vrot.lane.b32.xlu1 %v9927_v42, %s9716_s4  ;;  %v9934_v15 = vpack.c.bf16 %v9932_v25, %v9933_v44  ;;  %v9940_v42 = vpack.c.bf16 %v9938_v30, %v9939_v2  ;;  %v9674_v25 = vunpack.i.l.bf16 %v8942_v63  ;;  %v4485_v44 = vpack.c.bf16 %v8944_v10, %v5880_v49 }
0x12ed   : > { %4695 = vrot.lane.b32.xlu0 %v9930_v57, %s9716_s4  ;;  %v9943_v57 = vpack.i.bf16 %v9941_v36, %v9942_v56 }
0x12f3   : > { %4613 = vrot.lane.b32.xlu1 %v9931_v16, %s9716_s4  ;;  %v9676_v16 = vunpack.i.h.bf16 %v8942_v63 }
0x12f5   : > { %4597 = vrot.lane.b32.xlu0 %v9934_v15, %s9716_s4  ;;  %v4236_v24 = vsel %vm647_vm11, %v9674_v25, %v9676_v16  ;;  %v9124_v15 = vpop.permute.xlu2 %4685  ;;  %v9951_v16 = vld [vmem:[#allocation32_spill] sm:$0xff] }
0x12fb   : > { %4599 = vrot.lane.b32.xlu1 %v9937_v23, %s9716_s4  ;;  %v9675_v23 = vunpack.i.h.bf16 %v8939_v0 }
0x12fd   : > { %4661 = vrot.lane.b32.xlu0 %v9940_v42, %s9716_s4  ;;  %v4237_v31 = vsel %vm647_vm11, %v9673_v59, %v9675_v23  ;;  %v9131_v47 = vpop.permute.xlu2 %4625 }
0x12fe   : > { %v4502_v19 = vpack.c.bf16 %v4237_v31, %v4236_v24  ;;  %v9949_v24 = vld [vmem:[#allocation34_spill] sm:$0xff] }
0x1303   : > { %6042 = vrot.lane.b32.xlu1 %v9943_v57, %s9729_s24 }
0x1305   : > { %6062 = vrot.lane.b32.xlu0 %v6061_v54, %s9728_s27  ;;  %v9947_v54 = vpack.c.bf16 %v9945_v13, %v9946_v1  ;;  %v5934_v13 = vunpack.i.l.bf16 %v9949_v24 }
0x130b   : > { %6052 = vrot.lane.b32.xlu1 %v6051_v61, %s9730_s26  ;;  %v4519_v61 = vpack.c.bf16 %v6034_v4, %v5825_v12 }
0x130d   : > { %4603 = vrot.lane.b32.xlu0 %v9944_v48, %s9716_s4 }
0x1313   : > { %4605 = vrot.lane.b32.xlu1 %v9947_v54, %s9716_s4 }
0x1315   : > { %4653 = vrot.lane.b32.xlu0 %v4502_v19, %s9716_s4  ;;  %v5935_v19 = vunpack.i.h.bf16 %v9949_v24  ;;  %v5939_v24 = vunpack.i.l.bf16 %v9950_v50 }
0x1317   : > { %v4458_v35 = vsel %vm874_vm7, %v5939_v24, %v5940_v38 }
0x131b   : > { %4607 = vrot.lane.b32.xlu1 %v9948_v39, %s9716_s4 }
0x131d   : > { %4631 = vrot.lane.b32.xlu0 %v4491_v17, %s9716_s4  ;;  %v9135_v17 = vpop.permute.xlu2 %4611 }
0x1323   : > { %4687 = vrot.lane.b32.xlu1 %v4519_v61, %s9716_s4  ;;  %v4346_v61 = vsel %vm844_vm8, %v5934_v13, %v5935_v19 }
0x1325   : > { %v9145_v4 = vpop.permute.xlu2 %4693 }
0x132b   : > { %4619 = vrot.lane.b32.xlu1 %v4485_v44, %s9716_s4 }
0x1333   : > { %4641 = vrot.lane.b32.xlu1 %v4496_v33, %s9716_s4  ;;  %v9151_v33 = vpop.permute.xlu2 %4669 }
0x133b   : > { %4629 = vrot.lane.b32.xlu1 %v4490_v5, %s9716_s4  ;;  %v9159_v42 = vpop.permute.xlu2 %4659 }
0x133f   : > { %v9133_v22 = vpop.permute.xlu0 %4633 }
0x1343   : > { %v6048_v48 = vpop.permute.xlu2 %6047 }
0x1344   : > { %v6049_v54 = vunpack.i.l.bf16 %v6048_v48 }
0x1347   : > { %v9137_v37 = vpop.permute.xlu0 %4623 }
0x134d   : > { %v9139_v10 = vpop.permute.xlu1 %4683 }
0x134f   : > { %v4682_v49 = vpop.permute.xlu0 %4681 }
0x1350   : > { %v9143_v12 = vsel %vm759_vm5, %v4682_v49, %v9139_v10 }
0x1355   : > { %v9147_v53 = vpop.permute.xlu1 %4609 }
0x1357   : > { %v9149_v32 = vpop.permute.xlu0 %4671 }
0x135d   : > { %v4674_v5 = vpop.permute.xlu1 %4673 }
0x135e   : > { %v9155_v30 = vsel %vm759_vm5, %v9149_v32, %v4674_v5  ;;  %v9173_v5 = vpop.permute.xlu2 %6057 }
0x135f   : > { %v9157_v2 = vpop.permute.xlu0 %4695  ;;  %v6060_v26 = vunpack.i.h.bf16 %v9173_v5 }
0x1365   : > { %v9161_v36 = vpop.permute.xlu1 %4613 }
0x1367   : > { %v9163_v56 = vpop.permute.xlu0 %4597 }
0x136d   : > { %v9165_v57 = vpop.permute.xlu1 %4599 }
0x136f   : > { %v9167_v31 = vpop.permute.xlu0 %4661 }
0x1375   : > { %v6043_v1 = vpop.permute.xlu1 %6042 }
0x1376   : > { %v6045_v39 = vunpack.i.h.bf16 %v6043_v1 }
0x1377   : > { %v9176_v25 = vpop.permute.xlu0 %6062 }
0x1378   : > { %v4513_v44 = vpack.c.bf16 %v6045_v39, %v5934_v13  ;;  %v4348_v49 = vsel %vm844_vm8, %v6045_v39, %v6049_v54  ;;  %v5969_v13 = vunpack.i.l.bf16 %v9951_v16 }
0x1379   : > { %v4514_v59 = vpack.c.bf16 %v4348_v49, %v4346_v61 }
0x137a   : > { %4675 = vrot.lane.b32.xlu2 %v4513_v44, %s9716_s4  ;;  %v4507_v61 = vpack.c.bf16 %v6060_v26, %v5969_v13 }
0x137b   : > { %4677 = vrot.lane.b32.xlu1 %v4514_v59, %s9716_s4 }
0x137d   : > { %v6053_v23 = vpop.permute.xlu1 %6052 }
0x137e   : > { %v6055_v9 = vunpack.i.h.bf16 %v6053_v23  ;;  %v6054_v39 = vunpack.i.l.bf16 %v6053_v23  ;;  %v9952_v23 = vunpack.i.h.bf16 %v8942_v63 }
0x137f   : > { %v4604_v50 = vpop.permute.xlu0 %4603 }
0x1380   : > { %v4460_v44 = vsel %vm874_vm7, %v6054_v39, %v6055_v9  ;;  %v4525_v49 = vpack.c.bf16 %v6054_v39, %v5939_v24  ;;  %v4503_v20 = vpack.c.bf16 %v9953_v45, %v9952_v23  ;;  %v9954_v24 = vpack.c.bf16 %v8960_v3, %v8957_v6 }
0x1381   : > { %v4526_v55 = vpack.c.bf16 %v4460_v44, %v4458_v35  ;;  %v5994_v35 = vunpack.i.l.bf16 %v8954_v60  ;;  %v6000_v39 = vunpack.i.h.bf16 %v8952_v40  ;;  %v5999_v45 = vunpack.i.l.bf16 %v8952_v40 }
0x1382   : > { %4699 = vrot.lane.b32.xlu0 %v4525_v49, %s9716_s4  ;;  %4663 = vrot.lane.b32.xlu2 %v4507_v61, %s9716_s4  ;;  %v6068_v49 = vpop.permute.xlu2 %6067  ;;  %v6050_v40 = vunpack.i.h.bf16 %v6048_v48 }
0x1383   : > { %4701 = vrot.lane.b32.xlu1 %v4526_v55, %s9716_s4  ;;  %v9955_v55 = vpack.c.bf16 %v9051_v28, %v9042_v34  ;;  %v4234_v44 = vsel %vm647_vm11, %v5994_v35, %v5995_v52  ;;  %v4235_v6 = vsel %vm647_vm11, %v5999_v45, %v6000_v39  ;;  %v9956_v34 = vpack.c.bf16 %v9026_v21, %v9916_v62 }
0x1384   : > { %v4499_v3 = vpack.c.bf16 %v4235_v6, %v4234_v44  ;;  %v6070_v28 = vunpack.i.h.bf16 %v6068_v49 }
0x1385   : > { %v4606_v59 = vpop.permute.xlu1 %4605 }
0x1386   : > { %v9189_v8 = vsel %vm759_vm5, %v4604_v50, %v4606_v59  ;;  %v6044_v50 = vunpack.i.l.bf16 %v6043_v1  ;;  %v4461_v1 = vsel %vm874_vm7, %v6055_v9, %v6070_v28 }
0x1388   : > { %v4347_v23 = vsel %vm844_vm8, %v5935_v19, %v6044_v50 }
0x138a   : > { %4639 = vrot.lane.b32.xlu0 %v9954_v24, %s9716_s4  ;;  %4689 = vrot.lane.b32.xlu2 %v9955_v55, %s9716_s4  ;;  %v4349_v55 = vsel %vm844_vm8, %v6049_v54, %v6050_v40  ;;  %v3937_v54 = vld [vmem:[%s9513_s17] sm:$0xff] }
0x138b   : > { %4655 = vrot.lane.b32.xlu1 %v4503_v20, %s9716_s4  ;;  %v9957_v20 = vpack.c.bf16 %v8989_v46, %v8632_v11  ;;  %v4515_v62 = vpack.c.bf16 %v4349_v55, %v4347_v23  ;;  %v9958_v11 = vpack.c.bf16 %v9048_v43, %v9045_v18  ;;  %v5970_v46 = vunpack.i.h.bf16 %v9951_v16  ;;  %v9248_v16 = vpop.permute.xlu0 %4653  ;;  %v9963_v23 = vld [vmem:[#allocation49_spill] sm:$0xff] }
0x138c   : > { %v6065_v18 = vunpack.i.h.bf16 %v9176_v25  ;;  %v9959_v43 = vpack.c.bf16 %v8996_v14, %v8980_v7  ;;  %v9960_v7 = vld [vmem:[#allocation64_spill] sm:$0xff]  ;;  %v9961_v14 = vld [vmem:[#allocation63_spill] sm:$0xff]  ;;  %v4498_v55 = vpack.c.bf16 %v5999_v45, %v5994_v35  ;;  %v4729_v45 = vsel %vm759_vm5, %v9151_v33, %v9149_v32 }
0x138d   : > { %v4608_v61 = vpop.permute.xlu1 %4607 }
0x138e   : > { %v9210_v60 = vsel %vm759_vm5, %v4606_v59, %v4608_v61  ;;  %v6069_v59 = vunpack.i.l.bf16 %v6068_v49  ;;  %v6064_v61 = vunpack.i.l.bf16 %v9176_v25 }
0x1390   : > { %v4459_v21 = vsel %vm874_vm7, %v5940_v38, %v6069_v59  ;;  %v4292_v9 = vsel %vm829_vm10, %v6060_v26, %v6064_v61  ;;  %v4290_v38 = vsel %vm829_vm10, %v5969_v13, %v5970_v46  ;;  %v6059_v26 = vunpack.i.l.bf16 %v9173_v5  ;;  %v4644_v13 = vpop.permute.xlu2 %4643 }
0x1391   : > { %v4527_v44 = vpack.c.bf16 %v4461_v1, %v4459_v21  ;;  %v4508_v19 = vpack.c.bf16 %v4292_v9, %v4290_v38  ;;  %v4293_v6 = vsel %vm829_vm10, %v6064_v61, %v6065_v18  ;;  %v4718_v5 = vsel %vm759_vm5, %v9005_v27, %v9011_v51 }
0x1392   : > { %4627 = vrot.lane.b32.xlu0 %v9956_v34, %s9716_s4  ;;  %4615 = vrot.lane.b32.xlu2 %v9957_v20, %s9716_s4  ;;  %v4291_v25 = vsel %vm829_vm10, %v5970_v46, %v6059_v26  ;;  %v9962_v34 = vpack.c.bf16 %v9960_v7, %v9961_v14  ;;  %v4500_v59 = vpack.c.bf16 %v6000_v39, %v5995_v52  ;;  %v9964_v51 = vunpack.i.l.bf16 %v8942_v63  ;;  %v9966_v52 = vld [vmem:[#allocation38_spill] sm:$0xff] }
0x1393   : > { %4647 = vrot.lane.b32.xlu1 %v4499_v3, %s9716_s4  ;;  %v4509_v50 = vpack.c.bf16 %v4293_v6, %v4291_v25  ;;  %v4632_v20 = vpop.permute.xlu0 %4631  ;;  %v4714_v1 = vsel %vm759_vm5, %v9137_v37, %v9131_v47  ;;  %v9965_v21 = vunpack.i.l.bf16 %v8939_v0  ;;  %v9967_v39 = vld [vmem:[#allocation54_spill] sm:$0xff] }
0x1394   : > { %v9968_v61 = vpack.c.bf16 %v9966_v52, %v9967_v39 }
0x1395   : > { %v4688_v24 = vpop.permute.xlu1 %4687 }
0x139a   : > { %4691 = vrot.lane.b32.xlu0 %v9958_v11, %s9716_s4  ;;  %4679 = vrot.lane.b32.xlu2 %v4515_v62, %s9716_s4  ;;  %v4501_v62 = vpack.c.bf16 %v9965_v21, %v9964_v51 }
0x139b   : > { %4703 = vrot.lane.b32.xlu1 %v4527_v44, %s9716_s4 }
0x139d   : > { %v9235_v48 = vpop.permute.xlu1 %4619 }
0x13a2   : > { %4617 = vrot.lane.b32.xlu0 %v9959_v43, %s9716_s4  ;;  %4665 = vrot.lane.b32.xlu2 %v4508_v19, %s9716_s4  ;;  %v3936_v43 = vld [vmem:[%s9512_s16 + $0x8] sm:$0xf] }
0x13a3   : > { %4530 = vperm.xlu1 %5368, %v3937_v54   ;;  %v4537_v26 = vunpack.c.l.b16 %v3936_v43  ;;  %v9970_v43 = vld [vmem:[#allocation3_spill] sm:$0xff] }
0x13a5   : > { %v4642_v3 = vpop.permute.xlu1 %4641 }
0x13a6   : > { %v4720_v49 = vsel %vm759_vm5, %v4642_v3, %v4644_v13  ;;  %v9293_v13 = vpack.c.b16 %v4537_v26, %v4537_v26 }
0x13a7   : > { %4819 = vmatpush.bf16.msra.mxu3 %v4720_v49 }
0x13aa   : > { %4667 = vrot.lane.b32.xlu0 %v4509_v50, %s9716_s4  ;;  %4601 = vrot.lane.b32.xlu2 %v9962_v34, %s9716_s4 }
0x13ab   : > { %4820 = vmatpush.bf16.msra.mxu3 %v4718_v5 }
0x13ad   : > { %v4630_v40 = vpop.permute.xlu1 %4629 }
0x13ae   : > { %v4716_v28 = vsel %vm759_vm5, %v4630_v40, %v4632_v20 }
0x13af   : > { %4821 = vmatpush.bf16.msra.mxu3 %v4716_v28 }
0x13b2   : > { %4657 = vrot.lane.b32.xlu0 %v9963_v23, %s9716_s4  ;;  %4649 = vrot.lane.b32.xlu2 %v4500_v59, %s9716_s4 }
0x13b3   : > { %4822 = vmatpush.bf16.msra.mxu3 %v4714_v1 }
0x13ba   : > { %4651 = vrot.lane.b32.xlu0 %v4501_v62, %s9716_s4  ;;  %4645 = vrot.lane.b32.xlu2 %v4498_v55, %s9716_s4 }
0x13c2   : > { %4697 = vrot.lane.b32.xlu0 %v9968_v61, %s9716_s4 }
0x13d4   : > { %v4676_v44 = vpop.permute.xlu2 %4675 }
0x13dc   : > { %v4664_v11 = vpop.permute.xlu2 %4663 }
0x13e4   : > { %v4690_v46 = vpop.permute.xlu2 %4689 }
0x13e5   : > { %v4735_v47 = vsel %vm759_vm5, %v4688_v24, %v4690_v46 }
0x13e6   : > { %4793 = vmatpush.bf16.msrb.mxu1 %v4735_v47 }
0x13ea   : > { %4794 = vmatpush.bf16.msrb.mxu1 %v9143_v12  ;;  %v4737_v12 = vsel %vm759_vm5, %v9145_v4, %v9157_v2  ;;  %v4717_v4 = vsel %vm759_vm5, %v9133_v22, %v9005_v27  ;;  %v4734_v27 = vsel %vm759_vm5, %v9139_v10, %v9124_v15  ;;  %v4710_v15 = vsel %vm759_vm5, %v9135_v17, %v9161_v36 }
0x13ec   : > { %v4616_v63 = vpop.permute.xlu2 %4615 }
0x13ed   : > { %v4678_v0 = vpop.permute.xlu1 %4677 }
0x13ee   : > { %v4731_v35 = vsel %vm759_vm5, %v4676_v44, %v4678_v0 }
0x13ef   : > { %4795 = vmatpush.bf16.msrb.mxu1 %v4731_v35 }
0x13f3   : > { %4796 = vmatpush.bf16.msrb.mxu1 %v4729_v45 }
0x13f4   : > { %v4700_v9 = vpop.permute.xlu0 %4699  ;;  %v4680_v38 = vpop.permute.xlu2 %4679 }
0x13f5   : > { %v4702_v19 = vpop.permute.xlu1 %4701 }
0x13f6   : > { %v4739_v54 = vsel %vm759_vm5, %v4700_v9, %v4702_v19 }
0x13f7   : > { %4812 = vmatpush.bf16.msra.mxu2 %v4739_v54 }
0x13fb   : > { %4813 = vmatpush.bf16.msra.mxu2 %v4737_v12 }
0x13fc   : > { %v4640_v24 = vpop.permute.xlu0 %4639  ;;  %v4666_v18 = vpop.permute.xlu2 %4665 }
0x13fd   : > { %v4719_v32 = vsel %vm759_vm5, %v4640_v24, %v4642_v3  ;;  %v4727_v33 = vsel %vm759_vm5, %v4664_v11, %v4666_v18  ;;  %v4713_v3 = vsel %vm759_vm5, %v8970_v29, %v9137_v37  ;;  %v4656_v25 = vpop.permute.xlu1 %4655  ;;  %v4732_v29 = vsel %vm759_vm5, %v4678_v0, %v4680_v38  ;;  %v9969_v24 = vld [vmem:[#allocation8_spill] sm:$0xff] }
0x13fe   : > { %4780 = vmatpush.bf16.msrb.mxu0 %v4719_v32  ;;  %4797 = vmatpush.bf16.msrb.mxu1 %v4727_v33  ;;  %v4709_v37 = vsel %vm759_vm5, %v9147_v53, %v9135_v17  ;;  %v4705_v17 = vsel %vm759_vm5, %v9163_v56, %v9165_v57  ;;  %v9971_v33 = vld [vmem:[#allocation9_spill] sm:$0xff] }
0x13ff   : > { %5286 = vmatmul.msk.bf16.vlgmr.msra.gmra.mxu2 %vm2535_vm0, %v9293_v13 }
0x1402   : > { %4781 = vmatpush.bf16.msrb.mxu0 %v4717_v4 }
0x1404   : > { %v4628_v6 = vpop.permute.xlu0 %4627  ;;  %v4602_v10 = vpop.permute.xlu2 %4601 }
0x1405   : > { %v4715_v49 = vsel %vm759_vm5, %v4628_v6, %v4630_v40  ;;  %v4648_v14 = vpop.permute.xlu1 %4647  ;;  %v4706_v36 = vsel %vm759_vm5, %v9165_v57, %v4602_v10  ;;  %v4724_v57 = vsel %vm759_vm5, %v9248_v16, %v4656_v25  ;;  %v9977_v10 = vld [vmem:[#allocation12_spill] sm:$0xff] }
0x1406   : > { %4782 = vmatpush.bf16.msrb.mxu0 %v4715_v49 }
0x140a   : > { %4783 = vmatpush.bf16.msrb.mxu0 %v4713_v3  ;;  %v9972_v3 = vld [vmem:[#allocation19_spill] sm:$0xff] }
0x140c   : > { %v4692_v50 = vpop.permute.xlu0 %4691 }
0x140d   : > { %v4736_v7 = vsel %vm759_vm5, %v4690_v46, %v4692_v50  ;;  %v4704_v53 = vpop.permute.xlu1 %4703  ;;  %v9973_v50 = vld [vmem:[#allocation2_spill] sm:$0xff] }
0x140e   : > { %4832 = vmatpush.bf16.msrb.mxu2 %v4736_v7 }
0x1412   : > { %4833 = vmatpush.bf16.msrb.mxu2 %v4734_v27  ;;  %v9974_v27 = vld [vmem:[#allocation6_spill] sm:$0xff] }
0x1414   : > { %v4618_v22 = vpop.permute.xlu0 %4617 }
0x1415   : > { %v4711_v34 = vsel %vm759_vm5, %v4616_v63, %v4618_v22  ;;  %v4712_v5 = vsel %vm759_vm5, %v4618_v22, %v9235_v48  ;;  %v3935_v48 = vld [vmem:[%s9512_s16] sm:$0xff]  ;;  %v4531_v47 = vpop.permute.xlu1 %4530 }
0x1416   : > { %4784 = vmatpush.bf16.msrb.mxu0 %v4711_v34  ;;  %4823 = vmatpush.bf16.msra.mxu3 %v4712_v5  ;;  %v4535_v28 = vunpack.c.l.b16 %v3935_v48  ;;  %v4536_v1 = vunpack.c.h.b16 %v3935_v48 }
0x1417   : > { %4834 = vmatpush.bf16.msrb.mxu2 %v4732_v29 }
0x1418   : > { %v4538_v59 = vpack.c.b16 %v4535_v28, %v4535_v28  ;;  %v4539_v55 = vpack.c.b16 %v4536_v1, %v4536_v1  ;;  %v9983_v1 = vld [vmem:[#allocation22_spill] sm:$0xff] }
0x141a   : > { %4785 = vmatpush.bf16.msrb.mxu0 %v4709_v37  ;;  %4824 = vmatpush.bf16.msra.mxu3 %v4710_v15 }
0x141b   : > { %4835 = vmatpush.bf16.msrb.mxu2 %v9155_v30  ;;  %v4740_v30 = vsel %vm759_vm5, %v4702_v19, %v4704_v53 }
0x141c   : > { %v4668_v20 = vpop.permute.xlu0 %4667 }
0x141d   : > { %v4728_v40 = vsel %vm759_vm5, %v4666_v18, %v4668_v20  ;;  %v9978_v20 = vld [vmem:[#allocation13_spill] sm:$0xff] }
0x141e   : > { %4786 = vmatpush.bf16.msrb.mxu0 %v9189_v8  ;;  %4825 = vmatpush.bf16.msra.mxu3 %v9210_v60  ;;  %v4726_v8 = vsel %vm759_vm5, %v9159_v42, %v9167_v31  ;;  %v4650_v60 = vpop.permute.xlu2 %4649 }
0x141f   : > { %4836 = vmatpush.bf16.msrb.mxu2 %v4728_v40  ;;  %v4722_v51 = vsel %vm759_vm5, %v4648_v14, %v4650_v60 }
0x1422   : > { %4787 = vmatpush.bf16.msrb.mxu0 %v4705_v17  ;;  %4826 = vmatpush.bf16.msra.mxu3 %v4706_v36  ;;  %v9979_v17 = vld [vmem:[#allocation7_spill] sm:$0xff] }
0x1423   : > { %4837 = vmatpush.bf16.msrb.mxu2 %v4726_v8  ;;  %v9981_v8 = vld [vmem:[#allocation15_spill] sm:$0xff] }
0x1424   : > { %v4658_v23 = vpop.permute.xlu0 %4657 }
0x1425   : > { %4788 = vmatmul.bf16.vlgmr.msrb.gmra.mxu0 %v4538_v59  ;;  %4827 = vmatmul.bf16.vlgmr.msra.gmra.mxu3 %v4538_v59  ;;  %v4725_v56 = vsel %vm759_vm5, %v4658_v23, %v9159_v42  ;;  %v9980_v59 = vld [vmem:[#allocation20_spill] sm:$0xff]  ;;  %v9982_v23 = vld [vmem:[#allocation18_spill] sm:$0xff] }
0x1426   : > { %4851 = vmatpush.bf16.msra.mxu0 %v4740_v30  ;;  %4798 = vmatpush.bf16.msrb.mxu1 %v4725_v56  ;;  %v4646_v62 = vpop.permute.xlu2 %4645 }
0x1427   : > { %4838 = vmatpush.bf16.msrb.mxu2 %v4724_v57  ;;  %v4721_v52 = vsel %vm759_vm5, %v4646_v62, %v4648_v14  ;;  %v9975_v14 = vld [vmem:[#allocation5_spill] sm:$0xff] }
0x142b   : > { %4839 = vmatpush.bf16.msrb.mxu2 %v4722_v51 }
0x142c   : > { %v4652_v31 = vpop.permute.xlu0 %4651 }
0x142d   : > { %v4723_v21 = vsel %vm759_vm5, %v4652_v31, %v9248_v16 }
0x142e   : > { %4840 = vmatmul.bf16.vlgmr.msrb.gmra.mxu2 %v4539_v55  ;;  %4799 = vmatpush.bf16.msrb.mxu1 %v4723_v21 }
0x1432   : > { %4800 = vmatpush.bf16.msrb.mxu1 %v4721_v52  ;;  %v9985_v52 = vld [vmem:[#allocation16_spill] sm:$0xff] }
0x1434   : > { %v4698_v42 = vpop.permute.xlu0 %4697 }
0x1435   : > { %4801 = vmatmul.bf16.vlgmr.msrb.gmra.mxu1 %v4539_v55  ;;  %v4738_v39 = vsel %vm759_vm5, %v9157_v2, %v4698_v42  ;;  %v9984_v55 = vld [vmem:[#allocation17_spill] sm:$0xff] }
0x1436   : > { %4852 = vmatpush.bf16.msra.mxu0 %v4738_v39  ;;  %v9986_v39 = vld [vmem:[#allocation21_spill] sm:$0xff] }
0x1439   : > { %5287 = vmatmul.msk.bf16.vlgmr.msra.gmra.mxu0 %vm2535_vm0, %v9293_v13 }
0x1482   : > { %v4815_v61 = vpop.f32.mrf.mxu2 }
0x148a   : > { %v4817_v44 = vpop.f32.mrf.mxu2 }
0x148b   : > { %v9987_v44 = vld [vmem:[#allocation4_spill] sm:$0xff] }
0x14a2   : > { %v4789_v11 = vpop.f32.mrf.mxu0 }
0x14a3   : > { %v4790_v0 = vadd.f32 %v4789_v11, %v4531_v47 }
0x14a8   : > { %v4828_v46 = vpop.f32.mrf.mxu3 }
0x14a9   : > { %v4829_v9 = vadd.f32 %v4828_v46, %v4531_v47 }
0x14aa   : > { %v4791_v16 = vpop.f32.mrf.mxu0 }
0x14b0   : > { %v4830_v63 = vpop.f32.mrf.mxu3 }
0x14b1   : > { %v4841_v35 = vpop.f32.mrf.mxu2 }
0x14b2   : > { %v4802_v45 = vpop.f32.mrf.mxu1  ;;  %v4842_v19 = vadd.f32 %v4841_v35, %v4829_v9 }
0x14b3   : > { %v4803_v38 = vadd.f32 %v4802_v45, %v4790_v0 }
0x14b5   : > { %v9346_v54 = vadd.f32 %v4815_v61, %v4803_v38 }
0x14b6   : > { %v4854_v2 = vpop.f32.mrf.mxu0 }
0x14b7   : > { %v9348_v12 = vadd.f32 %v4854_v2, %v4842_v19  ;;  %v4881_v18 = vmul.f32 %v9346_v54, %v9969_v24  ;;  %v4878_v32 = vmul.f32 %v9346_v54, %v9970_v43  ;;  %v4875_v26 = vmul.f32 %v9346_v54, %v9971_v33 }
0x14b8   : > { %v4876_v7 = vmul.f32 %v9346_v54, %v9973_v50  ;;  %v4873_v22 = vmul.f32 %v9346_v54, %v9974_v27  ;;  %v4879_v34 = vmul.f32 %v9346_v54, %v9975_v14  ;;  %v4870_v48 = vmul.f32 %v9346_v54, %v9977_v10 }
0x14b9   : > { %4983 = vrot.lane.b32.xlu0 %v4881_v18, %s9730_s26  ;;  %4969 = vrot.lane.b32.xlu1 %v4878_v32, %s9756_s23  ;;  %v4843_v13 = vpop.f32.mrf.mxu2  ;;  %v4877_v6 = vmul.f32 %v9348_v12, %v9883_v58  ;;  %v4874_v49 = vmul.f32 %v9348_v12, %v9885_v41  ;;  %v4880_v25 = vmul.f32 %v9348_v12, %v9972_v3  ;;  %v9976_v41 = vld [vmem:[#allocation14_spill] sm:$0xff] }
0x14ba   : > { %4955 = vrot.lane.b32.xlu2 %v4875_v26, %s9729_s24  ;;  %v4804_v4 = vpop.f32.mrf.mxu1  ;;  %v4871_v58 = vmul.f32 %v9348_v12, %v9976_v41  ;;  %v4872_v40 = vmul.f32 %v9346_v54, %v9978_v20  ;;  %v6076_v53 = vpack.i.bf16 %v9348_v12, %v9346_v54  ;;  %v4869_v36 = vmul.f32 %v9348_v12, %v9979_v17 }
0x14bb   : > { %v6086_v29 = vpack.i.bf16 %v4877_v6, %v4876_v7  ;;  %v6081_v37 = vpack.i.bf16 %v4874_v49, %v4873_v22  ;;  %v6071_v15 = vpack.i.bf16 %v4880_v25, %v4879_v34  ;;  %v4863_v30 = vmul.f32 %v9348_v12, %v9980_v59 }
0x14bc   : > { %v6091_v28 = vpack.i.bf16 %v4871_v58, %v4870_v48  ;;  %v4866_v60 = vmul.f32 %v9348_v12, %v9981_v8  ;;  %v4868_v56 = vmul.f32 %v9346_v54, %v9982_v23  ;;  %v4862_v57 = vmul.f32 %v9346_v54, %v9983_v1 }
0x14bd   : > { %v4865_v51 = vmul.f32 %v9346_v54, %v9984_v55  ;;  %v4867_v42 = vmul.f32 %v9348_v12, %v9985_v52  ;;  %v4861_v61 = vmul.f32 %v9348_v12, %v9986_v39  ;;  %v4864_v11 = vmul.f32 %v9348_v12, %v9987_v44  ;;  %v3943_v44 = vld [vmem:[%s9515_s19 + $0x8] sm:$0xff] }
0x14be   : > { %v4856_v5 = vpop.f32.mrf.mxu0  ;;  %v6101_v31 = vpack.i.bf16 %v4869_v36, %v4868_v56  ;;  %v6106_v21 = vpack.i.bf16 %v4863_v30, %v4862_v57 }
0x14bf   : > { %v6096_v62 = vpack.i.bf16 %v4866_v60, %v4865_v51  ;;  %v9988_v51 = vld [vmem:[#allocation25_spill] sm:$0xff] }
0x14c1   : > { %6087 = vrot.lane.b32.xlu0 %v6086_v29, %s9756_s23  ;;  %6082 = vrot.lane.b32.xlu1 %v6081_v37, %s9729_s24 }
0x14c2   : > { %6072 = vrot.lane.b32.xlu2 %v6071_v15, %s9730_s26 }
0x14c9   : > { %4941 = vrot.lane.b32.xlu1 %v4872_v40, %s9728_s27  ;;  %6092 = vrot.lane.b32.xlu0 %v6091_v28, %s9728_s27 }
0x14ca   : > { %6077 = vrot.lane.b32.xlu2 %v6076_v53, %s9731_s3 }
0x14d1   : > { %6102 = vrot.lane.b32.xlu0 %v6101_v31, %s9723_s25  ;;  %6107 = vrot.lane.b32.xlu1 %v6106_v21, %s9715_s30  ;;  %v4859_v31 = vmul.f32 %v9346_v54, %v9988_v51 }
0x14d2   : > { %6097 = vrot.lane.b32.xlu2 %v6096_v62, %s9725_s29 }
0x14d9   : > { %4913 = vrot.lane.b32.xlu0 %v4867_v42, %s9723_s25  ;;  %4885 = vrot.lane.b32.xlu1 %v4861_v61, %s9715_s30 }
0x14da   : > { %4899 = vrot.lane.b32.xlu2 %v4864_v11, %s9725_s29  ;;  %v9989_v11 = vld [vmem:[#allocation24_spill] sm:$0xff]  ;;  %s9483_s29 = scalar_lea.vmem %s9516_s20, %s5303_s0 }
0x14db   : > { %v4858_v54 = vmul.f32 %v9348_v12, %v9989_v11 }
0x1514   : > { %v4956_v46 = vpop.permute.xlu2 %4955 }
0x151c   : > { %v6073_v16 = vpop.permute.xlu2 %6072 }
0x151d   : > { %v6075_v47 = vunpack.i.h.bf16 %v6073_v16  ;;  %v6074_v63 = vunpack.i.l.bf16 %v6073_v16 }
0x151f   : > { %v4985_v0 = vsel %vm874_vm7, %v6074_v63, %v6075_v47  ;;  %v5002_v35 = vpack.c.bf16 %v6074_v63, %v6074_v63 }
0x1520   : > { %v5003_v45 = vpack.c.bf16 %v4985_v0, %v4985_v0 }
0x1521   : > { %5074 = vrot.lane.b32.xlu0 %v5002_v35, %s9716_s4  ;;  %v3944_v35 = vld [vmem:[%s9515_s19 + $0x10] sm:$0xff] }
0x1522   : > { %5076 = vrot.lane.b32.xlu2 %v5003_v45, %s9716_s4  ;;  %v3942_v45 = vld [vmem:[%s9515_s19] sm:$0xff] }
0x1524   : > { %v6078_v13 = vpop.permute.xlu2 %6077 }
0x1525   : > { %v6080_v25 = vunpack.i.h.bf16 %v6078_v13  ;;  %v6079_v50 = vunpack.i.l.bf16 %v6078_v13 }
0x1527   : > { %v4930_v34 = vsel %vm647_vm11, %v6079_v50, %v6080_v25 }
0x152b   : > { %v4984_v9 = vpop.permute.xlu0 %4983  ;;  %v4970_v38 = vpop.permute.xlu1 %4969 }
0x152c   : > { %v4986_v19 = vsel %vm874_vm7, %v6075_v47, %v4984_v9  ;;  %v6098_v37 = vpop.permute.xlu2 %6097  ;;  %v9990_v47 = vld [vmem:[#allocation23_spill] sm:$0xff]  ;;  %v3945_v9 = vld [vmem:[%s9515_s19 + $0x18] sm:$0xff] }
0x152d   : > { %v5004_v2 = vpack.c.bf16 %v4986_v19, %v4986_v19  ;;  %v6100_v41 = vunpack.i.h.bf16 %v6098_v37  ;;  %v6099_v58 = vunpack.i.l.bf16 %v6098_v37  ;;  %v4860_v63 = vmul.f32 %v9348_v12, %v9990_v47 }
0x152f   : > { %5078 = vrot.lane.b32.xlu0 %v5004_v2, %s9716_s4  ;;  %v4906_v28 = vsel %vm790_vm12, %v6099_v58, %v6100_v41 }
0x1533   : > { %v6088_v24 = vpop.permute.xlu0 %6087  ;;  %v6083_v18 = vpop.permute.xlu1 %6082 }
0x1534   : > { %v6090_v43 = vunpack.i.h.bf16 %v6088_v24  ;;  %v6089_v32 = vunpack.i.l.bf16 %v6088_v24  ;;  %v6085_v33 = vunpack.i.h.bf16 %v6083_v18  ;;  %v6084_v26 = vunpack.i.l.bf16 %v6083_v18  ;;  %v4900_v8 = vpop.permute.xlu2 %4899 }
0x1535   : > { %v4905_v1 = vsel %vm790_vm12, %v4900_v8, %v6099_v58 }
0x1536   : > { %v4971_v4 = vsel %vm859_vm9, %v6089_v32, %v6090_v43  ;;  %v4957_v6 = vsel %vm844_vm8, %v6084_v26, %v6085_v33  ;;  %v4999_v49 = vpack.c.bf16 %v6089_v32, %v6084_v26  ;;  %v4972_v60 = vsel %vm859_vm9, %v6090_v43, %v4970_v38 }
0x1537   : > { %v5000_v3 = vpack.c.bf16 %v4971_v4, %v4957_v6  ;;  %v4958_v23 = vsel %vm844_vm8, %v6085_v33, %v4956_v46 }
0x1538   : > { %5068 = vrot.lane.b32.xlu0 %v4999_v49, %s9716_s4  ;;  %v5001_v62 = vpack.c.bf16 %v4972_v60, %v4958_v23 }
0x1539   : > { %5070 = vrot.lane.b32.xlu1 %v5000_v3, %s9716_s4 }
0x153b   : > { %v4942_v7 = vpop.permute.xlu1 %4941  ;;  %v6093_v27 = vpop.permute.xlu0 %6092 }
0x153c   : > { %v6095_v22 = vunpack.i.h.bf16 %v6093_v27  ;;  %v6094_v14 = vunpack.i.l.bf16 %v6093_v27 }
0x153e   : > { %v4943_v5 = vsel %vm829_vm10, %v6094_v14, %v6095_v22  ;;  %v4996_v29 = vpack.c.bf16 %v6094_v14, %v6079_v50  ;;  %v4944_v39 = vsel %vm829_vm10, %v6095_v22, %v4942_v7 }
0x153f   : > { %v4997_v15 = vpack.c.bf16 %v4943_v5, %v4930_v34  ;;  %v4998_v46 = vpack.c.bf16 %v4944_v39, %v6080_v25 }
0x1540   : > { %5062 = vrot.lane.b32.xlu0 %v4996_v29, %s9716_s4 }
0x1541   : > { %5064 = vrot.lane.b32.xlu1 %v4997_v15, %s9716_s4  ;;  %v5304_v15 = vld [vmem:[%s9514_s18] sm:$0xff] }
0x1543   : > { %v6103_v10 = vpop.permute.xlu0 %6102  ;;  %v6108_v40 = vpop.permute.xlu1 %6107 }
0x1544   : > { %v6105_v48 = vunpack.i.h.bf16 %v6103_v10  ;;  %v6104_v20 = vunpack.i.l.bf16 %v6103_v10  ;;  %v6110_v59 = vunpack.i.h.bf16 %v6108_v40  ;;  %v6109_v30 = vunpack.i.l.bf16 %v6108_v40  ;;  %v5305_v10 = vld [vmem:[%s9514_s18 + $0x8] sm:$0xff] }
0x1546   : > { %v4920_v53 = vsel %vm663_vm6, %v6104_v20, %v6105_v48  ;;  %v4995_v17 = vpack.c.bf16 %v6105_v48, %v6100_v41  ;;  %v4892_v57 = vsel %vm695_vm4, %v6109_v30, %v6110_v59  ;;  %v4992_v0 = vpack.c.bf16 %v6110_v59, %v4860_v63 }
0x1547   : > { %v4994_v36 = vpack.c.bf16 %v4920_v53, %v4906_v28  ;;  %v4991_v52 = vpack.c.bf16 %v4892_v57, %v4859_v31 }
0x1548   : > { %5060 = vrot.lane.b32.xlu2 %v4995_v17, %s9716_s4 }
0x1549   : > { %5058 = vrot.lane.b32.xlu1 %v4994_v36, %s9716_s4 }
0x154b   : > { %v4914_v56 = vpop.permute.xlu0 %4913  ;;  %v4886_v42 = vpop.permute.xlu1 %4885 }
0x154c   : > { %v4919_v55 = vsel %vm663_vm6, %v4914_v56, %v6104_v20  ;;  %v4891_v61 = vsel %vm695_vm4, %v4886_v42, %v6109_v30 }
0x154d   : > { %v4993_v21 = vpack.c.bf16 %v4919_v55, %v4905_v1  ;;  %v4990_v16 = vpack.c.bf16 %v4891_v61, %v4858_v54 }
0x154f   : > { %5056 = vrot.lane.b32.xlu0 %v4993_v21, %s9716_s4 }
0x1550   : > { %5072 = vrot.lane.b32.xlu2 %v5001_v62, %s9716_s4 }
0x1551   : > { %5052 = vrot.lane.b32.xlu1 %v4991_v52, %s9716_s4 }
0x1557   : > { %5012 = vperm.xlu0 %5370, %v3943_v44  }
0x1558   : > { %5066 = vrot.lane.b32.xlu2 %v4998_v46, %s9716_s4 }
0x1559   : > { %5050 = vrot.lane.b32.xlu1 %v4990_v16, %s9716_s4 }
0x1560   : > { %5054 = vrot.lane.b32.xlu2 %v4992_v0, %s9716_s4 }
0x1561   : > { %5017 = vperm.xlu1 %5368, %v3944_v35  }
0x1568   : > { %5007 = vperm.xlu2 %5369, %v3942_v45  }
0x1570   : > { %5022 = vperm.xlu2 %5369, %v3945_v9  }
0x157c   : > { %v5077_v38 = vpop.permute.xlu2 %5076 }
0x1593   : > { %v5075_v12 = vpop.permute.xlu0 %5074 }
0x1594   : > { %v5088_v19 = vsel %vm759_vm5, %v5075_v12, %v5077_v38 }
0x1595   : > { %v5105_v2 = vsel %vm968_vm13, %v5088_v19, 0 }
0x1596   : > { %5113 = vmatpush.bf16.msra.mxu1 %v5105_v2 }
0x15a1   : > { %v5079_v24 = vpop.permute.xlu0 %5078 }
0x15a2   : > { %v5089_v18 = vsel %vm759_vm5, %v5077_v38, %v5079_v24  ;;  %v5061_v43 = vpop.permute.xlu2 %5060 }
0x15a3   : > { %v5108_v32 = vsel %vm968_vm13, %v5089_v18, 0 }
0x15a4   : > { %5132 = vmatpush.bf16.msrb.mxu3 %v5108_v32 }
0x15aa   : > { %v5073_v33 = vpop.permute.xlu2 %5072  ;;  %v5069_v26 = vpop.permute.xlu0 %5068 }
0x15ab   : > { %v5071_v13 = vpop.permute.xlu1 %5070 }
0x15ac   : > { %v5086_v4 = vsel %vm759_vm5, %v5069_v26, %v5071_v13  ;;  %v5087_v6 = vsel %vm759_vm5, %v5071_v13, %v5073_v33 }
0x15ad   : > { %5114 = vmatpush.bf16.msra.mxu1 %v5086_v4  ;;  %5133 = vmatpush.bf16.msrb.mxu3 %v5087_v6 }
0x15b2   : > { %v5067_v49 = vpop.permute.xlu2 %5066  ;;  %v5063_v3 = vpop.permute.xlu0 %5062 }
0x15b3   : > { %v5065_v25 = vpop.permute.xlu1 %5064 }
0x15b4   : > { %v5084_v50 = vsel %vm759_vm5, %v5063_v3, %v5065_v25  ;;  %v5085_v7 = vsel %vm759_vm5, %v5065_v25, %v5067_v49 }
0x15b5   : > { %5115 = vmatpush.bf16.msra.mxu1 %v5084_v50  ;;  %5134 = vmatpush.bf16.msrb.mxu3 %v5085_v7 }
0x15ba   : > { %v5055_v5 = vpop.permute.xlu2 %5054 }
0x15bb   : > { %v5059_v27 = vpop.permute.xlu1 %5058 }
0x15bc   : > { %v5083_v22 = vsel %vm759_vm5, %v5059_v27, %v5061_v43 }
0x15bd   : > { %5135 = vmatpush.bf16.msrb.mxu3 %v5083_v22 }
0x15c1   : > { %v5057_v14 = vpop.permute.xlu0 %5056 }
0x15c2   : > { %v5082_v34 = vsel %vm759_vm5, %v5057_v14, %v5059_v27  ;;  %v5008_v48 = vpop.permute.xlu2 %5007 }
0x15c3   : > { %5116 = vmatpush.bf16.msra.mxu1 %v5082_v34  ;;  %v5053_v29 = vpop.permute.xlu1 %5052 }
0x15c4   : > { %v5081_v37 = vsel %vm759_vm5, %v5053_v29, %v5055_v5 }
0x15c5   : > { %5136 = vmatpush.bf16.msrb.mxu3 %v5081_v37 }
0x15c8   : > { %5298 = vmatmul.msk.bf16.vlgmr.msrb.gmra.mxu3 %vm964_vm14, %v5304_v15 }
0x15c9   : > { %v5013_v8 = vpop.permute.xlu0 %5012 }
0x15ca   : > { %v5023_v46 = vpop.permute.xlu2 %5022 }
0x15cb   : > { %v5051_v41 = vpop.permute.xlu1 %5050 }
0x15cc   : > { %v5080_v58 = vsel %vm759_vm5, %v5051_v41, %v5053_v29 }
0x15cd   : > { %5117 = vmatpush.bf16.msra.mxu1 %v5080_v58 }
0x15d0   : > { %5296 = vmatmul.msk.bf16.vlgmr.msra.gmra.mxu1 %vm964_vm14, %v5304_v15 }
0x15d3   : > { %v5018_v21 = vpop.permute.xlu1 %5017 }
0x15d8   : > { %5299 = vmatmul.msk.bf16.gmra.mxu3 %vm964_vm14, %v5305_v10 }
0x15e0   : > { %5297 = vmatmul.msk.bf16.gmra.mxu1 %vm964_vm14, %v5305_v10 }
0x164b   : > { %v5138_v20 = vpop.f32.mrf.mxu3 }
0x164c   : > { %v5139_v40 = vadd.f32 %v5138_v20, %v5008_v48 }
0x164d   : > { %v5119_v28 = vpop.f32.mrf.mxu1 }
0x164e   : > { %vm5149_vm1 = vcmp.ge.f32.partialorder %v5139_v40, 0.0  ;;  %v5157_v53 = vmul.f32 0.01, %v5139_v40  ;;  %v5120_v17 = vadd.f32 %v5119_v28, %v5008_v48 }
0x1650   : > { %v5165_v36 = vsel %vm5149_vm1, %v5139_v40, %v5157_v53  ;;  %vm5148_vm2 = vcmp.ge.f32.partialorder %v5120_v17, 0.0  ;;  %v5156_v59 = vmul.f32 0.01, %v5120_v17 }
0x1651   : > { %5173 = vst [vmem:[%s9483_s29 + $0x8] sm:$0xff] %v5165_v36 }
0x1652   : > { %v5164_v30 = vsel %vm5148_vm2, %v5120_v17, %v5156_v59 }
0x1653   : > { %5172 = vst [vmem:[%s9483_s29] sm:$0xff] %v5164_v30  ;;  %v5140_v60 = vpop.f32.mrf.mxu3 }
0x1654   : > { %v5141_v23 = vadd.f32 %v5140_v60, %v5013_v8 }
0x1655   : > { %v5121_v56 = vpop.f32.mrf.mxu1 }
0x1656   : > { %vm5151_vm3 = vcmp.ge.f32.partialorder %v5141_v23, 0.0  ;;  %v5159_v1 = vmul.f32 0.01, %v5141_v23  ;;  %v5122_v57 = vadd.f32 %v5121_v56, %v5013_v8 }
0x1658   : > { %v5167_v55 = vsel %vm5151_vm3, %v5141_v23, %v5159_v1  ;;  %vm5150_vm4 = vcmp.ge.f32.partialorder %v5122_v57, 0.0  ;;  %v5158_v51 = vmul.f32 0.01, %v5122_v57 }
0x1659   : > { %5175 = vst [vmem:[%s9483_s29 + $0x18] sm:$0xff] %v5167_v55 }
0x165a   : > { %v5166_v31 = vsel %vm5150_vm4, %v5122_v57, %v5158_v51 }
0x165b   : > { %5174 = vst [vmem:[%s9483_s29 + $0x10] sm:$0xff] %v5166_v31  ;;  %v5143_v62 = vpop.f32.mrf.mxu3 }
0x165c   : > { %v5144_v52 = vadd.f32 %v5143_v62, %v5018_v21 }
0x165d   : > { %v5124_v42 = vpop.f32.mrf.mxu1 }
0x165e   : > { %vm5153_vm5 = vcmp.ge.f32.partialorder %v5144_v52, 0.0  ;;  %v5161_v39 = vmul.f32 0.01, %v5144_v52  ;;  %v5125_v61 = vadd.f32 %v5124_v42, %v5018_v21 }
0x1660   : > { %v5169_v44 = vsel %vm5153_vm5, %v5144_v52, %v5161_v39  ;;  %vm5152_vm6 = vcmp.ge.f32.partialorder %v5125_v61, 0.0  ;;  %v5160_v11 = vmul.f32 0.01, %v5125_v61 }
0x1661   : > { %5177 = vst [vmem:[%s9483_s29 + $0x28] sm:$0xff] %v5169_v44 }
0x1662   : > { %v5168_v54 = vsel %vm5152_vm6, %v5125_v61, %v5160_v11 }
0x1663   : > { %5176 = vst [vmem:[%s9483_s29 + $0x20] sm:$0xff] %v5168_v54  ;;  %v5145_v16 = vpop.f32.mrf.mxu3 }
0x1664   : > { %v5146_v47 = vadd.f32 %v5145_v16, %v5023_v46 }
0x1665   : > { %v5126_v63 = vpop.f32.mrf.mxu1 }
0x1666   : > { %vm5155_vm7 = vcmp.ge.f32.partialorder %v5146_v47, 0.0  ;;  %v5163_v0 = vmul.f32 0.01, %v5146_v47  ;;  %v5127_v35 = vadd.f32 %v5126_v63, %v5023_v46 }
0x1668   : > { %v5171_v45 = vsel %vm5155_vm7, %v5146_v47, %v5163_v0  ;;  %vm5154_vm8 = vcmp.ge.f32.partialorder %v5127_v35, 0.0  ;;  %v5162_v9 = vmul.f32 0.01, %v5127_v35 }
0x1669   : > { %5179 = vst [vmem:[%s9483_s29 + $0x38] sm:$0xff] %v5171_v45 }
0x166a   : > { %v5170_v38 = vsel %vm5154_vm8, %v5127_v35, %v5162_v9 }
0x166b   : > { %5178 = vst [vmem:[%s9483_s29 + $0x30] sm:$0xff] %v5170_v38 }
0x166c PF: > { %s30_s1 = sadd.s32 1, %s6119_s1  }
0x166d   : > { %p27_p4 = scmp.ge.s32.totalorder %s30_s1, 4  }
0x166f   :  { %29 = sbr.rel (!%p27_p4) target bundleno = 6 (0x6), region = 130 }

</bundles_post_ra>
